<compile_context>
chip_gen: v5e
topology: v5e:2x2
jax: 0.10.0
libtpu: 0.0.40
codegen_flags: <defaults>
</compile_context>

<pallas_src>
import jax
import jax.numpy as jnp
from jax.experimental import pallas as pl
from jax.experimental.pallas import tpu as pltpu


# ----------------------------------------------------------------------------
# Pallas kernel
# ----------------------------------------------------------------------------
def _bidir_layer(x_bf16, w_ih_ref, w_hh_ref, b_ref, gx_ref, seq_ref, T, B, H):
    """One bidirectional LSTM layer with fwd/bwd recurrences interleaved.

    x_bf16  : (T*B, D_in) bf16 value   time-major rows; rows [t*B, t*B+B) = step t
    w_ih_ref: (D_in, 8H)  bf16 ref     cols [0:4H] fwd gates, [4H:8H] bwd gates
    w_hh_ref: (2, H, 4H)  bf16 ref     [0] = fwd, [1] = bwd
    b_ref   : (1, 8H)     f32  ref     b_ih + b_hh, fwd|bwd stacked
    gx_ref  : (T*B, 8H)   f32  scratch input projection for both directions
    seq_ref : (T*B, 2H)   f32  scratch or None; per-step [h_fwd | h_bwd] outputs
    returns : (h_fwd_last, h_bwd_last) each (B, H) f32
    """
    G = 4 * H

    # Hoisted input projection: whole sequence, both directions, one MXU matmul
    # (N = 8H = 1024), bias folded in.
    gx_ref[...] = (
        jnp.dot(x_bf16, w_ih_ref[...], preferred_element_type=jnp.float32)
        + b_ref[...]
    )

    w_hh_f = w_hh_ref[0]                      # (H, 4H) bf16, stays resident
    w_hh_b = w_hh_ref[1]

    def gates_to_hc(g, c):
        # PyTorch gate order i, f, g, o; H=128 -> aligned full-lane slices.
        i = jax.nn.sigmoid(g[:, 0 * H:1 * H])
        f = jax.nn.sigmoid(g[:, 1 * H:2 * H])
        cand = jnp.tanh(g[:, 2 * H:3 * H])
        o = jax.nn.sigmoid(g[:, 3 * H:4 * H])
        c_new = f * c + i * cand
        h_new = o * jnp.tanh(c_new)
        return h_new, c_new

    def step(t, carry):
        hf, cf, hb, cb = carry
        rf = pl.multiple_of(t * B, B)                 # fwd rows: time t
        rb = pl.multiple_of((T - 1 - t) * B, B)       # bwd rows: time T-1-t
        # Two small recurrent dots back-to-back: the independent fwd/bwd chains
        # hide each other's MXU/EUP latency on a single TensorCore.
        gf = gx_ref[pl.ds(rf, B), 0:G] + jnp.dot(
            hf.astype(jnp.bfloat16), w_hh_f, preferred_element_type=jnp.float32)
        gb = gx_ref[pl.ds(rb, B), G:2 * G] + jnp.dot(
            hb.astype(jnp.bfloat16), w_hh_b, preferred_element_type=jnp.float32)
        hf_new, cf_new = gates_to_hc(gf, cf)
        hb_new, cb_new = gates_to_hc(gb, cb)
        if seq_ref is not None:
            # (8,128) full-tile, lane-aligned stores into the VMEM sequence.
            seq_ref[pl.ds(rf, B), 0:H] = hf_new
            seq_ref[pl.ds(rb, B), H:2 * H] = hb_new
        return hf_new, cf_new, hb_new, cb_new

    z = jnp.zeros((B, H), jnp.float32)
    # Short fixed trip count -> full unroll for LLO visibility; bound the
    # unroll for longer sequences to avoid vreg spills.
    unroll = True if T <= 16 else 8
    hf, _, hb, _ = jax.lax.fori_loop(0, T, step, (z, z, z, z), unroll=unroll)
    return hf, hb


def fused_bilstm2_kernel(x_ref, w_ih0_ref, w_hh0_ref, b0_ref,
                         w_ih1_ref, w_hh1_ref, b1_ref,
                         feat_ref, gx_ref, seq_ref):
    """Embedded sequence -> 2-layer bidirectional LSTM -> (B, 2H) final feature.

    feat_ref layout matches torch.cat((h_n[-1], h_n[-2]), dim=-1):
      cols [0:H]  = last layer's BACKWARD final hidden state
      cols [H:2H] = last layer's FORWARD  final hidden state
    """
    B, H2 = feat_ref.shape
    H = H2 // 2
    TB = x_ref.shape[0]
    T = TB // B

    # Layer 0: consumes embedded tokens, leaves its output sequence in VMEM.
    _bidir_layer(x_ref[...], w_ih0_ref, w_hh0_ref, b0_ref,
                 gx_ref, seq_ref, T, B, H)

    # Layer 1: consumes layer 0's sequence (cast to bf16 once); only the final
    # hidden states are needed, so no sequence writeback at all.
    x1 = seq_ref[...].astype(jnp.bfloat16)
    hf1, hb1 = _bidir_layer(x1, w_ih1_ref, w_hh1_ref, b1_ref,
                            gx_ref, None, T, B, H)

    feat_ref[:, 0:H] = hb1
    feat_ref[:, H:2 * H] = hf1


# ----------------------------------------------------------------------------
# Wrapper (glue)
# ----------------------------------------------------------------------------
@jax.jit
def lstm_model_forward(tokens, params):
    """Replicates LSTM.forward: embedding -> bi-LSTM -> fc(cat(h_n[-1], h_n[-2]))."""
    assert len(params["lstm"]) == 2, "fused kernel is specialized to num_layers=2"
    B, T = tokens.shape
    B_pad = ((B + 7) // 8) * 8                     # fill f32 sublane tiles
    if B_pad != B:
        tokens = jnp.pad(tokens, ((0, B_pad - B), (0, 0)))  # pad rows use pad_idx=0

    # Embedding lookup (glue), time-major, flattened to (T*B, E) bf16.
    emb = jnp.take(params["embedding"], tokens, axis=0)          # (B_pad, T, E)
    x_flat = (jnp.transpose(emb, (1, 0, 2))
              .reshape(T * B_pad, -1)
              .astype(jnp.bfloat16))                              # (T*B_pad, E)

    l0, l1 = params["lstm"]
    H = l0["w_hh"].shape[1]

    feat = pl.pallas_call(
        fused_bilstm2_kernel,
        out_shape=jax.ShapeDtypeStruct((B_pad, 2 * H), jnp.float32),
        in_specs=[pl.BlockSpec(memory_space=pltpu.MemorySpace.VMEM)] * 7,
        out_specs=pl.BlockSpec(memory_space=pltpu.MemorySpace.VMEM),
        scratch_shapes=[
            pltpu.VMEM((T * B_pad, 8 * H), jnp.float32),   # gx: both directions
            pltpu.VMEM((T * B_pad, 2 * H), jnp.float32),   # layer-0 output sequence
        ],
        compiler_params=pltpu.CompilerParams(
            # Explicit VMEM budget (fits every generation incl. v7x's 64 MiB).
            vmem_limit_bytes=32 * 1024 * 1024,
        ),
    )(x_flat,
      l0["w_ih"], l0["w_hh"], l0["b"],
      l1["w_ih"], l1["w_hh"], l1["b"])

    # FC head in plain XLA: a pallas_call launch dwarfs this ~1 KFLOP op.
    logits = jnp.dot(feat, params["fc"]["w_t"]) + params["fc"]["b"]
    return logits[:B]


# ----------------------------------------------------------------------------
# Deterministic parameter construction (mirrors the PyTorch module's shapes)
# ----------------------------------------------------------------------------
def xavier_uniform(key, shape):
    fan_out, fan_in = shape[0], shape[1]
    bound = (6.0 / (fan_in + fan_out)) ** 0.5
    return jax.random.uniform(key, shape, jnp.float32, -bound, bound)


def make_params(key, vocab_size, embed_size, hidden_size, num_layers, pad_idx=0):
    keys = jax.random.split(key, 2 + 8 * num_layers)
    kit = iter(keys)

    # nn.Embedding(len(vocab), embed_size, padding_idx=pad_idx), xavier init
    embedding = xavier_uniform(next(kit), (vocab_size, embed_size))
    embedding = embedding.at[pad_idx].set(0.0)

    lstm_layers = []
    for layer in range(num_layers):
        d_in = embed_size if layer == 0 else 2 * hidden_size
        stdv = 1.0 / (hidden_size ** 0.5)
        w_ih_cols, w_hh_dirs, b_cols = [], [], []
        for _ in range(2):  # fwd, bwd
            w_ih = xavier_uniform(next(kit), (4 * hidden_size, d_in))       # torch layout
            w_hh = xavier_uniform(next(kit), (4 * hidden_size, hidden_size))
            b_ih = jax.random.uniform(next(kit), (4 * hidden_size,),
                                      jnp.float32, -stdv, stdv)
            b_hh = jax.random.uniform(next(kit), (4 * hidden_size,),
                                      jnp.float32, -stdv, stdv)
            w_ih_cols.append(w_ih.T)               # (D_in, 4H)
            w_hh_dirs.append(w_hh.T)               # (H, 4H)
            b_cols.append(b_ih + b_hh)             # (4H,)
        lstm_layers.append({
            # bf16 matmul operands (f32 accumulation in-kernel); bias stays f32.
            "w_ih": jnp.concatenate(w_ih_cols, axis=1).astype(jnp.bfloat16),  # (D_in, 8H)
            "w_hh": jnp.stack(w_hh_dirs).astype(jnp.bfloat16),                # (2, H, 4H)
            "b": jnp.concatenate(b_cols).reshape(1, -1),                      # (1, 8H) f32
        })

    fc_w = xavier_uniform(next(kit), (2, 2 * hidden_size))   # nn.Linear(2H, 2)
    fc_b = jnp.zeros((1, 2), jnp.float32)

    return {
        "embedding": embedding,
        "lstm": lstm_layers,
        "fc": {"w_t": fc_w.T, "b": fc_b},
    }


# ----------------------------------------------------------------------------
# Main
# ----------------------------------------------------------------------------
if __name__ == "__main__":
    # Small but hardware-aligned shapes: B multiple of 8 (f32 sublanes),
    # H = 128 so hidden / gate tiles are lane-dense.
    VOCAB = 64
    EMBED = 128
    HIDDEN = 128
    NUM_LAYERS = 2
    BATCH = 8
    SEQ = 8

    root = jax.random.PRNGKey(0)
    pkey, tkey = jax.random.split(root)

    params = make_params(pkey, VOCAB, EMBED, HIDDEN, NUM_LAYERS, pad_idx=0)
    tokens = jax.random.randint(tkey, (BATCH, SEQ), 0, VOCAB, dtype=jnp.int32)

    logits = lstm_model_forward(tokens, params)
    jax.block_until_ready(logits)

    assert logits.shape == (BATCH, 2), logits.shape
    assert logits.dtype == jnp.float32
    print("KERNEL_OK")
</pallas_src>

<mosaic_0001>
module attributes {stable_mosaic.version = 11 : i64} {
  func.func @fused_bilstm2_kernel(%arg0: memref<64x128xbf16, #tpu.memory_space<vmem>>, %arg1: memref<128x1024xbf16, #tpu.memory_space<vmem>>, %arg2: memref<2x128x512xbf16, #tpu.memory_space<vmem>>, %arg3: memref<1x1024xf32, #tpu.memory_space<vmem>>, %arg4: memref<256x1024xbf16, #tpu.memory_space<vmem>>, %arg5: memref<2x128x512xbf16, #tpu.memory_space<vmem>>, %arg6: memref<1x1024xf32, #tpu.memory_space<vmem>>, %arg7: memref<8x256xf32, #tpu.memory_space<vmem>>, %arg8: memref<64x1024xf32, #tpu.memory_space<vmem>>, %arg9: memref<64x256xf32, #tpu.memory_space<vmem>>) attributes {dimension_semantics = [], scalar_prefetch = 0 : i64, scratch_operands = 2 : i64, tpu.core_type = #tpu.core_type<tc>} {
    %c0 = arith.constant 0 : index
    %c0_0 = arith.constant 0 : index
    %0 = vector.load %arg0[%c0, %c0_0] : memref<64x128xbf16, #tpu.memory_space<vmem>>, vector<64x128xbf16>
    %c0_1 = arith.constant 0 : index
    %c0_2 = arith.constant 0 : index
    %1 = vector.load %arg1[%c0_1, %c0_2] : memref<128x1024xbf16, #tpu.memory_space<vmem>>, vector<128x1024xbf16>
    %cst = arith.constant dense<0.000000e+00> : vector<64x1024xf32>
    %2 = tpu.matmul %0, %1, %cst {dimension_numbers = #tpu.dot_dimension_numbers<[1], [0], [0], [1], [0, 0, 1, 1], [], []>} : vector<64x128xbf16>, vector<128x1024xbf16>, vector<64x1024xf32> -> vector<64x1024xf32>
    %c0_3 = arith.constant 0 : index
    %c0_4 = arith.constant 0 : index
    %3 = vector.load %arg3[%c0_3, %c0_4] : memref<1x1024xf32, #tpu.memory_space<vmem>>, vector<1x1024xf32>
    %4 = vector.broadcast %3 : vector<1x1024xf32> to vector<64x1024xf32>
    %5 = arith.addf %2, %4 : vector<64x1024xf32>
    %c0_5 = arith.constant 0 : index
    %c0_6 = arith.constant 0 : index
    %6 = vector.load %arg8[%c0_5, %c0_6] : memref<64x1024xf32, #tpu.memory_space<vmem>>, vector<64x1024xf32>
    tpu.vector_store %arg8[%c0_5, %c0_6], %5 {strides = array<i32>} : memref<64x1024xf32, #tpu.memory_space<vmem>>, vector<64x1024xf32>,
    %c0_7 = arith.constant 0 : index
    %c0_8 = arith.constant 0 : index
    %c0_9 = arith.constant 0 : index
    %7 = vector.load %arg2[%c0_7, %c0_8, %c0_9] : memref<2x128x512xbf16, #tpu.memory_space<vmem>>, vector<1x128x512xbf16>
    %8 = vector.shape_cast %7 : vector<1x128x512xbf16> to vector<128x512xbf16>
    %c1 = arith.constant 1 : index
    %c0_10 = arith.constant 0 : index
    %c0_11 = arith.constant 0 : index
    %9 = vector.load %arg2[%c1, %c0_10, %c0_11] : memref<2x128x512xbf16, #tpu.memory_space<vmem>>, vector<1x128x512xbf16>
    %10 = vector.shape_cast %9 : vector<1x128x512xbf16> to vector<128x512xbf16>
    %cst_12 = arith.constant 0.000000e+00 : f32
    %11 = vector.broadcast %cst_12 : f32 to vector<8x128xf32>
    %c0_i32 = arith.constant 0 : i32
    %c8_i32 = arith.constant 8 : i32
    %12 = arith.muli %c0_i32, %c8_i32 : i32
    %13 = tpu.assume_multiple %12, 8 : i32
    %c7_i32 = arith.constant 7 : i32
    %14 = arith.subi %c7_i32, %c0_i32 : i32
    %c8_i32_13 = arith.constant 8 : i32
    %15 = arith.muli %14, %c8_i32_13 : i32
    %16 = tpu.assume_multiple %15, 8 : i32
    %17 = arith.index_cast %13 : i32 to index
    %c0_14 = arith.constant 0 : index
    %18 = vector.load %arg8[%17, %c0_14] : memref<64x1024xf32, #tpu.memory_space<vmem>>, vector<8x512xf32>
    %19 = arith.truncf %11 : vector<8x128xf32> to vector<8x128xbf16>
    %cst_15 = arith.constant dense<0.000000e+00> : vector<8x512xf32>
    %20 = tpu.matmul %19, %8, %cst_15 {dimension_numbers = #tpu.dot_dimension_numbers<[1], [0], [0], [1], [0, 0, 1, 1], [], []>} : vector<8x128xbf16>, vector<128x512xbf16>, vector<8x512xf32> -> vector<8x512xf32>
    %21 = arith.addf %18, %20 : vector<8x512xf32>
    %22 = arith.index_cast %16 : i32 to index
    %c512 = arith.constant 512 : index
    %23 = vector.load %arg8[%22, %c512] : memref<64x1024xf32, #tpu.memory_space<vmem>>, vector<8x512xf32>
    %24 = arith.truncf %11 : vector<8x128xf32> to vector<8x128xbf16>
    %cst_16 = arith.constant dense<0.000000e+00> : vector<8x512xf32>
    %25 = tpu.matmul %24, %10, %cst_16 {dimension_numbers = #tpu.dot_dimension_numbers<[1], [0], [0], [1], [0, 0, 1, 1], [], []>} : vector<8x128xbf16>, vector<128x512xbf16>, vector<8x512xf32> -> vector<8x512xf32>
    %26 = arith.addf %23, %25 : vector<8x512xf32>
    %27 = vector.extract_strided_slice %21 {offsets = [0, 0], sizes = [8, 128], strides = [1, 1]} : vector<8x512xf32> to vector<8x128xf32>
    %28 = arith.negf %27 : vector<8x128xf32>
    %29 = math.exp %28 : vector<8x128xf32>
    %cst_17 = arith.constant 1.000000e+00 : f32
    %30 = vector.broadcast %cst_17 : f32 to vector<8x128xf32>
    %31 = arith.addf %30, %29 : vector<8x128xf32>
    %32 = arith.divf %30, %31 : vector<8x128xf32>
    %33 = vector.extract_strided_slice %21 {offsets = [0, 128], sizes = [8, 128], strides = [1, 1]} : vector<8x512xf32> to vector<8x128xf32>
    %34 = arith.negf %33 : vector<8x128xf32>
    %35 = math.exp %34 : vector<8x128xf32>
    %cst_18 = arith.constant 1.000000e+00 : f32
    %36 = vector.broadcast %cst_18 : f32 to vector<8x128xf32>
    %37 = arith.addf %36, %35 : vector<8x128xf32>
    %38 = arith.divf %36, %37 : vector<8x128xf32>
    %39 = vector.extract_strided_slice %21 {offsets = [0, 256], sizes = [8, 128], strides = [1, 1]} : vector<8x512xf32> to vector<8x128xf32>
    %40 = math.tanh %39 : vector<8x128xf32>
    %41 = vector.extract_strided_slice %21 {offsets = [0, 384], sizes = [8, 128], strides = [1, 1]} : vector<8x512xf32> to vector<8x128xf32>
    %42 = arith.negf %41 : vector<8x128xf32>
    %43 = math.exp %42 : vector<8x128xf32>
    %cst_19 = arith.constant 1.000000e+00 : f32
    %44 = vector.broadcast %cst_19 : f32 to vector<8x128xf32>
    %45 = arith.addf %44, %43 : vector<8x128xf32>
    %46 = arith.divf %44, %45 : vector<8x128xf32>
    %47 = arith.mulf %38, %11 : vector<8x128xf32>
    %48 = arith.mulf %32, %40 : vector<8x128xf32>
    %49 = arith.addf %47, %48 : vector<8x128xf32>
    %50 = math.tanh %49 : vector<8x128xf32>
    %51 = arith.mulf %46, %50 : vector<8x128xf32>
    %52 = vector.extract_strided_slice %26 {offsets = [0, 0], sizes = [8, 128], strides = [1, 1]} : vector<8x512xf32> to vector<8x128xf32>
    %53 = arith.negf %52 : vector<8x128xf32>
    %54 = math.exp %53 : vector<8x128xf32>
    %cst_20 = arith.constant 1.000000e+00 : f32
    %55 = vector.broadcast %cst_20 : f32 to vector<8x128xf32>
    %56 = arith.addf %55, %54 : vector<8x128xf32>
    %57 = arith.divf %55, %56 : vector<8x128xf32>
    %58 = vector.extract_strided_slice %26 {offsets = [0, 128], sizes = [8, 128], strides = [1, 1]} : vector<8x512xf32> to vector<8x128xf32>
    %59 = arith.negf %58 : vector<8x128xf32>
    %60 = math.exp %59 : vector<8x128xf32>
    %cst_21 = arith.constant 1.000000e+00 : f32
    %61 = vector.broadcast %cst_21 : f32 to vector<8x128xf32>
    %62 = arith.addf %61, %60 : vector<8x128xf32>
    %63 = arith.divf %61, %62 : vector<8x128xf32>
    %64 = vector.extract_strided_slice %26 {offsets = [0, 256], sizes = [8, 128], strides = [1, 1]} : vector<8x512xf32> to vector<8x128xf32>
    %65 = math.tanh %64 : vector<8x128xf32>
    %66 = vector.extract_strided_slice %26 {offsets = [0, 384], sizes = [8, 128], strides = [1, 1]} : vector<8x512xf32> to vector<8x128xf32>
    %67 = arith.negf %66 : vector<8x128xf32>
    %68 = math.exp %67 : vector<8x128xf32>
    %cst_22 = arith.constant 1.000000e+00 : f32
    %69 = vector.broadcast %cst_22 : f32 to vector<8x128xf32>
    %70 = arith.addf %69, %68 : vector<8x128xf32>
    %71 = arith.divf %69, %70 : vector<8x128xf32>
    %72 = arith.mulf %63, %11 : vector<8x128xf32>
    %73 = arith.mulf %57, %65 : vector<8x128xf32>
    %74 = arith.addf %72, %73 : vector<8x128xf32>
    %75 = math.tanh %74 : vector<8x128xf32>
    %76 = arith.mulf %71, %75 : vector<8x128xf32>
    %77 = arith.index_cast %13 : i32 to index
    %c0_23 = arith.constant 0 : index
    %78 = vector.load %arg9[%77, %c0_23] : memref<64x256xf32, #tpu.memory_space<vmem>>, vector<8x128xf32>
    tpu.vector_store %arg9[%77, %c0_23], %51 {strides = array<i32>} : memref<64x256xf32, #tpu.memory_space<vmem>>, vector<8x128xf32>,
    %79 = arith.index_cast %16 : i32 to index
    %c128 = arith.constant 128 : index
    %80 = vector.load %arg9[%79, %c128] : memref<64x256xf32, #tpu.memory_space<vmem>>, vector<8x128xf32>
    tpu.vector_store %arg9[%79, %c128], %76 {strides = array<i32>} : memref<64x256xf32, #tpu.memory_space<vmem>>, vector<8x128xf32>,
    %c1_i32 = arith.constant 1 : i32
    %c8_i32_24 = arith.constant 8 : i32
    %81 = arith.muli %c1_i32, %c8_i32_24 : i32
    %82 = tpu.assume_multiple %81, 8 : i32
    %c7_i32_25 = arith.constant 7 : i32
    %83 = arith.subi %c7_i32_25, %c1_i32 : i32
    %c8_i32_26 = arith.constant 8 : i32
    %84 = arith.muli %83, %c8_i32_26 : i32
    %85 = tpu.assume_multiple %84, 8 : i32
    %86 = arith.index_cast %82 : i32 to index
    %c0_27 = arith.constant 0 : index
    %87 = vector.load %arg8[%86, %c0_27] : memref<64x1024xf32, #tpu.memory_space<vmem>>, vector<8x512xf32>
    %88 = arith.truncf %51 : vector<8x128xf32> to vector<8x128xbf16>
    %cst_28 = arith.constant dense<0.000000e+00> : vector<8x512xf32>
    %89 = tpu.matmul %88, %8, %cst_28 {dimension_numbers = #tpu.dot_dimension_numbers<[1], [0], [0], [1], [0, 0, 1, 1], [], []>} : vector<8x128xbf16>, vector<128x512xbf16>, vector<8x512xf32> -> vector<8x512xf32>
    %90 = arith.addf %87, %89 : vector<8x512xf32>
    %91 = arith.index_cast %85 : i32 to index
    %c512_29 = arith.constant 512 : index
    %92 = vector.load %arg8[%91, %c512_29] : memref<64x1024xf32, #tpu.memory_space<vmem>>, vector<8x512xf32>
    %93 = arith.truncf %76 : vector<8x128xf32> to vector<8x128xbf16>
    %cst_30 = arith.constant dense<0.000000e+00> : vector<8x512xf32>
    %94 = tpu.matmul %93, %10, %cst_30 {dimension_numbers = #tpu.dot_dimension_numbers<[1], [0], [0], [1], [0, 0, 1, 1], [], []>} : vector<8x128xbf16>, vector<128x512xbf16>, vector<8x512xf32> -> vector<8x512xf32>
    %95 = arith.addf %92, %94 : vector<8x512xf32>
    %96 = vector.extract_strided_slice %90 {offsets = [0, 0], sizes = [8, 128], strides = [1, 1]} : vector<8x512xf32> to vector<8x128xf32>
    %97 = arith.negf %96 : vector<8x128xf32>
    %98 = math.exp %97 : vector<8x128xf32>
    %cst_31 = arith.constant 1.000000e+00 : f32
    %99 = vector.broadcast %cst_31 : f32 to vector<8x128xf32>
    %100 = arith.addf %99, %98 : vector<8x128xf32>
    %101 = arith.divf %99, %100 : vector<8x128xf32>
    %102 = vector.extract_strided_slice %90 {offsets = [0, 128], sizes = [8, 128], strides = [1, 1]} : vector<8x512xf32> to vector<8x128xf32>
    %103 = arith.negf %102 : vector<8x128xf32>
    %104 = math.exp %103 : vector<8x128xf32>
    %cst_32 = arith.constant 1.000000e+00 : f32
    %105 = vector.broadcast %cst_32 : f32 to vector<8x128xf32>
    %106 = arith.addf %105, %104 : vector<8x128xf32>
    %107 = arith.divf %105, %106 : vector<8x128xf32>
    %108 = vector.extract_strided_slice %90 {offsets = [0, 256], sizes = [8, 128], strides = [1, 1]} : vector<8x512xf32> to vector<8x128xf32>
    %109 = math.tanh %108 : vector<8x128xf32>
    %110 = vector.extract_strided_slice %90 {offsets = [0, 384], sizes = [8, 128], strides = [1, 1]} : vector<8x512xf32> to vector<8x128xf32>
    %111 = arith.negf %110 : vector<8x128xf32>
    %112 = math.exp %111 : vector<8x128xf32>
    %cst_33 = arith.constant 1.000000e+00 : f32
    %113 = vector.broadcast %cst_33 : f32 to vector<8x128xf32>
    %114 = arith.addf %113, %112 : vector<8x128xf32>
    %115 = arith.divf %113, %114 : vector<8x128xf32>
    %116 = arith.mulf %107, %49 : vector<8x128xf32>
    %117 = arith.mulf %101, %109 : vector<8x128xf32>
    %118 = arith.addf %116, %117 : vector<8x128xf32>
    %119 = math.tanh %118 : vector<8x128xf32>
    %120 = arith.mulf %115, %119 : vector<8x128xf32>
    %121 = vector.extract_strided_slice %95 {offsets = [0, 0], sizes = [8, 128], strides = [1, 1]} : vector<8x512xf32> to vector<8x128xf32>
    %122 = arith.negf %121 : vector<8x128xf32>
    %123 = math.exp %122 : vector<8x128xf32>
    %cst_34 = arith.constant 1.000000e+00 : f32
    %124 = vector.broadcast %cst_34 : f32 to vector<8x128xf32>
    %125 = arith.addf %124, %123 : vector<8x128xf32>
    %126 = arith.divf %124, %125 : vector<8x128xf32>
    %127 = vector.extract_strided_slice %95 {offsets = [0, 128], sizes = [8, 128], strides = [1, 1]} : vector<8x512xf32> to vector<8x128xf32>
    %128 = arith.negf %127 : vector<8x128xf32>
    %129 = math.exp %128 : vector<8x128xf32>
    %cst_35 = arith.constant 1.000000e+00 : f32
    %130 = vector.broadcast %cst_35 : f32 to vector<8x128xf32>
    %131 = arith.addf %130, %129 : vector<8x128xf32>
    %132 = arith.divf %130, %131 : vector<8x128xf32>
    %133 = vector.extract_strided_slice %95 {offsets = [0, 256], sizes = [8, 128], strides = [1, 1]} : vector<8x512xf32> to vector<8x128xf32>
    %134 = math.tanh %133 : vector<8x128xf32>
    %135 = vector.extract_strided_slice %95 {offsets = [0, 384], sizes = [8, 128], strides = [1, 1]} : vector<8x512xf32> to vector<8x128xf32>
    %136 = arith.negf %135 : vector<8x128xf32>
    %137 = math.exp %136 : vector<8x128xf32>
    %cst_36 = arith.constant 1.000000e+00 : f32
    %138 = vector.broadcast %cst_36 : f32 to vector<8x128xf32>
    %139 = arith.addf %138, %137 : vector<8x128xf32>
    %140 = arith.divf %138, %139 : vector<8x128xf32>
    %141 = arith.mulf %132, %74 : vector<8x128xf32>
    %142 = arith.mulf %126, %134 : vector<8x128xf32>
    %143 = arith.addf %141, %142 : vector<8x128xf32>
    %144 = math.tanh %143 : vector<8x128xf32>
    %145 = arith.mulf %140, %144 : vector<8x128xf32>
    %146 = arith.index_cast %82 : i32 to index
    %c0_37 = arith.constant 0 : index
    %147 = vector.load %arg9[%146, %c0_37] : memref<64x256xf32, #tpu.memory_space<vmem>>, vector<8x128xf32>
    tpu.vector_store %arg9[%146, %c0_37], %120 {strides = array<i32>} : memref<64x256xf32, #tpu.memory_space<vmem>>, vector<8x128xf32>,
    %148 = arith.index_cast %85 : i32 to index
    %c128_38 = arith.constant 128 : index
    %149 = vector.load %arg9[%148, %c128_38] : memref<64x256xf32, #tpu.memory_space<vmem>>, vector<8x128xf32>
    tpu.vector_store %arg9[%148, %c128_38], %145 {strides = array<i32>} : memref<64x256xf32, #tpu.memory_space<vmem>>, vector<8x128xf32>,
    %c2_i32 = arith.constant 2 : i32
    %c8_i32_39 = arith.constant 8 : i32
    %150 = arith.muli %c2_i32, %c8_i32_39 : i32
    %151 = tpu.assume_multiple %150, 8 : i32
    %c7_i32_40 = arith.constant 7 : i32
    %152 = arith.subi %c7_i32_40, %c2_i32 : i32
    %c8_i32_41 = arith.constant 8 : i32
    %153 = arith.muli %152, %c8_i32_41 : i32
    %154 = tpu.assume_multiple %153, 8 : i32
    %155 = arith.index_cast %151 : i32 to index
    %c0_42 = arith.constant 0 : index
    %156 = vector.load %arg8[%155, %c0_42] : memref<64x1024xf32, #tpu.memory_space<vmem>>, vector<8x512xf32>
    %157 = arith.truncf %120 : vector<8x128xf32> to vector<8x128xbf16>
    %cst_43 = arith.constant dense<0.000000e+00> : vector<8x512xf32>
    %158 = tpu.matmul %157, %8, %cst_43 {dimension_numbers = #tpu.dot_dimension_numbers<[1], [0], [0], [1], [0, 0, 1, 1], [], []>} : vector<8x128xbf16>, vector<128x512xbf16>, vector<8x512xf32> -> vector<8x512xf32>
    %159 = arith.addf %156, %158 : vector<8x512xf32>
    %160 = arith.index_cast %154 : i32 to index
    %c512_44 = arith.constant 512 : index
    %161 = vector.load %arg8[%160, %c512_44] : memref<64x1024xf32, #tpu.memory_space<vmem>>, vector<8x512xf32>
    %162 = arith.truncf %145 : vector<8x128xf32> to vector<8x128xbf16>
    %cst_45 = arith.constant dense<0.000000e+00> : vector<8x512xf32>
    %163 = tpu.matmul %162, %10, %cst_45 {dimension_numbers = #tpu.dot_dimension_numbers<[1], [0], [0], [1], [0, 0, 1, 1], [], []>} : vector<8x128xbf16>, vector<128x512xbf16>, vector<8x512xf32> -> vector<8x512xf32>
    %164 = arith.addf %161, %163 : vector<8x512xf32>
    %165 = vector.extract_strided_slice %159 {offsets = [0, 0], sizes = [8, 128], strides = [1, 1]} : vector<8x512xf32> to vector<8x128xf32>
    %166 = arith.negf %165 : vector<8x128xf32>
    %167 = math.exp %166 : vector<8x128xf32>
    %cst_46 = arith.constant 1.000000e+00 : f32
    %168 = vector.broadcast %cst_46 : f32 to vector<8x128xf32>
    %169 = arith.addf %168, %167 : vector<8x128xf32>
    %170 = arith.divf %168, %169 : vector<8x128xf32>
    %171 = vector.extract_strided_slice %159 {offsets = [0, 128], sizes = [8, 128], strides = [1, 1]} : vector<8x512xf32> to vector<8x128xf32>
    %172 = arith.negf %171 : vector<8x128xf32>
    %173 = math.exp %172 : vector<8x128xf32>
    %cst_47 = arith.constant 1.000000e+00 : f32
    %174 = vector.broadcast %cst_47 : f32 to vector<8x128xf32>
    %175 = arith.addf %174, %173 : vector<8x128xf32>
    %176 = arith.divf %174, %175 : vector<8x128xf32>
    %177 = vector.extract_strided_slice %159 {offsets = [0, 256], sizes = [8, 128], strides = [1, 1]} : vector<8x512xf32> to vector<8x128xf32>
    %178 = math.tanh %177 : vector<8x128xf32>
    %179 = vector.extract_strided_slice %159 {offsets = [0, 384], sizes = [8, 128], strides = [1, 1]} : vector<8x512xf32> to vector<8x128xf32>
    %180 = arith.negf %179 : vector<8x128xf32>
    %181 = math.exp %180 : vector<8x128xf32>
    %cst_48 = arith.constant 1.000000e+00 : f32
    %182 = vector.broadcast %cst_48 : f32 to vector<8x128xf32>
    %183 = arith.addf %182, %181 : vector<8x128xf32>
    %184 = arith.divf %182, %183 : vector<8x128xf32>
    %185 = arith.mulf %176, %118 : vector<8x128xf32>
    %186 = arith.mulf %170, %178 : vector<8x128xf32>
    %187 = arith.addf %185, %186 : vector<8x128xf32>
    %188 = math.tanh %187 : vector<8x128xf32>
    %189 = arith.mulf %184, %188 : vector<8x128xf32>
    %190 = vector.extract_strided_slice %164 {offsets = [0, 0], sizes = [8, 128], strides = [1, 1]} : vector<8x512xf32> to vector<8x128xf32>
    %191 = arith.negf %190 : vector<8x128xf32>
    %192 = math.exp %191 : vector<8x128xf32>
    %cst_49 = arith.constant 1.000000e+00 : f32
    %193 = vector.broadcast %cst_49 : f32 to vector<8x128xf32>
    %194 = arith.addf %193, %192 : vector<8x128xf32>
    %195 = arith.divf %193, %194 : vector<8x128xf32>
    %196 = vector.extract_strided_slice %164 {offsets = [0, 128], sizes = [8, 128], strides = [1, 1]} : vector<8x512xf32> to vector<8x128xf32>
    %197 = arith.negf %196 : vector<8x128xf32>
    %198 = math.exp %197 : vector<8x128xf32>
    %cst_50 = arith.constant 1.000000e+00 : f32
    %199 = vector.broadcast %cst_50 : f32 to vector<8x128xf32>
    %200 = arith.addf %199, %198 : vector<8x128xf32>
    %201 = arith.divf %199, %200 : vector<8x128xf32>
    %202 = vector.extract_strided_slice %164 {offsets = [0, 256], sizes = [8, 128], strides = [1, 1]} : vector<8x512xf32> to vector<8x128xf32>
    %203 = math.tanh %202 : vector<8x128xf32>
    %204 = vector.extract_strided_slice %164 {offsets = [0, 384], sizes = [8, 128], strides = [1, 1]} : vector<8x512xf32> to vector<8x128xf32>
    %205 = arith.negf %204 : vector<8x128xf32>
    %206 = math.exp %205 : vector<8x128xf32>
    %cst_51 = arith.constant 1.000000e+00 : f32
    %207 = vector.broadcast %cst_51 : f32 to vector<8x128xf32>
    %208 = arith.addf %207, %206 : vector<8x128xf32>
    %209 = arith.divf %207, %208 : vector<8x128xf32>
    %210 = arith.mulf %201, %143 : vector<8x128xf32>
    %211 = arith.mulf %195, %203 : vector<8x128xf32>
    %212 = arith.addf %210, %211 : vector<8x128xf32>
    %213 = math.tanh %212 : vector<8x128xf32>
    %214 = arith.mulf %209, %213 : vector<8x128xf32>
    %215 = arith.index_cast %151 : i32 to index
    %c0_52 = arith.constant 0 : index
    %216 = vector.load %arg9[%215, %c0_52] : memref<64x256xf32, #tpu.memory_space<vmem>>, vector<8x128xf32>
    tpu.vector_store %arg9[%215, %c0_52], %189 {strides = array<i32>} : memref<64x256xf32, #tpu.memory_space<vmem>>, vector<8x128xf32>,
    %217 = arith.index_cast %154 : i32 to index
    %c128_53 = arith.constant 128 : index
    %218 = vector.load %arg9[%217, %c128_53] : memref<64x256xf32, #tpu.memory_space<vmem>>, vector<8x128xf32>
    tpu.vector_store %arg9[%217, %c128_53], %214 {strides = array<i32>} : memref<64x256xf32, #tpu.memory_space<vmem>>, vector<8x128xf32>,
    %c3_i32 = arith.constant 3 : i32
    %c8_i32_54 = arith.constant 8 : i32
    %219 = arith.muli %c3_i32, %c8_i32_54 : i32
    %220 = tpu.assume_multiple %219, 8 : i32
    %c7_i32_55 = arith.constant 7 : i32
    %221 = arith.subi %c7_i32_55, %c3_i32 : i32
    %c8_i32_56 = arith.constant 8 : i32
    %222 = arith.muli %221, %c8_i32_56 : i32
    %223 = tpu.assume_multiple %222, 8 : i32
    %224 = arith.index_cast %220 : i32 to index
    %c0_57 = arith.constant 0 : index
    %225 = vector.load %arg8[%224, %c0_57] : memref<64x1024xf32, #tpu.memory_space<vmem>>, vector<8x512xf32>
    %226 = arith.truncf %189 : vector<8x128xf32> to vector<8x128xbf16>
    %cst_58 = arith.constant dense<0.000000e+00> : vector<8x512xf32>
    %227 = tpu.matmul %226, %8, %cst_58 {dimension_numbers = #tpu.dot_dimension_numbers<[1], [0], [0], [1], [0, 0, 1, 1], [], []>} : vector<8x128xbf16>, vector<128x512xbf16>, vector<8x512xf32> -> vector<8x512xf32>
    %228 = arith.addf %225, %227 : vector<8x512xf32>
    %229 = arith.index_cast %223 : i32 to index
    %c512_59 = arith.constant 512 : index
    %230 = vector.load %arg8[%229, %c512_59] : memref<64x1024xf32, #tpu.memory_space<vmem>>, vector<8x512xf32>
    %231 = arith.truncf %214 : vector<8x128xf32> to vector<8x128xbf16>
    %cst_60 = arith.constant dense<0.000000e+00> : vector<8x512xf32>
    %232 = tpu.matmul %231, %10, %cst_60 {dimension_numbers = #tpu.dot_dimension_numbers<[1], [0], [0], [1], [0, 0, 1, 1], [], []>} : vector<8x128xbf16>, vector<128x512xbf16>, vector<8x512xf32> -> vector<8x512xf32>
    %233 = arith.addf %230, %232 : vector<8x512xf32>
    %234 = vector.extract_strided_slice %228 {offsets = [0, 0], sizes = [8, 128], strides = [1, 1]} : vector<8x512xf32> to vector<8x128xf32>
    %235 = arith.negf %234 : vector<8x128xf32>
    %236 = math.exp %235 : vector<8x128xf32>
    %cst_61 = arith.constant 1.000000e+00 : f32
    %237 = vector.broadcast %cst_61 : f32 to vector<8x128xf32>
    %238 = arith.addf %237, %236 : vector<8x128xf32>
    %239 = arith.divf %237, %238 : vector<8x128xf32>
    %240 = vector.extract_strided_slice %228 {offsets = [0, 128], sizes = [8, 128], strides = [1, 1]} : vector<8x512xf32> to vector<8x128xf32>
    %241 = arith.negf %240 : vector<8x128xf32>
    %242 = math.exp %241 : vector<8x128xf32>
    %cst_62 = arith.constant 1.000000e+00 : f32
    %243 = vector.broadcast %cst_62 : f32 to vector<8x128xf32>
    %244 = arith.addf %243, %242 : vector<8x128xf32>
    %245 = arith.divf %243, %244 : vector<8x128xf32>
    %246 = vector.extract_strided_slice %228 {offsets = [0, 256], sizes = [8, 128], strides = [1, 1]} : vector<8x512xf32> to vector<8x128xf32>
    %247 = math.tanh %246 : vector<8x128xf32>
    %248 = vector.extract_strided_slice %228 {offsets = [0, 384], sizes = [8, 128], strides = [1, 1]} : vector<8x512xf32> to vector<8x128xf32>
    %249 = arith.negf %248 : vector<8x128xf32>
    %250 = math.exp %249 : vector<8x128xf32>
    %cst_63 = arith.constant 1.000000e+00 : f32
    %251 = vector.broadcast %cst_63 : f32 to vector<8x128xf32>
    %252 = arith.addf %251, %250 : vector<8x128xf32>
    %253 = arith.divf %251, %252 : vector<8x128xf32>
    %254 = arith.mulf %245, %187 : vector<8x128xf32>
    %255 = arith.mulf %239, %247 : vector<8x128xf32>
    %256 = arith.addf %254, %255 : vector<8x128xf32>
    %257 = math.tanh %256 : vector<8x128xf32>
    %258 = arith.mulf %253, %257 : vector<8x128xf32>
    %259 = vector.extract_strided_slice %233 {offsets = [0, 0], sizes = [8, 128], strides = [1, 1]} : vector<8x512xf32> to vector<8x128xf32>
    %260 = arith.negf %259 : vector<8x128xf32>
    %261 = math.exp %260 : vector<8x128xf32>
    %cst_64 = arith.constant 1.000000e+00 : f32
    %262 = vector.broadcast %cst_64 : f32 to vector<8x128xf32>
    %263 = arith.addf %262, %261 : vector<8x128xf32>
    %264 = arith.divf %262, %263 : vector<8x128xf32>
    %265 = vector.extract_strided_slice %233 {offsets = [0, 128], sizes = [8, 128], strides = [1, 1]} : vector<8x512xf32> to vector<8x128xf32>
    %266 = arith.negf %265 : vector<8x128xf32>
    %267 = math.exp %266 : vector<8x128xf32>
    %cst_65 = arith.constant 1.000000e+00 : f32
    %268 = vector.broadcast %cst_65 : f32 to vector<8x128xf32>
    %269 = arith.addf %268, %267 : vector<8x128xf32>
    %270 = arith.divf %268, %269 : vector<8x128xf32>
    %271 = vector.extract_strided_slice %233 {offsets = [0, 256], sizes = [8, 128], strides = [1, 1]} : vector<8x512xf32> to vector<8x128xf32>
    %272 = math.tanh %271 : vector<8x128xf32>
    %273 = vector.extract_strided_slice %233 {offsets = [0, 384], sizes = [8, 128], strides = [1, 1]} : vector<8x512xf32> to vector<8x128xf32>
    %274 = arith.negf %273 : vector<8x128xf32>
    %275 = math.exp %274 : vector<8x128xf32>
    %cst_66 = arith.constant 1.000000e+00 : f32
    %276 = vector.broadcast %cst_66 : f32 to vector<8x128xf32>
    %277 = arith.addf %276, %275 : vector<8x128xf32>
    %278 = arith.divf %276, %277 : vector<8x128xf32>
    %279 = arith.mulf %270, %212 : vector<8x128xf32>
    %280 = arith.mulf %264, %272 : vector<8x128xf32>
    %281 = arith.addf %279, %280 : vector<8x128xf32>
    %282 = math.tanh %281 : vector<8x128xf32>
    %283 = arith.mulf %278, %282 : vector<8x128xf32>
    %284 = arith.index_cast %220 : i32 to index
    %c0_67 = arith.constant 0 : index
    %285 = vector.load %arg9[%284, %c0_67] : memref<64x256xf32, #tpu.memory_space<vmem>>, vector<8x128xf32>
    tpu.vector_store %arg9[%284, %c0_67], %258 {strides = array<i32>} : memref<64x256xf32, #tpu.memory_space<vmem>>, vector<8x128xf32>,
    %286 = arith.index_cast %223 : i32 to index
    %c128_68 = arith.constant 128 : index
    %287 = vector.load %arg9[%286, %c128_68] : memref<64x256xf32, #tpu.memory_space<vmem>>, vector<8x128xf32>
    tpu.vector_store %arg9[%286, %c128_68], %283 {strides = array<i32>} : memref<64x256xf32, #tpu.memory_space<vmem>>, vector<8x128xf32>,
    %c4_i32 = arith.constant 4 : i32
    %c8_i32_69 = arith.constant 8 : i32
    %288 = arith.muli %c4_i32, %c8_i32_69 : i32
    %289 = tpu.assume_multiple %288, 8 : i32
    %c7_i32_70 = arith.constant 7 : i32
    %290 = arith.subi %c7_i32_70, %c4_i32 : i32
    %c8_i32_71 = arith.constant 8 : i32
    %291 = arith.muli %290, %c8_i32_71 : i32
    %292 = tpu.assume_multiple %291, 8 : i32
    %293 = arith.index_cast %289 : i32 to index
    %c0_72 = arith.constant 0 : index
    %294 = vector.load %arg8[%293, %c0_72] : memref<64x1024xf32, #tpu.memory_space<vmem>>, vector<8x512xf32>
    %295 = arith.truncf %258 : vector<8x128xf32> to vector<8x128xbf16>
    %cst_73 = arith.constant dense<0.000000e+00> : vector<8x512xf32>
    %296 = tpu.matmul %295, %8, %cst_73 {dimension_numbers = #tpu.dot_dimension_numbers<[1], [0], [0], [1], [0, 0, 1, 1], [], []>} : vector<8x128xbf16>, vector<128x512xbf16>, vector<8x512xf32> -> vector<8x512xf32>
    %297 = arith.addf %294, %296 : vector<8x512xf32>
    %298 = arith.index_cast %292 : i32 to index
    %c512_74 = arith.constant 512 : index
    %299 = vector.load %arg8[%298, %c512_74] : memref<64x1024xf32, #tpu.memory_space<vmem>>, vector<8x512xf32>
    %300 = arith.truncf %283 : vector<8x128xf32> to vector<8x128xbf16>
    %cst_75 = arith.constant dense<0.000000e+00> : vector<8x512xf32>
    %301 = tpu.matmul %300, %10, %cst_75 {dimension_numbers = #tpu.dot_dimension_numbers<[1], [0], [0], [1], [0, 0, 1, 1], [], []>} : vector<8x128xbf16>, vector<128x512xbf16>, vector<8x512xf32> -> vector<8x512xf32>
    %302 = arith.addf %299, %301 : vector<8x512xf32>
    %303 = vector.extract_strided_slice %297 {offsets = [0, 0], sizes = [8, 128], strides = [1, 1]} : vector<8x512xf32> to vector<8x128xf32>
    %304 = arith.negf %303 : vector<8x128xf32>
    %305 = math.exp %304 : vector<8x128xf32>
    %cst_76 = arith.constant 1.000000e+00 : f32
    %306 = vector.broadcast %cst_76 : f32 to vector<8x128xf32>
    %307 = arith.addf %306, %305 : vector<8x128xf32>
    %308 = arith.divf %306, %307 : vector<8x128xf32>
    %309 = vector.extract_strided_slice %297 {offsets = [0, 128], sizes = [8, 128], strides = [1, 1]} : vector<8x512xf32> to vector<8x128xf32>
    %310 = arith.negf %309 : vector<8x128xf32>
    %311 = math.exp %310 : vector<8x128xf32>
    %cst_77 = arith.constant 1.000000e+00 : f32
    %312 = vector.broadcast %cst_77 : f32 to vector<8x128xf32>
    %313 = arith.addf %312, %311 : vector<8x128xf32>
    %314 = arith.divf %312, %313 : vector<8x128xf32>
    %315 = vector.extract_strided_slice %297 {offsets = [0, 256], sizes = [8, 128], strides = [1, 1]} : vector<8x512xf32> to vector<8x128xf32>
    %316 = math.tanh %315 : vector<8x128xf32>
    %317 = vector.extract_strided_slice %297 {offsets = [0, 384], sizes = [8, 128], strides = [1, 1]} : vector<8x512xf32> to vector<8x128xf32>
    %318 = arith.negf %317 : vector<8x128xf32>
    %319 = math.exp %318 : vector<8x128xf32>
    %cst_78 = arith.constant 1.000000e+00 : f32
    %320 = vector.broadcast %cst_78 : f32 to vector<8x128xf32>
    %321 = arith.addf %320, %319 : vector<8x128xf32>
    %322 = arith.divf %320, %321 : vector<8x128xf32>
    %323 = arith.mulf %314, %256 : vector<8x128xf32>
    %324 = arith.mulf %308, %316 : vector<8x128xf32>
    %325 = arith.addf %323, %324 : vector<8x128xf32>
    %326 = math.tanh %325 : vector<8x128xf32>
    %327 = arith.mulf %322, %326 : vector<8x128xf32>
    %328 = vector.extract_strided_slice %302 {offsets = [0, 0], sizes = [8, 128], strides = [1, 1]} : vector<8x512xf32> to vector<8x128xf32>
    %329 = arith.negf %328 : vector<8x128xf32>
    %330 = math.exp %329 : vector<8x128xf32>
    %cst_79 = arith.constant 1.000000e+00 : f32
    %331 = vector.broadcast %cst_79 : f32 to vector<8x128xf32>
    %332 = arith.addf %331, %330 : vector<8x128xf32>
    %333 = arith.divf %331, %332 : vector<8x128xf32>
    %334 = vector.extract_strided_slice %302 {offsets = [0, 128], sizes = [8, 128], strides = [1, 1]} : vector<8x512xf32> to vector<8x128xf32>
    %335 = arith.negf %334 : vector<8x128xf32>
    %336 = math.exp %335 : vector<8x128xf32>
    %cst_80 = arith.constant 1.000000e+00 : f32
    %337 = vector.broadcast %cst_80 : f32 to vector<8x128xf32>
    %338 = arith.addf %337, %336 : vector<8x128xf32>
    %339 = arith.divf %337, %338 : vector<8x128xf32>
    %340 = vector.extract_strided_slice %302 {offsets = [0, 256], sizes = [8, 128], strides = [1, 1]} : vector<8x512xf32> to vector<8x128xf32>
    %341 = math.tanh %340 : vector<8x128xf32>
    %342 = vector.extract_strided_slice %302 {offsets = [0, 384], sizes = [8, 128], strides = [1, 1]} : vector<8x512xf32> to vector<8x128xf32>
    %343 = arith.negf %342 : vector<8x128xf32>
    %344 = math.exp %343 : vector<8x128xf32>
    %cst_81 = arith.constant 1.000000e+00 : f32
    %345 = vector.broadcast %cst_81 : f32 to vector<8x128xf32>
    %346 = arith.addf %345, %344 : vector<8x128xf32>
    %347 = arith.divf %345, %346 : vector<8x128xf32>
    %348 = arith.mulf %339, %281 : vector<8x128xf32>
    %349 = arith.mulf %333, %341 : vector<8x128xf32>
    %350 = arith.addf %348, %349 : vector<8x128xf32>
    %351 = math.tanh %350 : vector<8x128xf32>
    %352 = arith.mulf %347, %351 : vector<8x128xf32>
    %353 = arith.index_cast %289 : i32 to index
    %c0_82 = arith.constant 0 : index
    %354 = vector.load %arg9[%353, %c0_82] : memref<64x256xf32, #tpu.memory_space<vmem>>, vector<8x128xf32>
    tpu.vector_store %arg9[%353, %c0_82], %327 {strides = array<i32>} : memref<64x256xf32, #tpu.memory_space<vmem>>, vector<8x128xf32>,
    %355 = arith.index_cast %292 : i32 to index
    %c128_83 = arith.constant 128 : index
    %356 = vector.load %arg9[%355, %c128_83] : memref<64x256xf32, #tpu.memory_space<vmem>>, vector<8x128xf32>
    tpu.vector_store %arg9[%355, %c128_83], %352 {strides = array<i32>} : memref<64x256xf32, #tpu.memory_space<vmem>>, vector<8x128xf32>,
    %c5_i32 = arith.constant 5 : i32
    %c8_i32_84 = arith.constant 8 : i32
    %357 = arith.muli %c5_i32, %c8_i32_84 : i32
    %358 = tpu.assume_multiple %357, 8 : i32
    %c7_i32_85 = arith.constant 7 : i32
    %359 = arith.subi %c7_i32_85, %c5_i32 : i32
    %c8_i32_86 = arith.constant 8 : i32
    %360 = arith.muli %359, %c8_i32_86 : i32
    %361 = tpu.assume_multiple %360, 8 : i32
    %362 = arith.index_cast %358 : i32 to index
    %c0_87 = arith.constant 0 : index
    %363 = vector.load %arg8[%362, %c0_87] : memref<64x1024xf32, #tpu.memory_space<vmem>>, vector<8x512xf32>
    %364 = arith.truncf %327 : vector<8x128xf32> to vector<8x128xbf16>
    %cst_88 = arith.constant dense<0.000000e+00> : vector<8x512xf32>
    %365 = tpu.matmul %364, %8, %cst_88 {dimension_numbers = #tpu.dot_dimension_numbers<[1], [0], [0], [1], [0, 0, 1, 1], [], []>} : vector<8x128xbf16>, vector<128x512xbf16>, vector<8x512xf32> -> vector<8x512xf32>
    %366 = arith.addf %363, %365 : vector<8x512xf32>
    %367 = arith.index_cast %361 : i32 to index
    %c512_89 = arith.constant 512 : index
    %368 = vector.load %arg8[%367, %c512_89] : memref<64x1024xf32, #tpu.memory_space<vmem>>, vector<8x512xf32>
    %369 = arith.truncf %352 : vector<8x128xf32> to vector<8x128xbf16>
    %cst_90 = arith.constant dense<0.000000e+00> : vector<8x512xf32>
    %370 = tpu.matmul %369, %10, %cst_90 {dimension_numbers = #tpu.dot_dimension_numbers<[1], [0], [0], [1], [0, 0, 1, 1], [], []>} : vector<8x128xbf16>, vector<128x512xbf16>, vector<8x512xf32> -> vector<8x512xf32>
    %371 = arith.addf %368, %370 : vector<8x512xf32>
    %372 = vector.extract_strided_slice %366 {offsets = [0, 0], sizes = [8, 128], strides = [1, 1]} : vector<8x512xf32> to vector<8x128xf32>
    %373 = arith.negf %372 : vector<8x128xf32>
    %374 = math.exp %373 : vector<8x128xf32>
    %cst_91 = arith.constant 1.000000e+00 : f32
    %375 = vector.broadcast %cst_91 : f32 to vector<8x128xf32>
    %376 = arith.addf %375, %374 : vector<8x128xf32>
    %377 = arith.divf %375, %376 : vector<8x128xf32>
    %378 = vector.extract_strided_slice %366 {offsets = [0, 128], sizes = [8, 128], strides = [1, 1]} : vector<8x512xf32> to vector<8x128xf32>
    %379 = arith.negf %378 : vector<8x128xf32>
    %380 = math.exp %379 : vector<8x128xf32>
    %cst_92 = arith.constant 1.000000e+00 : f32
    %381 = vector.broadcast %cst_92 : f32 to vector<8x128xf32>
    %382 = arith.addf %381, %380 : vector<8x128xf32>
    %383 = arith.divf %381, %382 : vector<8x128xf32>
    %384 = vector.extract_strided_slice %366 {offsets = [0, 256], sizes = [8, 128], strides = [1, 1]} : vector<8x512xf32> to vector<8x128xf32>
    %385 = math.tanh %384 : vector<8x128xf32>
    %386 = vector.extract_strided_slice %366 {offsets = [0, 384], sizes = [8, 128], strides = [1, 1]} : vector<8x512xf32> to vector<8x128xf32>
    %387 = arith.negf %386 : vector<8x128xf32>
    %388 = math.exp %387 : vector<8x128xf32>
    %cst_93 = arith.constant 1.000000e+00 : f32
    %389 = vector.broadcast %cst_93 : f32 to vector<8x128xf32>
    %390 = arith.addf %389, %388 : vector<8x128xf32>
    %391 = arith.divf %389, %390 : vector<8x128xf32>
    %392 = arith.mulf %383, %325 : vector<8x128xf32>
    %393 = arith.mulf %377, %385 : vector<8x128xf32>
    %394 = arith.addf %392, %393 : vector<8x128xf32>
    %395 = math.tanh %394 : vector<8x128xf32>
    %396 = arith.mulf %391, %395 : vector<8x128xf32>
    %397 = vector.extract_strided_slice %371 {offsets = [0, 0], sizes = [8, 128], strides = [1, 1]} : vector<8x512xf32> to vector<8x128xf32>
    %398 = arith.negf %397 : vector<8x128xf32>
    %399 = math.exp %398 : vector<8x128xf32>
    %cst_94 = arith.constant 1.000000e+00 : f32
    %400 = vector.broadcast %cst_94 : f32 to vector<8x128xf32>
    %401 = arith.addf %400, %399 : vector<8x128xf32>
    %402 = arith.divf %400, %401 : vector<8x128xf32>
    %403 = vector.extract_strided_slice %371 {offsets = [0, 128], sizes = [8, 128], strides = [1, 1]} : vector<8x512xf32> to vector<8x128xf32>
    %404 = arith.negf %403 : vector<8x128xf32>
    %405 = math.exp %404 : vector<8x128xf32>
    %cst_95 = arith.constant 1.000000e+00 : f32
    %406 = vector.broadcast %cst_95 : f32 to vector<8x128xf32>
    %407 = arith.addf %406, %405 : vector<8x128xf32>
    %408 = arith.divf %406, %407 : vector<8x128xf32>
    %409 = vector.extract_strided_slice %371 {offsets = [0, 256], sizes = [8, 128], strides = [1, 1]} : vector<8x512xf32> to vector<8x128xf32>
    %410 = math.tanh %409 : vector<8x128xf32>
    %411 = vector.extract_strided_slice %371 {offsets = [0, 384], sizes = [8, 128], strides = [1, 1]} : vector<8x512xf32> to vector<8x128xf32>
    %412 = arith.negf %411 : vector<8x128xf32>
    %413 = math.exp %412 : vector<8x128xf32>
    %cst_96 = arith.constant 1.000000e+00 : f32
    %414 = vector.broadcast %cst_96 : f32 to vector<8x128xf32>
    %415 = arith.addf %414, %413 : vector<8x128xf32>
    %416 = arith.divf %414, %415 : vector<8x128xf32>
    %417 = arith.mulf %408, %350 : vector<8x128xf32>
    %418 = arith.mulf %402, %410 : vector<8x128xf32>
    %419 = arith.addf %417, %418 : vector<8x128xf32>
    %420 = math.tanh %419 : vector<8x128xf32>
    %421 = arith.mulf %416, %420 : vector<8x128xf32>
    %422 = arith.index_cast %358 : i32 to index
    %c0_97 = arith.constant 0 : index
    %423 = vector.load %arg9[%422, %c0_97] : memref<64x256xf32, #tpu.memory_space<vmem>>, vector<8x128xf32>
    tpu.vector_store %arg9[%422, %c0_97], %396 {strides = array<i32>} : memref<64x256xf32, #tpu.memory_space<vmem>>, vector<8x128xf32>,
    %424 = arith.index_cast %361 : i32 to index
    %c128_98 = arith.constant 128 : index
    %425 = vector.load %arg9[%424, %c128_98] : memref<64x256xf32, #tpu.memory_space<vmem>>, vector<8x128xf32>
    tpu.vector_store %arg9[%424, %c128_98], %421 {strides = array<i32>} : memref<64x256xf32, #tpu.memory_space<vmem>>, vector<8x128xf32>,
    %c6_i32 = arith.constant 6 : i32
    %c8_i32_99 = arith.constant 8 : i32
    %426 = arith.muli %c6_i32, %c8_i32_99 : i32
    %427 = tpu.assume_multiple %426, 8 : i32
    %c7_i32_100 = arith.constant 7 : i32
    %428 = arith.subi %c7_i32_100, %c6_i32 : i32
    %c8_i32_101 = arith.constant 8 : i32
    %429 = arith.muli %428, %c8_i32_101 : i32
    %430 = tpu.assume_multiple %429, 8 : i32
    %431 = arith.index_cast %427 : i32 to index
    %c0_102 = arith.constant 0 : index
    %432 = vector.load %arg8[%431, %c0_102] : memref<64x1024xf32, #tpu.memory_space<vmem>>, vector<8x512xf32>
    %433 = arith.truncf %396 : vector<8x128xf32> to vector<8x128xbf16>
    %cst_103 = arith.constant dense<0.000000e+00> : vector<8x512xf32>
    %434 = tpu.matmul %433, %8, %cst_103 {dimension_numbers = #tpu.dot_dimension_numbers<[1], [0], [0], [1], [0, 0, 1, 1], [], []>} : vector<8x128xbf16>, vector<128x512xbf16>, vector<8x512xf32> -> vector<8x512xf32>
    %435 = arith.addf %432, %434 : vector<8x512xf32>
    %436 = arith.index_cast %430 : i32 to index
    %c512_104 = arith.constant 512 : index
    %437 = vector.load %arg8[%436, %c512_104] : memref<64x1024xf32, #tpu.memory_space<vmem>>, vector<8x512xf32>
    %438 = arith.truncf %421 : vector<8x128xf32> to vector<8x128xbf16>
    %cst_105 = arith.constant dense<0.000000e+00> : vector<8x512xf32>
    %439 = tpu.matmul %438, %10, %cst_105 {dimension_numbers = #tpu.dot_dimension_numbers<[1], [0], [0], [1], [0, 0, 1, 1], [], []>} : vector<8x128xbf16>, vector<128x512xbf16>, vector<8x512xf32> -> vector<8x512xf32>
    %440 = arith.addf %437, %439 : vector<8x512xf32>
    %441 = vector.extract_strided_slice %435 {offsets = [0, 0], sizes = [8, 128], strides = [1, 1]} : vector<8x512xf32> to vector<8x128xf32>
    %442 = arith.negf %441 : vector<8x128xf32>
    %443 = math.exp %442 : vector<8x128xf32>
    %cst_106 = arith.constant 1.000000e+00 : f32
    %444 = vector.broadcast %cst_106 : f32 to vector<8x128xf32>
    %445 = arith.addf %444, %443 : vector<8x128xf32>
    %446 = arith.divf %444, %445 : vector<8x128xf32>
    %447 = vector.extract_strided_slice %435 {offsets = [0, 128], sizes = [8, 128], strides = [1, 1]} : vector<8x512xf32> to vector<8x128xf32>
    %448 = arith.negf %447 : vector<8x128xf32>
    %449 = math.exp %448 : vector<8x128xf32>
    %cst_107 = arith.constant 1.000000e+00 : f32
    %450 = vector.broadcast %cst_107 : f32 to vector<8x128xf32>
    %451 = arith.addf %450, %449 : vector<8x128xf32>
    %452 = arith.divf %450, %451 : vector<8x128xf32>
    %453 = vector.extract_strided_slice %435 {offsets = [0, 256], sizes = [8, 128], strides = [1, 1]} : vector<8x512xf32> to vector<8x128xf32>
    %454 = math.tanh %453 : vector<8x128xf32>
    %455 = vector.extract_strided_slice %435 {offsets = [0, 384], sizes = [8, 128], strides = [1, 1]} : vector<8x512xf32> to vector<8x128xf32>
    %456 = arith.negf %455 : vector<8x128xf32>
    %457 = math.exp %456 : vector<8x128xf32>
    %cst_108 = arith.constant 1.000000e+00 : f32
    %458 = vector.broadcast %cst_108 : f32 to vector<8x128xf32>
    %459 = arith.addf %458, %457 : vector<8x128xf32>
    %460 = arith.divf %458, %459 : vector<8x128xf32>
    %461 = arith.mulf %452, %394 : vector<8x128xf32>
    %462 = arith.mulf %446, %454 : vector<8x128xf32>
    %463 = arith.addf %461, %462 : vector<8x128xf32>
    %464 = math.tanh %463 : vector<8x128xf32>
    %465 = arith.mulf %460, %464 : vector<8x128xf32>
    %466 = vector.extract_strided_slice %440 {offsets = [0, 0], sizes = [8, 128], strides = [1, 1]} : vector<8x512xf32> to vector<8x128xf32>
    %467 = arith.negf %466 : vector<8x128xf32>
    %468 = math.exp %467 : vector<8x128xf32>
    %cst_109 = arith.constant 1.000000e+00 : f32
    %469 = vector.broadcast %cst_109 : f32 to vector<8x128xf32>
    %470 = arith.addf %469, %468 : vector<8x128xf32>
    %471 = arith.divf %469, %470 : vector<8x128xf32>
    %472 = vector.extract_strided_slice %440 {offsets = [0, 128], sizes = [8, 128], strides = [1, 1]} : vector<8x512xf32> to vector<8x128xf32>
    %473 = arith.negf %472 : vector<8x128xf32>
    %474 = math.exp %473 : vector<8x128xf32>
    %cst_110 = arith.constant 1.000000e+00 : f32
    %475 = vector.broadcast %cst_110 : f32 to vector<8x128xf32>
    %476 = arith.addf %475, %474 : vector<8x128xf32>
    %477 = arith.divf %475, %476 : vector<8x128xf32>
    %478 = vector.extract_strided_slice %440 {offsets = [0, 256], sizes = [8, 128], strides = [1, 1]} : vector<8x512xf32> to vector<8x128xf32>
    %479 = math.tanh %478 : vector<8x128xf32>
    %480 = vector.extract_strided_slice %440 {offsets = [0, 384], sizes = [8, 128], strides = [1, 1]} : vector<8x512xf32> to vector<8x128xf32>
    %481 = arith.negf %480 : vector<8x128xf32>
    %482 = math.exp %481 : vector<8x128xf32>
    %cst_111 = arith.constant 1.000000e+00 : f32
    %483 = vector.broadcast %cst_111 : f32 to vector<8x128xf32>
    %484 = arith.addf %483, %482 : vector<8x128xf32>
    %485 = arith.divf %483, %484 : vector<8x128xf32>
    %486 = arith.mulf %477, %419 : vector<8x128xf32>
    %487 = arith.mulf %471, %479 : vector<8x128xf32>
    %488 = arith.addf %486, %487 : vector<8x128xf32>
    %489 = math.tanh %488 : vector<8x128xf32>
    %490 = arith.mulf %485, %489 : vector<8x128xf32>
    %491 = arith.index_cast %427 : i32 to index
    %c0_112 = arith.constant 0 : index
    %492 = vector.load %arg9[%491, %c0_112] : memref<64x256xf32, #tpu.memory_space<vmem>>, vector<8x128xf32>
    tpu.vector_store %arg9[%491, %c0_112], %465 {strides = array<i32>} : memref<64x256xf32, #tpu.memory_space<vmem>>, vector<8x128xf32>,
    %493 = arith.index_cast %430 : i32 to index
    %c128_113 = arith.constant 128 : index
    %494 = vector.load %arg9[%493, %c128_113] : memref<64x256xf32, #tpu.memory_space<vmem>>, vector<8x128xf32>
    tpu.vector_store %arg9[%493, %c128_113], %490 {strides = array<i32>} : memref<64x256xf32, #tpu.memory_space<vmem>>, vector<8x128xf32>,
    %c7_i32_114 = arith.constant 7 : i32
    %c8_i32_115 = arith.constant 8 : i32
    %495 = arith.muli %c7_i32_114, %c8_i32_115 : i32
    %496 = tpu.assume_multiple %495, 8 : i32
    %c7_i32_116 = arith.constant 7 : i32
    %497 = arith.subi %c7_i32_116, %c7_i32_114 : i32
    %c8_i32_117 = arith.constant 8 : i32
    %498 = arith.muli %497, %c8_i32_117 : i32
    %499 = tpu.assume_multiple %498, 8 : i32
    %500 = arith.index_cast %496 : i32 to index
    %c0_118 = arith.constant 0 : index
    %501 = vector.load %arg8[%500, %c0_118] : memref<64x1024xf32, #tpu.memory_space<vmem>>, vector<8x512xf32>
    %502 = arith.truncf %465 : vector<8x128xf32> to vector<8x128xbf16>
    %cst_119 = arith.constant dense<0.000000e+00> : vector<8x512xf32>
    %503 = tpu.matmul %502, %8, %cst_119 {dimension_numbers = #tpu.dot_dimension_numbers<[1], [0], [0], [1], [0, 0, 1, 1], [], []>} : vector<8x128xbf16>, vector<128x512xbf16>, vector<8x512xf32> -> vector<8x512xf32>
    %504 = arith.addf %501, %503 : vector<8x512xf32>
    %505 = arith.index_cast %499 : i32 to index
    %c512_120 = arith.constant 512 : index
    %506 = vector.load %arg8[%505, %c512_120] : memref<64x1024xf32, #tpu.memory_space<vmem>>, vector<8x512xf32>
    %507 = arith.truncf %490 : vector<8x128xf32> to vector<8x128xbf16>
    %cst_121 = arith.constant dense<0.000000e+00> : vector<8x512xf32>
    %508 = tpu.matmul %507, %10, %cst_121 {dimension_numbers = #tpu.dot_dimension_numbers<[1], [0], [0], [1], [0, 0, 1, 1], [], []>} : vector<8x128xbf16>, vector<128x512xbf16>, vector<8x512xf32> -> vector<8x512xf32>
    %509 = arith.addf %506, %508 : vector<8x512xf32>
    %510 = vector.extract_strided_slice %504 {offsets = [0, 0], sizes = [8, 128], strides = [1, 1]} : vector<8x512xf32> to vector<8x128xf32>
    %511 = arith.negf %510 : vector<8x128xf32>
    %512 = math.exp %511 : vector<8x128xf32>
    %cst_122 = arith.constant 1.000000e+00 : f32
    %513 = vector.broadcast %cst_122 : f32 to vector<8x128xf32>
    %514 = arith.addf %513, %512 : vector<8x128xf32>
    %515 = arith.divf %513, %514 : vector<8x128xf32>
    %516 = vector.extract_strided_slice %504 {offsets = [0, 128], sizes = [8, 128], strides = [1, 1]} : vector<8x512xf32> to vector<8x128xf32>
    %517 = arith.negf %516 : vector<8x128xf32>
    %518 = math.exp %517 : vector<8x128xf32>
    %cst_123 = arith.constant 1.000000e+00 : f32
    %519 = vector.broadcast %cst_123 : f32 to vector<8x128xf32>
    %520 = arith.addf %519, %518 : vector<8x128xf32>
    %521 = arith.divf %519, %520 : vector<8x128xf32>
    %522 = vector.extract_strided_slice %504 {offsets = [0, 256], sizes = [8, 128], strides = [1, 1]} : vector<8x512xf32> to vector<8x128xf32>
    %523 = math.tanh %522 : vector<8x128xf32>
    %524 = vector.extract_strided_slice %504 {offsets = [0, 384], sizes = [8, 128], strides = [1, 1]} : vector<8x512xf32> to vector<8x128xf32>
    %525 = arith.negf %524 : vector<8x128xf32>
    %526 = math.exp %525 : vector<8x128xf32>
    %cst_124 = arith.constant 1.000000e+00 : f32
    %527 = vector.broadcast %cst_124 : f32 to vector<8x128xf32>
    %528 = arith.addf %527, %526 : vector<8x128xf32>
    %529 = arith.divf %527, %528 : vector<8x128xf32>
    %530 = arith.mulf %521, %463 : vector<8x128xf32>
    %531 = arith.mulf %515, %523 : vector<8x128xf32>
    %532 = arith.addf %530, %531 : vector<8x128xf32>
    %533 = math.tanh %532 : vector<8x128xf32>
    %534 = arith.mulf %529, %533 : vector<8x128xf32>
    %535 = vector.extract_strided_slice %509 {offsets = [0, 0], sizes = [8, 128], strides = [1, 1]} : vector<8x512xf32> to vector<8x128xf32>
    %536 = arith.negf %535 : vector<8x128xf32>
    %537 = math.exp %536 : vector<8x128xf32>
    %cst_125 = arith.constant 1.000000e+00 : f32
    %538 = vector.broadcast %cst_125 : f32 to vector<8x128xf32>
    %539 = arith.addf %538, %537 : vector<8x128xf32>
    %540 = arith.divf %538, %539 : vector<8x128xf32>
    %541 = vector.extract_strided_slice %509 {offsets = [0, 128], sizes = [8, 128], strides = [1, 1]} : vector<8x512xf32> to vector<8x128xf32>
    %542 = arith.negf %541 : vector<8x128xf32>
    %543 = math.exp %542 : vector<8x128xf32>
    %cst_126 = arith.constant 1.000000e+00 : f32
    %544 = vector.broadcast %cst_126 : f32 to vector<8x128xf32>
    %545 = arith.addf %544, %543 : vector<8x128xf32>
    %546 = arith.divf %544, %545 : vector<8x128xf32>
    %547 = vector.extract_strided_slice %509 {offsets = [0, 256], sizes = [8, 128], strides = [1, 1]} : vector<8x512xf32> to vector<8x128xf32>
    %548 = math.tanh %547 : vector<8x128xf32>
    %549 = vector.extract_strided_slice %509 {offsets = [0, 384], sizes = [8, 128], strides = [1, 1]} : vector<8x512xf32> to vector<8x128xf32>
    %550 = arith.negf %549 : vector<8x128xf32>
    %551 = math.exp %550 : vector<8x128xf32>
    %cst_127 = arith.constant 1.000000e+00 : f32
    %552 = vector.broadcast %cst_127 : f32 to vector<8x128xf32>
    %553 = arith.addf %552, %551 : vector<8x128xf32>
    %554 = arith.divf %552, %553 : vector<8x128xf32>
    %555 = arith.mulf %546, %488 : vector<8x128xf32>
    %556 = arith.mulf %540, %548 : vector<8x128xf32>
    %557 = arith.addf %555, %556 : vector<8x128xf32>
    %558 = math.tanh %557 : vector<8x128xf32>
    %559 = arith.mulf %554, %558 : vector<8x128xf32>
    %560 = arith.index_cast %496 : i32 to index
    %c0_128 = arith.constant 0 : index
    %561 = vector.load %arg9[%560, %c0_128] : memref<64x256xf32, #tpu.memory_space<vmem>>, vector<8x128xf32>
    tpu.vector_store %arg9[%560, %c0_128], %534 {strides = array<i32>} : memref<64x256xf32, #tpu.memory_space<vmem>>, vector<8x128xf32>,
    %562 = arith.index_cast %499 : i32 to index
    %c128_129 = arith.constant 128 : index
    %563 = vector.load %arg9[%562, %c128_129] : memref<64x256xf32, #tpu.memory_space<vmem>>, vector<8x128xf32>
    tpu.vector_store %arg9[%562, %c128_129], %559 {strides = array<i32>} : memref<64x256xf32, #tpu.memory_space<vmem>>, vector<8x128xf32>,
    %c8_i32_130 = arith.constant 8 : i32
    %c0_131 = arith.constant 0 : index
    %c0_132 = arith.constant 0 : index
    %564 = vector.load %arg9[%c0_131, %c0_132] : memref<64x256xf32, #tpu.memory_space<vmem>>, vector<64x256xf32>
    %565 = arith.truncf %564 : vector<64x256xf32> to vector<64x256xbf16>
    %c0_133 = arith.constant 0 : index
    %c0_134 = arith.constant 0 : index
    %566 = vector.load %arg4[%c0_133, %c0_134] : memref<256x1024xbf16, #tpu.memory_space<vmem>>, vector<256x1024xbf16>
    %cst_135 = arith.constant dense<0.000000e+00> : vector<64x1024xf32>
    %567 = tpu.matmul %565, %566, %cst_135 {dimension_numbers = #tpu.dot_dimension_numbers<[1], [0], [0], [1], [0, 0, 1, 1], [], []>} : vector<64x256xbf16>, vector<256x1024xbf16>, vector<64x1024xf32> -> vector<64x1024xf32>
    %c0_136 = arith.constant 0 : index
    %c0_137 = arith.constant 0 : index
    %568 = vector.load %arg6[%c0_136, %c0_137] : memref<1x1024xf32, #tpu.memory_space<vmem>>, vector<1x1024xf32>
    %569 = vector.broadcast %568 : vector<1x1024xf32> to vector<64x1024xf32>
    %570 = arith.addf %567, %569 : vector<64x1024xf32>
    %c0_138 = arith.constant 0 : index
    %c0_139 = arith.constant 0 : index
    %571 = vector.load %arg8[%c0_138, %c0_139] : memref<64x1024xf32, #tpu.memory_space<vmem>>, vector<64x1024xf32>
    tpu.vector_store %arg8[%c0_138, %c0_139], %570 {strides = array<i32>} : memref<64x1024xf32, #tpu.memory_space<vmem>>, vector<64x1024xf32>,
    %c0_140 = arith.constant 0 : index
    %c0_141 = arith.constant 0 : index
    %c0_142 = arith.constant 0 : index
    %572 = vector.load %arg5[%c0_140, %c0_141, %c0_142] : memref<2x128x512xbf16, #tpu.memory_space<vmem>>, vector<1x128x512xbf16>
    %573 = vector.shape_cast %572 : vector<1x128x512xbf16> to vector<128x512xbf16>
    %c1_143 = arith.constant 1 : index
    %c0_144 = arith.constant 0 : index
    %c0_145 = arith.constant 0 : index
    %574 = vector.load %arg5[%c1_143, %c0_144, %c0_145] : memref<2x128x512xbf16, #tpu.memory_space<vmem>>, vector<1x128x512xbf16>
    %575 = vector.shape_cast %574 : vector<1x128x512xbf16> to vector<128x512xbf16>
    %cst_146 = arith.constant 0.000000e+00 : f32
    %576 = vector.broadcast %cst_146 : f32 to vector<8x128xf32>
    %c0_i32_147 = arith.constant 0 : i32
    %c8_i32_148 = arith.constant 8 : i32
    %577 = arith.muli %c0_i32_147, %c8_i32_148 : i32
    %578 = tpu.assume_multiple %577, 8 : i32
    %c7_i32_149 = arith.constant 7 : i32
    %579 = arith.subi %c7_i32_149, %c0_i32_147 : i32
    %c8_i32_150 = arith.constant 8 : i32
    %580 = arith.muli %579, %c8_i32_150 : i32
    %581 = tpu.assume_multiple %580, 8 : i32
    %582 = arith.index_cast %578 : i32 to index
    %c0_151 = arith.constant 0 : index
    %583 = vector.load %arg8[%582, %c0_151] : memref<64x1024xf32, #tpu.memory_space<vmem>>, vector<8x512xf32>
    %584 = arith.truncf %576 : vector<8x128xf32> to vector<8x128xbf16>
    %cst_152 = arith.constant dense<0.000000e+00> : vector<8x512xf32>
    %585 = tpu.matmul %584, %573, %cst_152 {dimension_numbers = #tpu.dot_dimension_numbers<[1], [0], [0], [1], [0, 0, 1, 1], [], []>} : vector<8x128xbf16>, vector<128x512xbf16>, vector<8x512xf32> -> vector<8x512xf32>
    %586 = arith.addf %583, %585 : vector<8x512xf32>
    %587 = arith.index_cast %581 : i32 to index
    %c512_153 = arith.constant 512 : index
    %588 = vector.load %arg8[%587, %c512_153] : memref<64x1024xf32, #tpu.memory_space<vmem>>, vector<8x512xf32>
    %589 = arith.truncf %576 : vector<8x128xf32> to vector<8x128xbf16>
    %cst_154 = arith.constant dense<0.000000e+00> : vector<8x512xf32>
    %590 = tpu.matmul %589, %575, %cst_154 {dimension_numbers = #tpu.dot_dimension_numbers<[1], [0], [0], [1], [0, 0, 1, 1], [], []>} : vector<8x128xbf16>, vector<128x512xbf16>, vector<8x512xf32> -> vector<8x512xf32>
    %591 = arith.addf %588, %590 : vector<8x512xf32>
    %592 = vector.extract_strided_slice %586 {offsets = [0, 0], sizes = [8, 128], strides = [1, 1]} : vector<8x512xf32> to vector<8x128xf32>
    %593 = arith.negf %592 : vector<8x128xf32>
    %594 = math.exp %593 : vector<8x128xf32>
    %cst_155 = arith.constant 1.000000e+00 : f32
    %595 = vector.broadcast %cst_155 : f32 to vector<8x128xf32>
    %596 = arith.addf %595, %594 : vector<8x128xf32>
    %597 = arith.divf %595, %596 : vector<8x128xf32>
    %598 = vector.extract_strided_slice %586 {offsets = [0, 128], sizes = [8, 128], strides = [1, 1]} : vector<8x512xf32> to vector<8x128xf32>
    %599 = arith.negf %598 : vector<8x128xf32>
    %600 = math.exp %599 : vector<8x128xf32>
    %cst_156 = arith.constant 1.000000e+00 : f32
    %601 = vector.broadcast %cst_156 : f32 to vector<8x128xf32>
    %602 = arith.addf %601, %600 : vector<8x128xf32>
    %603 = arith.divf %601, %602 : vector<8x128xf32>
    %604 = vector.extract_strided_slice %586 {offsets = [0, 256], sizes = [8, 128], strides = [1, 1]} : vector<8x512xf32> to vector<8x128xf32>
    %605 = math.tanh %604 : vector<8x128xf32>
    %606 = vector.extract_strided_slice %586 {offsets = [0, 384], sizes = [8, 128], strides = [1, 1]} : vector<8x512xf32> to vector<8x128xf32>
    %607 = arith.negf %606 : vector<8x128xf32>
    %608 = math.exp %607 : vector<8x128xf32>
    %cst_157 = arith.constant 1.000000e+00 : f32
    %609 = vector.broadcast %cst_157 : f32 to vector<8x128xf32>
    %610 = arith.addf %609, %608 : vector<8x128xf32>
    %611 = arith.divf %609, %610 : vector<8x128xf32>
    %612 = arith.mulf %603, %576 : vector<8x128xf32>
    %613 = arith.mulf %597, %605 : vector<8x128xf32>
    %614 = arith.addf %612, %613 : vector<8x128xf32>
    %615 = math.tanh %614 : vector<8x128xf32>
    %616 = arith.mulf %611, %615 : vector<8x128xf32>
    %617 = vector.extract_strided_slice %591 {offsets = [0, 0], sizes = [8, 128], strides = [1, 1]} : vector<8x512xf32> to vector<8x128xf32>
    %618 = arith.negf %617 : vector<8x128xf32>
    %619 = math.exp %618 : vector<8x128xf32>
    %cst_158 = arith.constant 1.000000e+00 : f32
    %620 = vector.broadcast %cst_158 : f32 to vector<8x128xf32>
    %621 = arith.addf %620, %619 : vector<8x128xf32>
    %622 = arith.divf %620, %621 : vector<8x128xf32>
    %623 = vector.extract_strided_slice %591 {offsets = [0, 128], sizes = [8, 128], strides = [1, 1]} : vector<8x512xf32> to vector<8x128xf32>
    %624 = arith.negf %623 : vector<8x128xf32>
    %625 = math.exp %624 : vector<8x128xf32>
    %cst_159 = arith.constant 1.000000e+00 : f32
    %626 = vector.broadcast %cst_159 : f32 to vector<8x128xf32>
    %627 = arith.addf %626, %625 : vector<8x128xf32>
    %628 = arith.divf %626, %627 : vector<8x128xf32>
    %629 = vector.extract_strided_slice %591 {offsets = [0, 256], sizes = [8, 128], strides = [1, 1]} : vector<8x512xf32> to vector<8x128xf32>
    %630 = math.tanh %629 : vector<8x128xf32>
    %631 = vector.extract_strided_slice %591 {offsets = [0, 384], sizes = [8, 128], strides = [1, 1]} : vector<8x512xf32> to vector<8x128xf32>
    %632 = arith.negf %631 : vector<8x128xf32>
    %633 = math.exp %632 : vector<8x128xf32>
    %cst_160 = arith.constant 1.000000e+00 : f32
    %634 = vector.broadcast %cst_160 : f32 to vector<8x128xf32>
    %635 = arith.addf %634, %633 : vector<8x128xf32>
    %636 = arith.divf %634, %635 : vector<8x128xf32>
    %637 = arith.mulf %628, %576 : vector<8x128xf32>
    %638 = arith.mulf %622, %630 : vector<8x128xf32>
    %639 = arith.addf %637, %638 : vector<8x128xf32>
    %640 = math.tanh %639 : vector<8x128xf32>
    %641 = arith.mulf %636, %640 : vector<8x128xf32>
    %c1_i32_161 = arith.constant 1 : i32
    %c8_i32_162 = arith.constant 8 : i32
    %642 = arith.muli %c1_i32_161, %c8_i32_162 : i32
    %643 = tpu.assume_multiple %642, 8 : i32
    %c7_i32_163 = arith.constant 7 : i32
    %644 = arith.subi %c7_i32_163, %c1_i32_161 : i32
    %c8_i32_164 = arith.constant 8 : i32
    %645 = arith.muli %644, %c8_i32_164 : i32
    %646 = tpu.assume_multiple %645, 8 : i32
    %647 = arith.index_cast %643 : i32 to index
    %c0_165 = arith.constant 0 : index
    %648 = vector.load %arg8[%647, %c0_165] : memref<64x1024xf32, #tpu.memory_space<vmem>>, vector<8x512xf32>
    %649 = arith.truncf %616 : vector<8x128xf32> to vector<8x128xbf16>
    %cst_166 = arith.constant dense<0.000000e+00> : vector<8x512xf32>
    %650 = tpu.matmul %649, %573, %cst_166 {dimension_numbers = #tpu.dot_dimension_numbers<[1], [0], [0], [1], [0, 0, 1, 1], [], []>} : vector<8x128xbf16>, vector<128x512xbf16>, vector<8x512xf32> -> vector<8x512xf32>
    %651 = arith.addf %648, %650 : vector<8x512xf32>
    %652 = arith.index_cast %646 : i32 to index
    %c512_167 = arith.constant 512 : index
    %653 = vector.load %arg8[%652, %c512_167] : memref<64x1024xf32, #tpu.memory_space<vmem>>, vector<8x512xf32>
    %654 = arith.truncf %641 : vector<8x128xf32> to vector<8x128xbf16>
    %cst_168 = arith.constant dense<0.000000e+00> : vector<8x512xf32>
    %655 = tpu.matmul %654, %575, %cst_168 {dimension_numbers = #tpu.dot_dimension_numbers<[1], [0], [0], [1], [0, 0, 1, 1], [], []>} : vector<8x128xbf16>, vector<128x512xbf16>, vector<8x512xf32> -> vector<8x512xf32>
    %656 = arith.addf %653, %655 : vector<8x512xf32>
    %657 = vector.extract_strided_slice %651 {offsets = [0, 0], sizes = [8, 128], strides = [1, 1]} : vector<8x512xf32> to vector<8x128xf32>
    %658 = arith.negf %657 : vector<8x128xf32>
    %659 = math.exp %658 : vector<8x128xf32>
    %cst_169 = arith.constant 1.000000e+00 : f32
    %660 = vector.broadcast %cst_169 : f32 to vector<8x128xf32>
    %661 = arith.addf %660, %659 : vector<8x128xf32>
    %662 = arith.divf %660, %661 : vector<8x128xf32>
    %663 = vector.extract_strided_slice %651 {offsets = [0, 128], sizes = [8, 128], strides = [1, 1]} : vector<8x512xf32> to vector<8x128xf32>
    %664 = arith.negf %663 : vector<8x128xf32>
    %665 = math.exp %664 : vector<8x128xf32>
    %cst_170 = arith.constant 1.000000e+00 : f32
    %666 = vector.broadcast %cst_170 : f32 to vector<8x128xf32>
    %667 = arith.addf %666, %665 : vector<8x128xf32>
    %668 = arith.divf %666, %667 : vector<8x128xf32>
    %669 = vector.extract_strided_slice %651 {offsets = [0, 256], sizes = [8, 128], strides = [1, 1]} : vector<8x512xf32> to vector<8x128xf32>
    %670 = math.tanh %669 : vector<8x128xf32>
    %671 = vector.extract_strided_slice %651 {offsets = [0, 384], sizes = [8, 128], strides = [1, 1]} : vector<8x512xf32> to vector<8x128xf32>
    %672 = arith.negf %671 : vector<8x128xf32>
    %673 = math.exp %672 : vector<8x128xf32>
    %cst_171 = arith.constant 1.000000e+00 : f32
    %674 = vector.broadcast %cst_171 : f32 to vector<8x128xf32>
    %675 = arith.addf %674, %673 : vector<8x128xf32>
    %676 = arith.divf %674, %675 : vector<8x128xf32>
    %677 = arith.mulf %668, %614 : vector<8x128xf32>
    %678 = arith.mulf %662, %670 : vector<8x128xf32>
    %679 = arith.addf %677, %678 : vector<8x128xf32>
    %680 = math.tanh %679 : vector<8x128xf32>
    %681 = arith.mulf %676, %680 : vector<8x128xf32>
    %682 = vector.extract_strided_slice %656 {offsets = [0, 0], sizes = [8, 128], strides = [1, 1]} : vector<8x512xf32> to vector<8x128xf32>
    %683 = arith.negf %682 : vector<8x128xf32>
    %684 = math.exp %683 : vector<8x128xf32>
    %cst_172 = arith.constant 1.000000e+00 : f32
    %685 = vector.broadcast %cst_172 : f32 to vector<8x128xf32>
    %686 = arith.addf %685, %684 : vector<8x128xf32>
    %687 = arith.divf %685, %686 : vector<8x128xf32>
    %688 = vector.extract_strided_slice %656 {offsets = [0, 128], sizes = [8, 128], strides = [1, 1]} : vector<8x512xf32> to vector<8x128xf32>
    %689 = arith.negf %688 : vector<8x128xf32>
    %690 = math.exp %689 : vector<8x128xf32>
    %cst_173 = arith.constant 1.000000e+00 : f32
    %691 = vector.broadcast %cst_173 : f32 to vector<8x128xf32>
    %692 = arith.addf %691, %690 : vector<8x128xf32>
    %693 = arith.divf %691, %692 : vector<8x128xf32>
    %694 = vector.extract_strided_slice %656 {offsets = [0, 256], sizes = [8, 128], strides = [1, 1]} : vector<8x512xf32> to vector<8x128xf32>
    %695 = math.tanh %694 : vector<8x128xf32>
    %696 = vector.extract_strided_slice %656 {offsets = [0, 384], sizes = [8, 128], strides = [1, 1]} : vector<8x512xf32> to vector<8x128xf32>
    %697 = arith.negf %696 : vector<8x128xf32>
    %698 = math.exp %697 : vector<8x128xf32>
    %cst_174 = arith.constant 1.000000e+00 : f32
    %699 = vector.broadcast %cst_174 : f32 to vector<8x128xf32>
    %700 = arith.addf %699, %698 : vector<8x128xf32>
    %701 = arith.divf %699, %700 : vector<8x128xf32>
    %702 = arith.mulf %693, %639 : vector<8x128xf32>
    %703 = arith.mulf %687, %695 : vector<8x128xf32>
    %704 = arith.addf %702, %703 : vector<8x128xf32>
    %705 = math.tanh %704 : vector<8x128xf32>
    %706 = arith.mulf %701, %705 : vector<8x128xf32>
    %c2_i32_175 = arith.constant 2 : i32
    %c8_i32_176 = arith.constant 8 : i32
    %707 = arith.muli %c2_i32_175, %c8_i32_176 : i32
    %708 = tpu.assume_multiple %707, 8 : i32
    %c7_i32_177 = arith.constant 7 : i32
    %709 = arith.subi %c7_i32_177, %c2_i32_175 : i32
    %c8_i32_178 = arith.constant 8 : i32
    %710 = arith.muli %709, %c8_i32_178 : i32
    %711 = tpu.assume_multiple %710, 8 : i32
    %712 = arith.index_cast %708 : i32 to index
    %c0_179 = arith.constant 0 : index
    %713 = vector.load %arg8[%712, %c0_179] : memref<64x1024xf32, #tpu.memory_space<vmem>>, vector<8x512xf32>
    %714 = arith.truncf %681 : vector<8x128xf32> to vector<8x128xbf16>
    %cst_180 = arith.constant dense<0.000000e+00> : vector<8x512xf32>
    %715 = tpu.matmul %714, %573, %cst_180 {dimension_numbers = #tpu.dot_dimension_numbers<[1], [0], [0], [1], [0, 0, 1, 1], [], []>} : vector<8x128xbf16>, vector<128x512xbf16>, vector<8x512xf32> -> vector<8x512xf32>
    %716 = arith.addf %713, %715 : vector<8x512xf32>
    %717 = arith.index_cast %711 : i32 to index
    %c512_181 = arith.constant 512 : index
    %718 = vector.load %arg8[%717, %c512_181] : memref<64x1024xf32, #tpu.memory_space<vmem>>, vector<8x512xf32>
    %719 = arith.truncf %706 : vector<8x128xf32> to vector<8x128xbf16>
    %cst_182 = arith.constant dense<0.000000e+00> : vector<8x512xf32>
    %720 = tpu.matmul %719, %575, %cst_182 {dimension_numbers = #tpu.dot_dimension_numbers<[1], [0], [0], [1], [0, 0, 1, 1], [], []>} : vector<8x128xbf16>, vector<128x512xbf16>, vector<8x512xf32> -> vector<8x512xf32>
    %721 = arith.addf %718, %720 : vector<8x512xf32>
    %722 = vector.extract_strided_slice %716 {offsets = [0, 0], sizes = [8, 128], strides = [1, 1]} : vector<8x512xf32> to vector<8x128xf32>
    %723 = arith.negf %722 : vector<8x128xf32>
    %724 = math.exp %723 : vector<8x128xf32>
    %cst_183 = arith.constant 1.000000e+00 : f32
    %725 = vector.broadcast %cst_183 : f32 to vector<8x128xf32>
    %726 = arith.addf %725, %724 : vector<8x128xf32>
    %727 = arith.divf %725, %726 : vector<8x128xf32>
    %728 = vector.extract_strided_slice %716 {offsets = [0, 128], sizes = [8, 128], strides = [1, 1]} : vector<8x512xf32> to vector<8x128xf32>
    %729 = arith.negf %728 : vector<8x128xf32>
    %730 = math.exp %729 : vector<8x128xf32>
    %cst_184 = arith.constant 1.000000e+00 : f32
    %731 = vector.broadcast %cst_184 : f32 to vector<8x128xf32>
    %732 = arith.addf %731, %730 : vector<8x128xf32>
    %733 = arith.divf %731, %732 : vector<8x128xf32>
    %734 = vector.extract_strided_slice %716 {offsets = [0, 256], sizes = [8, 128], strides = [1, 1]} : vector<8x512xf32> to vector<8x128xf32>
    %735 = math.tanh %734 : vector<8x128xf32>
    %736 = vector.extract_strided_slice %716 {offsets = [0, 384], sizes = [8, 128], strides = [1, 1]} : vector<8x512xf32> to vector<8x128xf32>
    %737 = arith.negf %736 : vector<8x128xf32>
    %738 = math.exp %737 : vector<8x128xf32>
    %cst_185 = arith.constant 1.000000e+00 : f32
    %739 = vector.broadcast %cst_185 : f32 to vector<8x128xf32>
    %740 = arith.addf %739, %738 : vector<8x128xf32>
    %741 = arith.divf %739, %740 : vector<8x128xf32>
    %742 = arith.mulf %733, %679 : vector<8x128xf32>
    %743 = arith.mulf %727, %735 : vector<8x128xf32>
    %744 = arith.addf %742, %743 : vector<8x128xf32>
    %745 = math.tanh %744 : vector<8x128xf32>
    %746 = arith.mulf %741, %745 : vector<8x128xf32>
    %747 = vector.extract_strided_slice %721 {offsets = [0, 0], sizes = [8, 128], strides = [1, 1]} : vector<8x512xf32> to vector<8x128xf32>
    %748 = arith.negf %747 : vector<8x128xf32>
    %749 = math.exp %748 : vector<8x128xf32>
    %cst_186 = arith.constant 1.000000e+00 : f32
    %750 = vector.broadcast %cst_186 : f32 to vector<8x128xf32>
    %751 = arith.addf %750, %749 : vector<8x128xf32>
    %752 = arith.divf %750, %751 : vector<8x128xf32>
    %753 = vector.extract_strided_slice %721 {offsets = [0, 128], sizes = [8, 128], strides = [1, 1]} : vector<8x512xf32> to vector<8x128xf32>
    %754 = arith.negf %753 : vector<8x128xf32>
    %755 = math.exp %754 : vector<8x128xf32>
    %cst_187 = arith.constant 1.000000e+00 : f32
    %756 = vector.broadcast %cst_187 : f32 to vector<8x128xf32>
    %757 = arith.addf %756, %755 : vector<8x128xf32>
    %758 = arith.divf %756, %757 : vector<8x128xf32>
    %759 = vector.extract_strided_slice %721 {offsets = [0, 256], sizes = [8, 128], strides = [1, 1]} : vector<8x512xf32> to vector<8x128xf32>
    %760 = math.tanh %759 : vector<8x128xf32>
    %761 = vector.extract_strided_slice %721 {offsets = [0, 384], sizes = [8, 128], strides = [1, 1]} : vector<8x512xf32> to vector<8x128xf32>
    %762 = arith.negf %761 : vector<8x128xf32>
    %763 = math.exp %762 : vector<8x128xf32>
    %cst_188 = arith.constant 1.000000e+00 : f32
    %764 = vector.broadcast %cst_188 : f32 to vector<8x128xf32>
    %765 = arith.addf %764, %763 : vector<8x128xf32>
    %766 = arith.divf %764, %765 : vector<8x128xf32>
    %767 = arith.mulf %758, %704 : vector<8x128xf32>
    %768 = arith.mulf %752, %760 : vector<8x128xf32>
    %769 = arith.addf %767, %768 : vector<8x128xf32>
    %770 = math.tanh %769 : vector<8x128xf32>
    %771 = arith.mulf %766, %770 : vector<8x128xf32>
    %c3_i32_189 = arith.constant 3 : i32
    %c8_i32_190 = arith.constant 8 : i32
    %772 = arith.muli %c3_i32_189, %c8_i32_190 : i32
    %773 = tpu.assume_multiple %772, 8 : i32
    %c7_i32_191 = arith.constant 7 : i32
    %774 = arith.subi %c7_i32_191, %c3_i32_189 : i32
    %c8_i32_192 = arith.constant 8 : i32
    %775 = arith.muli %774, %c8_i32_192 : i32
    %776 = tpu.assume_multiple %775, 8 : i32
    %777 = arith.index_cast %773 : i32 to index
    %c0_193 = arith.constant 0 : index
    %778 = vector.load %arg8[%777, %c0_193] : memref<64x1024xf32, #tpu.memory_space<vmem>>, vector<8x512xf32>
    %779 = arith.truncf %746 : vector<8x128xf32> to vector<8x128xbf16>
    %cst_194 = arith.constant dense<0.000000e+00> : vector<8x512xf32>
    %780 = tpu.matmul %779, %573, %cst_194 {dimension_numbers = #tpu.dot_dimension_numbers<[1], [0], [0], [1], [0, 0, 1, 1], [], []>} : vector<8x128xbf16>, vector<128x512xbf16>, vector<8x512xf32> -> vector<8x512xf32>
    %781 = arith.addf %778, %780 : vector<8x512xf32>
    %782 = arith.index_cast %776 : i32 to index
    %c512_195 = arith.constant 512 : index
    %783 = vector.load %arg8[%782, %c512_195] : memref<64x1024xf32, #tpu.memory_space<vmem>>, vector<8x512xf32>
    %784 = arith.truncf %771 : vector<8x128xf32> to vector<8x128xbf16>
    %cst_196 = arith.constant dense<0.000000e+00> : vector<8x512xf32>
    %785 = tpu.matmul %784, %575, %cst_196 {dimension_numbers = #tpu.dot_dimension_numbers<[1], [0], [0], [1], [0, 0, 1, 1], [], []>} : vector<8x128xbf16>, vector<128x512xbf16>, vector<8x512xf32> -> vector<8x512xf32>
    %786 = arith.addf %783, %785 : vector<8x512xf32>
    %787 = vector.extract_strided_slice %781 {offsets = [0, 0], sizes = [8, 128], strides = [1, 1]} : vector<8x512xf32> to vector<8x128xf32>
    %788 = arith.negf %787 : vector<8x128xf32>
    %789 = math.exp %788 : vector<8x128xf32>
    %cst_197 = arith.constant 1.000000e+00 : f32
    %790 = vector.broadcast %cst_197 : f32 to vector<8x128xf32>
    %791 = arith.addf %790, %789 : vector<8x128xf32>
    %792 = arith.divf %790, %791 : vector<8x128xf32>
    %793 = vector.extract_strided_slice %781 {offsets = [0, 128], sizes = [8, 128], strides = [1, 1]} : vector<8x512xf32> to vector<8x128xf32>
    %794 = arith.negf %793 : vector<8x128xf32>
    %795 = math.exp %794 : vector<8x128xf32>
    %cst_198 = arith.constant 1.000000e+00 : f32
    %796 = vector.broadcast %cst_198 : f32 to vector<8x128xf32>
    %797 = arith.addf %796, %795 : vector<8x128xf32>
    %798 = arith.divf %796, %797 : vector<8x128xf32>
    %799 = vector.extract_strided_slice %781 {offsets = [0, 256], sizes = [8, 128], strides = [1, 1]} : vector<8x512xf32> to vector<8x128xf32>
    %800 = math.tanh %799 : vector<8x128xf32>
    %801 = vector.extract_strided_slice %781 {offsets = [0, 384], sizes = [8, 128], strides = [1, 1]} : vector<8x512xf32> to vector<8x128xf32>
    %802 = arith.negf %801 : vector<8x128xf32>
    %803 = math.exp %802 : vector<8x128xf32>
    %cst_199 = arith.constant 1.000000e+00 : f32
    %804 = vector.broadcast %cst_199 : f32 to vector<8x128xf32>
    %805 = arith.addf %804, %803 : vector<8x128xf32>
    %806 = arith.divf %804, %805 : vector<8x128xf32>
    %807 = arith.mulf %798, %744 : vector<8x128xf32>
    %808 = arith.mulf %792, %800 : vector<8x128xf32>
    %809 = arith.addf %807, %808 : vector<8x128xf32>
    %810 = math.tanh %809 : vector<8x128xf32>
    %811 = arith.mulf %806, %810 : vector<8x128xf32>
    %812 = vector.extract_strided_slice %786 {offsets = [0, 0], sizes = [8, 128], strides = [1, 1]} : vector<8x512xf32> to vector<8x128xf32>
    %813 = arith.negf %812 : vector<8x128xf32>
    %814 = math.exp %813 : vector<8x128xf32>
    %cst_200 = arith.constant 1.000000e+00 : f32
    %815 = vector.broadcast %cst_200 : f32 to vector<8x128xf32>
    %816 = arith.addf %815, %814 : vector<8x128xf32>
    %817 = arith.divf %815, %816 : vector<8x128xf32>
    %818 = vector.extract_strided_slice %786 {offsets = [0, 128], sizes = [8, 128], strides = [1, 1]} : vector<8x512xf32> to vector<8x128xf32>
    %819 = arith.negf %818 : vector<8x128xf32>
    %820 = math.exp %819 : vector<8x128xf32>
    %cst_201 = arith.constant 1.000000e+00 : f32
    %821 = vector.broadcast %cst_201 : f32 to vector<8x128xf32>
    %822 = arith.addf %821, %820 : vector<8x128xf32>
    %823 = arith.divf %821, %822 : vector<8x128xf32>
    %824 = vector.extract_strided_slice %786 {offsets = [0, 256], sizes = [8, 128], strides = [1, 1]} : vector<8x512xf32> to vector<8x128xf32>
    %825 = math.tanh %824 : vector<8x128xf32>
    %826 = vector.extract_strided_slice %786 {offsets = [0, 384], sizes = [8, 128], strides = [1, 1]} : vector<8x512xf32> to vector<8x128xf32>
    %827 = arith.negf %826 : vector<8x128xf32>
    %828 = math.exp %827 : vector<8x128xf32>
    %cst_202 = arith.constant 1.000000e+00 : f32
    %829 = vector.broadcast %cst_202 : f32 to vector<8x128xf32>
    %830 = arith.addf %829, %828 : vector<8x128xf32>
    %831 = arith.divf %829, %830 : vector<8x128xf32>
    %832 = arith.mulf %823, %769 : vector<8x128xf32>
    %833 = arith.mulf %817, %825 : vector<8x128xf32>
    %834 = arith.addf %832, %833 : vector<8x128xf32>
    %835 = math.tanh %834 : vector<8x128xf32>
    %836 = arith.mulf %831, %835 : vector<8x128xf32>
    %c4_i32_203 = arith.constant 4 : i32
    %c8_i32_204 = arith.constant 8 : i32
    %837 = arith.muli %c4_i32_203, %c8_i32_204 : i32
    %838 = tpu.assume_multiple %837, 8 : i32
    %c7_i32_205 = arith.constant 7 : i32
    %839 = arith.subi %c7_i32_205, %c4_i32_203 : i32
    %c8_i32_206 = arith.constant 8 : i32
    %840 = arith.muli %839, %c8_i32_206 : i32
    %841 = tpu.assume_multiple %840, 8 : i32
    %842 = arith.index_cast %838 : i32 to index
    %c0_207 = arith.constant 0 : index
    %843 = vector.load %arg8[%842, %c0_207] : memref<64x1024xf32, #tpu.memory_space<vmem>>, vector<8x512xf32>
    %844 = arith.truncf %811 : vector<8x128xf32> to vector<8x128xbf16>
    %cst_208 = arith.constant dense<0.000000e+00> : vector<8x512xf32>
    %845 = tpu.matmul %844, %573, %cst_208 {dimension_numbers = #tpu.dot_dimension_numbers<[1], [0], [0], [1], [0, 0, 1, 1], [], []>} : vector<8x128xbf16>, vector<128x512xbf16>, vector<8x512xf32> -> vector<8x512xf32>
    %846 = arith.addf %843, %845 : vector<8x512xf32>
    %847 = arith.index_cast %841 : i32 to index
    %c512_209 = arith.constant 512 : index
    %848 = vector.load %arg8[%847, %c512_209] : memref<64x1024xf32, #tpu.memory_space<vmem>>, vector<8x512xf32>
    %849 = arith.truncf %836 : vector<8x128xf32> to vector<8x128xbf16>
    %cst_210 = arith.constant dense<0.000000e+00> : vector<8x512xf32>
    %850 = tpu.matmul %849, %575, %cst_210 {dimension_numbers = #tpu.dot_dimension_numbers<[1], [0], [0], [1], [0, 0, 1, 1], [], []>} : vector<8x128xbf16>, vector<128x512xbf16>, vector<8x512xf32> -> vector<8x512xf32>
    %851 = arith.addf %848, %850 : vector<8x512xf32>
    %852 = vector.extract_strided_slice %846 {offsets = [0, 0], sizes = [8, 128], strides = [1, 1]} : vector<8x512xf32> to vector<8x128xf32>
    %853 = arith.negf %852 : vector<8x128xf32>
    %854 = math.exp %853 : vector<8x128xf32>
    %cst_211 = arith.constant 1.000000e+00 : f32
    %855 = vector.broadcast %cst_211 : f32 to vector<8x128xf32>
    %856 = arith.addf %855, %854 : vector<8x128xf32>
    %857 = arith.divf %855, %856 : vector<8x128xf32>
    %858 = vector.extract_strided_slice %846 {offsets = [0, 128], sizes = [8, 128], strides = [1, 1]} : vector<8x512xf32> to vector<8x128xf32>
    %859 = arith.negf %858 : vector<8x128xf32>
    %860 = math.exp %859 : vector<8x128xf32>
    %cst_212 = arith.constant 1.000000e+00 : f32
    %861 = vector.broadcast %cst_212 : f32 to vector<8x128xf32>
    %862 = arith.addf %861, %860 : vector<8x128xf32>
    %863 = arith.divf %861, %862 : vector<8x128xf32>
    %864 = vector.extract_strided_slice %846 {offsets = [0, 256], sizes = [8, 128], strides = [1, 1]} : vector<8x512xf32> to vector<8x128xf32>
    %865 = math.tanh %864 : vector<8x128xf32>
    %866 = vector.extract_strided_slice %846 {offsets = [0, 384], sizes = [8, 128], strides = [1, 1]} : vector<8x512xf32> to vector<8x128xf32>
    %867 = arith.negf %866 : vector<8x128xf32>
    %868 = math.exp %867 : vector<8x128xf32>
    %cst_213 = arith.constant 1.000000e+00 : f32
    %869 = vector.broadcast %cst_213 : f32 to vector<8x128xf32>
    %870 = arith.addf %869, %868 : vector<8x128xf32>
    %871 = arith.divf %869, %870 : vector<8x128xf32>
    %872 = arith.mulf %863, %809 : vector<8x128xf32>
    %873 = arith.mulf %857, %865 : vector<8x128xf32>
    %874 = arith.addf %872, %873 : vector<8x128xf32>
    %875 = math.tanh %874 : vector<8x128xf32>
    %876 = arith.mulf %871, %875 : vector<8x128xf32>
    %877 = vector.extract_strided_slice %851 {offsets = [0, 0], sizes = [8, 128], strides = [1, 1]} : vector<8x512xf32> to vector<8x128xf32>
    %878 = arith.negf %877 : vector<8x128xf32>
    %879 = math.exp %878 : vector<8x128xf32>
    %cst_214 = arith.constant 1.000000e+00 : f32
    %880 = vector.broadcast %cst_214 : f32 to vector<8x128xf32>
    %881 = arith.addf %880, %879 : vector<8x128xf32>
    %882 = arith.divf %880, %881 : vector<8x128xf32>
    %883 = vector.extract_strided_slice %851 {offsets = [0, 128], sizes = [8, 128], strides = [1, 1]} : vector<8x512xf32> to vector<8x128xf32>
    %884 = arith.negf %883 : vector<8x128xf32>
    %885 = math.exp %884 : vector<8x128xf32>
    %cst_215 = arith.constant 1.000000e+00 : f32
    %886 = vector.broadcast %cst_215 : f32 to vector<8x128xf32>
    %887 = arith.addf %886, %885 : vector<8x128xf32>
    %888 = arith.divf %886, %887 : vector<8x128xf32>
    %889 = vector.extract_strided_slice %851 {offsets = [0, 256], sizes = [8, 128], strides = [1, 1]} : vector<8x512xf32> to vector<8x128xf32>
    %890 = math.tanh %889 : vector<8x128xf32>
    %891 = vector.extract_strided_slice %851 {offsets = [0, 384], sizes = [8, 128], strides = [1, 1]} : vector<8x512xf32> to vector<8x128xf32>
    %892 = arith.negf %891 : vector<8x128xf32>
    %893 = math.exp %892 : vector<8x128xf32>
    %cst_216 = arith.constant 1.000000e+00 : f32
    %894 = vector.broadcast %cst_216 : f32 to vector<8x128xf32>
    %895 = arith.addf %894, %893 : vector<8x128xf32>
    %896 = arith.divf %894, %895 : vector<8x128xf32>
    %897 = arith.mulf %888, %834 : vector<8x128xf32>
    %898 = arith.mulf %882, %890 : vector<8x128xf32>
    %899 = arith.addf %897, %898 : vector<8x128xf32>
    %900 = math.tanh %899 : vector<8x128xf32>
    %901 = arith.mulf %896, %900 : vector<8x128xf32>
    %c5_i32_217 = arith.constant 5 : i32
    %c8_i32_218 = arith.constant 8 : i32
    %902 = arith.muli %c5_i32_217, %c8_i32_218 : i32
    %903 = tpu.assume_multiple %902, 8 : i32
    %c7_i32_219 = arith.constant 7 : i32
    %904 = arith.subi %c7_i32_219, %c5_i32_217 : i32
    %c8_i32_220 = arith.constant 8 : i32
    %905 = arith.muli %904, %c8_i32_220 : i32
    %906 = tpu.assume_multiple %905, 8 : i32
    %907 = arith.index_cast %903 : i32 to index
    %c0_221 = arith.constant 0 : index
    %908 = vector.load %arg8[%907, %c0_221] : memref<64x1024xf32, #tpu.memory_space<vmem>>, vector<8x512xf32>
    %909 = arith.truncf %876 : vector<8x128xf32> to vector<8x128xbf16>
    %cst_222 = arith.constant dense<0.000000e+00> : vector<8x512xf32>
    %910 = tpu.matmul %909, %573, %cst_222 {dimension_numbers = #tpu.dot_dimension_numbers<[1], [0], [0], [1], [0, 0, 1, 1], [], []>} : vector<8x128xbf16>, vector<128x512xbf16>, vector<8x512xf32> -> vector<8x512xf32>
    %911 = arith.addf %908, %910 : vector<8x512xf32>
    %912 = arith.index_cast %906 : i32 to index
    %c512_223 = arith.constant 512 : index
    %913 = vector.load %arg8[%912, %c512_223] : memref<64x1024xf32, #tpu.memory_space<vmem>>, vector<8x512xf32>
    %914 = arith.truncf %901 : vector<8x128xf32> to vector<8x128xbf16>
    %cst_224 = arith.constant dense<0.000000e+00> : vector<8x512xf32>
    %915 = tpu.matmul %914, %575, %cst_224 {dimension_numbers = #tpu.dot_dimension_numbers<[1], [0], [0], [1], [0, 0, 1, 1], [], []>} : vector<8x128xbf16>, vector<128x512xbf16>, vector<8x512xf32> -> vector<8x512xf32>
    %916 = arith.addf %913, %915 : vector<8x512xf32>
    %917 = vector.extract_strided_slice %911 {offsets = [0, 0], sizes = [8, 128], strides = [1, 1]} : vector<8x512xf32> to vector<8x128xf32>
    %918 = arith.negf %917 : vector<8x128xf32>
    %919 = math.exp %918 : vector<8x128xf32>
    %cst_225 = arith.constant 1.000000e+00 : f32
    %920 = vector.broadcast %cst_225 : f32 to vector<8x128xf32>
    %921 = arith.addf %920, %919 : vector<8x128xf32>
    %922 = arith.divf %920, %921 : vector<8x128xf32>
    %923 = vector.extract_strided_slice %911 {offsets = [0, 128], sizes = [8, 128], strides = [1, 1]} : vector<8x512xf32> to vector<8x128xf32>
    %924 = arith.negf %923 : vector<8x128xf32>
    %925 = math.exp %924 : vector<8x128xf32>
    %cst_226 = arith.constant 1.000000e+00 : f32
    %926 = vector.broadcast %cst_226 : f32 to vector<8x128xf32>
    %927 = arith.addf %926, %925 : vector<8x128xf32>
    %928 = arith.divf %926, %927 : vector<8x128xf32>
    %929 = vector.extract_strided_slice %911 {offsets = [0, 256], sizes = [8, 128], strides = [1, 1]} : vector<8x512xf32> to vector<8x128xf32>
    %930 = math.tanh %929 : vector<8x128xf32>
    %931 = vector.extract_strided_slice %911 {offsets = [0, 384], sizes = [8, 128], strides = [1, 1]} : vector<8x512xf32> to vector<8x128xf32>
    %932 = arith.negf %931 : vector<8x128xf32>
    %933 = math.exp %932 : vector<8x128xf32>
    %cst_227 = arith.constant 1.000000e+00 : f32
    %934 = vector.broadcast %cst_227 : f32 to vector<8x128xf32>
    %935 = arith.addf %934, %933 : vector<8x128xf32>
    %936 = arith.divf %934, %935 : vector<8x128xf32>
    %937 = arith.mulf %928, %874 : vector<8x128xf32>
    %938 = arith.mulf %922, %930 : vector<8x128xf32>
    %939 = arith.addf %937, %938 : vector<8x128xf32>
    %940 = math.tanh %939 : vector<8x128xf32>
    %941 = arith.mulf %936, %940 : vector<8x128xf32>
    %942 = vector.extract_strided_slice %916 {offsets = [0, 0], sizes = [8, 128], strides = [1, 1]} : vector<8x512xf32> to vector<8x128xf32>
    %943 = arith.negf %942 : vector<8x128xf32>
    %944 = math.exp %943 : vector<8x128xf32>
    %cst_228 = arith.constant 1.000000e+00 : f32
    %945 = vector.broadcast %cst_228 : f32 to vector<8x128xf32>
    %946 = arith.addf %945, %944 : vector<8x128xf32>
    %947 = arith.divf %945, %946 : vector<8x128xf32>
    %948 = vector.extract_strided_slice %916 {offsets = [0, 128], sizes = [8, 128], strides = [1, 1]} : vector<8x512xf32> to vector<8x128xf32>
    %949 = arith.negf %948 : vector<8x128xf32>
    %950 = math.exp %949 : vector<8x128xf32>
    %cst_229 = arith.constant 1.000000e+00 : f32
    %951 = vector.broadcast %cst_229 : f32 to vector<8x128xf32>
    %952 = arith.addf %951, %950 : vector<8x128xf32>
    %953 = arith.divf %951, %952 : vector<8x128xf32>
    %954 = vector.extract_strided_slice %916 {offsets = [0, 256], sizes = [8, 128], strides = [1, 1]} : vector<8x512xf32> to vector<8x128xf32>
    %955 = math.tanh %954 : vector<8x128xf32>
    %956 = vector.extract_strided_slice %916 {offsets = [0, 384], sizes = [8, 128], strides = [1, 1]} : vector<8x512xf32> to vector<8x128xf32>
    %957 = arith.negf %956 : vector<8x128xf32>
    %958 = math.exp %957 : vector<8x128xf32>
    %cst_230 = arith.constant 1.000000e+00 : f32
    %959 = vector.broadcast %cst_230 : f32 to vector<8x128xf32>
    %960 = arith.addf %959, %958 : vector<8x128xf32>
    %961 = arith.divf %959, %960 : vector<8x128xf32>
    %962 = arith.mulf %953, %899 : vector<8x128xf32>
    %963 = arith.mulf %947, %955 : vector<8x128xf32>
    %964 = arith.addf %962, %963 : vector<8x128xf32>
    %965 = math.tanh %964 : vector<8x128xf32>
    %966 = arith.mulf %961, %965 : vector<8x128xf32>
    %c6_i32_231 = arith.constant 6 : i32
    %c8_i32_232 = arith.constant 8 : i32
    %967 = arith.muli %c6_i32_231, %c8_i32_232 : i32
    %968 = tpu.assume_multiple %967, 8 : i32
    %c7_i32_233 = arith.constant 7 : i32
    %969 = arith.subi %c7_i32_233, %c6_i32_231 : i32
    %c8_i32_234 = arith.constant 8 : i32
    %970 = arith.muli %969, %c8_i32_234 : i32
    %971 = tpu.assume_multiple %970, 8 : i32
    %972 = arith.index_cast %968 : i32 to index
    %c0_235 = arith.constant 0 : index
    %973 = vector.load %arg8[%972, %c0_235] : memref<64x1024xf32, #tpu.memory_space<vmem>>, vector<8x512xf32>
    %974 = arith.truncf %941 : vector<8x128xf32> to vector<8x128xbf16>
    %cst_236 = arith.constant dense<0.000000e+00> : vector<8x512xf32>
    %975 = tpu.matmul %974, %573, %cst_236 {dimension_numbers = #tpu.dot_dimension_numbers<[1], [0], [0], [1], [0, 0, 1, 1], [], []>} : vector<8x128xbf16>, vector<128x512xbf16>, vector<8x512xf32> -> vector<8x512xf32>
    %976 = arith.addf %973, %975 : vector<8x512xf32>
    %977 = arith.index_cast %971 : i32 to index
    %c512_237 = arith.constant 512 : index
    %978 = vector.load %arg8[%977, %c512_237] : memref<64x1024xf32, #tpu.memory_space<vmem>>, vector<8x512xf32>
    %979 = arith.truncf %966 : vector<8x128xf32> to vector<8x128xbf16>
    %cst_238 = arith.constant dense<0.000000e+00> : vector<8x512xf32>
    %980 = tpu.matmul %979, %575, %cst_238 {dimension_numbers = #tpu.dot_dimension_numbers<[1], [0], [0], [1], [0, 0, 1, 1], [], []>} : vector<8x128xbf16>, vector<128x512xbf16>, vector<8x512xf32> -> vector<8x512xf32>
    %981 = arith.addf %978, %980 : vector<8x512xf32>
    %982 = vector.extract_strided_slice %976 {offsets = [0, 0], sizes = [8, 128], strides = [1, 1]} : vector<8x512xf32> to vector<8x128xf32>
    %983 = arith.negf %982 : vector<8x128xf32>
    %984 = math.exp %983 : vector<8x128xf32>
    %cst_239 = arith.constant 1.000000e+00 : f32
    %985 = vector.broadcast %cst_239 : f32 to vector<8x128xf32>
    %986 = arith.addf %985, %984 : vector<8x128xf32>
    %987 = arith.divf %985, %986 : vector<8x128xf32>
    %988 = vector.extract_strided_slice %976 {offsets = [0, 128], sizes = [8, 128], strides = [1, 1]} : vector<8x512xf32> to vector<8x128xf32>
    %989 = arith.negf %988 : vector<8x128xf32>
    %990 = math.exp %989 : vector<8x128xf32>
    %cst_240 = arith.constant 1.000000e+00 : f32
    %991 = vector.broadcast %cst_240 : f32 to vector<8x128xf32>
    %992 = arith.addf %991, %990 : vector<8x128xf32>
    %993 = arith.divf %991, %992 : vector<8x128xf32>
    %994 = vector.extract_strided_slice %976 {offsets = [0, 256], sizes = [8, 128], strides = [1, 1]} : vector<8x512xf32> to vector<8x128xf32>
    %995 = math.tanh %994 : vector<8x128xf32>
    %996 = vector.extract_strided_slice %976 {offsets = [0, 384], sizes = [8, 128], strides = [1, 1]} : vector<8x512xf32> to vector<8x128xf32>
    %997 = arith.negf %996 : vector<8x128xf32>
    %998 = math.exp %997 : vector<8x128xf32>
    %cst_241 = arith.constant 1.000000e+00 : f32
    %999 = vector.broadcast %cst_241 : f32 to vector<8x128xf32>
    %1000 = arith.addf %999, %998 : vector<8x128xf32>
    %1001 = arith.divf %999, %1000 : vector<8x128xf32>
    %1002 = arith.mulf %993, %939 : vector<8x128xf32>
    %1003 = arith.mulf %987, %995 : vector<8x128xf32>
    %1004 = arith.addf %1002, %1003 : vector<8x128xf32>
    %1005 = math.tanh %1004 : vector<8x128xf32>
    %1006 = arith.mulf %1001, %1005 : vector<8x128xf32>
    %1007 = vector.extract_strided_slice %981 {offsets = [0, 0], sizes = [8, 128], strides = [1, 1]} : vector<8x512xf32> to vector<8x128xf32>
    %1008 = arith.negf %1007 : vector<8x128xf32>
    %1009 = math.exp %1008 : vector<8x128xf32>
    %cst_242 = arith.constant 1.000000e+00 : f32
    %1010 = vector.broadcast %cst_242 : f32 to vector<8x128xf32>
    %1011 = arith.addf %1010, %1009 : vector<8x128xf32>
    %1012 = arith.divf %1010, %1011 : vector<8x128xf32>
    %1013 = vector.extract_strided_slice %981 {offsets = [0, 128], sizes = [8, 128], strides = [1, 1]} : vector<8x512xf32> to vector<8x128xf32>
    %1014 = arith.negf %1013 : vector<8x128xf32>
    %1015 = math.exp %1014 : vector<8x128xf32>
    %cst_243 = arith.constant 1.000000e+00 : f32
    %1016 = vector.broadcast %cst_243 : f32 to vector<8x128xf32>
    %1017 = arith.addf %1016, %1015 : vector<8x128xf32>
    %1018 = arith.divf %1016, %1017 : vector<8x128xf32>
    %1019 = vector.extract_strided_slice %981 {offsets = [0, 256], sizes = [8, 128], strides = [1, 1]} : vector<8x512xf32> to vector<8x128xf32>
    %1020 = math.tanh %1019 : vector<8x128xf32>
    %1021 = vector.extract_strided_slice %981 {offsets = [0, 384], sizes = [8, 128], strides = [1, 1]} : vector<8x512xf32> to vector<8x128xf32>
    %1022 = arith.negf %1021 : vector<8x128xf32>
    %1023 = math.exp %1022 : vector<8x128xf32>
    %cst_244 = arith.constant 1.000000e+00 : f32
    %1024 = vector.broadcast %cst_244 : f32 to vector<8x128xf32>
    %1025 = arith.addf %1024, %1023 : vector<8x128xf32>
    %1026 = arith.divf %1024, %1025 : vector<8x128xf32>
    %1027 = arith.mulf %1018, %964 : vector<8x128xf32>
    %1028 = arith.mulf %1012, %1020 : vector<8x128xf32>
    %1029 = arith.addf %1027, %1028 : vector<8x128xf32>
    %1030 = math.tanh %1029 : vector<8x128xf32>
    %1031 = arith.mulf %1026, %1030 : vector<8x128xf32>
    %c7_i32_245 = arith.constant 7 : i32
    %c8_i32_246 = arith.constant 8 : i32
    %1032 = arith.muli %c7_i32_245, %c8_i32_246 : i32
    %1033 = tpu.assume_multiple %1032, 8 : i32
    %c7_i32_247 = arith.constant 7 : i32
    %1034 = arith.subi %c7_i32_247, %c7_i32_245 : i32
    %c8_i32_248 = arith.constant 8 : i32
    %1035 = arith.muli %1034, %c8_i32_248 : i32
    %1036 = tpu.assume_multiple %1035, 8 : i32
    %1037 = arith.index_cast %1033 : i32 to index
    %c0_249 = arith.constant 0 : index
    %1038 = vector.load %arg8[%1037, %c0_249] : memref<64x1024xf32, #tpu.memory_space<vmem>>, vector<8x512xf32>
    %1039 = arith.truncf %1006 : vector<8x128xf32> to vector<8x128xbf16>
    %cst_250 = arith.constant dense<0.000000e+00> : vector<8x512xf32>
    %1040 = tpu.matmul %1039, %573, %cst_250 {dimension_numbers = #tpu.dot_dimension_numbers<[1], [0], [0], [1], [0, 0, 1, 1], [], []>} : vector<8x128xbf16>, vector<128x512xbf16>, vector<8x512xf32> -> vector<8x512xf32>
    %1041 = arith.addf %1038, %1040 : vector<8x512xf32>
    %1042 = arith.index_cast %1036 : i32 to index
    %c512_251 = arith.constant 512 : index
    %1043 = vector.load %arg8[%1042, %c512_251] : memref<64x1024xf32, #tpu.memory_space<vmem>>, vector<8x512xf32>
    %1044 = arith.truncf %1031 : vector<8x128xf32> to vector<8x128xbf16>
    %cst_252 = arith.constant dense<0.000000e+00> : vector<8x512xf32>
    %1045 = tpu.matmul %1044, %575, %cst_252 {dimension_numbers = #tpu.dot_dimension_numbers<[1], [0], [0], [1], [0, 0, 1, 1], [], []>} : vector<8x128xbf16>, vector<128x512xbf16>, vector<8x512xf32> -> vector<8x512xf32>
    %1046 = arith.addf %1043, %1045 : vector<8x512xf32>
    %1047 = vector.extract_strided_slice %1041 {offsets = [0, 0], sizes = [8, 128], strides = [1, 1]} : vector<8x512xf32> to vector<8x128xf32>
    %1048 = arith.negf %1047 : vector<8x128xf32>
    %1049 = math.exp %1048 : vector<8x128xf32>
    %cst_253 = arith.constant 1.000000e+00 : f32
    %1050 = vector.broadcast %cst_253 : f32 to vector<8x128xf32>
    %1051 = arith.addf %1050, %1049 : vector<8x128xf32>
    %1052 = arith.divf %1050, %1051 : vector<8x128xf32>
    %1053 = vector.extract_strided_slice %1041 {offsets = [0, 128], sizes = [8, 128], strides = [1, 1]} : vector<8x512xf32> to vector<8x128xf32>
    %1054 = arith.negf %1053 : vector<8x128xf32>
    %1055 = math.exp %1054 : vector<8x128xf32>
    %cst_254 = arith.constant 1.000000e+00 : f32
    %1056 = vector.broadcast %cst_254 : f32 to vector<8x128xf32>
    %1057 = arith.addf %1056, %1055 : vector<8x128xf32>
    %1058 = arith.divf %1056, %1057 : vector<8x128xf32>
    %1059 = vector.extract_strided_slice %1041 {offsets = [0, 256], sizes = [8, 128], strides = [1, 1]} : vector<8x512xf32> to vector<8x128xf32>
    %1060 = math.tanh %1059 : vector<8x128xf32>
    %1061 = vector.extract_strided_slice %1041 {offsets = [0, 384], sizes = [8, 128], strides = [1, 1]} : vector<8x512xf32> to vector<8x128xf32>
    %1062 = arith.negf %1061 : vector<8x128xf32>
    %1063 = math.exp %1062 : vector<8x128xf32>
    %cst_255 = arith.constant 1.000000e+00 : f32
    %1064 = vector.broadcast %cst_255 : f32 to vector<8x128xf32>
    %1065 = arith.addf %1064, %1063 : vector<8x128xf32>
    %1066 = arith.divf %1064, %1065 : vector<8x128xf32>
    %1067 = arith.mulf %1058, %1004 : vector<8x128xf32>
    %1068 = arith.mulf %1052, %1060 : vector<8x128xf32>
    %1069 = arith.addf %1067, %1068 : vector<8x128xf32>
    %1070 = math.tanh %1069 : vector<8x128xf32>
    %1071 = arith.mulf %1066, %1070 : vector<8x128xf32>
    %1072 = vector.extract_strided_slice %1046 {offsets = [0, 0], sizes = [8, 128], strides = [1, 1]} : vector<8x512xf32> to vector<8x128xf32>
    %1073 = arith.negf %1072 : vector<8x128xf32>
    %1074 = math.exp %1073 : vector<8x128xf32>
    %cst_256 = arith.constant 1.000000e+00 : f32
    %1075 = vector.broadcast %cst_256 : f32 to vector<8x128xf32>
    %1076 = arith.addf %1075, %1074 : vector<8x128xf32>
    %1077 = arith.divf %1075, %1076 : vector<8x128xf32>
    %1078 = vector.extract_strided_slice %1046 {offsets = [0, 128], sizes = [8, 128], strides = [1, 1]} : vector<8x512xf32> to vector<8x128xf32>
    %1079 = arith.negf %1078 : vector<8x128xf32>
    %1080 = math.exp %1079 : vector<8x128xf32>
    %cst_257 = arith.constant 1.000000e+00 : f32
    %1081 = vector.broadcast %cst_257 : f32 to vector<8x128xf32>
    %1082 = arith.addf %1081, %1080 : vector<8x128xf32>
    %1083 = arith.divf %1081, %1082 : vector<8x128xf32>
    %1084 = vector.extract_strided_slice %1046 {offsets = [0, 256], sizes = [8, 128], strides = [1, 1]} : vector<8x512xf32> to vector<8x128xf32>
    %1085 = math.tanh %1084 : vector<8x128xf32>
    %1086 = vector.extract_strided_slice %1046 {offsets = [0, 384], sizes = [8, 128], strides = [1, 1]} : vector<8x512xf32> to vector<8x128xf32>
    %1087 = arith.negf %1086 : vector<8x128xf32>
    %1088 = math.exp %1087 : vector<8x128xf32>
    %cst_258 = arith.constant 1.000000e+00 : f32
    %1089 = vector.broadcast %cst_258 : f32 to vector<8x128xf32>
    %1090 = arith.addf %1089, %1088 : vector<8x128xf32>
    %1091 = arith.divf %1089, %1090 : vector<8x128xf32>
    %1092 = arith.mulf %1083, %1029 : vector<8x128xf32>
    %1093 = arith.mulf %1077, %1085 : vector<8x128xf32>
    %1094 = arith.addf %1092, %1093 : vector<8x128xf32>
    %1095 = math.tanh %1094 : vector<8x128xf32>
    %1096 = arith.mulf %1091, %1095 : vector<8x128xf32>
    %c8_i32_259 = arith.constant 8 : i32
    %c0_260 = arith.constant 0 : index
    %c0_261 = arith.constant 0 : index
    %1097 = vector.load %arg7[%c0_260, %c0_261] : memref<8x256xf32, #tpu.memory_space<vmem>>, vector<8x128xf32>
    tpu.vector_store %arg7[%c0_260, %c0_261], %1096 {strides = array<i32>} : memref<8x256xf32, #tpu.memory_space<vmem>>, vector<8x128xf32>,
    %c0_262 = arith.constant 0 : index
    %c128_263 = arith.constant 128 : index
    %1098 = vector.load %arg7[%c0_262, %c128_263] : memref<8x256xf32, #tpu.memory_space<vmem>>, vector<8x128xf32>
    tpu.vector_store %arg7[%c0_262, %c128_263], %1071 {strides = array<i32>} : memref<8x256xf32, #tpu.memory_space<vmem>>, vector<8x128xf32>,
    return
  }
}

</mosaic_0001>

<bundles_post_ra>
// kernel: lstm_model_forward.1
= control target key start
LH: loop header
LB: loop body
LE: loop exit
PB: predicated region body
PF: predicated region fallthrough
CT: control target
= control target key end

     0   :  { %12 = vsyncpa [#allocation5], 0  ;;  %s12083_s0 = inlined_call_operand.vmem [shape: bf16[64,128], index: 0, kind: input, shape index: {}]   ;;  %s12084_s1 = inlined_call_operand.hbm [shape: bf16[128,1024], index: 1, kind: input, shape index: {}]   ;;  %s12085_s2 = inlined_call_operand.hbm [shape: bf16[2,128,512], index: 2, kind: input, shape index: {}]   ;;  %s12086_s3 = inlined_call_operand.vmem [shape: f32[1,1024], index: 3, kind: input, shape index: {}]   ;;  %s12087_s4 = inlined_call_operand.hbm [shape: bf16[256,1024], index: 4, kind: input, shape index: {}]   ;;  %s12088_s5 = inlined_call_operand.hbm [shape: bf16[2,128,512], index: 5, kind: input, shape index: {}]   ;;  %s12089_s6 = inlined_call_operand.vmem [shape: f32[1,1024], index: 6, kind: input, shape index: {}]   ;;  %s12090_s7 = inlined_call_operand.vmem [shape: f32[8,256], index: 7, kind: output, shape index: {}]  }
   0x1   :  { %13 = vsyncpa [#allocation7], 0  ;;  %s34_s26 = sshll.u32 %s12085_s2, 4  ;;  %s35_s26 = int_to_ptr.hbm [resolvable:$true] %s34_s26 }
   0x2   :  { %14 = vsyncpa [#allocation10], 0  ;;  %s9318_s27 = smov [#allocation6]   ;;  %s21_s8 = sshll.u32 %s12084_s1, 4  ;;  %s22_s8 = int_to_ptr.hbm [resolvable:$true] %s21_s8 }
   0x3   :  { %s36_s28 = sshll.u32 %s9318_s27, 4  ;;  %s9319_s9 = smov 256   ;;  %s37_s28 = int_to_ptr.vmem [resolvable:$true] %s36_s28 }
   0x4   :  { %s9320_s10 = smov 16   ;;  %s9321_s11 = smov [#allocation4]  }
   0x5   :  { %42 = dma.hbm_to_vmem [thread:$0]  %s35_s26, 8192, %s37_s28, [#allocation7], %s9319_s9, %s9319_s9, %s9320_s10  }
   0x6   :  { %s23_s12 = sshll.u32 %s9321_s11, 4  ;;  %s9322_s13 = smov 512   ;;  %s24_s12 = int_to_ptr.vmem [resolvable:$true] %s23_s12 }
   0x7   :  { %s9323_s14 = smov 32   ;;  %s49_s16 = sshll.u32 %s12087_s4, 4  ;;  %s50_s16 = int_to_ptr.hbm [resolvable:$true] %s49_s16 }
   0x8   :  { %29 = dma.hbm_to_vmem [thread:$0]  %s22_s8, 8192, %s24_s12, [#allocation5], %s9322_s13, %s9322_s13, %s9323_s14  }
   0x9   :  { %s9324_s17 = smov [#allocation8]   ;;  %s62_s20 = sshll.u32 %s12088_s5, 4  ;;  %s63_s20 = int_to_ptr.hbm [resolvable:$true] %s62_s20 }
   0xa   :  { %s51_s18 = sshll.u32 %s9324_s17, 4  ;;  %s9325_s21 = smov [#allocation9]   ;;  %s52_s18 = int_to_ptr.vmem [resolvable:$true] %s51_s18 }
   0xb   :  { %57 = dma.hbm_to_vmem [thread:$0]  %s50_s16, 16384, %s52_s18, [#allocation7], %s9322_s13, %s9322_s13, %s9323_s14  }
   0xc   :  { %s64_s22 = sshll.u32 %s9325_s21, 4  ;;  %s65_s22 = int_to_ptr.vmem [resolvable:$true] %s64_s22 }
   0xd   :  { %70 = dma.hbm_to_vmem [thread:$0]  %s63_s20, 8192, %s65_s22, [#allocation10], %s9319_s9, %s9319_s9, %s9320_s10  }
   0xe   :  { %9312 = dma.done.wait [#allocation5], 8192  }
   0xf   :  { %9313 = vsyncadd [#allocation5], 4294959104 }
  0x10   :  { %9314 = dma.done.wait [#allocation7], 24576  }
  0x11   :  { %9315 = vsyncadd [#allocation7], 4294942720 }
  0x12   :  { %9316 = dma.done.wait [#allocation10], 8192  }
  0x13   :  { %9317 = vsyncadd [#allocation10], 4294959104  ;;  %v7221_v0 = vld [vmem:[#allocation4 + $0x1c0] sm:$0xf]  ;;  %v8431_v2 = vld [vmem:[#allocation4 + $0x1c4] sm:$0xf] }
  0x14   :  { %v8435_v1 = vld [vmem:[#allocation4 + $0x1dc] sm:$0xf0]  ;;  %v7223_v4 = vld [vmem:[#allocation4 + $0x1e0] sm:$0xf0]  ;;  %v7229_v5 = vld [vmem:[#allocation4 + $0x1c8] sm:$0xf] }
  0x15   :  { %v7222_v3 = vor.u32 %v8435_v1, %v7221_v0  ;;  %v8436_v6 = vld [vmem:[#allocation4 + $0x1e4] sm:$0xf0]  ;;  %v7226_v7 = vor.u32 %v8431_v2, %v7223_v4  ;;  %v8432_v9 = vld [vmem:[#allocation4 + $0x1cc] sm:$0xf]  ;;  %v7189_v11 = vld [vmem:[#allocation4 + $0x180] sm:$0xf] }
  0x16   :  { %v7230_v8 = vor.u32 %v8436_v6, %v7229_v5  ;;  %v7231_v10 = vld [vmem:[#allocation4 + $0x1e8] sm:$0xf0]  ;;  %v8427_v13 = vld [vmem:[#allocation4 + $0x19c] sm:$0xf0]  ;;  %v8423_v14 = vld [vmem:[#allocation4 + $0x184] sm:$0xf] }
  0x17   :  { %524 = vmatpush.bf16.msra.mxu0 %v7222_v3  ;;  %v7234_v12 = vor.u32 %v8432_v9, %v7231_v10  ;;  %v7191_v15 = vld [vmem:[#allocation4 + $0x1a0] sm:$0xf0]  ;;  %553 = vmatpush.bf16.msra.mxu1 %v7226_v7  ;;  %v7190_v16 = vor.u32 %v8427_v13, %v7189_v11  ;;  %v7197_v18 = vld [vmem:[#allocation4 + $0x188] sm:$0xf]  ;;  %v8424_v20 = vld [vmem:[#allocation4 + $0x18c] sm:$0xf] }
  0x18   :  { %582 = vmatpush.bf16.msra.mxu2 %v7230_v8  ;;  %v7194_v17 = vor.u32 %v8423_v14, %v7191_v15  ;;  %v8428_v19 = vld [vmem:[#allocation4 + $0x1a4] sm:$0xf0]  ;;  %v7199_v22 = vld [vmem:[#allocation4 + $0x1a8] sm:$0xf0]  ;;  %v7157_v23 = vld [vmem:[#allocation4 + $0x140] sm:$0xf] }
  0x19   :  { %611 = vmatpush.bf16.msra.mxu3 %v7234_v12  ;;  %v7198_v21 = vor.u32 %v8428_v19, %v7197_v18  ;;  %v8419_v24 = vld [vmem:[#allocation4 + $0x15c] sm:$0xf0]  ;;  %v7202_v25 = vor.u32 %v8424_v20, %v7199_v22  ;;  %v8415_v26 = vld [vmem:[#allocation4 + $0x144] sm:$0xf]  ;;  %v7165_v28 = vld [vmem:[#allocation4 + $0x148] sm:$0xf] }
  0x1a   :  { %v7159_v27 = vld [vmem:[#allocation4 + $0x160] sm:$0xf0]  ;;  %v7158_v29 = vor.u32 %v8419_v24, %v7157_v23  ;;  %v8420_v30 = vld [vmem:[#allocation4 + $0x164] sm:$0xf0]  ;;  %v8416_v31 = vld [vmem:[#allocation4 + $0x14c] sm:$0xf] }
  0x1b   :  { %525 = vmatpush.bf16.msra.mxu0 %v7190_v16  ;;  %v7167_v32 = vld [vmem:[#allocation4 + $0x168] sm:$0xf0]  ;;  %554 = vmatpush.bf16.msra.mxu1 %v7194_v17  ;;  %v7162_v33 = vor.u32 %v8415_v26, %v7159_v27  ;;  %v7166_v34 = vor.u32 %v8420_v30, %v7165_v28  ;;  %v7125_v35 = vld [vmem:[#allocation4 + $0x100] sm:$0xf]  ;;  %v8407_v37 = vld [vmem:[#allocation4 + $0x104] sm:$0xf] }
  0x1c   :  { %583 = vmatpush.bf16.msra.mxu2 %v7198_v21  ;;  %v8411_v36 = vld [vmem:[#allocation4 + $0x11c] sm:$0xf0]  ;;  %v7170_v38 = vor.u32 %v8416_v31, %v7167_v32  ;;  %v7127_v39 = vld [vmem:[#allocation4 + $0x120] sm:$0xf0]  ;;  %v7133_v40 = vld [vmem:[#allocation4 + $0x108] sm:$0xf] }
  0x1d   :  { %612 = vmatpush.bf16.msra.mxu3 %v7202_v25  ;;  %v8412_v41 = vld [vmem:[#allocation4 + $0x124] sm:$0xf0]  ;;  %v8408_v42 = vld [vmem:[#allocation4 + $0x10c] sm:$0xf]  ;;  %v7126_v44 = vor.u32 %v8411_v36, %v7125_v35  ;;  %v7130_v45 = vor.u32 %v8407_v37, %v7127_v39  ;;  %v7093_v47 = vld [vmem:[#allocation4 + $0xc0] sm:$0xf] }
  0x1e   :  { %v7135_v43 = vld [vmem:[#allocation4 + $0x128] sm:$0xf0]  ;;  %v7134_v46 = vor.u32 %v8412_v41, %v7133_v40  ;;  %v8403_v48 = vld [vmem:[#allocation4 + $0xdc] sm:$0xf0]  ;;  %v8399_v49 = vld [vmem:[#allocation4 + $0xc4] sm:$0xf] }
  0x1f   :  { %526 = vmatpush.bf16.msra.mxu0 %v7158_v29  ;;  %555 = vmatpush.bf16.msra.mxu1 %v7162_v33  ;;  %v7138_v50 = vor.u32 %v8408_v42, %v7135_v43  ;;  %v7095_v51 = vld [vmem:[#allocation4 + $0xe0] sm:$0xf0]  ;;  %v7101_v52 = vld [vmem:[#allocation4 + $0xc8] sm:$0xf]  ;;  %v8400_v54 = vld [vmem:[#allocation4 + $0xcc] sm:$0xf]  ;;  %v7094_v56 = vor.u32 %v8403_v48, %v7093_v47 }
  0x20   :  { %584 = vmatpush.bf16.msra.mxu2 %v7166_v34  ;;  %v8404_v53 = vld [vmem:[#allocation4 + $0xe4] sm:$0xf0]  ;;  %v7103_v55 = vld [vmem:[#allocation4 + $0xe8] sm:$0xf0]  ;;  %v7098_v57 = vor.u32 %v8399_v49, %v7095_v51  ;;  %v7061_v59 = vld [vmem:[#allocation4 + $0x80] sm:$0xf] }
  0x21   :  { %613 = vmatpush.bf16.msra.mxu3 %v7170_v38  ;;  %v7102_v58 = vor.u32 %v8404_v53, %v7101_v52  ;;  %v8395_v60 = vld [vmem:[#allocation4 + $0x9c] sm:$0xf0]  ;;  %v8391_v61 = vld [vmem:[#allocation4 + $0x84] sm:$0xf]  ;;  %v7106_v62 = vor.u32 %v8400_v54, %v7103_v55  ;;  %v7069_v0 = vld [vmem:[#allocation4 + $0x88] sm:$0xf] }
  0x22   :  { %v7063_v63 = vld [vmem:[#allocation4 + $0xa0] sm:$0xf0]  ;;  %v8396_v1 = vld [vmem:[#allocation4 + $0xa4] sm:$0xf0]  ;;  %v8392_v2 = vld [vmem:[#allocation4 + $0x8c] sm:$0xf]  ;;  %v7062_v4 = vor.u32 %v8395_v60, %v7061_v59 }
  0x23   :  { %527 = vmatpush.bf16.msra.mxu0 %v7126_v44  ;;  %556 = vmatpush.bf16.msra.mxu1 %v7130_v45  ;;  %v7071_v3 = vld [vmem:[#allocation4 + $0xa8] sm:$0xf0]  ;;  %v7066_v5 = vor.u32 %v8391_v61, %v7063_v63  ;;  %v7070_v6 = vor.u32 %v8396_v1, %v7069_v0  ;;  %v7029_v7 = vld [vmem:[#allocation4 + $0x40] sm:$0xf]  ;;  %v8383_v9 = vld [vmem:[#allocation4 + $0x44] sm:$0xf] }
  0x24   :  { %585 = vmatpush.bf16.msra.mxu2 %v7134_v46  ;;  %v8387_v8 = vld [vmem:[#allocation4 + $0x5c] sm:$0xf0]  ;;  %v7074_v10 = vor.u32 %v8392_v2, %v7071_v3  ;;  %v7031_v11 = vld [vmem:[#allocation4 + $0x60] sm:$0xf0]  ;;  %v7037_v12 = vld [vmem:[#allocation4 + $0x48] sm:$0xf] }
  0x25   :  { %614 = vmatpush.bf16.msra.mxu3 %v7138_v50  ;;  %v8388_v13 = vld [vmem:[#allocation4 + $0x64] sm:$0xf0]  ;;  %v8384_v14 = vld [vmem:[#allocation4 + $0x4c] sm:$0xf]  ;;  %v7030_v16 = vor.u32 %v8387_v8, %v7029_v7  ;;  %v6997_v17 = vld [vmem:[#allocation4] sm:$0xf]  ;;  %v7034_v18 = vor.u32 %v8383_v9, %v7031_v11 }
  0x26   :  { %v7039_v15 = vld [vmem:[#allocation4 + $0x68] sm:$0xf0]  ;;  %v7038_v19 = vor.u32 %v8388_v13, %v7037_v12  ;;  %v8379_v20 = vld [vmem:[#allocation4 + $0x1c] sm:$0xf0]  ;;  %v8375_v21 = vld [vmem:[#allocation4 + $0x4] sm:$0xf] }
  0x27   :  { %528 = vmatpush.bf16.msra.mxu0 %v7094_v56  ;;  %557 = vmatpush.bf16.msra.mxu1 %v7098_v57  ;;  %v6999_v22 = vld [vmem:[#allocation4 + $0x20] sm:$0xf0]  ;;  %v7042_v23 = vor.u32 %v8384_v14, %v7039_v15  ;;  %v7005_v24 = vld [vmem:[#allocation4 + $0x8] sm:$0xf]  ;;  %v8376_v26 = vld [vmem:[#allocation4 + $0xc] sm:$0xf]  ;;  %v6998_v30 = vor.u32 %v8379_v20, %v6997_v17 }
  0x28   :  { %586 = vmatpush.bf16.msra.mxu2 %v7102_v58  ;;  %v8380_v25 = vld [vmem:[#allocation4 + $0x24] sm:$0xf0]  ;;  %v7007_v27 = vld [vmem:[#allocation4 + $0x28] sm:$0xf0]  ;;  %v7237_v28 = vld [vmem:[#allocation4 + $0x1d0] sm:$0xf]  ;;  %v7002_v33 = vor.u32 %v8375_v21, %v6999_v22 }
  0x29   :  { %615 = vmatpush.bf16.msra.mxu3 %v7106_v62  ;;  %v8437_v29 = vld [vmem:[#allocation4 + $0x1ec] sm:$0xf0]  ;;  %v8433_v31 = vld [vmem:[#allocation4 + $0x1d4] sm:$0xf]  ;;  %v7006_v34 = vor.u32 %v8380_v25, %v7005_v24  ;;  %v9382_v35 = vld [vmem:[%s12083_s0] sm:$0xff]  ;;  %v7010_v36 = vor.u32 %v8376_v26, %v7007_v27 }
  0x2a   :  { %v7239_v32 = vld [vmem:[#allocation4 + $0x1f0] sm:$0xf0]  ;;  %v7238_v37 = vor.u32 %v8437_v29, %v7237_v28  ;;  %v8434_v38 = vld [vmem:[#allocation4 + $0x1dc] sm:$0xf]  ;;  %v7245_v39 = vld [vmem:[#allocation4 + $0x1d8] sm:$0xf] }
  0x2b   :  { %529 = vmatpush.bf16.msra.mxu0 %v7062_v4  ;;  %558 = vmatpush.bf16.msra.mxu1 %v7066_v5  ;;  %v8438_v40 = vld [vmem:[#allocation4 + $0x1f4] sm:$0xf0]  ;;  %v7242_v41 = vor.u32 %v8433_v31, %v7239_v32  ;;  %v7247_v42 = vld [vmem:[#allocation4 + $0x1f8] sm:$0xf0]  ;;  %v7205_v43 = vld [vmem:[#allocation4 + $0x190] sm:$0xf] }
  0x2c   :  { %587 = vmatpush.bf16.msra.mxu2 %v7070_v6  ;;  %v8429_v44 = vld [vmem:[#allocation4 + $0x1ac] sm:$0xf0]  ;;  %v8425_v45 = vld [vmem:[#allocation4 + $0x194] sm:$0xf]  ;;  %v7246_v47 = vor.u32 %v8438_v40, %v7245_v39  ;;  %v7250_v48 = vor.u32 %v8434_v38, %v7247_v42  ;;  %v8426_v50 = vld [vmem:[#allocation4 + $0x19c] sm:$0xf] }
  0x2d   :  { %616 = vmatpush.bf16.msra.mxu3 %v7074_v10  ;;  %v7207_v46 = vld [vmem:[#allocation4 + $0x1b0] sm:$0xf0]  ;;  %v7206_v49 = vor.u32 %v8429_v44, %v7205_v43  ;;  %v7213_v51 = vld [vmem:[#allocation4 + $0x198] sm:$0xf]  ;;  %v7215_v54 = vld [vmem:[#allocation4 + $0x1b8] sm:$0xf0] }
  0x2e   :  { %v8430_v52 = vld [vmem:[#allocation4 + $0x1b4] sm:$0xf0]  ;;  %v7210_v53 = vor.u32 %v8425_v45, %v7207_v46  ;;  %v7173_v55 = vld [vmem:[#allocation4 + $0x150] sm:$0xf]  ;;  %v8417_v57 = vld [vmem:[#allocation4 + $0x154] sm:$0xf]  ;;  %v7218_v60 = vor.u32 %v8426_v50, %v7215_v54 }
  0x2f   :  { %530 = vmatpush.bf16.msra.mxu0 %v7030_v16  ;;  %559 = vmatpush.bf16.msra.mxu1 %v7034_v18  ;;  %v8421_v56 = vld [vmem:[#allocation4 + $0x16c] sm:$0xf0]  ;;  %v7175_v58 = vld [vmem:[#allocation4 + $0x170] sm:$0xf0]  ;;  %v7214_v59 = vor.u32 %v8430_v52, %v7213_v51  ;;  %v8418_v62 = vld [vmem:[#allocation4 + $0x15c] sm:$0xf] }
  0x30   :  { %588 = vmatpush.bf16.msra.mxu2 %v7038_v19  ;;  %v7174_v61 = vor.u32 %v8421_v56, %v7173_v55  ;;  %v7181_v63 = vld [vmem:[#allocation4 + $0x158] sm:$0xf]  ;;  %v7178_v1 = vor.u32 %v8417_v57, %v7175_v58  ;;  %v7183_v2 = vld [vmem:[#allocation4 + $0x178] sm:$0xf0]  ;;  %v7141_v3 = vld [vmem:[#allocation4 + $0x110] sm:$0xf] }
  0x31   :  { %617 = vmatpush.bf16.msra.mxu3 %v7042_v23  ;;  %v8422_v0 = vld [vmem:[#allocation4 + $0x174] sm:$0xf0]  ;;  %v8413_v4 = vld [vmem:[#allocation4 + $0x12c] sm:$0xf0]  ;;  %v8409_v5 = vld [vmem:[#allocation4 + $0x114] sm:$0xf]  ;;  %v7186_v8 = vor.u32 %v8418_v62, %v7183_v2 }
  0x32   :  { %v7143_v6 = vld [vmem:[#allocation4 + $0x130] sm:$0xf0]  ;;  %v7182_v7 = vor.u32 %v8422_v0, %v7181_v63  ;;  %v7142_v9 = vor.u32 %v8413_v4, %v7141_v3  ;;  %v8410_v10 = vld [vmem:[#allocation4 + $0x11c] sm:$0xf]  ;;  %v7149_v11 = vld [vmem:[#allocation4 + $0x118] sm:$0xf] }
  0x33   :  { %531 = vmatpush.bf16.msra.mxu0 %v6998_v30  ;;  %560 = vmatpush.bf16.msra.mxu1 %v7002_v33  ;;  %v8414_v12 = vld [vmem:[#allocation4 + $0x134] sm:$0xf0]  ;;  %v7146_v13 = vor.u32 %v8409_v5, %v7143_v6  ;;  %v7151_v14 = vld [vmem:[#allocation4 + $0x138] sm:$0xf0]  ;;  %v7109_v15 = vld [vmem:[#allocation4 + $0xd0] sm:$0xf] }
  0x34   :  { %589 = vmatpush.bf16.msra.mxu2 %v7006_v34  ;;  %v8405_v16 = vld [vmem:[#allocation4 + $0xec] sm:$0xf0]  ;;  %v8401_v17 = vld [vmem:[#allocation4 + $0xd4] sm:$0xf]  ;;  %v9391_v19 = vld [vmem:[%s12083_s0 + $0x8] sm:$0xff]  ;;  %v7150_v20 = vor.u32 %v8414_v12, %v7149_v11  ;;  %v7154_v21 = vor.u32 %v8410_v10, %v7151_v14 }
  0x35   :  { %618 = vmatpush.bf16.msra.mxu3 %v7010_v36  ;;  %v7111_v18 = vld [vmem:[#allocation4 + $0xf0] sm:$0xf0]  ;;  %v7110_v22 = vor.u32 %v8405_v16, %v7109_v15  ;;  %v8402_v23 = vld [vmem:[#allocation4 + $0xdc] sm:$0xf]  ;;  %v7117_v24 = vld [vmem:[#allocation4 + $0xd8] sm:$0xf] }
  0x36   :  { %532 = vmatmul.bf16.vlgmr.msra.gmra.mxu0 %v9382_v35  ;;  %561 = vmatmul.bf16.vlgmr.msra.gmra.mxu1 %v9382_v35  ;;  %v8406_v25 = vld [vmem:[#allocation4 + $0xf4] sm:$0xf0]  ;;  %v7114_v26 = vor.u32 %v8401_v17, %v7111_v18  ;;  %v7119_v27 = vld [vmem:[#allocation4 + $0xf8] sm:$0xf0]  ;;  %v7077_v28 = vld [vmem:[#allocation4 + $0x90] sm:$0xf] }
  0x37   :  { %640 = vmatpush.bf16.msrb.mxu0 %v7238_v37  ;;  %669 = vmatpush.bf16.msrb.mxu1 %v7242_v41  ;;  %v8397_v29 = vld [vmem:[#allocation4 + $0xac] sm:$0xf0]  ;;  %v8393_v30 = vld [vmem:[#allocation4 + $0x94] sm:$0xf]  ;;  %v7118_v32 = vor.u32 %v8406_v25, %v7117_v24  ;;  %v7122_v33 = vor.u32 %v8402_v23, %v7119_v27  ;;  %v8394_v37 = vld [vmem:[#allocation4 + $0x9c] sm:$0xf] }
  0x38   :  { %590 = vmatmul.bf16.vlgmr.msra.gmra.mxu2 %v9382_v35  ;;  %619 = vmatmul.bf16.vlgmr.msra.gmra.mxu3 %v9382_v35  ;;  %v7079_v31 = vld [vmem:[#allocation4 + $0xb0] sm:$0xf0]  ;;  %v7078_v34 = vor.u32 %v8397_v29, %v7077_v28  ;;  %v7087_v38 = vld [vmem:[#allocation4 + $0xb8] sm:$0xf0]  ;;  %v7045_v39 = vld [vmem:[#allocation4 + $0x50] sm:$0xf] }
  0x39   :  { %698 = vmatpush.bf16.msrb.mxu2 %v7246_v47  ;;  %727 = vmatpush.bf16.msrb.mxu3 %v7250_v48  ;;  %v7082_v36 = vor.u32 %v8393_v30, %v7079_v31  ;;  %v8389_v40 = vld [vmem:[#allocation4 + $0x6c] sm:$0xf0]  ;;  %v8385_v41 = vld [vmem:[#allocation4 + $0x54] sm:$0xf]  ;;  %v7090_v42 = vor.u32 %v8394_v37, %v7087_v38  ;;  %v7085_v45 = vld [vmem:[#allocation4 + $0x98] sm:$0xf] }
  0x3a   :  { %v7046_v43 = vor.u32 %v8389_v40, %v7045_v39  ;;  %v7047_v44 = vld [vmem:[#allocation4 + $0x70] sm:$0xf0]  ;;  %v8398_v46 = vld [vmem:[#allocation4 + $0xb4] sm:$0xf0]  ;;  %v7055_v50 = vld [vmem:[#allocation4 + $0x78] sm:$0xf0] }
  0x3b   :  { %641 = vmatpush.bf16.msrb.mxu0 %v7206_v49  ;;  %670 = vmatpush.bf16.msrb.mxu1 %v7210_v53  ;;  %v7050_v47 = vor.u32 %v8385_v41, %v7047_v44  ;;  %v7086_v48 = vor.u32 %v8398_v46, %v7085_v45  ;;  %v8386_v49 = vld [vmem:[#allocation4 + $0x5c] sm:$0xf]  ;;  %v7013_v51 = vld [vmem:[#allocation4 + $0x10] sm:$0xf]  ;;  %v8377_v53 = vld [vmem:[#allocation4 + $0x14] sm:$0xf] }
  0x3c   :  { %v8381_v52 = vld [vmem:[#allocation4 + $0x2c] sm:$0xf0]  ;;  %v7015_v54 = vld [vmem:[#allocation4 + $0x30] sm:$0xf0]  ;;  %v7053_v55 = vld [vmem:[#allocation4 + $0x58] sm:$0xf]  ;;  %v7058_v57 = vor.u32 %v8386_v49, %v7055_v50 }
  0x3d   :  { %699 = vmatpush.bf16.msrb.mxu2 %v7214_v59  ;;  %728 = vmatpush.bf16.msrb.mxu3 %v7218_v60  ;;  %v8390_v56 = vld [vmem:[#allocation4 + $0x74] sm:$0xf0]  ;;  %v7014_v58 = vor.u32 %v8381_v52, %v7013_v51  ;;  %v7018_v62 = vor.u32 %v8377_v53, %v7015_v54  ;;  %v8378_v63 = vld [vmem:[#allocation4 + $0x1c] sm:$0xf]  ;;  %v9400_v3 = vld [vmem:[%s12083_s0 + $0x10] sm:$0xff] }
  0x3e   :  { %v7054_v59 = vor.u32 %v8390_v56, %v7053_v55  ;;  %v7021_v60 = vld [vmem:[#allocation4 + $0x18] sm:$0xf]  ;;  %v7023_v0 = vld [vmem:[#allocation4 + $0x38] sm:$0xf0]  ;;  %v7365_v4 = vld [vmem:[#allocation6 + $0xe0] sm:$0xf] }
  0x3f   :  { %642 = vmatpush.bf16.msrb.mxu0 %v7174_v61  ;;  %671 = vmatpush.bf16.msrb.mxu1 %v7178_v1  ;;  %v8382_v61 = vld [vmem:[#allocation4 + $0x34] sm:$0xf0]  ;;  %v7026_v2 = vor.u32 %v8378_v63, %v7023_v0  ;;  %v8469_v5 = vld [vmem:[#allocation6 + $0xec] sm:$0xf0]  ;;  %v8467_v6 = vld [vmem:[#allocation6 + $0xe4] sm:$0xf] }
  0x40   :  { %v7022_v1 = vor.u32 %v8382_v61, %v7021_v60  ;;  %v7375_v10 = vld [vmem:[#allocation6 + $0xf8] sm:$0xf0]  ;;  %v8465_v14 = vld [vmem:[#allocation6 + $0xcc] sm:$0xf0]  ;;  %v8463_v15 = vld [vmem:[#allocation6 + $0xc4] sm:$0xf] }
  0x41   :  { %700 = vmatpush.bf16.msrb.mxu2 %v7182_v7  ;;  %729 = vmatpush.bf16.msrb.mxu3 %v7186_v8  ;;  %v9406_v7 = vor.u32 %v8469_v5, %v7365_v4  ;;  %v7367_v8 = vld [vmem:[#allocation6 + $0xf0] sm:$0xf0]  ;;  %v8464_v18 = vld [vmem:[#allocation6 + $0xcc] sm:$0xf]  ;;  %v7373_v23 = vld [vmem:[#allocation6 + $0xe8] sm:$0xf] }
  0x42   :  { %v9408_v11 = vor.u32 %v8467_v6, %v7367_v8  ;;  %v7351_v17 = vld [vmem:[#allocation6 + $0xd0] sm:$0xf0]  ;;  %v8470_v24 = vld [vmem:[#allocation6 + $0xf4] sm:$0xf0]  ;;  %v7333_v27 = vld [vmem:[#allocation6 + $0xa0] sm:$0xf] }
  0x43   :  { %643 = vmatpush.bf16.msrb.mxu0 %v7142_v9  ;;  %672 = vmatpush.bf16.msrb.mxu1 %v7146_v13  ;;  %v8468_v9 = vld [vmem:[#allocation6 + $0xec] sm:$0xf]  ;;  %v7349_v13 = vld [vmem:[#allocation6 + $0xc0] sm:$0xf]  ;;  %v9421_v25 = vor.u32 %v8470_v24, %v7373_v23  ;;  %v8461_v28 = vld [vmem:[#allocation6 + $0xac] sm:$0xf0] }
  0x44   :  { %v9410_v12 = vor.u32 %v8468_v9, %v7375_v10  ;;  %v9413_v16 = vor.u32 %v8465_v14, %v7349_v13  ;;  %v8459_v29 = vld [vmem:[#allocation6 + $0xa4] sm:$0xf]  ;;  %v9436_v30 = vor.u32 %v8461_v28, %v7333_v27  ;;  %v7335_v31 = vld [vmem:[#allocation6 + $0xb0] sm:$0xf0]  ;;  %v7357_v37 = vld [vmem:[#allocation6 + $0xc8] sm:$0xf] }
  0x45   :  { %701 = vmatpush.bf16.msrb.mxu2 %v7150_v20  ;;  %730 = vmatpush.bf16.msrb.mxu3 %v7154_v21  ;;  %v7359_v20 = vld [vmem:[#allocation6 + $0xd8] sm:$0xf0]  ;;  %v9417_v21 = vor.u32 %v8463_v15, %v7351_v17  ;;  %v8466_v38 = vld [vmem:[#allocation6 + $0xd4] sm:$0xf0]  ;;  %v7317_v39 = vld [vmem:[#allocation6 + $0x80] sm:$0xf] }
  0x46   :  { %537 = vmatmul.bf16.gmra.mxu0 %v9391_v19  ;;  %566 = vmatmul.bf16.gmra.mxu1 %v9391_v19  ;;  %v9443_v40 = vor.u32 %v8466_v38, %v7357_v37  ;;  %v8457_v41 = vld [vmem:[#allocation6 + $0x8c] sm:$0xf0]  ;;  %v7341_v46 = vld [vmem:[#allocation6 + $0xa8] sm:$0xf]  ;;  %v7327_v50 = vld [vmem:[#allocation6 + $0x98] sm:$0xf0] }
  0x47   :  { %644 = vmatpush.bf16.msrb.mxu0 %v7110_v22  ;;  %673 = vmatpush.bf16.msrb.mxu1 %v7114_v26  ;;  %v9419_v22 = vor.u32 %v8464_v18, %v7359_v20  ;;  %v9430_v26 = vld [vmem:[%s12083_s0 + $0x18] sm:$0xff]  ;;  %v9447_v44 = vor.u32 %v8457_v41, %v7317_v39  ;;  %v7325_v52 = vld [vmem:[#allocation6 + $0x88] sm:$0xf]  ;;  %v7301_v55 = vld [vmem:[#allocation6 + $0x60] sm:$0xf] }
  0x48   :  { %595 = vmatmul.bf16.gmra.mxu2 %v9391_v19  ;;  %624 = vmatmul.bf16.gmra.mxu3 %v9391_v19  ;;  %v8458_v53 = vld [vmem:[#allocation6 + $0x94] sm:$0xf0]  ;;  %v8453_v56 = vld [vmem:[#allocation6 + $0x6c] sm:$0xf0]  ;;  %v7309_v60 = vld [vmem:[#allocation6 + $0x68] sm:$0xf] }
  0x49   :  { %702 = vmatpush.bf16.msrb.mxu2 %v7118_v32  ;;  %731 = vmatpush.bf16.msrb.mxu3 %v7122_v33  ;;  %v8460_v32 = vld [vmem:[#allocation6 + $0xac] sm:$0xf]  ;;  %v7343_v33 = vld [vmem:[#allocation6 + $0xb8] sm:$0xf0]  ;;  %v9461_v54 = vor.u32 %v8458_v53, %v7325_v52  ;;  %v8454_v61 = vld [vmem:[#allocation6 + $0x74] sm:$0xf0] }
  0x4a   :  { %v9471_v63 = vor.u32 %v8454_v61, %v7309_v60  ;;  %v8452_v0 = vld [vmem:[#allocation6 + $0x6c] sm:$0xf]  ;;  %v8449_v4 = vld [vmem:[#allocation6 + $0x4c] sm:$0xf0]  ;;  %v8447_v5 = vld [vmem:[#allocation6 + $0x44] sm:$0xf] }
  0x4b   :  { %645 = vmatpush.bf16.msrb.mxu0 %v7078_v34  ;;  %674 = vmatpush.bf16.msrb.mxu1 %v7082_v36  ;;  %v9438_v34 = vor.u32 %v8459_v29, %v7335_v31  ;;  %v9440_v36 = vor.u32 %v8460_v32, %v7343_v33  ;;  %v7287_v6 = vld [vmem:[#allocation6 + $0x50] sm:$0xf0]  ;;  %v7293_v10 = vld [vmem:[#allocation6 + $0x48] sm:$0xf]  ;;  %v8450_v13 = vld [vmem:[#allocation6 + $0x54] sm:$0xf0] }
  0x4c   :  { %v9480_v9 = vor.u32 %v8447_v5, %v7287_v6  ;;  %v8448_v14 = vld [vmem:[#allocation6 + $0x4c] sm:$0xf]  ;;  %v9483_v15 = vor.u32 %v8450_v13, %v7293_v10  ;;  %v7295_v17 = vld [vmem:[#allocation6 + $0x58] sm:$0xf0]  ;;  %v7269_v18 = vld [vmem:[#allocation6 + $0x20] sm:$0xf] }
  0x4d   :  { %703 = vmatpush.bf16.msrb.mxu2 %v7086_v48  ;;  %732 = vmatpush.bf16.msrb.mxu3 %v7090_v42  ;;  %v8455_v42 = vld [vmem:[#allocation6 + $0x84] sm:$0xf]  ;;  %v8456_v48 = vld [vmem:[#allocation6 + $0x8c] sm:$0xf]  ;;  %v8445_v20 = vld [vmem:[#allocation6 + $0x2c] sm:$0xf0]  ;;  %v9485_v23 = vor.u32 %v8448_v14, %v7295_v17 }
  0x4e   :  { %v9454_v51 = vor.u32 %v8456_v48, %v7327_v50  ;;  %v8443_v24 = vld [vmem:[#allocation6 + $0x24] sm:$0xf]  ;;  %v7271_v27 = vld [vmem:[#allocation6 + $0x30] sm:$0xf0]  ;;  %v7277_v28 = vld [vmem:[#allocation6 + $0x28] sm:$0xf]  ;;  %v9488_v29 = vor.u32 %v8445_v20, %v7269_v18 }
  0x4f   :  { %646 = vmatpush.bf16.msrb.mxu0 %v7046_v43  ;;  %675 = vmatpush.bf16.msrb.mxu1 %v7050_v47  ;;  %v7319_v43 = vld [vmem:[#allocation6 + $0x90] sm:$0xf0]  ;;  %v8462_v47 = vld [vmem:[#allocation6 + $0xb4] sm:$0xf0]  ;;  %v8444_v32 = vld [vmem:[#allocation6 + $0x2c] sm:$0xf]  ;;  %v9492_v37 = vor.u32 %v8443_v24, %v7271_v27 }
  0x50   :  { %v9449_v45 = vor.u32 %v8455_v42, %v7319_v43  ;;  %v9452_v49 = vor.u32 %v8462_v47, %v7341_v46  ;;  %12313 = vst [vmem:[#allocation15_spill] sm:$0xff] %v9454_v51  ;;  %v8446_v31 = vld [vmem:[#allocation6 + $0x34] sm:$0xf0]  ;;  %v7279_v33 = vld [vmem:[#allocation6 + $0x38] sm:$0xf0] }
  0x51   :  { %704 = vmatpush.bf16.msrb.mxu2 %v7054_v59  ;;  %733 = vmatpush.bf16.msrb.mxu3 %v7058_v57  ;;  %v8451_v57 = vld [vmem:[#allocation6 + $0x64] sm:$0xf]  ;;  %v7303_v59 = vld [vmem:[#allocation6 + $0x70] sm:$0xf0]  ;;  %v9494_v38 = vor.u32 %v8446_v31, %v7277_v28  ;;  %v9497_v39 = vor.u32 %v8444_v32, %v7279_v33  ;;  %v7253_v41 = vld [vmem:[#allocation6] sm:$0xf] }
  0x52   :  { %12312 = vst [vmem:[#allocation14_spill] sm:$0xff] %v9452_v49  ;;  %v8441_v42 = vld [vmem:[#allocation6 + $0xc] sm:$0xf0]  ;;  %v8439_v43 = vld [vmem:[#allocation6 + $0x4] sm:$0xf] }
  0x53   :  { %647 = vmatpush.bf16.msrb.mxu0 %v7014_v58  ;;  %676 = vmatpush.bf16.msrb.mxu1 %v7018_v62  ;;  %v9467_v58 = vor.u32 %v8453_v56, %v7301_v55  ;;  %v9469_v62 = vor.u32 %v8451_v57, %v7303_v59  ;;  %v9504_v46 = vor.u32 %v8441_v42, %v7253_v41  ;;  %v7255_v47 = vld [vmem:[#allocation6 + $0x10] sm:$0xf0]  ;;  %v7261_v48 = vld [vmem:[#allocation6 + $0x8] sm:$0xf]  ;;  %v8442_v50 = vld [vmem:[#allocation6 + $0x14] sm:$0xf0] }
  0x54   :  { %v9508_v52 = vor.u32 %v8439_v43, %v7255_v47  ;;  %v9510_v53 = vor.u32 %v8442_v50, %v7261_v48  ;;  %v8440_v55 = vld [vmem:[#allocation6 + $0xc] sm:$0xf]  ;;  %v7263_v56 = vld [vmem:[#allocation6 + $0x18] sm:$0xf0]  ;;  %v7493_v57 = vld [vmem:[#allocation6 + $0x1e0] sm:$0xf] }
  0x55   :  { %705 = vmatpush.bf16.msrb.mxu2 %v7022_v1  ;;  %734 = vmatpush.bf16.msrb.mxu3 %v7026_v2  ;;  %12314 = vst [vmem:[#allocation16_spill] sm:$0xff] %v9467_v58  ;;  %v7311_v1 = vld [vmem:[#allocation6 + $0x78] sm:$0xf0]  ;;  %v7285_v2 = vld [vmem:[#allocation6 + $0x40] sm:$0xf]  ;;  %v9514_v59 = vor.u32 %v8440_v55, %v7263_v56 }
  0x56   :  { %542 = vmatmul.bf16.gmra.mxu0 %v9400_v3  ;;  %571 = vmatmul.bf16.gmra.mxu1 %v9400_v3  ;;  %v9478_v8 = vor.u32 %v8449_v4, %v7285_v2  ;;  %v8501_v60 = vld [vmem:[#allocation6 + $0x1ec] sm:$0xf0]  ;;  %v8499_v61 = vld [vmem:[#allocation6 + $0x1e4] sm:$0xf]  ;;  %v7501_v4 = vld [vmem:[#allocation6 + $0x1e8] sm:$0xf] }
  0x57   :  { %1052 = vmatpush.bf16.msra.mxu0 %v9406_v7  ;;  %1065 = vmatpush.bf16.msra.mxu1 %v9408_v11  ;;  %12315 = vst [vmem:[#allocation17_spill] sm:$0xff] %v9514_v59  ;;  %v8502_v5 = vld [vmem:[#allocation6 + $0x1f4] sm:$0xf0]  ;;  %v8500_v6 = vld [vmem:[#allocation6 + $0x1ec] sm:$0xf] }
  0x58   :  { %600 = vmatmul.bf16.gmra.mxu2 %v9400_v3  ;;  %629 = vmatmul.bf16.gmra.mxu3 %v9400_v3  ;;  %v7503_v10 = vld [vmem:[#allocation6 + $0x1f8] sm:$0xf0]  ;;  %v7477_v13 = vld [vmem:[#allocation6 + $0x1c0] sm:$0xf]  ;;  %v8497_v14 = vld [vmem:[#allocation6 + $0x1cc] sm:$0xf0] }
  0x59   :  { %1091 = vmatpush.bf16.msra.mxu3 %v9410_v12  ;;  %1078 = vmatpush.bf16.msra.mxu2 %v9421_v25  ;;  %v9527_v17 = vor.u32 %v8500_v6, %v7503_v10  ;;  %v9529_v18 = vor.u32 %v8497_v14, %v7477_v13  ;;  %v8495_v20 = vld [vmem:[#allocation6 + $0x1c4] sm:$0xf]  ;;  %v7479_v24 = vld [vmem:[#allocation6 + $0x1d0] sm:$0xf0]  ;;  %v7485_v27 = vld [vmem:[#allocation6 + $0x1c8] sm:$0xf] }
  0x5a   :  { %v9532_v28 = vor.u32 %v8495_v20, %v7479_v24  ;;  %v8498_v31 = vld [vmem:[#allocation6 + $0x1d4] sm:$0xf0]  ;;  %v8496_v32 = vld [vmem:[#allocation6 + $0x1cc] sm:$0xf]  ;;  %v7487_v33 = vld [vmem:[#allocation6 + $0x1d8] sm:$0xf0] }
  0x5b   :  { %1053 = vmatpush.bf16.msra.mxu0 %v9413_v16  ;;  %1066 = vmatpush.bf16.msra.mxu1 %v9417_v21  ;;  %12319 = vst [vmem:[#allocation21_spill] sm:$0xff] %v9527_v17  ;;  %v9535_v41 = vor.u32 %v8498_v31, %v7485_v27  ;;  %v9537_v42 = vor.u32 %v8496_v32, %v7487_v33  ;;  %v7461_v43 = vld [vmem:[#allocation6 + $0x1a0] sm:$0xf]  ;;  %v8493_v47 = vld [vmem:[#allocation6 + $0x1ac] sm:$0xf0] }
  0x5c   :  { %12320 = vst [vmem:[#allocation22_spill] sm:$0xff] %v9529_v18  ;;  %v8491_v48 = vld [vmem:[#allocation6 + $0x1a4] sm:$0xf]  ;;  %v7463_v50 = vld [vmem:[#allocation6 + $0x1b0] sm:$0xf0] }
  0x5d   :  { %1092 = vmatpush.bf16.msra.mxu3 %v9419_v22  ;;  %1079 = vmatpush.bf16.msra.mxu2 %v9443_v40  ;;  %12321 = vst [vmem:[#allocation23_spill] sm:$0xff] %v9532_v28  ;;  %v7469_v55 = vld [vmem:[#allocation6 + $0x1a8] sm:$0xf]  ;;  %v8494_v56 = vld [vmem:[#allocation6 + $0x1b4] sm:$0xf0] }
  0x5e   :  { %12322 = vst [vmem:[#allocation24_spill] sm:$0xff] %v9535_v41  ;;  %v7445_v6 = vld [vmem:[#allocation6 + $0x180] sm:$0xf]  ;;  %v8489_v10 = vld [vmem:[#allocation6 + $0x18c] sm:$0xf0] }
  0x5f   :  { %1054 = vmatpush.bf16.msra.mxu0 %v9436_v30  ;;  %1067 = vmatpush.bf16.msra.mxu1 %v9438_v34  ;;  %12323 = vst [vmem:[#allocation25_spill] sm:$0xff] %v9537_v42  ;;  %v8487_v13 = vld [vmem:[#allocation6 + $0x184] sm:$0xf]  ;;  %v7447_v14 = vld [vmem:[#allocation6 + $0x190] sm:$0xf0]  ;;  %v9554_v27 = vor.u32 %v8489_v10, %v7445_v6 }
  0x60   :  { %v7453_v20 = vld [vmem:[#allocation6 + $0x188] sm:$0xf]  ;;  %v8490_v24 = vld [vmem:[#allocation6 + $0x194] sm:$0xf0]  ;;  %v8488_v31 = vld [vmem:[#allocation6 + $0x18c] sm:$0xf]  ;;  %v9557_v33 = vor.u32 %v8487_v13, %v7447_v14 }
  0x61   :  { %1093 = vmatpush.bf16.msra.mxu3 %v9440_v36  ;;  %1080 = vmatpush.bf16.msra.mxu2 %v9452_v49  ;;  %12328 = vst [vmem:[#allocation30_spill] sm:$0xff] %v9554_v27  ;;  %v7455_v32 = vld [vmem:[#allocation6 + $0x198] sm:$0xf0]  ;;  %v8484_v10 = vld [vmem:[#allocation6 + $0x16c] sm:$0xf] }
  0x62   :  { %12329 = vst [vmem:[#allocation31_spill] sm:$0xff] %v9557_v33  ;;  %v7439_v13 = vld [vmem:[#allocation6 + $0x178] sm:$0xf0] }
  0x63   :  { %1055 = vmatpush.bf16.msra.mxu0 %v9447_v44  ;;  %1068 = vmatpush.bf16.msra.mxu1 %v9449_v45 }
  0x65   :  { %1094 = vmatpush.bf16.msra.mxu3 %v9454_v51  ;;  %1081 = vmatpush.bf16.msra.mxu2 %v9461_v54 }
  0x66   :  { %547 = vmatmul.bf16.gmra.mxu0 %v9430_v26  ;;  %576 = vmatmul.bf16.gmra.mxu1 %v9430_v26 }
  0x67   :  { %1056 = vmatpush.bf16.msra.mxu0 %v9467_v58  ;;  %1069 = vmatpush.bf16.msra.mxu1 %v9469_v62 }
  0x68   :  { %605 = vmatmul.bf16.gmra.mxu2 %v9430_v26  ;;  %634 = vmatmul.bf16.gmra.mxu3 %v9430_v26 }
  0x69   :  { %1082 = vmatpush.bf16.msra.mxu2 %v9471_v63 }
  0x6b   :  { %1057 = vmatpush.bf16.msra.mxu0 %v9478_v8  ;;  %1070 = vmatpush.bf16.msra.mxu1 %v9480_v9 }
  0x6d   :  { %1083 = vmatpush.bf16.msra.mxu2 %v9483_v15 }
  0x6f   :  { %1058 = vmatpush.bf16.msra.mxu0 %v9488_v29  ;;  %1071 = vmatpush.bf16.msra.mxu1 %v9492_v37 }
  0x71   :  { %1084 = vmatpush.bf16.msra.mxu2 %v9494_v38 }
  0x73   :  { %1059 = vmatpush.bf16.msra.mxu0 %v9504_v46  ;;  %1072 = vmatpush.bf16.msra.mxu1 %v9508_v52 }
  0x75   :  { %1085 = vmatpush.bf16.msra.mxu2 %v9510_v53 }
  0x76   :  { %648 = vmatmul.bf16.vlgmr.msrb.gmra.mxu0 %v9382_v35  ;;  %677 = vmatmul.bf16.vlgmr.msrb.gmra.mxu1 %v9382_v35 }
  0x78   :  { %706 = vmatmul.bf16.vlgmr.msrb.gmra.mxu2 %v9382_v35  ;;  %735 = vmatmul.bf16.vlgmr.msrb.gmra.mxu3 %v9382_v35  ;;  %v9474_v35 = vor.u32 %v8452_v0, %v7311_v1  ;;  %v7495_v0 = vld [vmem:[#allocation6 + $0x1f0] sm:$0xf0]  ;;  %v9518_v1 = vor.u32 %v8501_v60, %v7493_v57  ;;  %v9541_v57 = vor.u32 %v8493_v47, %v7461_v43 }
  0x79   :  { %v9520_v2 = vor.u32 %v8499_v61, %v7495_v0  ;;  %v9543_v60 = vor.u32 %v8491_v48, %v7463_v50  ;;  %v8492_v61 = vld [vmem:[#allocation6 + $0x1ac] sm:$0xf]  ;;  %v7471_v0 = vld [vmem:[#allocation6 + $0x1b8] sm:$0xf0]  ;;  %v9559_v43 = vor.u32 %v8490_v24, %v7453_v20  ;;  %v9562_v47 = vor.u32 %v8488_v31, %v7455_v32  ;;  %v7429_v48 = vld [vmem:[#allocation6 + $0x160] sm:$0xf] }
  0x7a   :  { %1095 = vmatpush.bf16.msra.mxu3 %v9474_v35  ;;  %12316 = vst [vmem:[#allocation18_spill] sm:$0xff] %v9518_v1  ;;  %1275 = vmatpush.bf16.msrb.mxu0 %v9518_v1  ;;  %v8485_v50 = vld [vmem:[#allocation6 + $0x16c] sm:$0xf0]  ;;  %v9577_v24 = vor.u32 %v8484_v10, %v7439_v13  ;;  %v7413_v31 = vld [vmem:[#allocation6 + $0x140] sm:$0xf] }
  0x7b   :  { %12317 = vst [vmem:[#allocation19_spill] sm:$0xff] %v9520_v2  ;;  %1288 = vmatpush.bf16.msrb.mxu1 %v9520_v2  ;;  %v9568_v6 = vor.u32 %v8485_v50, %v7429_v48  ;;  %v8479_v32 = vld [vmem:[#allocation6 + $0x144] sm:$0xf]  ;;  %v7421_v48 = vld [vmem:[#allocation6 + $0x148] sm:$0xf] }
  0x7c   :  { %12324 = vst [vmem:[#allocation26_spill] sm:$0xff] %v9541_v57  ;;  %v8475_v10 = vld [vmem:[#allocation6 + $0x124] sm:$0xf] }
  0x7d   :  { %12325 = vst [vmem:[#allocation27_spill] sm:$0xff] %v9543_v60 }
  0x7e   :  { %1096 = vmatpush.bf16.msra.mxu3 %v9485_v23  ;;  %1276 = vmatpush.bf16.msrb.mxu0 %v9529_v18  ;;  %12330 = vst [vmem:[#allocation32_spill] sm:$0xff] %v9559_v43 }
  0x7f   :  { %1289 = vmatpush.bf16.msrb.mxu1 %v9532_v28  ;;  %12331 = vst [vmem:[#allocation33_spill] sm:$0xff] %v9562_v47 }
  0x80   :  { %12332 = vst [vmem:[#allocation34_spill] sm:$0xff] %v9568_v6 }
  0x81   :  { %12335 = vst [vmem:[#allocation37_spill] sm:$0xff] %v9577_v24 }
  0x82   :  { %1097 = vmatpush.bf16.msra.mxu3 %v9497_v39  ;;  %1277 = vmatpush.bf16.msrb.mxu0 %v9541_v57 }
  0x83   :  { %1290 = vmatpush.bf16.msrb.mxu1 %v9543_v60 }
  0x86   :  { %653 = vmatmul.bf16.gmra.mxu0 %v9391_v19  ;;  %682 = vmatmul.bf16.gmra.mxu1 %v9391_v19 }
  0x87   :  { %1098 = vmatpush.bf16.msra.mxu3 %v9514_v59  ;;  %1278 = vmatpush.bf16.msrb.mxu0 %v9554_v27  ;;  %v7415_v27 = vld [vmem:[#allocation6 + $0x150] sm:$0xf0] }
  0x88   :  { %711 = vmatmul.bf16.gmra.mxu2 %v9391_v19  ;;  %740 = vmatmul.bf16.gmra.mxu3 %v9391_v19  ;;  %v9523_v19 = vor.u32 %v8502_v5, %v7501_v4  ;;  %v9546_v4 = vor.u32 %v8494_v56, %v7469_v55  ;;  %v9549_v5 = vor.u32 %v8492_v61, %v7471_v0  ;;  %v8483_v55 = vld [vmem:[#allocation6 + $0x164] sm:$0xf]  ;;  %v7431_v56 = vld [vmem:[#allocation6 + $0x170] sm:$0xf0]  ;;  %v7437_v61 = vld [vmem:[#allocation6 + $0x168] sm:$0xf] }
  0x89   :  { %v8486_v0 = vld [vmem:[#allocation6 + $0x174] sm:$0xf0]  ;;  %1291 = vmatpush.bf16.msrb.mxu1 %v9557_v33  ;;  %v9572_v14 = vor.u32 %v8483_v55, %v7431_v56  ;;  %v9584_v55 = vor.u32 %v8479_v32, %v7415_v27  ;;  %v8473_v32 = vld [vmem:[#allocation6 + $0x10c] sm:$0xf0] }
  0x8a   :  { %12318 = vst [vmem:[#allocation20_spill] sm:$0xff] %v9523_v19  ;;  %1301 = vmatpush.bf16.msrb.mxu2 %v9523_v19  ;;  %v9574_v20 = vor.u32 %v8486_v0, %v7437_v61  ;;  %v8482_v33 = vld [vmem:[#allocation6 + $0x154] sm:$0xf0]  ;;  %v7397_v61 = vld [vmem:[#allocation6 + $0x120] sm:$0xf] }
  0x8b   :  { %1314 = vmatpush.bf16.msrb.mxu3 %v9527_v17  ;;  %12326 = vst [vmem:[#allocation28_spill] sm:$0xff] %v9546_v4  ;;  %1279 = vmatpush.bf16.msrb.mxu0 %v9568_v6  ;;  %v9586_v56 = vor.u32 %v8482_v33, %v7421_v48  ;;  %v8477_v0 = vld [vmem:[#allocation6 + $0x12c] sm:$0xf0]  ;;  %v8478_v6 = vld [vmem:[#allocation6 + $0x134] sm:$0xf0] }
  0x8c   :  { %12327 = vst [vmem:[#allocation29_spill] sm:$0xff] %v9549_v5  ;;  %v8471_v48 = vld [vmem:[#allocation6 + $0x104] sm:$0xf] }
  0x8d   :  { %12333 = vst [vmem:[#allocation35_spill] sm:$0xff] %v9572_v14  ;;  %1292 = vmatpush.bf16.msrb.mxu1 %v9572_v14  ;;  %v9592_v14 = vor.u32 %v8477_v0, %v7397_v61  ;;  %v8472_v0 = vld [vmem:[#allocation6 + $0x10c] sm:$0xf] }
  0x8e   :  { %1302 = vmatpush.bf16.msrb.mxu2 %v9535_v41  ;;  %12334 = vst [vmem:[#allocation36_spill] sm:$0xff] %v9574_v20 }
  0x8f   :  { %1315 = vmatpush.bf16.msrb.mxu3 %v9537_v42  ;;  %12337 = vst [vmem:[#allocation39_spill] sm:$0xff] %v9584_v55 }
  0x90   :  { %12338 = vst [vmem:[#allocation40_spill] sm:$0xff] %v9586_v56 }
  0x91   :  { %12340 = vst [vmem:[#allocation42_spill] sm:$0xff] %v9592_v14  ;;  %1293 = vmatpush.bf16.msrb.mxu1 %v9584_v55 }
  0x92   :  { %1303 = vmatpush.bf16.msrb.mxu2 %v9546_v4  ;;  %v7407_v4 = vld [vmem:[#allocation6 + $0x138] sm:$0xf0] }
  0x93   :  { %1316 = vmatpush.bf16.msrb.mxu3 %v9549_v5  ;;  %v8480_v5 = vld [vmem:[#allocation6 + $0x14c] sm:$0xf] }
  0x96   :  { %658 = vmatmul.bf16.gmra.mxu0 %v9400_v3  ;;  %687 = vmatmul.bf16.gmra.mxu1 %v9400_v3 }
  0x97   :  { %1304 = vmatpush.bf16.msrb.mxu2 %v9559_v43  ;;  %1317 = vmatpush.bf16.msrb.mxu3 %v9562_v47  ;;  %v7423_v43 = vld [vmem:[#allocation6 + $0x158] sm:$0xf0]  ;;  %v8476_v47 = vld [vmem:[#allocation6 + $0x12c] sm:$0xf] }
  0x98   :  { %716 = vmatmul.bf16.gmra.mxu2 %v9400_v3  ;;  %745 = vmatmul.bf16.gmra.mxu3 %v9400_v3  ;;  %v8481_v3 = vld [vmem:[#allocation6 + $0x14c] sm:$0xf0]  ;;  %v9589_v13 = vor.u32 %v8480_v5, %v7423_v43  ;;  %v9601_v5 = vor.u32 %v8476_v47, %v7407_v4  ;;  %v7381_v43 = vld [vmem:[#allocation6 + $0x100] sm:$0xf] }
  0x99   :  { %v9580_v50 = vor.u32 %v8481_v3, %v7413_v31  ;;  %v7399_v31 = vld [vmem:[#allocation6 + $0x130] sm:$0xf0]  ;;  %v7405_v3 = vld [vmem:[#allocation6 + $0x128] sm:$0xf]  ;;  %v9604_v61 = vor.u32 %v8473_v32, %v7381_v43 }
  0x9a   :  { %12339 = vst [vmem:[#allocation41_spill] sm:$0xff] %v9589_v13  ;;  %v9596_v27 = vor.u32 %v8475_v10, %v7399_v31  ;;  %v9598_v33 = vor.u32 %v8478_v6, %v7405_v3  ;;  %v9650_v3 = vld [vmem:[%s12086_s3] sm:$0xff] }
  0x9b   :  { %12336 = vst [vmem:[#allocation38_spill] sm:$0xff] %v9580_v50  ;;  %1305 = vmatpush.bf16.msrb.mxu2 %v9574_v20  ;;  %1318 = vmatpush.bf16.msrb.mxu3 %v9577_v24  ;;  %v7383_v24 = vld [vmem:[#allocation6 + $0x110] sm:$0xf0]  ;;  %v7389_v20 = vld [vmem:[#allocation6 + $0x108] sm:$0xf]  ;;  %v9656_v43 = vperm.slane %v9650_v3, 0 }
  0x9c   :  { %1280 = vmatpush.bf16.msrb.mxu0 %v9580_v50  ;;  %12341 = vst [vmem:[#allocation43_spill] sm:$0xff] %v9596_v27  ;;  %v8474_v50 = vld [vmem:[#allocation6 + $0x114] sm:$0xf0]  ;;  %1294 = vmatpush.bf16.msrb.mxu1 %v9596_v27  ;;  %v9608_v6 = vor.u32 %v8471_v48, %v7383_v24  ;;  %v9662_v48 = vperm.slane %v9650_v3, 1 }
  0x9d   :  { %12342 = vst [vmem:[#allocation44_spill] sm:$0xff] %v9598_v33  ;;  %v9610_v4 = vor.u32 %v8474_v50, %v7389_v20  ;;  %v12115_v50 = vmov 0  }
  0x9e   :  { %12343 = vst [vmem:[#allocation45_spill] sm:$0xff] %v9601_v5 }
  0x9f   :  { %1306 = vmatpush.bf16.msrb.mxu2 %v9586_v56  ;;  %1319 = vmatpush.bf16.msrb.mxu3 %v9589_v13  ;;  %12344 = vst [vmem:[#allocation46_spill] sm:$0xff] %v9604_v61  ;;  %v7391_v56 = vld [vmem:[#allocation6 + $0x118] sm:$0xf0] }
  0xa0   :  { %1281 = vmatpush.bf16.msrb.mxu0 %v9592_v14  ;;  %12345 = vst [vmem:[#allocation47_spill] sm:$0xff] %v9608_v6  ;;  %v9614_v47 = vor.u32 %v8472_v0, %v7391_v56  ;;  %1295 = vmatpush.bf16.msrb.mxu1 %v9608_v6 }
  0xa1   :  { %12346 = vst [vmem:[#allocation48_spill] sm:$0xff] %v9610_v4 }
  0xa2   :  { %12347 = vst [vmem:[#allocation49_spill] sm:$0xff] %v9614_v47 }
  0xa3   :  { %1307 = vmatpush.bf16.msrb.mxu2 %v9598_v33  ;;  %1320 = vmatpush.bf16.msrb.mxu3 %v9601_v5  ;;  %12350 = vst [vmem:[#allocation52_spill] sm:$0xff] %v9656_v43 }
  0xa4   :  { %1282 = vmatpush.bf16.msrb.mxu0 %v9604_v61  ;;  %12352 = vst [vmem:[#allocation54_spill] sm:$0xff] %v9662_v48 }
  0xa6   :  { %663 = vmatmul.bf16.gmra.mxu0 %v9430_v26  ;;  %692 = vmatmul.bf16.gmra.mxu1 %v9430_v26 }
  0xa7   :  { %1308 = vmatpush.bf16.msrb.mxu2 %v9610_v4  ;;  %1321 = vmatpush.bf16.msrb.mxu3 %v9614_v47 }
  0xa8   :  { %721 = vmatmul.bf16.gmra.mxu2 %v9430_v26  ;;  %750 = vmatmul.bf16.gmra.mxu3 %v9430_v26 }
  0xb3   :  { %v9623_v20 = vpop.f32.mrf.mxu0  ;;  %v9625_v24 = vpop.f32.mrf.mxu1 }
  0xb6   :  { %1060 = vmatmul.bf16.vlgmr.msra.gmra.mxu0 %v12115_v50  ;;  %1073 = vmatmul.bf16.vlgmr.msra.gmra.mxu1 %v12115_v50 }
  0xb7   :  { %1473 = vmatpush.bf16.msra.mxu0 %v9406_v7  ;;  %1486 = vmatpush.bf16.msra.mxu1 %v9408_v11 }
  0xb8   :  { %1086 = vmatmul.bf16.vlgmr.msra.gmra.mxu2 %v12115_v50  ;;  %1099 = vmatmul.bf16.vlgmr.msra.gmra.mxu3 %v12115_v50 }
  0xb9   :  { %1499 = vmatpush.bf16.msra.mxu2 %v9421_v25  ;;  %1512 = vmatpush.bf16.msra.mxu3 %v9410_v12 }
  0xbb   :  { %v9634_v26 = vpop.f32.mrf.mxu2  ;;  %v9637_v56 = vpop.f32.mrf.mxu3  ;;  %1474 = vmatpush.bf16.msra.mxu0 %v9413_v16  ;;  %1487 = vmatpush.bf16.msra.mxu1 %v9417_v21 }
  0xbc   :  { %v9639_v10 = vpop.f32.mrf.mxu0  ;;  %v9641_v31 = vpop.f32.mrf.mxu1 }
  0xbd   :  { %12348 = vst [vmem:[#allocation50_spill] sm:$0xff] %v9639_v10  ;;  %1500 = vmatpush.bf16.msra.mxu2 %v9443_v40  ;;  %1513 = vmatpush.bf16.msra.mxu3 %v9419_v22 }
  0xbe   :  { %12349 = vst [vmem:[#allocation51_spill] sm:$0xff] %v9641_v31 }
  0xbf   :  { %1475 = vmatpush.bf16.msra.mxu0 %v9436_v30  ;;  %1488 = vmatpush.bf16.msra.mxu1 %v9438_v34 }
  0xc1   :  { %1501 = vmatpush.bf16.msra.mxu2 %v9452_v49  ;;  %1514 = vmatpush.bf16.msra.mxu3 %v9440_v36 }
  0xc3   :  { %v9658_v32 = vpop.f32.mrf.mxu2  ;;  %v9664_v0 = vpop.f32.mrf.mxu3  ;;  %1476 = vmatpush.bf16.msra.mxu0 %v9447_v44  ;;  %1489 = vmatpush.bf16.msra.mxu1 %v9449_v45 }
  0xc4   :  { %12351 = vst [vmem:[#allocation53_spill] sm:$0xff] %v9658_v32  ;;  %v538_v50 = vpop.f32.mrf.mxu0  ;;  %v567_v10 = vpop.f32.mrf.mxu1  ;;  %v12356_v32 = vmov 0  }
  0xc5   :  { %12353 = vst [vmem:[#allocation55_spill] sm:$0xff] %v9664_v0  ;;  %v9667_v31 = vadd.f32 %v538_v50, %v9656_v43  ;;  %v9671_v49 = vadd.f32 %v567_v10, %v9662_v48  ;;  %1502 = vmatpush.bf16.msra.mxu2 %v9461_v54  ;;  %1515 = vmatpush.bf16.msra.mxu3 %v9454_v51  ;;  %v9682_v50 = vperm.slane %v9650_v3, 2  ;;  %v9687_v10 = vperm.slane %v9650_v3, 3 }
  0xc6   :  { %1283 = vmatmul.bf16.vlgmr.msrb.gmra.mxu0 %v12356_v32  ;;  %1296 = vmatmul.bf16.vlgmr.msrb.gmra.mxu1 %v12356_v32 }
  0xc7   :  { %12354 = vst [vmem:[#allocation56_spill] sm:$0xff] %v9667_v31  ;;  %1477 = vmatpush.bf16.msra.mxu0 %v9467_v58  ;;  %1490 = vmatpush.bf16.msra.mxu1 %v9469_v62 }
  0xc8   :  { %12355 = vst [vmem:[#allocation57_spill] sm:$0xff] %v9671_v49  ;;  %1309 = vmatmul.bf16.vlgmr.msrb.gmra.mxu2 %v12356_v32  ;;  %1322 = vmatmul.bf16.vlgmr.msrb.gmra.mxu3 %v12356_v32 }
  0xc9   :  { %12357 = vst [vmem:[#allocation58_spill] sm:$0xff] %v9682_v50  ;;  %1503 = vmatpush.bf16.msra.mxu2 %v9471_v63  ;;  %1516 = vmatpush.bf16.msra.mxu3 %v9474_v35 }
  0xca   :  { %12358 = vst [vmem:[#allocation59_spill] sm:$0xff] %v9687_v10 }
  0xcb   :  { %v596_v49 = vpop.f32.mrf.mxu2  ;;  %v625_v0 = vpop.f32.mrf.mxu3  ;;  %1478 = vmatpush.bf16.msra.mxu0 %v9478_v8  ;;  %1491 = vmatpush.bf16.msra.mxu1 %v9480_v9 }
  0xcc   :  { %v9691_v31 = vadd.f32 %v596_v49, %v9682_v50  ;;  %v9693_v32 = vpop.f32.mrf.mxu0  ;;  %v9696_v58 = vadd.f32 %v625_v0, %v9687_v10  ;;  %v9698_v51 = vpop.f32.mrf.mxu1 }
  0xcd   :  { %12360 = vst [vmem:[#allocation61_spill] sm:$0xff] %v9693_v32  ;;  %1504 = vmatpush.bf16.msra.mxu2 %v9483_v15  ;;  %1517 = vmatpush.bf16.msra.mxu3 %v9485_v23 }
  0xce   :  { %12359 = vst [vmem:[#allocation60_spill] sm:$0xff] %v9691_v31 }
  0xcf   :  { %12361 = vst [vmem:[#allocation62_spill] sm:$0xff] %v9696_v58  ;;  %1479 = vmatpush.bf16.msra.mxu0 %v9488_v29  ;;  %1492 = vmatpush.bf16.msra.mxu1 %v9492_v37 }
  0xd0   :  { %12362 = vst [vmem:[#allocation63_spill] sm:$0xff] %v9698_v51 }
  0xd1   :  { %1505 = vmatpush.bf16.msra.mxu2 %v9494_v38  ;;  %1518 = vmatpush.bf16.msra.mxu3 %v9497_v39 }
  0xd3   :  { %v9707_v49 = vpop.f32.mrf.mxu2  ;;  %v9710_v0 = vpop.f32.mrf.mxu3  ;;  %1480 = vmatpush.bf16.msra.mxu0 %v9504_v46  ;;  %1493 = vmatpush.bf16.msra.mxu1 %v9508_v52 }
  0xd4   :  { %12363 = vst [vmem:[#allocation64_spill] sm:$0xff] %v9707_v49  ;;  %v543_v51 = vpop.f32.mrf.mxu0  ;;  %v572_v31 = vpop.f32.mrf.mxu1 }
  0xd5   :  { %12364 = vst [vmem:[#allocation65_spill] sm:$0xff] %v9710_v0  ;;  %v9713_v32 = vadd.f32 %v543_v51, %v9656_v43  ;;  %v9717_v58 = vadd.f32 %v572_v31, %v9662_v48  ;;  %1506 = vmatpush.bf16.msra.mxu2 %v9510_v53  ;;  %1519 = vmatpush.bf16.msra.mxu3 %v9514_v59 }
  0xd7   :  { %12365 = vst [vmem:[#allocation66_spill] sm:$0xff] %v9713_v32  ;;  %1537 = vmatpush.bf16.msrb.mxu0 %v9518_v1  ;;  %1550 = vmatpush.bf16.msrb.mxu1 %v9520_v2 }
  0xd8   :  { %12366 = vst [vmem:[#allocation67_spill] sm:$0xff] %v9717_v58 }
  0xd9   :  { %1563 = vmatpush.bf16.msrb.mxu2 %v9523_v19  ;;  %1576 = vmatpush.bf16.msrb.mxu3 %v9527_v17 }
  0xdb   :  { %v601_v51 = vpop.f32.mrf.mxu2  ;;  %1538 = vmatpush.bf16.msrb.mxu0 %v9529_v18  ;;  %v630_v58 = vpop.f32.mrf.mxu3  ;;  %1551 = vmatpush.bf16.msrb.mxu1 %v9532_v28  ;;  %v12374_v28 = vld [vmem:[#allocation30_spill] sm:$0xff] }
  0xdc   :  { %v9728_v31 = vadd.f32 %v601_v51, %v9682_v50  ;;  %v9730_v32 = vpop.f32.mrf.mxu0  ;;  %v9735_v49 = vadd.f32 %v630_v58, %v9687_v10  ;;  %v9737_v0 = vpop.f32.mrf.mxu1  ;;  %v12371_v51 = vld [vmem:[#allocation28_spill] sm:$0xff]  ;;  %v12385_v18 = vld [vmem:[#allocation38_spill] sm:$0xff] }
  0xdd   :  { %12368 = vst [vmem:[#allocation69_spill] sm:$0xff] %v9730_v32  ;;  %1564 = vmatpush.bf16.msrb.mxu2 %v9535_v41  ;;  %1577 = vmatpush.bf16.msrb.mxu3 %v9537_v42 }
  0xde   :  { %12367 = vst [vmem:[#allocation68_spill] sm:$0xff] %v9728_v31  ;;  %v12372_v31 = vld [vmem:[#allocation29_spill] sm:$0xff] }
  0xdf   :  { %12369 = vst [vmem:[#allocation70_spill] sm:$0xff] %v9735_v49  ;;  %1539 = vmatpush.bf16.msrb.mxu0 %v9541_v57  ;;  %1552 = vmatpush.bf16.msrb.mxu1 %v9543_v60  ;;  %v12376_v49 = vld [vmem:[#allocation31_spill] sm:$0xff]  ;;  %v12379_v60 = vld [vmem:[#allocation33_spill] sm:$0xff] }
  0xe0   :  { %12370 = vst [vmem:[#allocation71_spill] sm:$0xff] %v9737_v0  ;;  %v12377_v0 = vld [vmem:[#allocation32_spill] sm:$0xff] }
  0xe1   :  { %1565 = vmatpush.bf16.msrb.mxu2 %v12371_v51  ;;  %1578 = vmatpush.bf16.msrb.mxu3 %v12372_v31  ;;  %v12381_v31 = vld [vmem:[#allocation34_spill] sm:$0xff] }
  0xe3   :  { %v9744_v32 = vpop.f32.mrf.mxu2  ;;  %1540 = vmatpush.bf16.msrb.mxu0 %v12374_v28  ;;  %v9747_v41 = vpop.f32.mrf.mxu3  ;;  %1553 = vmatpush.bf16.msrb.mxu1 %v12376_v49  ;;  %v12383_v28 = vld [vmem:[#allocation36_spill] sm:$0xff] }
  0xe4   :  { %12373 = vst [vmem:[#allocation72_spill] sm:$0xff] %v9744_v32  ;;  %v548_v58 = vpop.f32.mrf.mxu0  ;;  %v577_v57 = vpop.f32.mrf.mxu1  ;;  %v12382_v32 = vld [vmem:[#allocation35_spill] sm:$0xff] }
  0xe5   :  { %12375 = vst [vmem:[#allocation73_spill] sm:$0xff] %v9747_v41  ;;  %1566 = vmatpush.bf16.msrb.mxu2 %v12377_v0  ;;  %v9752_v42 = vadd.f32 %v548_v58, %v9656_v43  ;;  %1579 = vmatpush.bf16.msrb.mxu3 %v12379_v60  ;;  %v9756_v51 = vadd.f32 %v577_v57, %v9662_v48  ;;  %v12384_v41 = vld [vmem:[#allocation37_spill] sm:$0xff]  ;;  %v12388_v57 = vld [vmem:[#allocation40_spill] sm:$0xff] }
  0xe7   :  { %12378 = vst [vmem:[#allocation74_spill] sm:$0xff] %v9752_v42  ;;  %1541 = vmatpush.bf16.msrb.mxu0 %v12381_v31  ;;  %1554 = vmatpush.bf16.msrb.mxu1 %v12382_v32 }
  0xe8   :  { %12380 = vst [vmem:[#allocation75_spill] sm:$0xff] %v9756_v51 }
  0xe9   :  { %1567 = vmatpush.bf16.msrb.mxu2 %v12383_v28  ;;  %1580 = vmatpush.bf16.msrb.mxu3 %v12384_v41 }
  0xeb   :  { %v606_v49 = vpop.f32.mrf.mxu2  ;;  %1542 = vmatpush.bf16.msrb.mxu0 %v12385_v18  ;;  %v635_v42 = vpop.f32.mrf.mxu3  ;;  %1555 = vmatpush.bf16.msrb.mxu1 %v9584_v55 }
  0xec   :  { %v9764_v58 = vadd.f32 %v606_v49, %v9682_v50  ;;  %v9766_v0 = vpop.f32.mrf.mxu0  ;;  %v9771_v51 = vadd.f32 %v635_v42, %v9687_v10  ;;  %v9773_v32 = vpop.f32.mrf.mxu1  ;;  %v9780_v49 = vperm.slane %v9650_v3, 4 }
  0xed   :  { %12387 = vst [vmem:[#allocation77_spill] sm:$0xff] %v9766_v0  ;;  %1568 = vmatpush.bf16.msrb.mxu2 %v12388_v57  ;;  %1581 = vmatpush.bf16.msrb.mxu3 %v9589_v13  ;;  %v9784_v0 = vperm.slane %v9650_v3, 5 }
  0xee   :  { %12386 = vst [vmem:[#allocation76_spill] sm:$0xff] %v9764_v58 }
  0xef   :  { %12389 = vst [vmem:[#allocation78_spill] sm:$0xff] %v9771_v51  ;;  %1543 = vmatpush.bf16.msrb.mxu0 %v9592_v14  ;;  %1556 = vmatpush.bf16.msrb.mxu1 %v9596_v27 }
  0xf0   :  { %12390 = vst [vmem:[#allocation79_spill] sm:$0xff] %v9773_v32 }
  0xf1   :  { %1569 = vmatpush.bf16.msrb.mxu2 %v9598_v33  ;;  %12391 = vst [vmem:[#allocation80_spill] sm:$0xff] %v9780_v49  ;;  %1582 = vmatpush.bf16.msrb.mxu3 %v9601_v5 }
  0xf2   :  { %12392 = vst [vmem:[#allocation81_spill] sm:$0xff] %v9784_v0 }
  0xf3   :  { %v9786_v42 = vpop.f32.mrf.mxu2  ;;  %1544 = vmatpush.bf16.msrb.mxu0 %v9604_v61  ;;  %v9789_v32 = vpop.f32.mrf.mxu3  ;;  %1557 = vmatpush.bf16.msrb.mxu1 %v9608_v6  ;;  %v9804_v61 = vperm.slane %v9650_v3, 7 }
  0xf4   :  { %12393 = vst [vmem:[#allocation82_spill] sm:$0xff] %v9786_v42  ;;  %v649_v58 = vpop.f32.mrf.mxu0  ;;  %v678_v33 = vpop.f32.mrf.mxu1  ;;  %v9801_v42 = vperm.slane %v9650_v3, 6 }
  0xf5   :  { %12394 = vst [vmem:[#allocation83_spill] sm:$0xff] %v9789_v32  ;;  %1570 = vmatpush.bf16.msrb.mxu2 %v9610_v4  ;;  %v9794_v51 = vadd.f32 %v649_v58, %v9780_v49  ;;  %1583 = vmatpush.bf16.msrb.mxu3 %v9614_v47  ;;  %v9798_v5 = vadd.f32 %v678_v33, %v9784_v0 }
  0xf6   :  { %12397 = vst [vmem:[#allocation86_spill] sm:$0xff] %v9801_v42 }
  0xf7   :  { %12395 = vst [vmem:[#allocation84_spill] sm:$0xff] %v9794_v51 }
  0xf8   :  { %12396 = vst [vmem:[#allocation85_spill] sm:$0xff] %v9798_v5 }
  0xf9   :  { %12398 = vst [vmem:[#allocation87_spill] sm:$0xff] %v9804_v61 }
  0xfb   :  { %v707_v32 = vpop.f32.mrf.mxu2  ;;  %v736_v4 = vpop.f32.mrf.mxu3 }
  0xfc   :  { %v9807_v6 = vadd.f32 %v707_v32, %v9801_v42  ;;  %v9809_v27 = vpop.f32.mrf.mxu0  ;;  %v9812_v58 = vadd.f32 %v736_v4, %v9804_v61  ;;  %v9814_v51 = vpop.f32.mrf.mxu1 }
  0xfd   :  { %12400 = vst [vmem:[#allocation89_spill] sm:$0xff] %v9809_v27 }
  0xfe   :  { %12399 = vst [vmem:[#allocation88_spill] sm:$0xff] %v9807_v6 }
  0xff   :  { %12401 = vst [vmem:[#allocation90_spill] sm:$0xff] %v9812_v58 }
 0x100   :  { %12402 = vst [vmem:[#allocation91_spill] sm:$0xff] %v9814_v51 }
 0x103   :  { %v9816_v33 = vpop.f32.mrf.mxu2  ;;  %v9818_v5 = vpop.f32.mrf.mxu3 }
 0x104   :  { %12403 = vst [vmem:[#allocation92_spill] sm:$0xff] %v9816_v33  ;;  %v654_v47 = vpop.f32.mrf.mxu0  ;;  %v683_v14 = vpop.f32.mrf.mxu1 }
 0x105   :  { %12404 = vst [vmem:[#allocation93_spill] sm:$0xff] %v9818_v5  ;;  %v9821_v3 = vadd.f32 %v654_v47, %v9780_v49  ;;  %v9824_v32 = vadd.f32 %v683_v14, %v9784_v0 }
 0x107   :  { %12405 = vst [vmem:[#allocation94_spill] sm:$0xff] %v9821_v3 }
 0x108   :  { %12406 = vst [vmem:[#allocation95_spill] sm:$0xff] %v9824_v32 }
 0x10b   :  { %v712_v6 = vpop.f32.mrf.mxu2  ;;  %v741_v4 = vpop.f32.mrf.mxu3 }
 0x10c   :  { %v9827_v27 = vadd.f32 %v712_v6, %v9801_v42  ;;  %v9829_v58 = vpop.f32.mrf.mxu0  ;;  %v9832_v51 = vadd.f32 %v741_v4, %v9804_v61  ;;  %v9834_v33 = vpop.f32.mrf.mxu1 }
 0x10d   :  { %12408 = vst [vmem:[#allocation97_spill] sm:$0xff] %v9829_v58 }
 0x10e   :  { %12407 = vst [vmem:[#allocation96_spill] sm:$0xff] %v9827_v27 }
 0x10f   :  { %12409 = vst [vmem:[#allocation98_spill] sm:$0xff] %v9832_v51 }
 0x110   :  { %12410 = vst [vmem:[#allocation99_spill] sm:$0xff] %v9834_v33 }
 0x113   :  { %v9836_v5 = vpop.f32.mrf.mxu2  ;;  %v9838_v47 = vpop.f32.mrf.mxu3 }
 0x114   :  { %12411 = vst [vmem:[#allocation100_spill] sm:$0xff] %v9836_v5  ;;  %v659_v3 = vpop.f32.mrf.mxu0  ;;  %v688_v32 = vpop.f32.mrf.mxu1 }
 0x115   :  { %12412 = vst [vmem:[#allocation101_spill] sm:$0xff] %v9838_v47  ;;  %v9841_v14 = vadd.f32 %v659_v3, %v9780_v49  ;;  %v9844_v6 = vadd.f32 %v688_v32, %v9784_v0 }
 0x117   :  { %12413 = vst [vmem:[#allocation102_spill] sm:$0xff] %v9841_v14 }
 0x118   :  { %12414 = vst [vmem:[#allocation103_spill] sm:$0xff] %v9844_v6 }
 0x11b   :  { %v717_v27 = vpop.f32.mrf.mxu2  ;;  %v746_v4 = vpop.f32.mrf.mxu3 }
 0x11c   :  { %v9847_v58 = vadd.f32 %v717_v27, %v9801_v42  ;;  %v9849_v51 = vpop.f32.mrf.mxu0  ;;  %v9852_v33 = vadd.f32 %v746_v4, %v9804_v61  ;;  %v9854_v5 = vpop.f32.mrf.mxu1 }
 0x11d   :  { %12416 = vst [vmem:[#allocation105_spill] sm:$0xff] %v9849_v51 }
 0x11e   :  { %12415 = vst [vmem:[#allocation104_spill] sm:$0xff] %v9847_v58 }
 0x11f   :  { %12417 = vst [vmem:[#allocation106_spill] sm:$0xff] %v9852_v33 }
 0x120   :  { %12418 = vst [vmem:[#allocation107_spill] sm:$0xff] %v9854_v5 }
 0x123   :  { %v9856_v47 = vpop.f32.mrf.mxu2  ;;  %v9858_v3 = vpop.f32.mrf.mxu3 }
 0x124   :  { %12419 = vst [vmem:[#allocation108_spill] sm:$0xff] %v9856_v47  ;;  %v664_v14 = vpop.f32.mrf.mxu0  ;;  %v693_v6 = vpop.f32.mrf.mxu1 }
 0x125   :  { %12420 = vst [vmem:[#allocation109_spill] sm:$0xff] %v9858_v3  ;;  %v9861_v32 = vadd.f32 %v664_v14, %v9780_v49  ;;  %v9864_v27 = vadd.f32 %v693_v6, %v9784_v0  ;;  %v534_v3 = vadd.f32 %v9623_v20, %v9656_v43  ;;  %v563_v14 = vadd.f32 %v9625_v24, %v9662_v48 }
 0x127   :  { %12421 = vst [vmem:[#allocation110_spill] sm:$0xff] %v9861_v32 }
 0x128   :  { %12422 = vst [vmem:[#allocation111_spill] sm:$0xff] %v9864_v27 }
 0x12b   :  { %v722_v58 = vpop.f32.mrf.mxu2  ;;  %v751_v4 = vpop.f32.mrf.mxu3 }
 0x12c   :  { %v9867_v51 = vadd.f32 %v722_v58, %v9801_v42  ;;  %v666_v33 = vpop.f32.mrf.mxu0  ;;  %v9870_v5 = vadd.f32 %v751_v4, %v9804_v61  ;;  %v695_v47 = vpop.f32.mrf.mxu1  ;;  %v621_v4 = vadd.f32 %v9637_v56, %v9687_v10 }
 0x12e   :  { %12423 = vst [vmem:[#allocation112_spill] sm:$0xff] %v9867_v51 }
 0x12f   :  { %12424 = vst [vmem:[#allocation113_spill] sm:$0xff] %v9870_v5 }
 0x133   :  { %v9874_v13 = vpop.f32.mrf.mxu2  ;;  %v753_v6 = vpop.f32.mrf.mxu3 }
 0x134   :  { %v1061_v27 = vpop.f32.mrf.mxu0  ;;  %v1074_v57 = vpop.f32.mrf.mxu1 }
 0x135   :  { %v1104_v32 = vadd.f32 %v1061_v27, %v534_v3  ;;  %v1105_v58 = vadd.f32 %v1074_v57, %v563_v14  ;;  %v667_v57 = vadd.f32 %v666_v33, %v9780_v49 }
 0x137   :  { %v7507_v51 = vmul.f32 -1.442695, %v1104_v32  ;;  %v7508_v55 = vmul.f32 -1.442695, %v1105_v58 }
 0x139   :  { %8704 = vpow2.f32 %v7507_v51 }
 0x13a   :  { %8706 = vpow2.f32 %v7508_v55  ;;  %v696_v55 = vadd.f32 %v695_v47, %v9784_v0  ;;  %v754_v47 = vadd.f32 %v753_v6, %v9804_v61 }
 0x13b   :  { %v1087_v5 = vpop.f32.mrf.mxu2  ;;  %v1100_v18 = vpop.f32.mrf.mxu3 }
 0x13c   :  { %v1063_v20 = vpop.f32.mrf.mxu0  ;;  %v1107_v43 = vadd.f32 %v1100_v18, %v621_v4  ;;  %v1076_v41 = vpop.f32.mrf.mxu1  ;;  %v592_v18 = vadd.f32 %v9634_v26, %v9682_v50 }
 0x13e   :  { %v7509_v31 = vmul.f32 -1.442695, %v1107_v43  ;;  %v1106_v58 = vadd.f32 %v1087_v5, %v592_v18 }
 0x13f   :  { %v8705_v28 = vpop.eup %8704 }
 0x140   :  { %v8707_v24 = vpop.eup %8706  ;;  %v1334_v48 = vadd.f32 1.0, %v8705_v28  ;;  %8708 = vpow2.f32 %v7509_v31 }
 0x141   :  { %v1353_v60 = vadd.f32 1.0, %v8707_v24 }
 0x142   :  { %8710 = vrcp.f32 %v1334_v48  ;;  %vm1340_vm1 = vweird.f32 %v1334_v48 }
 0x143   :  { %8712 = vrcp.f32 %v1353_v60  ;;  %v1089_v51 = vpop.f32.mrf.mxu2  ;;  %v1102_v3 = vpop.f32.mrf.mxu3  ;;  %v1363_v18 = vand.u32 2147483647, %v1353_v60  ;;  %vm1359_vm3 = vweird.f32 %v1353_v60 }
 0x144   :  { %v1284_v56 = vpop.f32.mrf.mxu0  ;;  %v1297_v27 = vpop.f32.mrf.mxu1  ;;  %v1344_v51 = vand.u32 2147483647, %v1334_v48  ;;  %v1365_v3 = vand.u32 2147483648, %v1353_v60 }
 0x145   :  { %v1327_v32 = vadd.f32 %v1284_v56, %v667_v57  ;;  %v1328_v41 = vadd.f32 %v1297_v27, %v696_v55  ;;  %v1346_v56 = vand.u32 2147483648, %v1334_v48  ;;  %vm1364_vm7 = vcmp.eq.f32.partialorder %v1363_v18, 8.507059e+37 }
 0x146   :  { %v8709_v43 = vpop.eup %8708  ;;  %vm1345_vm4 = vcmp.eq.f32.partialorder %v1344_v51, 8.507059e+37 }
 0x147   :  { %v7510_v14 = vmul.f32 -1.442695, %v1327_v32  ;;  %v9884_v31 = vadd.f32 1.0, %v8709_v43  ;;  %v7511_v4 = vmul.f32 -1.442695, %v1328_v41  ;;  %v1347_v61 = vor.u32 1.1754944e-38, %v1346_v56 }
 0x148   :  { %v8711_v28 = vpop.eup %8710 }
 0x149   :  { %v8713_v33 = vpop.eup %8712  ;;  %v1336_v20 = vmul.f32 %v8711_v28, %v1334_v48  ;;  %8714 = vpow2.f32 %v7510_v14  ;;  %vm1341_vm0 = vweird.f32 %v8711_v28  ;;  %vm1379_vm9 = vweird.f32 %v9884_v31 }
 0x14a   :  { %v1355_v24 = vmul.f32 %v8713_v33, %v1353_v60  ;;  %8716 = vrcp.f32 %v9884_v31  ;;  %vm1360_vm2 = vweird.f32 %v8713_v33  ;;  %vm1342_vm5 = vmor %vm1340_vm1, %vm1341_vm0 }
 0x14b   :  { %v1337_v57 = vsub.f32 1.0, %v1336_v20  ;;  %8718 = vpow2.f32 %v7511_v4  ;;  %v1310_v26 = vpop.f32.mrf.mxu2  ;;  %v1323_v5 = vpop.f32.mrf.mxu3  ;;  %vm1361_vm6 = vmor %vm1359_vm3, %vm1360_vm2 }
 0x14c   :  { %v1356_v55 = vsub.f32 1.0, %v1355_v24  ;;  %8720 = vtanh.f32 %v1106_v58  ;;  %v1286_v32 = vpop.f32.mrf.mxu0  ;;  %v1330_v41 = vadd.f32 %v1323_v5, %v754_v47  ;;  %v1299_v43 = vpop.f32.mrf.mxu1  ;;  %v1366_v24 = vor.u32 1.1754944e-38, %v1365_v3 }
 0x14d   :  { %v1338_v27 = vmul.f32 %v8711_v28, %v1337_v57 }
 0x14e   :  { %v1357_v14 = vmul.f32 %v8713_v33, %v1356_v55  ;;  %v7512_v4 = vmul.f32 -1.442695, %v1330_v41 }
 0x14f   :  { %v8715_v0 = vpop.eup %8714  ;;  %v1339_v6 = vadd.f32 %v8711_v28, %v1338_v27 }
 0x150   :  { %v8717_v20 = vpop.eup %8716  ;;  %v1358_v58 = vadd.f32 %v8713_v33, %v1357_v14  ;;  %v1397_v49 = vadd.f32 1.0, %v8715_v0  ;;  %8722 = vpow2.f32 %v7512_v4 }
 0x151   :  { %v8719_v32 = vpop.eup %8718  ;;  %v1343_v57 = vsel %vm1342_vm5, %v8711_v28, %v1339_v6  ;;  %v1375_v47 = vmul.f32 %v8717_v20, %v9884_v31  ;;  %v725_v28 = vadd.f32 %v9874_v13, %v9801_v42  ;;  %vm1380_vm8 = vweird.f32 %v8717_v20  ;;  %v12455_v42 = vld [vmem:[#allocation45_spill] sm:$0xff] }
 0x152   :  { %v8721_v48 = vpop.eup %8720  ;;  %v1348_v55 = vsel %vm1345_vm4, %v1347_v61, %v1343_v57  ;;  %v1362_v5 = vsel %vm1361_vm6, %v8713_v33, %v1358_v58  ;;  %8724 = vrcp.f32 %v1397_v49  ;;  %v1416_v60 = vadd.f32 1.0, %v8719_v32  ;;  %vm9900_vm10 = vmor %vm1379_vm9, %vm1380_vm8 }
 0x153   :  { %v1367_v51 = vsel %vm1364_vm7, %v1366_v24, %v1362_v5  ;;  %v1390_v27 = vmul.f32 %v8721_v48, %v1348_v55  ;;  %v1376_v41 = vsub.f32 1.0, %v1375_v47  ;;  %v1312_v3 = vpop.f32.mrf.mxu2  ;;  %v1325_v56 = vpop.f32.mrf.mxu3  ;;  %v1329_v33 = vadd.f32 %v1310_v26, %v725_v28 }
 0x154   :  { %v1389_v43 = vmul.f32 0.0, %v1367_v51  ;;  %8726 = vrcp.f32 %v1416_v60  ;;  %v1385_v24 = vand.u32 2147483648, %v9884_v31  ;;  %v1383_v32 = vand.u32 2147483647, %v9884_v31 }
 0x155   :  { %v1377_v0 = vmul.f32 %v8717_v20, %v1376_v41  ;;  %v1407_v55 = vand.u32 2147483647, %v1397_v49  ;;  %v1409_v5 = vand.u32 2147483648, %v1397_v49  ;;  %v1428_v3 = vand.u32 2147483648, %v1416_v60 }
 0x156   :  { %v9891_v18 = vadd.f32 %v1390_v27, %v1389_v43  ;;  %v8723_v14 = vpop.eup %8722  ;;  %v1386_v51 = vor.u32 1.1754944e-38, %v1385_v24  ;;  %vm1384_vm12 = vcmp.eq.f32.partialorder %v1383_v32, 8.507059e+37  ;;  %vm1403_vm13 = vweird.f32 %v1397_v49 }
 0x157   :  { %v1378_v6 = vadd.f32 %v8717_v20, %v1377_v0  ;;  %v9894_v4 = vadd.f32 1.0, %v8723_v14  ;;  %v1426_v43 = vand.u32 2147483647, %v1416_v60  ;;  %vm1422_vm15 = vweird.f32 %v1416_v60 }
 0x158   :  { %v8725_v61 = vpop.eup %8724  ;;  %8728 = vtanh.f32 %v9891_v18  ;;  %vm1408_vm1 = vcmp.eq.f32.partialorder %v1407_v55, 8.507059e+37  ;;  %v1429_v13 = vor.u32 1.1754944e-38, %v1428_v3 }
 0x159   :  { %v1399_v58 = vmul.f32 %v8725_v61, %v1397_v49  ;;  %8730 = vrcp.f32 %v9894_v4  ;;  %v1382_v26 = vsel %vm9900_vm10, %v8717_v20, %v1378_v6  ;;  %vm1404_vm11 = vweird.f32 %v8725_v61 }
 0x15a   :  { %v8727_v57 = vpop.eup %8726  ;;  %8732 = vtanh.f32 %v1329_v33  ;;  %v1387_v56 = vsel %vm1384_vm12, %v1386_v51, %v1382_v26  ;;  %vm1405_vm0 = vmor %vm1403_vm13, %vm1404_vm11  ;;  %v1410_v20 = vor.u32 1.1754944e-38, %v1409_v5  ;;  %vm1427_vm3 = vcmp.eq.f32.partialorder %v1426_v43, 8.507059e+37  ;;  %v12428_v43 = vld [vmem:[#allocation14_spill] sm:$0xff] }
 0x15b   :  { %v1400_v47 = vsub.f32 1.0, %v1399_v58  ;;  %v1418_v48 = vmul.f32 %v8727_v57, %v1416_v60  ;;  %vm1423_vm14 = vweird.f32 %v8727_v57  ;;  %vm1442_vm5 = vweird.f32 %v9894_v4 }
 0x15c   :  { %vm1424_vm2 = vmor %vm1422_vm15, %vm1423_vm14 }
 0x15d   :  { %v1419_v27 = vsub.f32 1.0, %v1418_v48  ;;  %v1401_v41 = vmul.f32 %v8725_v61, %v1400_v47 }
 0x15e   :  { %v8729_v31 = vpop.eup %8728 }
 0x15f   :  { %v1420_v0 = vmul.f32 %v8727_v57, %v1419_v27  ;;  %v1402_v28 = vadd.f32 %v8725_v61, %v1401_v41  ;;  %v9906_v14 = vmul.f32 %v8729_v31, %v1387_v56  ;;  %v8731_v58 = vpop.eup %8730  ;;  %v1448_v27 = vand.u32 2147483648, %v9894_v4 }
 0x160   :  { %v1438_v24 = vmul.f32 %v8731_v58, %v9894_v4  ;;  %v8733_v49 = vpop.eup %8732  ;;  %vm1443_vm4 = vweird.f32 %v8731_v58  ;;  %v1446_v41 = vand.u32 2147483647, %v9894_v4 }
 0x161   :  { %12427 = vst [vmem:[#allocation114_spill] sm:$0xff] %v9906_v14  ;;  %v1406_v6 = vsel %vm1405_vm0, %v8725_v61, %v1402_v28  ;;  %v1421_v33 = vadd.f32 %v8727_v57, %v1420_v0  ;;  %v1472_v32 = vpack.c.bf16 %v9906_v14, %v9906_v14  ;;  %vm1444_vm6 = vmor %vm1442_vm5, %vm1443_vm4  ;;  %v1449_v3 = vor.u32 1.1754944e-38, %v1448_v27  ;;  %v12446_v27 = vld [vmem:[#allocation36_spill] sm:$0xff] }
 0x162   :  { %v1411_v47 = vsel %vm1408_vm1, %v1410_v20, %v1406_v6  ;;  %v1439_v51 = vsub.f32 1.0, %v1438_v24  ;;  %vm1447_vm7 = vcmp.eq.f32.partialorder %v1446_v41, 8.507059e+37  ;;  %v12431_v20 = vld [vmem:[#allocation16_spill] sm:$0xff]  ;;  %v12432_v6 = vld [vmem:[#allocation22_spill] sm:$0xff]  ;;  %v12447_v41 = vld [vmem:[#allocation37_spill] sm:$0xff] }
 0x163   :  { %v1425_v48 = vsel %vm1424_vm2, %v8727_v57, %v1421_v33  ;;  %v1453_v26 = vmul.f32 %v8733_v49, %v1411_v47  ;;  %1481 = vmatmul.bf16.vlgmr.msra.gmra.mxu0 %v1472_v32  ;;  %1494 = vmatmul.bf16.vlgmr.msra.gmra.mxu1 %v1472_v32  ;;  %v12433_v33 = vld [vmem:[#allocation23_spill] sm:$0xff]  ;;  %v12434_v24 = vld [vmem:[#allocation24_spill] sm:$0xff]  ;;  %v12436_v49 = vld [vmem:[#allocation26_spill] sm:$0xff] }
 0x164   :  { %v1430_v60 = vsel %vm1427_vm3, %v1429_v13, %v1425_v48  ;;  %1507 = vmatmul.bf16.vlgmr.msra.gmra.mxu2 %v1472_v32  ;;  %1520 = vmatmul.bf16.vlgmr.msra.gmra.mxu3 %v1472_v32  ;;  %v1440_v55 = vmul.f32 %v8731_v58, %v1439_v51  ;;  %v12435_v32 = vld [vmem:[#allocation25_spill] sm:$0xff]  ;;  %v12437_v13 = vld [vmem:[#allocation27_spill] sm:$0xff]  ;;  %v12438_v47 = vld [vmem:[#allocation28_spill] sm:$0xff] }
 0x165   :  { %v1452_v61 = vmul.f32 0.0, %v1430_v60  ;;  %1735 = vmatpush.bf16.msra.mxu0 %v9406_v7  ;;  %1748 = vmatpush.bf16.msra.mxu1 %v9408_v11  ;;  %v12439_v48 = vld [vmem:[#allocation29_spill] sm:$0xff]  ;;  %v12441_v51 = vld [vmem:[#allocation31_spill] sm:$0xff]  ;;  %v12442_v60 = vld [vmem:[#allocation32_spill] sm:$0xff] }
 0x166   :  { %1761 = vmatpush.bf16.msra.mxu2 %v9421_v25  ;;  %1774 = vmatpush.bf16.msra.mxu3 %v9410_v12  ;;  %v1441_v57 = vadd.f32 %v8731_v58, %v1440_v55  ;;  %v12444_v55 = vld [vmem:[#allocation34_spill] sm:$0xff]  ;;  %v12454_v14 = vld [vmem:[#allocation44_spill] sm:$0xff] }
 0x167   :  { %v9915_v5 = vadd.f32 %v1453_v26, %v1452_v61  ;;  %v12440_v26 = vld [vmem:[#allocation30_spill] sm:$0xff]  ;;  %v12443_v61 = vld [vmem:[#allocation33_spill] sm:$0xff] }
 0x168   :  { %v1445_v31 = vsel %vm1444_vm6, %v8731_v58, %v1441_v57  ;;  %v12430_v58 = vld [vmem:[#allocation15_spill] sm:$0xff] }
 0x169   :  { %8734 = vtanh.f32 %v9915_v5  ;;  %1736 = vmatpush.bf16.msra.mxu0 %v9413_v16  ;;  %1749 = vmatpush.bf16.msra.mxu1 %v9417_v21  ;;  %v1450_v0 = vsel %vm1447_vm7, %v1449_v3, %v1445_v31  ;;  %v12445_v57 = vld [vmem:[#allocation35_spill] sm:$0xff]  ;;  %v12448_v31 = vld [vmem:[#allocation38_spill] sm:$0xff] }
 0x16a   :  { %1762 = vmatpush.bf16.msra.mxu2 %v9443_v40  ;;  %1775 = vmatpush.bf16.msra.mxu3 %v9419_v22  ;;  %v12449_v3 = vld [vmem:[#allocation39_spill] sm:$0xff] }
 0x16d   :  { %1737 = vmatpush.bf16.msra.mxu0 %v9436_v30  ;;  %1750 = vmatpush.bf16.msra.mxu1 %v9438_v34 }
 0x16e   :  { %1763 = vmatpush.bf16.msra.mxu2 %v12428_v43  ;;  %1776 = vmatpush.bf16.msra.mxu3 %v9440_v36 }
 0x16f   :  { %v8735_v56 = vpop.eup %8734 }
 0x170   :  { %v9929_v28 = vmul.f32 %v8735_v56, %v1450_v0  ;;  %v12450_v56 = vld [vmem:[#allocation40_spill] sm:$0xff]  ;;  %v12451_v0 = vld [vmem:[#allocation41_spill] sm:$0xff] }
 0x171   :  { %1738 = vmatpush.bf16.msra.mxu0 %v9447_v44  ;;  %1751 = vmatpush.bf16.msra.mxu1 %v9449_v45 }
 0x172   :  { %12429 = vst [vmem:[#allocation14_spill] sm:$0xff] %v9929_v28  ;;  %v1536_v4 = vpack.c.bf16 %v9929_v28, %v9929_v28  ;;  %1764 = vmatpush.bf16.msra.mxu2 %v9461_v54  ;;  %1777 = vmatpush.bf16.msra.mxu3 %v12430_v58  ;;  %v12453_v28 = vld [vmem:[#allocation43_spill] sm:$0xff] }
 0x174   :  { %1545 = vmatmul.bf16.vlgmr.msrb.gmra.mxu0 %v1536_v4  ;;  %1558 = vmatmul.bf16.vlgmr.msrb.gmra.mxu1 %v1536_v4 }
 0x175   :  { %1571 = vmatmul.bf16.vlgmr.msrb.gmra.mxu2 %v1536_v4  ;;  %1584 = vmatmul.bf16.vlgmr.msrb.gmra.mxu3 %v1536_v4  ;;  %v12452_v4 = vld [vmem:[#allocation42_spill] sm:$0xff] }
 0x176   :  { %1739 = vmatpush.bf16.msra.mxu0 %v12431_v20  ;;  %1752 = vmatpush.bf16.msra.mxu1 %v9469_v62 }
 0x177   :  { %1765 = vmatpush.bf16.msra.mxu2 %v9471_v63  ;;  %1778 = vmatpush.bf16.msra.mxu3 %v9474_v35 }
 0x17a   :  { %1740 = vmatpush.bf16.msra.mxu0 %v9478_v8  ;;  %1753 = vmatpush.bf16.msra.mxu1 %v9480_v9 }
 0x17b   :  { %1766 = vmatpush.bf16.msra.mxu2 %v9483_v15  ;;  %1779 = vmatpush.bf16.msra.mxu3 %v9485_v23 }
 0x17e   :  { %1741 = vmatpush.bf16.msra.mxu0 %v9488_v29  ;;  %1754 = vmatpush.bf16.msra.mxu1 %v9492_v37 }
 0x17f   :  { %1767 = vmatpush.bf16.msra.mxu2 %v9494_v38  ;;  %1780 = vmatpush.bf16.msra.mxu3 %v9497_v39 }
 0x182   :  { %1742 = vmatpush.bf16.msra.mxu0 %v9504_v46  ;;  %1755 = vmatpush.bf16.msra.mxu1 %v9508_v52 }
 0x183   :  { %1768 = vmatpush.bf16.msra.mxu2 %v9510_v53  ;;  %1781 = vmatpush.bf16.msra.mxu3 %v9514_v59 }
 0x186   :  { %1799 = vmatpush.bf16.msrb.mxu0 %v9518_v1  ;;  %1812 = vmatpush.bf16.msrb.mxu1 %v9520_v2 }
 0x187   :  { %1825 = vmatpush.bf16.msrb.mxu2 %v9523_v19  ;;  %1838 = vmatpush.bf16.msrb.mxu3 %v9527_v17 }
 0x18a   :  { %1800 = vmatpush.bf16.msrb.mxu0 %v12432_v6  ;;  %1813 = vmatpush.bf16.msrb.mxu1 %v12433_v33 }
 0x18b   :  { %1826 = vmatpush.bf16.msrb.mxu2 %v12434_v24  ;;  %1839 = vmatpush.bf16.msrb.mxu3 %v12435_v32 }
 0x18e   :  { %1801 = vmatpush.bf16.msrb.mxu0 %v12436_v49  ;;  %1814 = vmatpush.bf16.msrb.mxu1 %v12437_v13 }
 0x18f   :  { %1827 = vmatpush.bf16.msrb.mxu2 %v12438_v47  ;;  %1840 = vmatpush.bf16.msrb.mxu3 %v12439_v48 }
 0x192   :  { %1802 = vmatpush.bf16.msrb.mxu0 %v12440_v26  ;;  %1815 = vmatpush.bf16.msrb.mxu1 %v12441_v51 }
 0x193   :  { %1828 = vmatpush.bf16.msrb.mxu2 %v12442_v60  ;;  %1841 = vmatpush.bf16.msrb.mxu3 %v12443_v61  ;;  %v12463_v61 = vld [vmem:[#allocation51_spill] sm:$0xff] }
 0x196   :  { %1803 = vmatpush.bf16.msrb.mxu0 %v12444_v55  ;;  %1816 = vmatpush.bf16.msrb.mxu1 %v12445_v57  ;;  %v12456_v57 = vld [vmem:[#allocation46_spill] sm:$0xff] }
 0x197   :  { %1829 = vmatpush.bf16.msrb.mxu2 %v12446_v27  ;;  %1842 = vmatpush.bf16.msrb.mxu3 %v12447_v41  ;;  %v12457_v27 = vld [vmem:[#allocation47_spill] sm:$0xff]  ;;  %v12458_v41 = vld [vmem:[#allocation48_spill] sm:$0xff] }
 0x19a   :  { %1804 = vmatpush.bf16.msrb.mxu0 %v12448_v31  ;;  %1817 = vmatpush.bf16.msrb.mxu1 %v12449_v3  ;;  %v12459_v31 = vld [vmem:[#allocation49_spill] sm:$0xff]  ;;  %v12460_v3 = vld [vmem:[#allocation52_spill] sm:$0xff] }
 0x19b   :  { %1830 = vmatpush.bf16.msrb.mxu2 %v12450_v56  ;;  %1843 = vmatpush.bf16.msrb.mxu3 %v12451_v0  ;;  %v12461_v56 = vld [vmem:[#allocation50_spill] sm:$0xff] }
 0x19c   :  { %v536_v55 = vadd.f32 %v12461_v56, %v12460_v3  ;;  %v12462_v0 = vld [vmem:[#allocation54_spill] sm:$0xff] }
 0x19e   :  { %1805 = vmatpush.bf16.msrb.mxu0 %v12452_v4  ;;  %1818 = vmatpush.bf16.msrb.mxu1 %v12453_v28  ;;  %v565_v4 = vadd.f32 %v12463_v61, %v12462_v0 }
 0x19f   :  { %1831 = vmatpush.bf16.msrb.mxu2 %v12454_v14  ;;  %1844 = vmatpush.bf16.msrb.mxu3 %v12455_v42 }
 0x1a2   :  { %1806 = vmatpush.bf16.msrb.mxu0 %v12456_v57  ;;  %1819 = vmatpush.bf16.msrb.mxu1 %v12457_v27  ;;  %v12464_v57 = vld [vmem:[#allocation55_spill] sm:$0xff] }
 0x1a3   :  { %1832 = vmatpush.bf16.msrb.mxu2 %v12458_v41  ;;  %1845 = vmatpush.bf16.msrb.mxu3 %v12459_v31  ;;  %v623_v27 = vadd.f32 %v12464_v57, %v9687_v10 }
 0x1e0   :  { %v1482_v60 = vpop.f32.mrf.mxu0  ;;  %v1495_v28 = vpop.f32.mrf.mxu1 }
 0x1e1   :  { %v1525_v51 = vadd.f32 %v1482_v60, %v536_v55  ;;  %v1526_v14 = vadd.f32 %v1495_v28, %v565_v4 }
 0x1e3   :  { %v7513_v26 = vmul.f32 -1.442695, %v1525_v51  ;;  %v7514_v42 = vmul.f32 -1.442695, %v1526_v14 }
 0x1e5   :  { %8736 = vpow2.f32 %v7513_v26  ;;  %v12465_v26 = vld [vmem:[#allocation53_spill] sm:$0xff] }
 0x1e6   :  { %8738 = vpow2.f32 %v7514_v42  ;;  %v594_v51 = vadd.f32 %v12465_v26, %v9682_v50 }
 0x1e7   :  { %v1508_v41 = vpop.f32.mrf.mxu2  ;;  %v1521_v48 = vpop.f32.mrf.mxu3 }
 0x1e8   :  { %v1528_v31 = vadd.f32 %v1521_v48, %v623_v27  ;;  %v1484_v47 = vpop.f32.mrf.mxu0  ;;  %v1497_v13 = vpop.f32.mrf.mxu1  ;;  %v1527_v57 = vadd.f32 %v1508_v41, %v594_v51  ;;  %v12466_v48 = vld [vmem:[#allocation110_spill] sm:$0xff] }
 0x1e9   :  { %v12467_v13 = vld [vmem:[#allocation111_spill] sm:$0xff] }
 0x1ea   :  { %v7515_v56 = vmul.f32 -1.442695, %v1528_v31 }
 0x1eb   :  { %v8737_v3 = vpop.eup %8736 }
 0x1ec   :  { %v8739_v49 = vpop.eup %8738  ;;  %v1596_v61 = vadd.f32 1.0, %v8737_v3  ;;  %8740 = vpow2.f32 %v7515_v56 }
 0x1ed   :  { %v1615_v0 = vadd.f32 1.0, %v8739_v49 }
 0x1ee   :  { %8742 = vrcp.f32 %v1596_v61  ;;  %v1606_v26 = vand.u32 2147483647, %v1596_v61  ;;  %v1608_v51 = vand.u32 2147483648, %v1596_v61  ;;  %vm1602_vm11 = vweird.f32 %v1596_v61 }
 0x1ef   :  { %8744 = vrcp.f32 %v1615_v0  ;;  %v1510_v28 = vpop.f32.mrf.mxu2  ;;  %v1523_v14 = vpop.f32.mrf.mxu3  ;;  %v1627_v41 = vand.u32 2147483648, %v1615_v0  ;;  %vm1621_vm10 = vweird.f32 %v1615_v0 }
 0x1f0   :  { %vm1607_vm13 = vcmp.eq.f32.partialorder %v1606_v26, 8.507059e+37 }
 0x1f1   :  { %v1546_v60 = vpop.f32.mrf.mxu0  ;;  %v1559_v42 = vpop.f32.mrf.mxu1  ;;  %v1628_v17 = vor.u32 1.1754944e-38, %v1627_v41 }
 0x1f2   :  { %v8741_v55 = vpop.eup %8740  ;;  %v1589_v47 = vadd.f32 %v1546_v60, %v12466_v48  ;;  %v1590_v27 = vadd.f32 %v1559_v42, %v12467_v13  ;;  %v1625_v48 = vand.u32 2147483647, %v1615_v0 }
 0x1f3   :  { %v9995_v31 = vadd.f32 1.0, %v8741_v55 }
 0x1f4   :  { %v8743_v3 = vpop.eup %8742  ;;  %v7516_v4 = vmul.f32 -1.442695, %v1589_v47  ;;  %v7517_v49 = vmul.f32 -1.442695, %v1590_v27  ;;  %v12468_v47 = vld [vmem:[#allocation113_spill] sm:$0xff]  ;;  %vm1626_vm15 = vcmp.eq.f32.partialorder %v1625_v48, 8.507059e+37 }
 0x1f5   :  { %v8745_v56 = vpop.eup %8744  ;;  %v1598_v10 = vmul.f32 %v8743_v3, %v1596_v61  ;;  %8746 = vrcp.f32 %v9995_v31  ;;  %vm1603_vm8 = vweird.f32 %v8743_v3  ;;  %vm1641_vm1 = vweird.f32 %v9995_v31 }
 0x1f6   :  { %v1617_v28 = vmul.f32 %v8745_v56, %v1615_v0  ;;  %8748 = vtanh.f32 %v1527_v57  ;;  %vm1622_vm9 = vweird.f32 %v8745_v56  ;;  %vm1604_vm12 = vmor %vm1602_vm11, %vm1603_vm8 }
 0x1f7   :  { %v1599_v14 = vsub.f32 1.0, %v1598_v10  ;;  %8750 = vpow2.f32 %v7516_v4  ;;  %vm1623_vm14 = vmor %vm1621_vm10, %vm1622_vm9 }
 0x1f8   :  { %v1618_v50 = vsub.f32 1.0, %v1617_v28  ;;  %8752 = vpow2.f32 %v7517_v49  ;;  %v1572_v60 = vpop.f32.mrf.mxu2  ;;  %v1585_v42 = vpop.f32.mrf.mxu3  ;;  %v1609_v49 = vor.u32 1.1754944e-38, %v1608_v51 }
 0x1f9   :  { %v1600_v55 = vmul.f32 %v8743_v3, %v1599_v14  ;;  %v1592_v13 = vadd.f32 %v1585_v42, %v12468_v47  ;;  %v1548_v27 = vpop.f32.mrf.mxu0  ;;  %v1561_v32 = vpop.f32.mrf.mxu1 }
 0x1fa   :  { %v1619_v24 = vmul.f32 %v8745_v56, %v1618_v50 }
 0x1fb   :  { %v8747_v33 = vpop.eup %8746  ;;  %v1601_v10 = vadd.f32 %v8743_v3, %v1600_v55  ;;  %v7518_v57 = vmul.f32 -1.442695, %v1592_v13 }
 0x1fc   :  { %v8749_v4 = vpop.eup %8748  ;;  %v1620_v28 = vadd.f32 %v8745_v56, %v1619_v24  ;;  %v1637_v14 = vmul.f32 %v8747_v33, %v9995_v31  ;;  %vm1642_vm0 = vweird.f32 %v8747_v33 }
 0x1fd   :  { %v8751_v6 = vpop.eup %8750  ;;  %v1605_v42 = vsel %vm1604_vm12, %v8743_v3, %v1601_v10  ;;  %8754 = vpow2.f32 %v7518_v57  ;;  %vm1643_vm2 = vmor %vm1641_vm1, %vm1642_vm0 }
 0x1fe   :  { %v8753_v50 = vpop.eup %8752  ;;  %v1610_v32 = vsel %vm1607_vm13, %v1609_v49, %v1605_v42  ;;  %v1624_v47 = vsel %vm1623_vm14, %v8745_v56, %v1620_v28  ;;  %v1638_v0 = vsub.f32 1.0, %v1637_v14  ;;  %v1659_v55 = vadd.f32 1.0, %v8751_v6 }
 0x1ff   :  { %v1629_v61 = vsel %vm1626_vm15, %v1628_v17, %v1624_v47  ;;  %v1652_v13 = vmul.f32 %v8749_v4, %v1610_v32  ;;  %v1678_v27 = vadd.f32 1.0, %v8753_v50  ;;  %v1647_v56 = vand.u32 2147483648, %v9995_v31 }
 0x200   :  { %v1651_v26 = vmul.f32 %v1629_v61, %v9891_v18  ;;  %v1639_v51 = vmul.f32 %v8747_v33, %v1638_v0  ;;  %8756 = vrcp.f32 %v1659_v55  ;;  %v1574_v24 = vpop.f32.mrf.mxu2  ;;  %v1587_v19 = vpop.f32.mrf.mxu3  ;;  %v1645_v17 = vand.u32 2147483647, %v9995_v31  ;;  %v12469_v18 = vld [vmem:[#allocation112_spill] sm:$0xff] }
 0x201   :  { %8758 = vrcp.f32 %v1678_v27  ;;  %v1591_v48 = vadd.f32 %v1572_v60, %v12469_v18  ;;  %v1648_v49 = vor.u32 1.1754944e-38, %v1647_v56  ;;  %v1690_v32 = vand.u32 2147483648, %v1678_v27 }
 0x202   :  { %v10001_v2 = vadd.f32 %v1652_v13, %v1651_v26  ;;  %v1640_v41 = vadd.f32 %v8747_v33, %v1639_v51  ;;  %vm1646_vm3 = vcmp.eq.f32.partialorder %v1645_v17, 8.507059e+37  ;;  %v1671_v47 = vand.u32 2147483648, %v1659_v55 }
 0x203   :  { %v8755_v3 = vpop.eup %8754  ;;  %v1669_v60 = vand.u32 2147483647, %v1659_v55  ;;  %v1688_v51 = vand.u32 2147483647, %v1678_v27  ;;  %vm1665_vm6 = vweird.f32 %v1659_v55  ;;  %vm1684_vm7 = vweird.f32 %v1678_v27 }
 0x204   :  { %8760 = vtanh.f32 %v10001_v2  ;;  %v10005_v6 = vadd.f32 1.0, %v8755_v3  ;;  %v1644_v4 = vsel %vm1643_vm2, %v8747_v33, %v1640_v41  ;;  %v1672_v41 = vor.u32 1.1754944e-38, %v1671_v47 }
 0x205   :  { %v1649_v0 = vsel %vm1646_vm3, %v1648_v49, %v1644_v4  ;;  %v1691_v18 = vor.u32 1.1754944e-38, %v1690_v32  ;;  %vm1670_vm10 = vcmp.eq.f32.partialorder %v1669_v60, 8.507059e+37  ;;  %vm1689_vm11 = vcmp.eq.f32.partialorder %v1688_v51, 8.507059e+37  ;;  %v12472_v60 = vld [vmem:[#allocation19_spill] sm:$0xff]  ;;  %v12475_v51 = vld [vmem:[#allocation22_spill] sm:$0xff] }
 0x206   :  { %v8757_v10 = vpop.eup %8756  ;;  %8762 = vrcp.f32 %v10005_v6  ;;  %vm1704_vm13 = vweird.f32 %v10005_v6 }
 0x207   :  { %v8759_v19 = vpop.eup %8758  ;;  %v1661_v57 = vmul.f32 %v8757_v10, %v1659_v55  ;;  %8764 = vtanh.f32 %v1591_v48  ;;  %vm1666_vm4 = vweird.f32 %v8757_v10 }
 0x208   :  { %v1680_v28 = vmul.f32 %v8759_v19, %v1678_v27  ;;  %vm1685_vm5 = vweird.f32 %v8759_v19  ;;  %vm1667_vm8 = vmor %vm1665_vm6, %vm1666_vm4 }
 0x209   :  { %v1662_v14 = vsub.f32 1.0, %v1661_v57  ;;  %vm1686_vm9 = vmor %vm1684_vm7, %vm1685_vm5 }
 0x20a   :  { %v8761_v42 = vpop.eup %8760  ;;  %v1681_v50 = vsub.f32 1.0, %v1680_v28 }
 0x20b   :  { %v1663_v31 = vmul.f32 %v8757_v10, %v1662_v14  ;;  %v10011_v61 = vmul.f32 %v8761_v42, %v1649_v0 }
 0x20c   :  { %v8763_v13 = vpop.eup %8762  ;;  %v1682_v26 = vmul.f32 %v8759_v19, %v1681_v50 }
 0x20d   :  { %12470 = vst [vmem:[#allocation15_spill] sm:$0xff] %v10011_v61  ;;  %v1664_v33 = vadd.f32 %v8757_v10, %v1663_v31  ;;  %v1700_v24 = vmul.f32 %v8763_v13, %v10005_v6  ;;  %v1734_v3 = vpack.c.bf16 %v10011_v61, %v10011_v61  ;;  %v8765_v17 = vpop.eup %8764  ;;  %vm1705_vm12 = vweird.f32 %v8763_v13  ;;  %v12500_v61 = vld [vmem:[#allocation47_spill] sm:$0xff] }
 0x20e   :  { %v1683_v56 = vadd.f32 %v8759_v19, %v1682_v26  ;;  %vm1706_vm14 = vmor %vm1704_vm13, %vm1705_vm12  ;;  %v12474_v26 = vld [vmem:[#allocation21_spill] sm:$0xff] }
 0x20f   :  { %v1668_v48 = vsel %vm1667_vm8, %v8757_v10, %v1664_v33  ;;  %v1701_v57 = vsub.f32 1.0, %v1700_v24  ;;  %1743 = vmatmul.bf16.vlgmr.msra.gmra.mxu0 %v1734_v3  ;;  %1756 = vmatmul.bf16.vlgmr.msra.gmra.mxu1 %v1734_v3  ;;  %v12476_v33 = vld [vmem:[#allocation23_spill] sm:$0xff]  ;;  %v12477_v24 = vld [vmem:[#allocation24_spill] sm:$0xff] }
 0x210   :  { %v1673_v4 = vsel %vm1670_vm10, %v1672_v41, %v1668_v48  ;;  %v1687_v49 = vsel %vm1686_vm9, %v8759_v19, %v1683_v56  ;;  %1769 = vmatmul.bf16.vlgmr.msra.gmra.mxu2 %v1734_v3  ;;  %1782 = vmatmul.bf16.vlgmr.msra.gmra.mxu3 %v1734_v3  ;;  %v1710_v19 = vand.u32 2147483648, %v10005_v6  ;;  %v12478_v3 = vld [vmem:[#allocation25_spill] sm:$0xff]  ;;  %v12479_v41 = vld [vmem:[#allocation26_spill] sm:$0xff]  ;;  %v12480_v56 = vld [vmem:[#allocation27_spill] sm:$0xff] }
 0x211   :  { %v1692_v55 = vsel %vm1689_vm11, %v1691_v18, %v1687_v49  ;;  %v1715_v28 = vmul.f32 %v8765_v17, %v1673_v4  ;;  %v1702_v14 = vmul.f32 %v8763_v13, %v1701_v57  ;;  %1997 = vmatpush.bf16.msra.mxu0 %v9406_v7  ;;  %2010 = vmatpush.bf16.msra.mxu1 %v9408_v11  ;;  %v12481_v17 = vld [vmem:[#allocation28_spill] sm:$0xff]  ;;  %v12482_v18 = vld [vmem:[#allocation29_spill] sm:$0xff]  ;;  %v12483_v48 = vld [vmem:[#allocation30_spill] sm:$0xff] }
 0x212   :  { %v1714_v27 = vmul.f32 %v1692_v55, %v9915_v5  ;;  %2023 = vmatpush.bf16.msra.mxu2 %v9421_v25  ;;  %2036 = vmatpush.bf16.msra.mxu3 %v9410_v12  ;;  %v1708_v5 = vand.u32 2147483647, %v10005_v6  ;;  %v1711_v32 = vor.u32 1.1754944e-38, %v1710_v19  ;;  %v12484_v57 = vld [vmem:[#allocation31_spill] sm:$0xff]  ;;  %v12485_v4 = vld [vmem:[#allocation32_spill] sm:$0xff]  ;;  %v12486_v49 = vld [vmem:[#allocation33_spill] sm:$0xff] }
 0x213   :  { %v1703_v42 = vadd.f32 %v8763_v13, %v1702_v14  ;;  %v12487_v55 = vld [vmem:[#allocation34_spill] sm:$0xff]  ;;  %v12489_v14 = vld [vmem:[#allocation36_spill] sm:$0xff]  ;;  %v12492_v19 = vld [vmem:[#allocation39_spill] sm:$0xff] }
 0x214   :  { %v10021_v10 = vadd.f32 %v1715_v28, %v1714_v27  ;;  %vm1709_vm15 = vcmp.eq.f32.partialorder %v1708_v5, 8.507059e+37  ;;  %v12488_v28 = vld [vmem:[#allocation35_spill] sm:$0xff]  ;;  %v12490_v27 = vld [vmem:[#allocation37_spill] sm:$0xff]  ;;  %v12493_v5 = vld [vmem:[#allocation40_spill] sm:$0xff] }
 0x215   :  { %1998 = vmatpush.bf16.msra.mxu0 %v9413_v16  ;;  %2011 = vmatpush.bf16.msra.mxu1 %v9417_v21  ;;  %v1707_v50 = vsel %vm1706_vm14, %v8763_v13, %v1703_v42  ;;  %v12473_v13 = vld [vmem:[#allocation20_spill] sm:$0xff]  ;;  %v12491_v42 = vld [vmem:[#allocation38_spill] sm:$0xff] }
 0x216   :  { %8766 = vtanh.f32 %v10021_v10  ;;  %2024 = vmatpush.bf16.msra.mxu2 %v9443_v40  ;;  %2037 = vmatpush.bf16.msra.mxu3 %v9419_v22  ;;  %v1712_v0 = vsel %vm1709_vm15, %v1711_v32, %v1707_v50  ;;  %v12494_v50 = vld [vmem:[#allocation41_spill] sm:$0xff]  ;;  %v12495_v32 = vld [vmem:[#allocation42_spill] sm:$0xff] }
 0x219   :  { %1999 = vmatpush.bf16.msra.mxu0 %v9436_v30  ;;  %2012 = vmatpush.bf16.msra.mxu1 %v9438_v34 }
 0x21a   :  { %2025 = vmatpush.bf16.msra.mxu2 %v12428_v43  ;;  %2038 = vmatpush.bf16.msra.mxu3 %v9440_v36 }
 0x21c   :  { %v8767_v47 = vpop.eup %8766 }
 0x21d   :  { %v10035_v31 = vmul.f32 %v8767_v47, %v1712_v0  ;;  %2000 = vmatpush.bf16.msra.mxu0 %v9447_v44  ;;  %2013 = vmatpush.bf16.msra.mxu1 %v9449_v45  ;;  %v12496_v47 = vld [vmem:[#allocation43_spill] sm:$0xff]  ;;  %v12497_v0 = vld [vmem:[#allocation44_spill] sm:$0xff] }
 0x21e   :  { %2026 = vmatpush.bf16.msra.mxu2 %v9461_v54  ;;  %2039 = vmatpush.bf16.msra.mxu3 %v12430_v58 }
 0x21f   :  { %12471 = vst [vmem:[#allocation16_spill] sm:$0xff] %v10035_v31  ;;  %v1798_v6 = vpack.c.bf16 %v10035_v31, %v10035_v31  ;;  %v12499_v31 = vld [vmem:[#allocation46_spill] sm:$0xff] }
 0x221   :  { %1807 = vmatmul.bf16.vlgmr.msrb.gmra.mxu0 %v1798_v6  ;;  %1820 = vmatmul.bf16.vlgmr.msrb.gmra.mxu1 %v1798_v6 }
 0x222   :  { %1833 = vmatmul.bf16.vlgmr.msrb.gmra.mxu2 %v1798_v6  ;;  %1846 = vmatmul.bf16.vlgmr.msrb.gmra.mxu3 %v1798_v6  ;;  %v12498_v6 = vld [vmem:[#allocation45_spill] sm:$0xff] }
 0x223   :  { %2001 = vmatpush.bf16.msra.mxu0 %v12431_v20  ;;  %2014 = vmatpush.bf16.msra.mxu1 %v9469_v62 }
 0x224   :  { %2027 = vmatpush.bf16.msra.mxu2 %v9471_v63  ;;  %2040 = vmatpush.bf16.msra.mxu3 %v9474_v35 }
 0x227   :  { %2002 = vmatpush.bf16.msra.mxu0 %v9478_v8  ;;  %2015 = vmatpush.bf16.msra.mxu1 %v9480_v9 }
 0x228   :  { %2028 = vmatpush.bf16.msra.mxu2 %v9483_v15  ;;  %2041 = vmatpush.bf16.msra.mxu3 %v9485_v23 }
 0x22b   :  { %2003 = vmatpush.bf16.msra.mxu0 %v9488_v29  ;;  %2016 = vmatpush.bf16.msra.mxu1 %v9492_v37 }
 0x22c   :  { %2029 = vmatpush.bf16.msra.mxu2 %v9494_v38  ;;  %2042 = vmatpush.bf16.msra.mxu3 %v9497_v39 }
 0x22f   :  { %2004 = vmatpush.bf16.msra.mxu0 %v9504_v46  ;;  %2017 = vmatpush.bf16.msra.mxu1 %v9508_v52 }
 0x230   :  { %2030 = vmatpush.bf16.msra.mxu2 %v9510_v53  ;;  %2043 = vmatpush.bf16.msra.mxu3 %v9514_v59 }
 0x233   :  { %2061 = vmatpush.bf16.msrb.mxu0 %v9518_v1  ;;  %2074 = vmatpush.bf16.msrb.mxu1 %v12472_v60 }
 0x234   :  { %2087 = vmatpush.bf16.msrb.mxu2 %v12473_v13  ;;  %2100 = vmatpush.bf16.msrb.mxu3 %v12474_v26 }
 0x237   :  { %2062 = vmatpush.bf16.msrb.mxu0 %v12475_v51  ;;  %2075 = vmatpush.bf16.msrb.mxu1 %v12476_v33 }
 0x238   :  { %2088 = vmatpush.bf16.msrb.mxu2 %v12477_v24  ;;  %2101 = vmatpush.bf16.msrb.mxu3 %v12478_v3 }
 0x23b   :  { %2063 = vmatpush.bf16.msrb.mxu0 %v12479_v41  ;;  %2076 = vmatpush.bf16.msrb.mxu1 %v12480_v56 }
 0x23c   :  { %2089 = vmatpush.bf16.msrb.mxu2 %v12481_v17  ;;  %2102 = vmatpush.bf16.msrb.mxu3 %v12482_v18 }
 0x23f   :  { %2064 = vmatpush.bf16.msrb.mxu0 %v12483_v48  ;;  %2077 = vmatpush.bf16.msrb.mxu1 %v12484_v57 }
 0x240   :  { %2090 = vmatpush.bf16.msrb.mxu2 %v12485_v4  ;;  %2103 = vmatpush.bf16.msrb.mxu3 %v12486_v49  ;;  %v12505_v49 = vld [vmem:[#allocation62_spill] sm:$0xff] }
 0x243   :  { %2065 = vmatpush.bf16.msrb.mxu0 %v12487_v55  ;;  %2078 = vmatpush.bf16.msrb.mxu1 %v12488_v28  ;;  %v12504_v28 = vld [vmem:[#allocation57_spill] sm:$0xff] }
 0x244   :  { %2091 = vmatpush.bf16.msrb.mxu2 %v12489_v14  ;;  %2104 = vmatpush.bf16.msrb.mxu3 %v12490_v27  ;;  %v12501_v27 = vld [vmem:[#allocation48_spill] sm:$0xff] }
 0x245   :  { %v12503_v14 = vld [vmem:[#allocation56_spill] sm:$0xff] }
 0x247   :  { %2066 = vmatpush.bf16.msrb.mxu0 %v12491_v42  ;;  %2079 = vmatpush.bf16.msrb.mxu1 %v12492_v19  ;;  %v12502_v42 = vld [vmem:[#allocation49_spill] sm:$0xff] }
 0x248   :  { %2092 = vmatpush.bf16.msrb.mxu2 %v12493_v5  ;;  %2105 = vmatpush.bf16.msrb.mxu3 %v12494_v50 }
 0x24b   :  { %2067 = vmatpush.bf16.msrb.mxu0 %v12495_v32  ;;  %2080 = vmatpush.bf16.msrb.mxu1 %v12496_v47 }
 0x24c   :  { %2093 = vmatpush.bf16.msrb.mxu2 %v12497_v0  ;;  %2106 = vmatpush.bf16.msrb.mxu3 %v12498_v6 }
 0x24f   :  { %2068 = vmatpush.bf16.msrb.mxu0 %v12499_v31  ;;  %2081 = vmatpush.bf16.msrb.mxu1 %v12500_v61 }
 0x250   :  { %2094 = vmatpush.bf16.msrb.mxu2 %v12501_v27  ;;  %2107 = vmatpush.bf16.msrb.mxu3 %v12502_v42 }
 0x28c   :  { %v1744_v19 = vpop.f32.mrf.mxu0  ;;  %v1757_v5 = vpop.f32.mrf.mxu1 }
 0x28d   :  { %v1787_v50 = vadd.f32 %v1744_v19, %v12503_v14  ;;  %v1788_v32 = vadd.f32 %v1757_v5, %v12504_v28  ;;  %v12506_v19 = vld [vmem:[#allocation80_spill] sm:$0xff]  ;;  %v12507_v5 = vld [vmem:[#allocation105_spill] sm:$0xff] }
 0x28f   :  { %v7519_v55 = vmul.f32 -1.442695, %v1787_v50  ;;  %v7520_v47 = vmul.f32 -1.442695, %v1788_v32  ;;  %v12508_v50 = vld [vmem:[#allocation81_spill] sm:$0xff]  ;;  %v12509_v32 = vld [vmem:[#allocation107_spill] sm:$0xff] }
 0x291   :  { %8768 = vpow2.f32 %v7519_v55  ;;  %v662_v55 = vadd.f32 %v12507_v5, %v12506_v19 }
 0x292   :  { %8770 = vpow2.f32 %v7520_v47  ;;  %v691_v47 = vadd.f32 %v12509_v32, %v12508_v50 }
 0x293   :  { %v1770_v0 = vpop.f32.mrf.mxu2  ;;  %v1783_v6 = vpop.f32.mrf.mxu3 }
 0x294   :  { %v1790_v31 = vadd.f32 %v1783_v6, %v12505_v49  ;;  %v1746_v4 = vpop.f32.mrf.mxu0  ;;  %v1759_v61 = vpop.f32.mrf.mxu1 }
 0x295   :  { %v12510_v61 = vld [vmem:[#allocation60_spill] sm:$0xff] }
 0x296   :  { %v7521_v57 = vmul.f32 -1.442695, %v1790_v31  ;;  %v1789_v31 = vadd.f32 %v1770_v0, %v12510_v61 }
 0x297   :  { %v8769_v27 = vpop.eup %8768 }
 0x298   :  { %v8771_v48 = vpop.eup %8770  ;;  %v1858_v42 = vadd.f32 1.0, %v8769_v27  ;;  %8772 = vpow2.f32 %v7521_v57 }
 0x299   :  { %v1877_v18 = vadd.f32 1.0, %v8771_v48 }
 0x29a   :  { %8774 = vrcp.f32 %v1858_v42  ;;  %v1868_v0 = vand.u32 2147483647, %v1858_v42  ;;  %vm1864_vm2 = vweird.f32 %v1858_v42 }
 0x29b   :  { %8776 = vrcp.f32 %v1877_v18  ;;  %v1772_v14 = vpop.f32.mrf.mxu2  ;;  %v1785_v28 = vpop.f32.mrf.mxu3  ;;  %v1889_v33 = vand.u32 2147483648, %v1877_v18  ;;  %vm1883_vm3 = vweird.f32 %v1877_v18 }
 0x29c   :  { %v12511_v14 = vld [vmem:[#allocation87_spill] sm:$0xff]  ;;  %v12512_v28 = vld [vmem:[#allocation109_spill] sm:$0xff]  ;;  %vm1869_vm6 = vcmp.eq.f32.partialorder %v1868_v0, 8.507059e+37  ;;  %v12513_v0 = vld [vmem:[#allocation86_spill] sm:$0xff] }
 0x29d   :  { %v749_v5 = vadd.f32 %v12512_v28, %v12511_v14 }
 0x29e   :  { %v8773_v17 = vpop.eup %8772  ;;  %v1808_v49 = vpop.f32.mrf.mxu0 }
 0x29f   :  { %v1821_v4 = vpop.f32.mrf.mxu1  ;;  %v10099_v6 = vadd.f32 1.0, %v8773_v17  ;;  %v1851_v27 = vadd.f32 %v1808_v49, %v662_v55  ;;  %v1870_v17 = vand.u32 2147483648, %v1858_v42  ;;  %v1887_v55 = vand.u32 2147483647, %v1877_v18 }
 0x2a0   :  { %v1852_v57 = vadd.f32 %v1821_v4, %v691_v47  ;;  %v8775_v48 = vpop.eup %8774 }
 0x2a1   :  { %v8777_v56 = vpop.eup %8776  ;;  %v1860_v41 = vmul.f32 %v8775_v48, %v1858_v42  ;;  %8778 = vrcp.f32 %v10099_v6  ;;  %v7522_v32 = vmul.f32 -1.442695, %v1851_v27  ;;  %vm1865_vm0 = vweird.f32 %v8775_v48 }
 0x2a2   :  { %v1879_v19 = vmul.f32 %v8777_v56, %v1877_v18  ;;  %8780 = vtanh.f32 %v1789_v31  ;;  %v7523_v50 = vmul.f32 -1.442695, %v1852_v57  ;;  %vm1884_vm1 = vweird.f32 %v8777_v56  ;;  %vm1866_vm4 = vmor %vm1864_vm2, %vm1865_vm0 }
 0x2a3   :  { %v1861_v3 = vsub.f32 1.0, %v1860_v41  ;;  %8782 = vpow2.f32 %v7522_v32  ;;  %vm1885_vm5 = vmor %vm1883_vm3, %vm1884_vm1  ;;  %v1890_v32 = vor.u32 1.1754944e-38, %v1889_v33  ;;  %vm1888_vm7 = vcmp.eq.f32.partialorder %v1887_v55, 8.507059e+37  ;;  %v12514_v55 = vld [vmem:[#allocation108_spill] sm:$0xff] }
 0x2a4   :  { %v1880_v24 = vsub.f32 1.0, %v1879_v19  ;;  %8784 = vpow2.f32 %v7523_v50  ;;  %v1871_v19 = vor.u32 1.1754944e-38, %v1870_v17  ;;  %vm1903_vm9 = vweird.f32 %v10099_v6 }
 0x2a5   :  { %v1862_v61 = vmul.f32 %v8775_v48, %v1861_v3  ;;  %v1834_v47 = vpop.f32.mrf.mxu2  ;;  %v1847_v49 = vpop.f32.mrf.mxu3 }
 0x2a6   :  { %v1881_v4 = vmul.f32 %v8777_v56, %v1880_v24  ;;  %v1854_v51 = vadd.f32 %v1847_v49, %v749_v5  ;;  %v1810_v28 = vpop.f32.mrf.mxu0 }
 0x2a7   :  { %v1823_v14 = vpop.f32.mrf.mxu1  ;;  %v8779_v41 = vpop.eup %8778  ;;  %v1863_v31 = vadd.f32 %v8775_v48, %v1862_v61 }
 0x2a8   :  { %v1882_v27 = vadd.f32 %v8777_v56, %v1881_v4  ;;  %v1899_v3 = vmul.f32 %v8779_v41, %v10099_v6  ;;  %v8781_v57 = vpop.eup %8780  ;;  %v7524_v24 = vmul.f32 -1.442695, %v1854_v51  ;;  %vm1904_vm8 = vweird.f32 %v8779_v41 }
 0x2a9   :  { %v1867_v26 = vsel %vm1866_vm4, %v8775_v48, %v1863_v31  ;;  %v8783_v49 = vpop.eup %8782  ;;  %v1909_v51 = vand.u32 2147483648, %v10099_v6  ;;  %vm1905_vm10 = vmor %vm1903_vm9, %vm1904_vm8 }
 0x2aa   :  { %v1872_v50 = vsel %vm1869_vm6, %v1871_v19, %v1867_v26  ;;  %v1886_v5 = vsel %vm1885_vm5, %v8777_v56, %v1882_v27  ;;  %v1900_v14 = vsub.f32 1.0, %v1899_v3  ;;  %8786 = vpow2.f32 %v7524_v24  ;;  %v8785_v18 = vpop.eup %8784 }
 0x2ab   :  { %v1891_v61 = vsel %vm1888_vm7, %v1890_v32, %v1886_v5  ;;  %v1914_v42 = vmul.f32 %v8781_v57, %v1872_v50  ;;  %v1921_v28 = vadd.f32 1.0, %v8783_v49  ;;  %v10107_v13 = vadd.f32 1.0, %v8785_v18 }
 0x2ac   :  { %v1913_v17 = vmul.f32 %v1891_v61, %v10001_v2  ;;  %v1901_v4 = vmul.f32 %v8779_v41, %v1900_v14  ;;  %v1907_v2 = vand.u32 2147483647, %v10099_v6  ;;  %v1910_v3 = vor.u32 1.1754944e-38, %v1909_v51 }
 0x2ad   :  { %v1836_v60 = vpop.f32.mrf.mxu2  ;;  %v1849_v33 = vpop.f32.mrf.mxu3  ;;  %8788 = vrcp.f32 %v1921_v28  ;;  %v1933_v18 = vand.u32 2147483648, %v1921_v28  ;;  %vm1927_vm14 = vweird.f32 %v1921_v28  ;;  %vm1946_vm15 = vweird.f32 %v10107_v13 }
 0x2ae   :  { %v10109_v48 = vadd.f32 %v1914_v42, %v1913_v17  ;;  %v1902_v26 = vadd.f32 %v8779_v41, %v1901_v4  ;;  %8790 = vrcp.f32 %v10107_v13  ;;  %v720_v60 = vadd.f32 %v12514_v55, %v12513_v0  ;;  %v12545_v0 = vld [vmem:[#allocation47_spill] sm:$0xff] }
 0x2af   :  { %vm1908_vm11 = vcmp.eq.f32.partialorder %v1907_v2, 8.507059e+37  ;;  %v1952_v42 = vand.u32 2147483648, %v10107_v13  ;;  %v1934_v2 = vor.u32 1.1754944e-38, %v1933_v18 }
 0x2b0   :  { %8792 = vtanh.f32 %v10109_v48  ;;  %v8787_v56 = vpop.eup %8786  ;;  %v1906_v19 = vsel %vm1905_vm10, %v8779_v41, %v1902_v26  ;;  %v1853_v57 = vadd.f32 %v1834_v47, %v720_v60  ;;  %v1931_v47 = vand.u32 2147483647, %v1921_v28 }
 0x2b1   :  { %v10118_v31 = vadd.f32 1.0, %v8787_v56  ;;  %v1911_v14 = vsel %vm1908_vm11, %v1910_v3, %v1906_v19  ;;  %v1950_v26 = vand.u32 2147483647, %v10107_v13  ;;  %v1953_v60 = vor.u32 1.1754944e-38, %v1952_v42 }
 0x2b2   :  { %vm1932_vm2 = vcmp.eq.f32.partialorder %v1931_v47, 8.507059e+37 }
 0x2b3   :  { %v8789_v27 = vpop.eup %8788  ;;  %8794 = vrcp.f32 %v10118_v31  ;;  %vm1951_vm3 = vcmp.eq.f32.partialorder %v1950_v26, 8.507059e+37  ;;  %vm1966_vm5 = vweird.f32 %v10118_v31  ;;  %v12520_v26 = vld [vmem:[#allocation22_spill] sm:$0xff] }
 0x2b4   :  { %v8791_v32 = vpop.eup %8790  ;;  %v1923_v24 = vmul.f32 %v8789_v27, %v1921_v28  ;;  %8796 = vtanh.f32 %v1853_v57  ;;  %vm1928_vm12 = vweird.f32 %v8789_v27 }
 0x2b5   :  { %v1942_v5 = vmul.f32 %v8791_v32, %v10107_v13  ;;  %vm1947_vm13 = vweird.f32 %v8791_v32  ;;  %vm1929_vm0 = vmor %vm1927_vm14, %vm1928_vm12 }
 0x2b6   :  { %v8793_v50 = vpop.eup %8792  ;;  %v1924_v6 = vsub.f32 1.0, %v1923_v24  ;;  %vm1948_vm1 = vmor %vm1946_vm15, %vm1947_vm13 }
 0x2b7   :  { %v10122_v49 = vmul.f32 %v8793_v50, %v1911_v14  ;;  %v1943_v61 = vsub.f32 1.0, %v1942_v5 }
 0x2b8   :  { %v1925_v41 = vmul.f32 %v8789_v27, %v1924_v6  ;;  %v1972_v6 = vand.u32 2147483648, %v10118_v31 }
 0x2b9   :  { %12515 = vst [vmem:[#allocation50_spill] sm:$0xff] %v10122_v49  ;;  %v1996_v17 = vpack.c.bf16 %v10122_v49, %v10122_v49  ;;  %v8795_v4 = vpop.eup %8794  ;;  %v1944_v33 = vmul.f32 %v8791_v32, %v1943_v61  ;;  %v12544_v49 = vld [vmem:[#allocation46_spill] sm:$0xff] }
 0x2ba   :  { %v1926_v51 = vadd.f32 %v8789_v27, %v1925_v41  ;;  %v1962_v56 = vmul.f32 %v8795_v4, %v10118_v31  ;;  %v8797_v28 = vpop.eup %8796  ;;  %vm1967_vm4 = vweird.f32 %v8795_v4  ;;  %v1973_v42 = vor.u32 1.1754944e-38, %v1972_v6  ;;  %v12536_v6 = vld [vmem:[#allocation38_spill] sm:$0xff] }
 0x2bb   :  { %2005 = vmatmul.bf16.vlgmr.msra.gmra.mxu0 %v1996_v17  ;;  %2018 = vmatmul.bf16.vlgmr.msra.gmra.mxu1 %v1996_v17  ;;  %v1945_v55 = vadd.f32 %v8791_v32, %v1944_v33  ;;  %vm1968_vm6 = vmor %vm1966_vm5, %vm1967_vm4  ;;  %v12519_v33 = vld [vmem:[#allocation21_spill] sm:$0xff] }
 0x2bc   :  { %2031 = vmatmul.bf16.vlgmr.msra.gmra.mxu2 %v1996_v17  ;;  %2044 = vmatmul.bf16.vlgmr.msra.gmra.mxu3 %v1996_v17  ;;  %v1930_v19 = vsel %vm1929_vm0, %v8789_v27, %v1926_v51  ;;  %v1963_v3 = vsub.f32 1.0, %v1962_v56  ;;  %v12517_v17 = vld [vmem:[#allocation19_spill] sm:$0xff]  ;;  %v12522_v56 = vld [vmem:[#allocation24_spill] sm:$0xff] }
 0x2bd   :  { %2256 = vmatpush.bf16.msra.mxu0 %v9406_v7  ;;  %2269 = vmatpush.bf16.msra.mxu1 %v9408_v11  ;;  %v1935_v57 = vsel %vm1932_vm2, %v1934_v2, %v1930_v19  ;;  %v1949_v24 = vsel %vm1948_vm1, %v8791_v32, %v1945_v55  ;;  %v12521_v51 = vld [vmem:[#allocation23_spill] sm:$0xff]  ;;  %v12523_v2 = vld [vmem:[#allocation25_spill] sm:$0xff]  ;;  %v12524_v55 = vld [vmem:[#allocation26_spill] sm:$0xff] }
 0x2be   :  { %2282 = vmatpush.bf16.msra.mxu2 %v9421_v25  ;;  %2295 = vmatpush.bf16.msra.mxu3 %v9410_v12  ;;  %v1954_v13 = vsel %vm1951_vm3, %v1953_v60, %v1949_v24  ;;  %v1977_v50 = vmul.f32 %v8797_v28, %v1935_v57  ;;  %v1964_v5 = vmul.f32 %v8795_v4, %v1963_v3  ;;  %v12525_v60 = vld [vmem:[#allocation27_spill] sm:$0xff]  ;;  %v12526_v19 = vld [vmem:[#allocation28_spill] sm:$0xff]  ;;  %v12527_v3 = vld [vmem:[#allocation29_spill] sm:$0xff] }
 0x2bf   :  { %v1976_v14 = vmul.f32 %v1954_v13, %v10021_v10  ;;  %v1970_v10 = vand.u32 2147483647, %v10118_v31  ;;  %v12528_v28 = vld [vmem:[#allocation30_spill] sm:$0xff]  ;;  %v12529_v57 = vld [vmem:[#allocation31_spill] sm:$0xff]  ;;  %v12530_v24 = vld [vmem:[#allocation32_spill] sm:$0xff] }
 0x2c0   :  { %v1965_v32 = vadd.f32 %v8795_v4, %v1964_v5  ;;  %v12531_v13 = vld [vmem:[#allocation33_spill] sm:$0xff]  ;;  %v12533_v5 = vld [vmem:[#allocation35_spill] sm:$0xff] }
 0x2c1   :  { %2257 = vmatpush.bf16.msra.mxu0 %v9413_v16  ;;  %2270 = vmatpush.bf16.msra.mxu1 %v9417_v21  ;;  %v10137_v27 = vadd.f32 %v1977_v50, %v1976_v14  ;;  %vm1971_vm7 = vcmp.eq.f32.partialorder %v1970_v10, 8.507059e+37  ;;  %v12532_v50 = vld [vmem:[#allocation34_spill] sm:$0xff]  ;;  %v12534_v14 = vld [vmem:[#allocation36_spill] sm:$0xff]  ;;  %v12537_v10 = vld [vmem:[#allocation39_spill] sm:$0xff] }
 0x2c2   :  { %2283 = vmatpush.bf16.msra.mxu2 %v9443_v40  ;;  %2296 = vmatpush.bf16.msra.mxu3 %v9419_v22  ;;  %v1969_v61 = vsel %vm1968_vm6, %v8795_v4, %v1965_v32  ;;  %v12518_v4 = vld [vmem:[#allocation20_spill] sm:$0xff]  ;;  %v12535_v32 = vld [vmem:[#allocation37_spill] sm:$0xff] }
 0x2c3   :  { %8798 = vtanh.f32 %v10137_v27  ;;  %v1974_v41 = vsel %vm1971_vm7, %v1973_v42, %v1969_v61  ;;  %v12538_v61 = vld [vmem:[#allocation40_spill] sm:$0xff]  ;;  %v12539_v42 = vld [vmem:[#allocation41_spill] sm:$0xff] }
 0x2c5   :  { %2258 = vmatpush.bf16.msra.mxu0 %v9436_v30  ;;  %2271 = vmatpush.bf16.msra.mxu1 %v9438_v34 }
 0x2c6   :  { %2284 = vmatpush.bf16.msra.mxu2 %v12428_v43  ;;  %2297 = vmatpush.bf16.msra.mxu3 %v9440_v36 }
 0x2c9   :  { %2259 = vmatpush.bf16.msra.mxu0 %v9447_v44  ;;  %2272 = vmatpush.bf16.msra.mxu1 %v9449_v45  ;;  %v8799_v18 = vpop.eup %8798 }
 0x2ca   :  { %2285 = vmatpush.bf16.msra.mxu2 %v9461_v54  ;;  %2298 = vmatpush.bf16.msra.mxu3 %v12430_v58  ;;  %v10153_v31 = vmul.f32 %v8799_v18, %v1974_v41  ;;  %v12540_v18 = vld [vmem:[#allocation42_spill] sm:$0xff]  ;;  %v12541_v41 = vld [vmem:[#allocation43_spill] sm:$0xff] }
 0x2cc   :  { %12516 = vst [vmem:[#allocation51_spill] sm:$0xff] %v10153_v31  ;;  %v2060_v47 = vpack.c.bf16 %v10153_v31, %v10153_v31  ;;  %v12543_v31 = vld [vmem:[#allocation45_spill] sm:$0xff] }
 0x2cd   :  { %2260 = vmatpush.bf16.msra.mxu0 %v12431_v20  ;;  %2273 = vmatpush.bf16.msra.mxu1 %v9469_v62 }
 0x2ce   :  { %2286 = vmatpush.bf16.msra.mxu2 %v9471_v63  ;;  %2299 = vmatpush.bf16.msra.mxu3 %v9474_v35 }
 0x2cf   :  { %2069 = vmatmul.bf16.vlgmr.msrb.gmra.mxu0 %v2060_v47  ;;  %2082 = vmatmul.bf16.vlgmr.msrb.gmra.mxu1 %v2060_v47 }
 0x2d0   :  { %2095 = vmatmul.bf16.vlgmr.msrb.gmra.mxu2 %v2060_v47  ;;  %2108 = vmatmul.bf16.vlgmr.msrb.gmra.mxu3 %v2060_v47  ;;  %v12542_v47 = vld [vmem:[#allocation44_spill] sm:$0xff] }
 0x2d1   :  { %2261 = vmatpush.bf16.msra.mxu0 %v9478_v8  ;;  %2274 = vmatpush.bf16.msra.mxu1 %v9480_v9 }
 0x2d2   :  { %2287 = vmatpush.bf16.msra.mxu2 %v9483_v15  ;;  %2300 = vmatpush.bf16.msra.mxu3 %v9485_v23 }
 0x2d5   :  { %2262 = vmatpush.bf16.msra.mxu0 %v9488_v29  ;;  %2275 = vmatpush.bf16.msra.mxu1 %v9492_v37 }
 0x2d6   :  { %2288 = vmatpush.bf16.msra.mxu2 %v9494_v38  ;;  %2301 = vmatpush.bf16.msra.mxu3 %v9497_v39 }
 0x2d9   :  { %2263 = vmatpush.bf16.msra.mxu0 %v9504_v46  ;;  %2276 = vmatpush.bf16.msra.mxu1 %v9508_v52 }
 0x2da   :  { %2289 = vmatpush.bf16.msra.mxu2 %v9510_v53  ;;  %2302 = vmatpush.bf16.msra.mxu3 %v9514_v59 }
 0x2dd   :  { %2317 = vmatpush.bf16.msrb.mxu0 %v9518_v1  ;;  %2330 = vmatpush.bf16.msrb.mxu1 %v12517_v17 }
 0x2de   :  { %2343 = vmatpush.bf16.msrb.mxu2 %v12518_v4  ;;  %2356 = vmatpush.bf16.msrb.mxu3 %v12519_v33 }
 0x2e1   :  { %2318 = vmatpush.bf16.msrb.mxu0 %v12520_v26  ;;  %2331 = vmatpush.bf16.msrb.mxu1 %v12521_v51 }
 0x2e2   :  { %2344 = vmatpush.bf16.msrb.mxu2 %v12522_v56  ;;  %2357 = vmatpush.bf16.msrb.mxu3 %v12523_v2 }
 0x2e5   :  { %2319 = vmatpush.bf16.msrb.mxu0 %v12524_v55  ;;  %2332 = vmatpush.bf16.msrb.mxu1 %v12525_v60 }
 0x2e6   :  { %2345 = vmatpush.bf16.msrb.mxu2 %v12526_v19  ;;  %2358 = vmatpush.bf16.msrb.mxu3 %v12527_v3 }
 0x2e9   :  { %2320 = vmatpush.bf16.msrb.mxu0 %v12528_v28  ;;  %2333 = vmatpush.bf16.msrb.mxu1 %v12529_v57  ;;  %v12553_v57 = vld [vmem:[#allocation65_spill] sm:$0xff] }
 0x2ea   :  { %2346 = vmatpush.bf16.msrb.mxu2 %v12530_v24  ;;  %2359 = vmatpush.bf16.msrb.mxu3 %v12531_v13 }
 0x2ed   :  { %2321 = vmatpush.bf16.msrb.mxu0 %v12532_v50  ;;  %2334 = vmatpush.bf16.msrb.mxu1 %v12533_v5  ;;  %v12551_v5 = vld [vmem:[#allocation63_spill] sm:$0xff] }
 0x2ee   :  { %2347 = vmatpush.bf16.msrb.mxu2 %v12534_v14  ;;  %2360 = vmatpush.bf16.msrb.mxu3 %v12535_v32  ;;  %v12546_v32 = vld [vmem:[#allocation48_spill] sm:$0xff] }
 0x2f1   :  { %2322 = vmatpush.bf16.msrb.mxu0 %v12536_v6  ;;  %2335 = vmatpush.bf16.msrb.mxu1 %v12537_v10  ;;  %v12547_v6 = vld [vmem:[#allocation49_spill] sm:$0xff]  ;;  %v12548_v10 = vld [vmem:[#allocation52_spill] sm:$0xff] }
 0x2f2   :  { %2348 = vmatpush.bf16.msrb.mxu2 %v12538_v61  ;;  %2361 = vmatpush.bf16.msrb.mxu3 %v12539_v42  ;;  %v12549_v61 = vld [vmem:[#allocation61_spill] sm:$0xff]  ;;  %v12550_v42 = vld [vmem:[#allocation54_spill] sm:$0xff] }
 0x2f3   :  { %v541_v14 = vadd.f32 %v12549_v61, %v12548_v10 }
 0x2f5   :  { %2323 = vmatpush.bf16.msrb.mxu0 %v12540_v18  ;;  %2336 = vmatpush.bf16.msrb.mxu1 %v12541_v41  ;;  %v570_v18 = vadd.f32 %v12551_v5, %v12550_v42 }
 0x2f6   :  { %2349 = vmatpush.bf16.msrb.mxu2 %v12542_v47  ;;  %2362 = vmatpush.bf16.msrb.mxu3 %v12543_v31 }
 0x2f9   :  { %2324 = vmatpush.bf16.msrb.mxu0 %v12544_v49  ;;  %2337 = vmatpush.bf16.msrb.mxu1 %v12545_v0  ;;  %v12552_v49 = vld [vmem:[#allocation59_spill] sm:$0xff] }
 0x2fa   :  { %2350 = vmatpush.bf16.msrb.mxu2 %v12546_v32  ;;  %2363 = vmatpush.bf16.msrb.mxu3 %v12547_v6  ;;  %v628_v0 = vadd.f32 %v12553_v57, %v12552_v49 }
 0x338   :  { %v2006_v50 = vpop.f32.mrf.mxu0  ;;  %v2019_v41 = vpop.f32.mrf.mxu1 }
 0x339   :  { %v2049_v13 = vadd.f32 %v2006_v50, %v541_v14  ;;  %v2050_v47 = vadd.f32 %v2019_v41, %v570_v18  ;;  %v12555_v14 = vld [vmem:[#allocation64_spill] sm:$0xff] }
 0x33b   :  { %v7525_v24 = vmul.f32 -1.442695, %v2049_v13  ;;  %v7526_v31 = vmul.f32 -1.442695, %v2050_v47  ;;  %v12556_v47 = vld [vmem:[#allocation102_spill] sm:$0xff] }
 0x33d   :  { %8800 = vpow2.f32 %v7525_v24  ;;  %v12554_v24 = vld [vmem:[#allocation58_spill] sm:$0xff] }
 0x33e   :  { %8802 = vpow2.f32 %v7526_v31  ;;  %v599_v18 = vadd.f32 %v12555_v14, %v12554_v24 }
 0x33f   :  { %v2032_v32 = vpop.f32.mrf.mxu2  ;;  %v2045_v28 = vpop.f32.mrf.mxu3 }
 0x340   :  { %v2052_v6 = vadd.f32 %v2045_v28, %v628_v0  ;;  %v2008_v3 = vpop.f32.mrf.mxu0  ;;  %v2021_v19 = vpop.f32.mrf.mxu1  ;;  %v2051_v31 = vadd.f32 %v2032_v32, %v599_v18 }
 0x342   :  { %v7527_v61 = vmul.f32 -1.442695, %v2052_v6 }
 0x343   :  { %v8801_v10 = vpop.eup %8800 }
 0x344   :  { %v8803_v60 = vpop.eup %8802  ;;  %v2120_v5 = vadd.f32 1.0, %v8801_v10  ;;  %8804 = vpow2.f32 %v7527_v61 }
 0x345   :  { %v2139_v42 = vadd.f32 1.0, %v8803_v60 }
 0x346   :  { %8806 = vrcp.f32 %v2120_v5  ;;  %v2130_v24 = vand.u32 2147483647, %v2120_v5  ;;  %v2132_v32 = vand.u32 2147483648, %v2120_v5  ;;  %vm2126_vm11 = vweird.f32 %v2120_v5 }
 0x347   :  { %8808 = vrcp.f32 %v2139_v42  ;;  %v2034_v13 = vpop.f32.mrf.mxu2  ;;  %v2047_v50 = vpop.f32.mrf.mxu3  ;;  %v2151_v14 = vand.u32 2147483648, %v2139_v42  ;;  %v2149_v56 = vand.u32 2147483647, %v2139_v42  ;;  %vm2145_vm10 = vweird.f32 %v2139_v42 }
 0x348   :  { %v12557_v13 = vld [vmem:[#allocation103_spill] sm:$0xff]  ;;  %vm2131_vm14 = vcmp.eq.f32.partialorder %v2130_v24, 8.507059e+37 }
 0x349   :  { %vm2150_vm15 = vcmp.eq.f32.partialorder %v2149_v56, 8.507059e+37 }
 0x34a   :  { %v8805_v57 = vpop.eup %8804 }
 0x34b   :  { %v10213_v41 = vadd.f32 1.0, %v8805_v57 }
 0x34c   :  { %v8807_v0 = vpop.eup %8806  ;;  %v2070_v3 = vpop.f32.mrf.mxu0 }
 0x34d   :  { %v2083_v19 = vpop.f32.mrf.mxu1  ;;  %v8809_v28 = vpop.eup %8808  ;;  %v2122_v6 = vmul.f32 %v8807_v0, %v2120_v5  ;;  %8810 = vrcp.f32 %v10213_v41  ;;  %v2113_v61 = vadd.f32 %v2070_v3, %v12556_v47  ;;  %vm2127_vm8 = vweird.f32 %v8807_v0 }
 0x34e   :  { %v2141_v10 = vmul.f32 %v8809_v28, %v2139_v42  ;;  %8812 = vtanh.f32 %v2051_v31  ;;  %v2114_v50 = vadd.f32 %v2083_v19, %v12557_v13  ;;  %vm2146_vm9 = vweird.f32 %v8809_v28  ;;  %vm2128_vm12 = vmor %vm2126_vm11, %vm2127_vm8  ;;  %v12558_v42 = vld [vmem:[#allocation106_spill] sm:$0xff] }
 0x34f   :  { %v2123_v60 = vsub.f32 1.0, %v2122_v6  ;;  %v7528_v57 = vmul.f32 -1.442695, %v2113_v61  ;;  %v2133_v19 = vor.u32 1.1754944e-38, %v2132_v32  ;;  %vm2147_vm13 = vmor %vm2145_vm10, %vm2146_vm9  ;;  %v2171_v56 = vand.u32 2147483648, %v10213_v41 }
 0x350   :  { %v2142_v49 = vsub.f32 1.0, %v2141_v10  ;;  %v7529_v55 = vmul.f32 -1.442695, %v2114_v50  ;;  %vm2165_vm1 = vweird.f32 %v10213_v41 }
 0x351   :  { %v2124_v18 = vmul.f32 %v8807_v0, %v2123_v60  ;;  %8814 = vpow2.f32 %v7528_v57 }
 0x352   :  { %v2143_v2 = vmul.f32 %v8809_v28, %v2142_v49  ;;  %8816 = vpow2.f32 %v7529_v55  ;;  %v2152_v49 = vor.u32 1.1754944e-38, %v2151_v14 }
 0x353   :  { %v8811_v51 = vpop.eup %8810  ;;  %v2125_v26 = vadd.f32 %v8807_v0, %v2124_v18  ;;  %v2096_v31 = vpop.f32.mrf.mxu2 }
 0x354   :  { %v2109_v3 = vpop.f32.mrf.mxu3  ;;  %v2144_v6 = vadd.f32 %v8809_v28, %v2143_v2  ;;  %v2161_v10 = vmul.f32 %v8811_v51, %v10213_v41  ;;  %v2072_v60 = vpop.f32.mrf.mxu0  ;;  %vm2166_vm0 = vweird.f32 %v8811_v51 }
 0x355   :  { %v2085_v47 = vpop.f32.mrf.mxu1  ;;  %v8813_v61 = vpop.eup %8812  ;;  %v2129_v13 = vsel %vm2128_vm12, %v8807_v0, %v2125_v26  ;;  %v2116_v50 = vadd.f32 %v2109_v3, %v12558_v42  ;;  %vm2167_vm2 = vmor %vm2165_vm1, %vm2166_vm0 }
 0x356   :  { %v2134_v5 = vsel %vm2131_vm14, %v2133_v19, %v2129_v13  ;;  %v2148_v18 = vsel %vm2147_vm13, %v8809_v28, %v2144_v6  ;;  %v2162_v57 = vsub.f32 1.0, %v2161_v10  ;;  %v2172_v28 = vor.u32 1.1754944e-38, %v2171_v56 }
 0x357   :  { %v2153_v33 = vsel %vm2150_vm15, %v2152_v49, %v2148_v18  ;;  %v2176_v32 = vmul.f32 %v8813_v61, %v2134_v5  ;;  %v7530_v2 = vmul.f32 -1.442695, %v2116_v50  ;;  %v8815_v60 = vpop.eup %8814  ;;  %v12559_v49 = vld [vmem:[#allocation104_spill] sm:$0xff] }
 0x358   :  { %v2175_v4 = vmul.f32 %v2153_v33, %v10109_v48  ;;  %v2163_v55 = vmul.f32 %v8811_v51, %v2162_v57  ;;  %v8817_v47 = vpop.eup %8816  ;;  %v2183_v14 = vadd.f32 1.0, %v8815_v60  ;;  %v2169_v48 = vand.u32 2147483647, %v10213_v41 }
 0x359   :  { %8818 = vpow2.f32 %v7530_v2  ;;  %v2202_v24 = vadd.f32 1.0, %v8817_v47  ;;  %v2115_v13 = vadd.f32 %v2096_v31, %v12559_v49 }
 0x35a   :  { %v10222_v59 = vadd.f32 %v2176_v32, %v2175_v4  ;;  %v2164_v26 = vadd.f32 %v8811_v51, %v2163_v55  ;;  %vm2170_vm3 = vcmp.eq.f32.partialorder %v2169_v48, 8.507059e+37  ;;  %v2195_v32 = vand.u32 2147483648, %v2183_v14 }
 0x35b   :  { %v2098_v0 = vpop.f32.mrf.mxu2  ;;  %v2214_v55 = vand.u32 2147483648, %v2202_v24  ;;  %v2193_v47 = vand.u32 2147483647, %v2183_v14  ;;  %vm2189_vm6 = vweird.f32 %v2183_v14  ;;  %vm2208_vm7 = vweird.f32 %v2202_v24 }
 0x35c   :  { %v2111_v3 = vpop.f32.mrf.mxu3  ;;  %8820 = vtanh.f32 %v10222_v59  ;;  %v2168_v4 = vsel %vm2167_vm2, %v8811_v51, %v2164_v26  ;;  %v2212_v26 = vand.u32 2147483647, %v2202_v24  ;;  %v2196_v56 = vor.u32 1.1754944e-38, %v2195_v32 }
 0x35d   :  { %8822 = vrcp.f32 %v2183_v14  ;;  %v2173_v10 = vsel %vm2170_vm3, %v2172_v28, %v2168_v4  ;;  %v2215_v4 = vor.u32 1.1754944e-38, %v2214_v55  ;;  %vm2194_vm10 = vcmp.eq.f32.partialorder %v2193_v47, 8.507059e+37  ;;  %v12564_v47 = vld [vmem:[#allocation21_spill] sm:$0xff] }
 0x35e   :  { %8824 = vrcp.f32 %v2202_v24  ;;  %vm2213_vm11 = vcmp.eq.f32.partialorder %v2212_v26, 8.507059e+37  ;;  %v12566_v26 = vld [vmem:[#allocation23_spill] sm:$0xff] }
 0x35f   :  { %v8819_v33 = vpop.eup %8818 }
 0x360   :  { %v10228_v19 = vadd.f32 1.0, %v8819_v33 }
 0x362   :  { %v8821_v6 = vpop.eup %8820  ;;  %8826 = vrcp.f32 %v10228_v19  ;;  %vm2228_vm13 = vweird.f32 %v10228_v19 }
 0x363   :  { %v8823_v61 = vpop.eup %8822  ;;  %v10232_v42 = vmul.f32 %v8821_v6, %v2173_v10  ;;  %8828 = vtanh.f32 %v2115_v13 }
 0x364   :  { %v8825_v50 = vpop.eup %8824  ;;  %v2185_v41 = vmul.f32 %v8823_v61, %v2183_v14  ;;  %vm2190_vm4 = vweird.f32 %v8823_v61 }
 0x365   :  { %12560 = vst [vmem:[#allocation55_spill] sm:$0xff] %v10232_v42  ;;  %v2204_v5 = vmul.f32 %v8825_v50, %v2202_v24  ;;  %v2255_v18 = vpack.c.bf16 %v10232_v42, %v10232_v42  ;;  %vm2209_vm5 = vweird.f32 %v8825_v50  ;;  %vm2191_vm8 = vmor %vm2189_vm6, %vm2190_vm4  ;;  %v12590_v42 = vld [vmem:[#allocation47_spill] sm:$0xff] }
 0x366   :  { %v2186_v51 = vsub.f32 1.0, %v2185_v41  ;;  %vm2210_vm9 = vmor %vm2208_vm7, %vm2209_vm5 }
 0x367   :  { %v2205_v57 = vsub.f32 1.0, %v2204_v5  ;;  %2264 = vmatmul.bf16.vlgmr.msra.gmra.mxu0 %v2255_v18  ;;  %2277 = vmatmul.bf16.vlgmr.msra.gmra.mxu1 %v2255_v18 }
 0x368   :  { %v8827_v2 = vpop.eup %8826  ;;  %v2187_v60 = vmul.f32 %v8823_v61, %v2186_v51  ;;  %2290 = vmatmul.bf16.vlgmr.msra.gmra.mxu2 %v2255_v18  ;;  %2303 = vmatmul.bf16.vlgmr.msra.gmra.mxu3 %v2255_v18 }
 0x369   :  { %v2206_v31 = vmul.f32 %v8825_v50, %v2205_v57  ;;  %v2224_v0 = vmul.f32 %v8827_v2, %v10228_v19  ;;  %2506 = vmatpush.bf16.msra.mxu0 %v9406_v7  ;;  %2519 = vmatpush.bf16.msra.mxu1 %v9408_v11  ;;  %v8829_v6 = vpop.eup %8828  ;;  %vm2229_vm12 = vweird.f32 %v8827_v2 }
 0x36a   :  { %v2188_v3 = vadd.f32 %v8823_v61, %v2187_v60  ;;  %2532 = vmatpush.bf16.msra.mxu2 %v9421_v25  ;;  %2545 = vmatpush.bf16.msra.mxu3 %v9410_v12  ;;  %vm2230_vm14 = vmor %vm2228_vm13, %vm2229_vm12  ;;  %v12563_v60 = vld [vmem:[#allocation20_spill] sm:$0xff] }
 0x36b   :  { %v2207_v48 = vadd.f32 %v8825_v50, %v2206_v31  ;;  %v2225_v33 = vsub.f32 1.0, %v2224_v0  ;;  %v12565_v31 = vld [vmem:[#allocation22_spill] sm:$0xff]  ;;  %v12567_v0 = vld [vmem:[#allocation24_spill] sm:$0xff] }
 0x36c   :  { %v2192_v28 = vsel %vm2191_vm8, %v8823_v61, %v2188_v3  ;;  %v12568_v3 = vld [vmem:[#allocation25_spill] sm:$0xff] }
 0x36d   :  { %v2197_v10 = vsel %vm2194_vm10, %v2196_v56, %v2192_v28  ;;  %v2211_v49 = vsel %vm2210_vm9, %v8825_v50, %v2207_v48  ;;  %2507 = vmatpush.bf16.msra.mxu0 %v9413_v16  ;;  %2520 = vmatpush.bf16.msra.mxu1 %v9417_v21  ;;  %v2226_v24 = vmul.f32 %v8827_v2, %v2225_v33  ;;  %v2234_v50 = vand.u32 2147483648, %v10228_v19  ;;  %v12569_v56 = vld [vmem:[#allocation26_spill] sm:$0xff]  ;;  %v12570_v48 = vld [vmem:[#allocation27_spill] sm:$0xff]  ;;  %v12571_v33 = vld [vmem:[#allocation28_spill] sm:$0xff] }
 0x36e   :  { %v2216_v14 = vsel %vm2213_vm11, %v2215_v4, %v2211_v49  ;;  %v2239_v13 = vmul.f32 %v8829_v6, %v2197_v10  ;;  %2533 = vmatpush.bf16.msra.mxu2 %v9443_v40  ;;  %2546 = vmatpush.bf16.msra.mxu3 %v9419_v22  ;;  %v12572_v4 = vld [vmem:[#allocation29_spill] sm:$0xff]  ;;  %v12573_v28 = vld [vmem:[#allocation30_spill] sm:$0xff]  ;;  %v12574_v6 = vld [vmem:[#allocation31_spill] sm:$0xff] }
 0x36f   :  { %v2238_v41 = vmul.f32 %v2216_v14, %v10137_v27  ;;  %v2227_v61 = vadd.f32 %v8827_v2, %v2226_v24  ;;  %v2232_v27 = vand.u32 2147483647, %v10228_v19  ;;  %v2235_v51 = vor.u32 1.1754944e-38, %v2234_v50  ;;  %v12575_v10 = vld [vmem:[#allocation32_spill] sm:$0xff]  ;;  %v12576_v49 = vld [vmem:[#allocation33_spill] sm:$0xff]  ;;  %v12577_v14 = vld [vmem:[#allocation34_spill] sm:$0xff] }
 0x370   :  { %v12579_v24 = vld [vmem:[#allocation36_spill] sm:$0xff]  ;;  %v12582_v50 = vld [vmem:[#allocation39_spill] sm:$0xff] }
 0x371   :  { %v10247_v5 = vadd.f32 %v2239_v13, %v2238_v41  ;;  %2508 = vmatpush.bf16.msra.mxu0 %v9436_v30  ;;  %2521 = vmatpush.bf16.msra.mxu1 %v9438_v34  ;;  %v2231_v18 = vsel %vm2230_vm14, %v8827_v2, %v2227_v61  ;;  %vm2233_vm15 = vcmp.eq.f32.partialorder %v2232_v27, 8.507059e+37  ;;  %v12562_v2 = vld [vmem:[#allocation17_spill] sm:$0xff]  ;;  %v12578_v13 = vld [vmem:[#allocation35_spill] sm:$0xff]  ;;  %v12581_v61 = vld [vmem:[#allocation38_spill] sm:$0xff] }
 0x372   :  { %2534 = vmatpush.bf16.msra.mxu2 %v12428_v43  ;;  %2547 = vmatpush.bf16.msra.mxu3 %v9440_v36  ;;  %v2236_v32 = vsel %vm2233_vm15, %v2235_v51, %v2231_v18  ;;  %v12580_v41 = vld [vmem:[#allocation37_spill] sm:$0xff]  ;;  %v12583_v27 = vld [vmem:[#allocation40_spill] sm:$0xff]  ;;  %v12585_v51 = vld [vmem:[#allocation42_spill] sm:$0xff] }
 0x373   :  { %8830 = vtanh.f32 %v10247_v5  ;;  %v12584_v18 = vld [vmem:[#allocation41_spill] sm:$0xff] }
 0x375   :  { %2509 = vmatpush.bf16.msra.mxu0 %v9447_v44  ;;  %2522 = vmatpush.bf16.msra.mxu1 %v9449_v45 }
 0x376   :  { %2535 = vmatpush.bf16.msra.mxu2 %v9461_v54  ;;  %2548 = vmatpush.bf16.msra.mxu3 %v12430_v58 }
 0x379   :  { %v8831_v57 = vpop.eup %8830  ;;  %2510 = vmatpush.bf16.msra.mxu0 %v12431_v20  ;;  %2523 = vmatpush.bf16.msra.mxu1 %v9469_v62 }
 0x37a   :  { %v10263_v55 = vmul.f32 %v8831_v57, %v2236_v32  ;;  %2536 = vmatpush.bf16.msra.mxu2 %v9471_v63  ;;  %2549 = vmatpush.bf16.msra.mxu3 %v9474_v35  ;;  %v12586_v57 = vld [vmem:[#allocation43_spill] sm:$0xff]  ;;  %v12587_v32 = vld [vmem:[#allocation44_spill] sm:$0xff] }
 0x37c   :  { %12561 = vst [vmem:[#allocation53_spill] sm:$0xff] %v10263_v55  ;;  %v2316_v19 = vpack.c.bf16 %v10263_v55, %v10263_v55  ;;  %v12589_v55 = vld [vmem:[#allocation46_spill] sm:$0xff] }
 0x37d   :  { %2511 = vmatpush.bf16.msra.mxu0 %v9478_v8  ;;  %2524 = vmatpush.bf16.msra.mxu1 %v9480_v9 }
 0x37e   :  { %2325 = vmatmul.bf16.vlgmr.msrb.gmra.mxu0 %v2316_v19  ;;  %2338 = vmatmul.bf16.vlgmr.msrb.gmra.mxu1 %v2316_v19 }
 0x37f   :  { %2351 = vmatmul.bf16.vlgmr.msrb.gmra.mxu2 %v2316_v19  ;;  %2364 = vmatmul.bf16.vlgmr.msrb.gmra.mxu3 %v2316_v19  ;;  %v12588_v19 = vld [vmem:[#allocation45_spill] sm:$0xff] }
 0x380   :  { %2537 = vmatpush.bf16.msra.mxu2 %v9483_v15  ;;  %2550 = vmatpush.bf16.msra.mxu3 %v9485_v23 }
 0x381   :  { %2512 = vmatpush.bf16.msra.mxu0 %v9488_v29  ;;  %2525 = vmatpush.bf16.msra.mxu1 %v9492_v37 }
 0x384   :  { %2538 = vmatpush.bf16.msra.mxu2 %v9494_v38  ;;  %2551 = vmatpush.bf16.msra.mxu3 %v9497_v39 }
 0x385   :  { %2513 = vmatpush.bf16.msra.mxu0 %v9504_v46  ;;  %2526 = vmatpush.bf16.msra.mxu1 %v9508_v52 }
 0x388   :  { %2539 = vmatpush.bf16.msra.mxu2 %v9510_v53  ;;  %2552 = vmatpush.bf16.msra.mxu3 %v12562_v2 }
 0x389   :  { %2567 = vmatpush.bf16.msrb.mxu0 %v9518_v1  ;;  %2580 = vmatpush.bf16.msrb.mxu1 %v12517_v17 }
 0x38c   :  { %2593 = vmatpush.bf16.msrb.mxu2 %v12563_v60  ;;  %2606 = vmatpush.bf16.msrb.mxu3 %v12564_v47 }
 0x38d   :  { %2568 = vmatpush.bf16.msrb.mxu0 %v12565_v31  ;;  %2581 = vmatpush.bf16.msrb.mxu1 %v12566_v26 }
 0x390   :  { %2594 = vmatpush.bf16.msrb.mxu2 %v12567_v0  ;;  %2607 = vmatpush.bf16.msrb.mxu3 %v12568_v3 }
 0x391   :  { %2569 = vmatpush.bf16.msrb.mxu0 %v12569_v56  ;;  %2582 = vmatpush.bf16.msrb.mxu1 %v12570_v48 }
 0x394   :  { %2595 = vmatpush.bf16.msrb.mxu2 %v12571_v33  ;;  %2608 = vmatpush.bf16.msrb.mxu3 %v12572_v4  ;;  %v12601_v33 = vld [vmem:[#allocation87_spill] sm:$0xff] }
 0x395   :  { %2570 = vmatpush.bf16.msrb.mxu0 %v12573_v28  ;;  %2583 = vmatpush.bf16.msrb.mxu1 %v12574_v6 }
 0x398   :  { %2596 = vmatpush.bf16.msrb.mxu2 %v12575_v10  ;;  %2609 = vmatpush.bf16.msrb.mxu3 %v12576_v49  ;;  %v12595_v49 = vld [vmem:[#allocation70_spill] sm:$0xff] }
 0x399   :  { %2571 = vmatpush.bf16.msrb.mxu0 %v12577_v14  ;;  %2584 = vmatpush.bf16.msrb.mxu1 %v12578_v13  ;;  %v12594_v13 = vld [vmem:[#allocation67_spill] sm:$0xff] }
 0x39c   :  { %2597 = vmatpush.bf16.msrb.mxu2 %v12579_v24  ;;  %2610 = vmatpush.bf16.msrb.mxu3 %v12580_v41  ;;  %v12591_v41 = vld [vmem:[#allocation48_spill] sm:$0xff]  ;;  %v12593_v24 = vld [vmem:[#allocation66_spill] sm:$0xff] }
 0x39d   :  { %2572 = vmatpush.bf16.msrb.mxu0 %v12581_v61  ;;  %2585 = vmatpush.bf16.msrb.mxu1 %v12582_v50  ;;  %v12592_v61 = vld [vmem:[#allocation49_spill] sm:$0xff] }
 0x3a0   :  { %2598 = vmatpush.bf16.msrb.mxu2 %v12583_v27  ;;  %2611 = vmatpush.bf16.msrb.mxu3 %v12584_v18 }
 0x3a1   :  { %2573 = vmatpush.bf16.msrb.mxu0 %v12585_v51  ;;  %2586 = vmatpush.bf16.msrb.mxu1 %v12586_v57 }
 0x3a4   :  { %2599 = vmatpush.bf16.msrb.mxu2 %v12587_v32  ;;  %2612 = vmatpush.bf16.msrb.mxu3 %v12588_v19 }
 0x3a5   :  { %2574 = vmatpush.bf16.msrb.mxu0 %v12589_v55  ;;  %2587 = vmatpush.bf16.msrb.mxu1 %v12590_v42 }
 0x3a8   :  { %2600 = vmatpush.bf16.msrb.mxu2 %v12591_v41  ;;  %2613 = vmatpush.bf16.msrb.mxu3 %v12592_v61 }
 0x3e4   :  { %v2265_v50 = vpop.f32.mrf.mxu0  ;;  %v2278_v27 = vpop.f32.mrf.mxu1 }
 0x3e5   :  { %v2308_v18 = vadd.f32 %v2265_v50, %v12593_v24  ;;  %v2309_v51 = vadd.f32 %v2278_v27, %v12594_v13  ;;  %v12596_v27 = vld [vmem:[#allocation68_spill] sm:$0xff] }
 0x3e7   :  { %v7531_v14 = vmul.f32 -1.442695, %v2308_v18  ;;  %v7532_v57 = vmul.f32 -1.442695, %v2309_v51 }
 0x3e9   :  { %8832 = vpow2.f32 %v7531_v14 }
 0x3ea   :  { %8834 = vpow2.f32 %v7532_v57 }
 0x3eb   :  { %v2291_v32 = vpop.f32.mrf.mxu2  ;;  %v2304_v19 = vpop.f32.mrf.mxu3 }
 0x3ec   :  { %v2311_v55 = vadd.f32 %v2304_v19, %v12595_v49  ;;  %v2267_v10 = vpop.f32.mrf.mxu0  ;;  %v2280_v42 = vpop.f32.mrf.mxu1  ;;  %v2310_v14 = vadd.f32 %v2291_v32, %v12596_v27 }
 0x3ed   :  { %v12597_v42 = vld [vmem:[#allocation80_spill] sm:$0xff] }
 0x3ee   :  { %v7533_v6 = vmul.f32 -1.442695, %v2311_v55  ;;  %v12598_v55 = vld [vmem:[#allocation97_spill] sm:$0xff] }
 0x3ef   :  { %v8833_v41 = vpop.eup %8832  ;;  %v657_v10 = vadd.f32 %v12598_v55, %v12597_v42 }
 0x3f0   :  { %v8835_v28 = vpop.eup %8834  ;;  %v2376_v61 = vadd.f32 1.0, %v8833_v41  ;;  %8836 = vpow2.f32 %v7533_v6  ;;  %v12599_v6 = vld [vmem:[#allocation81_spill] sm:$0xff] }
 0x3f1   :  { %v2395_v4 = vadd.f32 1.0, %v8835_v28  ;;  %v12600_v28 = vld [vmem:[#allocation99_spill] sm:$0xff] }
 0x3f2   :  { %8838 = vrcp.f32 %v2376_v61  ;;  %v686_v19 = vadd.f32 %v12600_v28, %v12599_v6  ;;  %v2386_v56 = vand.u32 2147483647, %v2376_v61  ;;  %v2388_v3 = vand.u32 2147483648, %v2376_v61 }
 0x3f3   :  { %8840 = vrcp.f32 %v2395_v4  ;;  %v2293_v24 = vpop.f32.mrf.mxu2  ;;  %v2306_v13 = vpop.f32.mrf.mxu3  ;;  %v2407_v26 = vand.u32 2147483648, %v2395_v4  ;;  %v2405_v42 = vand.u32 2147483647, %v2395_v4  ;;  %vm2401_vm2 = vweird.f32 %v2395_v4 }
 0x3f4   :  { %v12602_v24 = vld [vmem:[#allocation101_spill] sm:$0xff]  ;;  %vm2382_vm3 = vweird.f32 %v2376_v61  ;;  %vm2387_vm6 = vcmp.eq.f32.partialorder %v2386_v56, 8.507059e+37 }
 0x3f5   :  { %v744_v13 = vadd.f32 %v12602_v24, %v12601_v33  ;;  %vm2406_vm7 = vcmp.eq.f32.partialorder %v2405_v42, 8.507059e+37 }
 0x3f6   :  { %v8837_v50 = vpop.eup %8836 }
 0x3f7   :  { %v10317_v18 = vadd.f32 1.0, %v8837_v50 }
 0x3f8   :  { %v8839_v51 = vpop.eup %8838 }
 0x3f9   :  { %v8841_v57 = vpop.eup %8840  ;;  %v2378_v49 = vmul.f32 %v8839_v51, %v2376_v61  ;;  %8842 = vrcp.f32 %v10317_v18  ;;  %vm2383_vm0 = vweird.f32 %v8839_v51  ;;  %v2427_v42 = vand.u32 2147483648, %v10317_v18 }
 0x3fa   :  { %v2397_v41 = vmul.f32 %v8841_v57, %v2395_v4  ;;  %8844 = vtanh.f32 %v2310_v14  ;;  %vm2402_vm1 = vweird.f32 %v8841_v57  ;;  %vm2384_vm4 = vmor %vm2382_vm3, %vm2383_vm0  ;;  %v2389_v14 = vor.u32 1.1754944e-38, %v2388_v3 }
 0x3fb   :  { %v2379_v48 = vsub.f32 1.0, %v2378_v49  ;;  %v2326_v32 = vpop.f32.mrf.mxu0  ;;  %v2339_v50 = vpop.f32.mrf.mxu1  ;;  %vm2403_vm5 = vmor %vm2401_vm2, %vm2402_vm1  ;;  %vm2421_vm9 = vweird.f32 %v10317_v18 }
 0x3fc   :  { %v2398_v27 = vsub.f32 1.0, %v2397_v41  ;;  %v2369_v0 = vadd.f32 %v2326_v32, %v657_v10  ;;  %v2370_v47 = vadd.f32 %v2339_v50, %v686_v19 }
 0x3fd   :  { %v2380_v31 = vmul.f32 %v8839_v51, %v2379_v48  ;;  %v2408_v48 = vor.u32 1.1754944e-38, %v2407_v26 }
 0x3fe   :  { %v2399_v55 = vmul.f32 %v8841_v57, %v2398_v27  ;;  %v7534_v60 = vmul.f32 -1.442695, %v2369_v0  ;;  %v7535_v49 = vmul.f32 -1.442695, %v2370_v47 }
 0x3ff   :  { %v8843_v28 = vpop.eup %8842  ;;  %v2381_v6 = vadd.f32 %v8839_v51, %v2380_v31 }
 0x400   :  { %v2400_v24 = vadd.f32 %v8841_v57, %v2399_v55  ;;  %v2417_v41 = vmul.f32 %v8843_v28, %v10317_v18  ;;  %8846 = vpow2.f32 %v7534_v60  ;;  %v8845_v10 = vpop.eup %8844  ;;  %vm2422_vm8 = vweird.f32 %v8843_v28 }
 0x401   :  { %v2385_v32 = vsel %vm2384_vm4, %v8839_v51, %v2381_v6  ;;  %8848 = vpow2.f32 %v7535_v49  ;;  %vm2423_vm10 = vmor %vm2421_vm9, %vm2422_vm8 }
 0x402   :  { %v2390_v19 = vsel %vm2387_vm6, %v2389_v14, %v2385_v32  ;;  %v2404_v50 = vsel %vm2403_vm5, %v8841_v57, %v2400_v24  ;;  %v2418_v0 = vsub.f32 1.0, %v2417_v41  ;;  %v2352_v4 = vpop.f32.mrf.mxu2  ;;  %v2365_v31 = vpop.f32.mrf.mxu3  ;;  %v2428_v14 = vor.u32 1.1754944e-38, %v2427_v42  ;;  %v12603_v41 = vld [vmem:[#allocation86_spill] sm:$0xff] }
 0x403   :  { %v2409_v61 = vsel %vm2406_vm7, %v2408_v48, %v2404_v50  ;;  %v2432_v47 = vmul.f32 %v8845_v10, %v2390_v19  ;;  %v2372_v27 = vadd.f32 %v2365_v31, %v744_v13  ;;  %v2328_v3 = vpop.f32.mrf.mxu0  ;;  %v2341_v55 = vpop.f32.mrf.mxu1  ;;  %v2425_v13 = vand.u32 2147483647, %v10317_v18 }
 0x404   :  { %v2431_v33 = vmul.f32 %v2409_v61, %v10222_v59  ;;  %v2419_v60 = vmul.f32 %v8843_v28, %v2418_v0 }
 0x405   :  { %v7536_v17 = vmul.f32 -1.442695, %v2372_v27  ;;  %vm2426_vm11 = vcmp.eq.f32.partialorder %v2425_v13, 8.507059e+37 }
 0x406   :  { %v8847_v1 = vpop.eup %8846  ;;  %v10328_v26 = vadd.f32 %v2432_v47, %v2431_v33  ;;  %v2420_v51 = vadd.f32 %v8843_v28, %v2419_v60 }
 0x407   :  { %v8849_v56 = vpop.eup %8848  ;;  %v2439_v57 = vadd.f32 1.0, %v8847_v1  ;;  %8850 = vpow2.f32 %v7536_v17  ;;  %v12604_v1 = vld [vmem:[#allocation100_spill] sm:$0xff] }
 0x408   :  { %8852 = vtanh.f32 %v10328_v26  ;;  %v2458_v6 = vadd.f32 1.0, %v8849_v56  ;;  %v2424_v49 = vsel %vm2423_vm10, %v8843_v28, %v2420_v51  ;;  %v715_v17 = vadd.f32 %v12604_v1, %v12603_v41  ;;  %v12636_v41 = vld [vmem:[#allocation47_spill] sm:$0xff] }
 0x409   :  { %8854 = vrcp.f32 %v2439_v57  ;;  %v2429_v32 = vsel %vm2426_vm11, %v2428_v14, %v2424_v49  ;;  %v2451_v3 = vand.u32 2147483648, %v2439_v57  ;;  %v2449_v56 = vand.u32 2147483647, %v2439_v57 }
 0x40a   :  { %8856 = vrcp.f32 %v2458_v6  ;;  %v2354_v59 = vpop.f32.mrf.mxu2  ;;  %v2367_v33 = vpop.f32.mrf.mxu3  ;;  %v2371_v50 = vadd.f32 %v2352_v4, %v715_v17  ;;  %v2470_v55 = vand.u32 2147483648, %v2458_v6  ;;  %v2468_v51 = vand.u32 2147483647, %v2458_v6 }
 0x40b   :  { %vm2445_vm14 = vweird.f32 %v2439_v57  ;;  %vm2464_vm15 = vweird.f32 %v2458_v6  ;;  %v2452_v59 = vor.u32 1.1754944e-38, %v2451_v3  ;;  %vm2450_vm2 = vcmp.eq.f32.partialorder %v2449_v56, 8.507059e+37  ;;  %v12608_v56 = vld [vmem:[#allocation19_spill] sm:$0xff] }
 0x40c   :  { %v2471_v14 = vor.u32 1.1754944e-38, %v2470_v55  ;;  %vm2469_vm3 = vcmp.eq.f32.partialorder %v2468_v51, 8.507059e+37  ;;  %v12610_v51 = vld [vmem:[#allocation21_spill] sm:$0xff] }
 0x40d   :  { %v8851_v24 = vpop.eup %8850 }
 0x40e   :  { %v8853_v10 = vpop.eup %8852  ;;  %v10336_v48 = vadd.f32 1.0, %v8851_v24 }
 0x40f   :  { %v8855_v19 = vpop.eup %8854  ;;  %v10338_v0 = vmul.f32 %v8853_v10, %v2429_v32 }
 0x410   :  { %v8857_v18 = vpop.eup %8856  ;;  %v2441_v31 = vmul.f32 %v8855_v19, %v2439_v57  ;;  %8858 = vrcp.f32 %v10336_v48  ;;  %vm2446_vm12 = vweird.f32 %v8855_v19  ;;  %vm2484_vm5 = vweird.f32 %v10336_v48 }
 0x411   :  { %12605 = vst [vmem:[#allocation110_spill] sm:$0xff] %v10338_v0  ;;  %v2460_v61 = vmul.f32 %v8857_v18, %v2458_v6  ;;  %v2505_v47 = vpack.c.bf16 %v10338_v0, %v10338_v0  ;;  %8860 = vtanh.f32 %v2371_v50  ;;  %vm2465_vm13 = vweird.f32 %v8857_v18  ;;  %vm2447_vm0 = vmor %vm2445_vm14, %vm2446_vm12  ;;  %v12635_v0 = vld [vmem:[#allocation46_spill] sm:$0xff] }
 0x412   :  { %v2442_v28 = vsub.f32 1.0, %v2441_v31  ;;  %vm2466_vm1 = vmor %vm2464_vm15, %vm2465_vm13 }
 0x413   :  { %v2461_v27 = vsub.f32 1.0, %v2460_v61  ;;  %2514 = vmatmul.bf16.vlgmr.msra.gmra.mxu0 %v2505_v47  ;;  %2527 = vmatmul.bf16.vlgmr.msra.gmra.mxu1 %v2505_v47 }
 0x414   :  { %v2443_v60 = vmul.f32 %v8855_v19, %v2442_v28  ;;  %2540 = vmatmul.bf16.vlgmr.msra.gmra.mxu2 %v2505_v47  ;;  %2553 = vmatmul.bf16.vlgmr.msra.gmra.mxu3 %v2505_v47 }
 0x415   :  { %v2462_v4 = vmul.f32 %v8857_v18, %v2461_v27  ;;  %2756 = vmatpush.bf16.msra.mxu0 %v9406_v7  ;;  %2769 = vmatpush.bf16.msra.mxu1 %v9408_v11 }
 0x416   :  { %v8859_v42 = vpop.eup %8858  ;;  %v2444_v13 = vadd.f32 %v8855_v19, %v2443_v60  ;;  %2782 = vmatpush.bf16.msra.mxu2 %v9421_v25  ;;  %2795 = vmatpush.bf16.msra.mxu3 %v9410_v12  ;;  %v12607_v60 = vld [vmem:[#allocation18_spill] sm:$0xff] }
 0x417   :  { %v2463_v33 = vadd.f32 %v8857_v18, %v2462_v4  ;;  %v2480_v49 = vmul.f32 %v8859_v42, %v10336_v48  ;;  %v8861_v57 = vpop.eup %8860  ;;  %vm2485_vm4 = vweird.f32 %v8859_v42  ;;  %v12609_v4 = vld [vmem:[#allocation20_spill] sm:$0xff] }
 0x418   :  { %v2448_v24 = vsel %vm2447_vm0, %v8855_v19, %v2444_v13  ;;  %vm2486_vm6 = vmor %vm2484_vm5, %vm2485_vm4  ;;  %v12612_v13 = vld [vmem:[#allocation23_spill] sm:$0xff] }
 0x419   :  { %v2453_v1 = vsel %vm2450_vm2, %v2452_v59, %v2448_v24  ;;  %v2467_v17 = vsel %vm2466_vm1, %v8857_v18, %v2463_v33  ;;  %v2481_v6 = vsub.f32 1.0, %v2480_v49  ;;  %2757 = vmatpush.bf16.msra.mxu0 %v9413_v16  ;;  %2770 = vmatpush.bf16.msra.mxu1 %v9417_v21  ;;  %v2490_v18 = vand.u32 2147483648, %v10336_v48  ;;  %v12613_v59 = vld [vmem:[#allocation24_spill] sm:$0xff]  ;;  %v12614_v33 = vld [vmem:[#allocation25_spill] sm:$0xff]  ;;  %v12615_v49 = vld [vmem:[#allocation26_spill] sm:$0xff] }
 0x41a   :  { %v2472_v10 = vsel %vm2469_vm3, %v2471_v14, %v2467_v17  ;;  %v2495_v32 = vmul.f32 %v8861_v57, %v2453_v1  ;;  %2783 = vmatpush.bf16.msra.mxu2 %v9443_v40  ;;  %2796 = vmatpush.bf16.msra.mxu3 %v9419_v22  ;;  %v12616_v14 = vld [vmem:[#allocation27_spill] sm:$0xff]  ;;  %v12617_v24 = vld [vmem:[#allocation28_spill] sm:$0xff]  ;;  %v12618_v57 = vld [vmem:[#allocation29_spill] sm:$0xff] }
 0x41b   :  { %v2494_v50 = vmul.f32 %v2472_v10, %v10247_v5  ;;  %v2482_v31 = vmul.f32 %v8859_v42, %v2481_v6  ;;  %v2488_v5 = vand.u32 2147483647, %v10336_v48  ;;  %v2491_v47 = vor.u32 1.1754944e-38, %v2490_v18  ;;  %v12619_v1 = vld [vmem:[#allocation30_spill] sm:$0xff]  ;;  %v12620_v17 = vld [vmem:[#allocation31_spill] sm:$0xff]  ;;  %v12621_v6 = vld [vmem:[#allocation32_spill] sm:$0xff] }
 0x41c   :  { %v12622_v10 = vld [vmem:[#allocation33_spill] sm:$0xff]  ;;  %v12627_v18 = vld [vmem:[#allocation38_spill] sm:$0xff] }
 0x41d   :  { %v10355_v19 = vadd.f32 %v2495_v32, %v2494_v50  ;;  %v2483_v61 = vadd.f32 %v8859_v42, %v2482_v31  ;;  %2758 = vmatpush.bf16.msra.mxu0 %v9436_v30  ;;  %2771 = vmatpush.bf16.msra.mxu1 %v9438_v34  ;;  %vm2489_vm7 = vcmp.eq.f32.partialorder %v2488_v5, 8.507059e+37  ;;  %v12623_v32 = vld [vmem:[#allocation34_spill] sm:$0xff]  ;;  %v12624_v50 = vld [vmem:[#allocation35_spill] sm:$0xff]  ;;  %v12625_v31 = vld [vmem:[#allocation36_spill] sm:$0xff] }
 0x41e   :  { %2784 = vmatpush.bf16.msra.mxu2 %v12428_v43  ;;  %2797 = vmatpush.bf16.msra.mxu3 %v9440_v36  ;;  %v12628_v5 = vld [vmem:[#allocation39_spill] sm:$0xff] }
 0x41f   :  { %8862 = vtanh.f32 %v10355_v19  ;;  %v2487_v28 = vsel %vm2486_vm6, %v8859_v42, %v2483_v61  ;;  %v12611_v42 = vld [vmem:[#allocation22_spill] sm:$0xff]  ;;  %v12626_v61 = vld [vmem:[#allocation37_spill] sm:$0xff] }
 0x420   :  { %v2492_v3 = vsel %vm2489_vm7, %v2491_v47, %v2487_v28  ;;  %v12629_v28 = vld [vmem:[#allocation40_spill] sm:$0xff]  ;;  %v12630_v47 = vld [vmem:[#allocation41_spill] sm:$0xff] }
 0x421   :  { %2759 = vmatpush.bf16.msra.mxu0 %v9447_v44  ;;  %2772 = vmatpush.bf16.msra.mxu1 %v9449_v45 }
 0x422   :  { %2785 = vmatpush.bf16.msra.mxu2 %v9461_v54  ;;  %2798 = vmatpush.bf16.msra.mxu3 %v12430_v58 }
 0x425   :  { %v8863_v27 = vpop.eup %8862  ;;  %2760 = vmatpush.bf16.msra.mxu0 %v12431_v20  ;;  %2773 = vmatpush.bf16.msra.mxu1 %v9469_v62 }
 0x426   :  { %v10369_v55 = vmul.f32 %v8863_v27, %v2492_v3  ;;  %2786 = vmatpush.bf16.msra.mxu2 %v9471_v63  ;;  %2799 = vmatpush.bf16.msra.mxu3 %v9474_v35  ;;  %v12631_v27 = vld [vmem:[#allocation42_spill] sm:$0xff]  ;;  %v12632_v3 = vld [vmem:[#allocation43_spill] sm:$0xff] }
 0x428   :  { %12606 = vst [vmem:[#allocation111_spill] sm:$0xff] %v10369_v55  ;;  %v2566_v48 = vpack.c.bf16 %v10369_v55, %v10369_v55  ;;  %v12634_v55 = vld [vmem:[#allocation45_spill] sm:$0xff] }
 0x429   :  { %2761 = vmatpush.bf16.msra.mxu0 %v9478_v8  ;;  %2774 = vmatpush.bf16.msra.mxu1 %v9480_v9 }
 0x42a   :  { %2575 = vmatmul.bf16.vlgmr.msrb.gmra.mxu0 %v2566_v48  ;;  %2588 = vmatmul.bf16.vlgmr.msrb.gmra.mxu1 %v2566_v48 }
 0x42b   :  { %2601 = vmatmul.bf16.vlgmr.msrb.gmra.mxu2 %v2566_v48  ;;  %2614 = vmatmul.bf16.vlgmr.msrb.gmra.mxu3 %v2566_v48  ;;  %v12633_v48 = vld [vmem:[#allocation44_spill] sm:$0xff] }
 0x42c   :  { %2787 = vmatpush.bf16.msra.mxu2 %v9483_v15  ;;  %2800 = vmatpush.bf16.msra.mxu3 %v9485_v23 }
 0x42d   :  { %2762 = vmatpush.bf16.msra.mxu0 %v9488_v29  ;;  %2775 = vmatpush.bf16.msra.mxu1 %v9492_v37 }
 0x430   :  { %2788 = vmatpush.bf16.msra.mxu2 %v9494_v38  ;;  %2801 = vmatpush.bf16.msra.mxu3 %v9497_v39 }
 0x431   :  { %2763 = vmatpush.bf16.msra.mxu0 %v9504_v46  ;;  %2776 = vmatpush.bf16.msra.mxu1 %v9508_v52 }
 0x434   :  { %2789 = vmatpush.bf16.msra.mxu2 %v9510_v53  ;;  %2802 = vmatpush.bf16.msra.mxu3 %v12562_v2 }
 0x435   :  { %2817 = vmatpush.bf16.msrb.mxu0 %v12607_v60  ;;  %2830 = vmatpush.bf16.msrb.mxu1 %v12608_v56 }
 0x438   :  { %2843 = vmatpush.bf16.msrb.mxu2 %v12609_v4  ;;  %2856 = vmatpush.bf16.msrb.mxu3 %v12610_v51 }
 0x439   :  { %2818 = vmatpush.bf16.msrb.mxu0 %v12611_v42  ;;  %2831 = vmatpush.bf16.msrb.mxu1 %v12612_v13 }
 0x43c   :  { %2844 = vmatpush.bf16.msrb.mxu2 %v12613_v59  ;;  %2857 = vmatpush.bf16.msrb.mxu3 %v12614_v33 }
 0x43d   :  { %2819 = vmatpush.bf16.msrb.mxu0 %v12615_v49  ;;  %2832 = vmatpush.bf16.msrb.mxu1 %v12616_v14 }
 0x440   :  { %2845 = vmatpush.bf16.msrb.mxu2 %v12617_v24  ;;  %2858 = vmatpush.bf16.msrb.mxu3 %v12618_v57 }
 0x441   :  { %2820 = vmatpush.bf16.msrb.mxu0 %v12619_v1  ;;  %2833 = vmatpush.bf16.msrb.mxu1 %v12620_v17 }
 0x444   :  { %2846 = vmatpush.bf16.msrb.mxu2 %v12621_v6  ;;  %2859 = vmatpush.bf16.msrb.mxu3 %v12622_v10  ;;  %v12644_v6 = vld [vmem:[#allocation73_spill] sm:$0xff] }
 0x445   :  { %2821 = vmatpush.bf16.msrb.mxu0 %v12623_v32  ;;  %2834 = vmatpush.bf16.msrb.mxu1 %v12624_v50 }
 0x448   :  { %2847 = vmatpush.bf16.msrb.mxu2 %v12625_v31  ;;  %2860 = vmatpush.bf16.msrb.mxu3 %v12626_v61  ;;  %v12637_v61 = vld [vmem:[#allocation48_spill] sm:$0xff]  ;;  %v12642_v31 = vld [vmem:[#allocation71_spill] sm:$0xff] }
 0x449   :  { %2822 = vmatpush.bf16.msrb.mxu0 %v12627_v18  ;;  %2835 = vmatpush.bf16.msrb.mxu1 %v12628_v5  ;;  %v12638_v18 = vld [vmem:[#allocation49_spill] sm:$0xff]  ;;  %v12639_v5 = vld [vmem:[#allocation52_spill] sm:$0xff] }
 0x44c   :  { %2848 = vmatpush.bf16.msrb.mxu2 %v12629_v28  ;;  %2861 = vmatpush.bf16.msrb.mxu3 %v12630_v47  ;;  %v12640_v28 = vld [vmem:[#allocation69_spill] sm:$0xff]  ;;  %v12641_v47 = vld [vmem:[#allocation54_spill] sm:$0xff] }
 0x44d   :  { %2823 = vmatpush.bf16.msrb.mxu0 %v12631_v27  ;;  %2836 = vmatpush.bf16.msrb.mxu1 %v12632_v3  ;;  %v546_v50 = vadd.f32 %v12640_v28, %v12639_v5  ;;  %v575_v27 = vadd.f32 %v12642_v31, %v12641_v47 }
 0x450   :  { %2849 = vmatpush.bf16.msrb.mxu2 %v12633_v48  ;;  %2862 = vmatpush.bf16.msrb.mxu3 %v12634_v55 }
 0x451   :  { %2824 = vmatpush.bf16.msrb.mxu0 %v12635_v0  ;;  %2837 = vmatpush.bf16.msrb.mxu1 %v12636_v41  ;;  %v12643_v0 = vld [vmem:[#allocation59_spill] sm:$0xff] }
 0x452   :  { %v633_v41 = vadd.f32 %v12644_v6, %v12643_v0 }
 0x454   :  { %2850 = vmatpush.bf16.msrb.mxu2 %v12637_v61  ;;  %2863 = vmatpush.bf16.msrb.mxu3 %v12638_v18 }
 0x490   :  { %v2515_v32 = vpop.f32.mrf.mxu0  ;;  %v2528_v3 = vpop.f32.mrf.mxu1 }
 0x491   :  { %v2558_v10 = vadd.f32 %v2515_v32, %v546_v50  ;;  %v2559_v48 = vadd.f32 %v2528_v3, %v575_v27  ;;  %v12646_v50 = vld [vmem:[#allocation72_spill] sm:$0xff] }
 0x493   :  { %v7537_v17 = vmul.f32 -1.442695, %v2558_v10  ;;  %v7538_v55 = vmul.f32 -1.442695, %v2559_v48  ;;  %v12647_v48 = vld [vmem:[#allocation94_spill] sm:$0xff] }
 0x495   :  { %8864 = vpow2.f32 %v7537_v17  ;;  %v12645_v17 = vld [vmem:[#allocation58_spill] sm:$0xff] }
 0x496   :  { %8866 = vpow2.f32 %v7538_v55  ;;  %v604_v27 = vadd.f32 %v12646_v50, %v12645_v17 }
 0x497   :  { %v2541_v61 = vpop.f32.mrf.mxu2  ;;  %v2554_v1 = vpop.f32.mrf.mxu3 }
 0x498   :  { %v2561_v18 = vadd.f32 %v2554_v1, %v633_v41  ;;  %v2517_v57 = vpop.f32.mrf.mxu0  ;;  %v2530_v14 = vpop.f32.mrf.mxu1  ;;  %v2560_v55 = vadd.f32 %v2541_v61, %v604_v27 }
 0x49a   :  { %v7539_v28 = vmul.f32 -1.442695, %v2561_v18 }
 0x49b   :  { %v8865_v5 = vpop.eup %8864 }
 0x49c   :  { %v8867_v24 = vpop.eup %8866  ;;  %v2626_v31 = vadd.f32 1.0, %v8865_v5  ;;  %8868 = vpow2.f32 %v7539_v28 }
 0x49d   :  { %v2645_v47 = vadd.f32 1.0, %v8867_v24 }
 0x49e   :  { %8870 = vrcp.f32 %v2626_v31  ;;  %v2636_v17 = vand.u32 2147483647, %v2626_v31  ;;  %v2638_v61 = vand.u32 2147483648, %v2626_v31  ;;  %vm2632_vm11 = vweird.f32 %v2626_v31 }
 0x49f   :  { %8872 = vrcp.f32 %v2645_v47  ;;  %v2543_v10 = vpop.f32.mrf.mxu2  ;;  %v2556_v32 = vpop.f32.mrf.mxu3  ;;  %v2657_v50 = vand.u32 2147483648, %v2645_v47  ;;  %v2655_v13 = vand.u32 2147483647, %v2645_v47  ;;  %vm2651_vm10 = vweird.f32 %v2645_v47 }
 0x4a0   :  { %v12648_v10 = vld [vmem:[#allocation95_spill] sm:$0xff]  ;;  %vm2637_vm14 = vcmp.eq.f32.partialorder %v2636_v17, 8.507059e+37 }
 0x4a1   :  { %vm2656_vm15 = vcmp.eq.f32.partialorder %v2655_v13, 8.507059e+37 }
 0x4a2   :  { %v8869_v6 = vpop.eup %8868 }
 0x4a3   :  { %v10429_v3 = vadd.f32 1.0, %v8869_v6 }
 0x4a4   :  { %v8871_v41 = vpop.eup %8870 }
 0x4a5   :  { %v8873_v57 = vpop.eup %8872  ;;  %v2628_v14 = vmul.f32 %v8871_v41, %v2626_v31  ;;  %8874 = vrcp.f32 %v10429_v3  ;;  %vm2633_vm8 = vweird.f32 %v8871_v41  ;;  %v2677_v13 = vand.u32 2147483648, %v10429_v3 }
 0x4a6   :  { %v2647_v1 = vmul.f32 %v8873_v57, %v2645_v47  ;;  %8876 = vtanh.f32 %v2560_v55  ;;  %vm2652_vm9 = vweird.f32 %v8873_v57  ;;  %vm2634_vm12 = vmor %vm2632_vm11, %vm2633_vm8  ;;  %v2639_v55 = vor.u32 1.1754944e-38, %v2638_v61  ;;  %v12649_v61 = vld [vmem:[#allocation98_spill] sm:$0xff] }
 0x4a7   :  { %v2576_v18 = vpop.f32.mrf.mxu0  ;;  %v2589_v5 = vpop.f32.mrf.mxu1  ;;  %v2629_v24 = vsub.f32 1.0, %v2628_v14  ;;  %vm2653_vm13 = vmor %vm2651_vm10, %vm2652_vm9  ;;  %vm2671_vm1 = vweird.f32 %v10429_v3 }
 0x4a8   :  { %v2619_v28 = vadd.f32 %v2576_v18, %v12647_v48  ;;  %v2620_v32 = vadd.f32 %v2589_v5, %v12648_v10  ;;  %v2648_v0 = vsub.f32 1.0, %v2647_v1  ;;  %v2658_v5 = vor.u32 1.1754944e-38, %v2657_v50 }
 0x4a9   :  { %v2630_v27 = vmul.f32 %v8871_v41, %v2629_v24 }
 0x4aa   :  { %v7540_v6 = vmul.f32 -1.442695, %v2619_v28  ;;  %v7541_v49 = vmul.f32 -1.442695, %v2620_v32  ;;  %v2649_v33 = vmul.f32 %v8873_v57, %v2648_v0 }
 0x4ab   :  { %v8875_v59 = vpop.eup %8874  ;;  %v2631_v42 = vadd.f32 %v8871_v41, %v2630_v27 }
 0x4ac   :  { %8878 = vpow2.f32 %v7540_v6  ;;  %v2650_v14 = vadd.f32 %v8873_v57, %v2649_v33  ;;  %v2667_v1 = vmul.f32 %v8875_v59, %v10429_v3  ;;  %v8877_v18 = vpop.eup %8876  ;;  %vm2672_vm0 = vweird.f32 %v8875_v59 }
 0x4ad   :  { %8880 = vpow2.f32 %v7541_v49  ;;  %v2635_v24 = vsel %vm2634_vm12, %v8871_v41, %v2631_v42  ;;  %vm2673_vm2 = vmor %vm2671_vm1, %vm2672_vm0 }
 0x4ae   :  { %v2602_v48 = vpop.f32.mrf.mxu2  ;;  %v2615_v0 = vpop.f32.mrf.mxu3  ;;  %v2640_v28 = vsel %vm2637_vm14, %v2639_v55, %v2635_v24  ;;  %v2654_v10 = vsel %vm2653_vm13, %v8873_v57, %v2650_v14  ;;  %v2668_v47 = vsub.f32 1.0, %v2667_v1  ;;  %v2675_v55 = vand.u32 2147483647, %v10429_v3 }
 0x4af   :  { %v2578_v32 = vpop.f32.mrf.mxu0  ;;  %v2591_v31 = vpop.f32.mrf.mxu1  ;;  %v2659_v27 = vsel %vm2656_vm15, %v2658_v5, %v2654_v10  ;;  %v2682_v6 = vmul.f32 %v8877_v18, %v2640_v28  ;;  %v2622_v33 = vadd.f32 %v2615_v0, %v12649_v61  ;;  %v2678_v1 = vor.u32 1.1754944e-38, %v2677_v13  ;;  %v12650_v0 = vld [vmem:[#allocation96_spill] sm:$0xff] }
 0x4b0   :  { %v2681_v51 = vmul.f32 %v2659_v27, %v10328_v26  ;;  %v2669_v49 = vmul.f32 %v8875_v59, %v2668_v47  ;;  %vm2676_vm3 = vcmp.eq.f32.partialorder %v2675_v55, 8.507059e+37  ;;  %v2621_v28 = vadd.f32 %v2602_v48, %v12650_v0  ;;  %v12674_v0 = vld [vmem:[#allocation42_spill] sm:$0xff] }
 0x4b1   :  { %v7542_v2 = vmul.f32 -1.442695, %v2622_v33 }
 0x4b2   :  { %v8879_v56 = vpop.eup %8878  ;;  %v10437_v42 = vadd.f32 %v2682_v6, %v2681_v51  ;;  %v2670_v41 = vadd.f32 %v8875_v59, %v2669_v49 }
 0x4b3   :  { %v8881_v50 = vpop.eup %8880  ;;  %v2689_v17 = vadd.f32 1.0, %v8879_v56  ;;  %8882 = vpow2.f32 %v7542_v2 }
 0x4b4   :  { %v2708_v57 = vadd.f32 1.0, %v8881_v50  ;;  %8884 = vtanh.f32 %v10437_v42  ;;  %v2674_v51 = vsel %vm2673_vm2, %v8875_v59, %v2670_v41 }
 0x4b5   :  { %8886 = vrcp.f32 %v2689_v17  ;;  %v2679_v2 = vsel %vm2676_vm3, %v2678_v1, %v2674_v51  ;;  %v2701_v6 = vand.u32 2147483648, %v2689_v17  ;;  %v2699_v49 = vand.u32 2147483647, %v2689_v17 }
 0x4b6   :  { %v2604_v26 = vpop.f32.mrf.mxu2  ;;  %v2617_v14 = vpop.f32.mrf.mxu3  ;;  %8888 = vrcp.f32 %v2708_v57  ;;  %v2720_v61 = vand.u32 2147483648, %v2708_v57  ;;  %v2718_v50 = vand.u32 2147483647, %v2708_v57  ;;  %vm2695_vm6 = vweird.f32 %v2689_v17 }
 0x4b7   :  { %vm2714_vm7 = vweird.f32 %v2708_v57  ;;  %v2702_v55 = vor.u32 1.1754944e-38, %v2701_v6  ;;  %vm2700_vm10 = vcmp.eq.f32.partialorder %v2699_v49, 8.507059e+37 }
 0x4b8   :  { %v2721_v51 = vor.u32 1.1754944e-38, %v2720_v61  ;;  %vm2719_vm11 = vcmp.eq.f32.partialorder %v2718_v50, 8.507059e+37 }
 0x4b9   :  { %v8883_v56 = vpop.eup %8882 }
 0x4ba   :  { %v8885_v18 = vpop.eup %8884  ;;  %v10443_v5 = vadd.f32 1.0, %v8883_v56 }
 0x4bb   :  { %v8887_v24 = vpop.eup %8886  ;;  %v10446_v10 = vmul.f32 %v8885_v18, %v2679_v2 }
 0x4bc   :  { %v8889_v47 = vpop.eup %8888  ;;  %v2691_v3 = vmul.f32 %v8887_v24, %v2689_v17  ;;  %8890 = vrcp.f32 %v10443_v5  ;;  %vm2696_vm4 = vweird.f32 %v8887_v24  ;;  %vm2734_vm13 = vweird.f32 %v10443_v5 }
 0x4bd   :  { %v2710_v32 = vmul.f32 %v8889_v47, %v2708_v57  ;;  %v2755_v59 = vpack.c.bf16 %v10446_v10, %v10446_v10  ;;  %8892 = vtanh.f32 %v2621_v28  ;;  %vm2715_vm5 = vweird.f32 %v8889_v47  ;;  %vm2697_vm8 = vmor %vm2695_vm6, %vm2696_vm4  ;;  %v12675_v28 = vld [vmem:[#allocation44_spill] sm:$0xff] }
 0x4be   :  { %v2692_v31 = vsub.f32 1.0, %v2691_v3  ;;  %vm2716_vm9 = vmor %vm2714_vm7, %vm2715_vm5  ;;  %v12677_v3 = vld [vmem:[#allocation45_spill] sm:$0xff] }
 0x4bf   :  { %v2711_v27 = vsub.f32 1.0, %v2710_v32  ;;  %2764 = vmatmul.bf16.vlgmr.msra.gmra.mxu0 %v2755_v59  ;;  %2777 = vmatmul.bf16.vlgmr.msra.gmra.mxu1 %v2755_v59  ;;  %v12678_v32 = vld [vmem:[#allocation46_spill] sm:$0xff] }
 0x4c0   :  { %v2693_v33 = vmul.f32 %v8887_v24, %v2692_v31  ;;  %2790 = vmatmul.bf16.vlgmr.msra.gmra.mxu2 %v2755_v59  ;;  %2803 = vmatmul.bf16.vlgmr.msra.gmra.mxu3 %v2755_v59  ;;  %v12679_v31 = vld [vmem:[#allocation48_spill] sm:$0xff]  ;;  %v12680_v59 = vld [vmem:[#allocation47_spill] sm:$0xff] }
 0x4c1   :  { %v2712_v48 = vmul.f32 %v8889_v47, %v2711_v27  ;;  %3006 = vmatpush.bf16.msra.mxu0 %v9406_v7  ;;  %3032 = vmatpush.bf16.msra.mxu2 %v9421_v25  ;;  %v12681_v27 = vld [vmem:[#allocation49_spill] sm:$0xff] }
 0x4c2   :  { %v8891_v41 = vpop.eup %8890  ;;  %v2694_v13 = vadd.f32 %v8887_v24, %v2693_v33  ;;  %3019 = vmatpush.bf16.msra.mxu1 %v9408_v11  ;;  %3045 = vmatpush.bf16.msra.mxu3 %v9410_v12  ;;  %v12682_v33 = vld [vmem:[#allocation74_spill] sm:$0xff] }
 0x4c3   :  { %v2713_v26 = vadd.f32 %v8889_v47, %v2712_v48  ;;  %v2730_v14 = vmul.f32 %v8891_v41, %v10443_v5  ;;  %v8893_v17 = vpop.eup %8892  ;;  %vm2735_vm12 = vweird.f32 %v8891_v41  ;;  %v12683_v48 = vld [vmem:[#allocation75_spill] sm:$0xff] }
 0x4c4   :  { %v2698_v1 = vsel %vm2697_vm8, %v8887_v24, %v2694_v13  ;;  %vm2736_vm14 = vmor %vm2734_vm13, %vm2735_vm12 }
 0x4c5   :  { %v2703_v7 = vsel %vm2700_vm10, %v2702_v55, %v2698_v1  ;;  %v2717_v56 = vsel %vm2716_vm9, %v8889_v47, %v2713_v26  ;;  %v2731_v25 = vsub.f32 1.0, %v2730_v14  ;;  %3007 = vmatpush.bf16.msra.mxu0 %v9413_v16  ;;  %3033 = vmatpush.bf16.msra.mxu2 %v9443_v40  ;;  %v2740_v16 = vand.u32 2147483648, %v10443_v5  ;;  %v12676_v47 = vld [vmem:[#allocation43_spill] sm:$0xff]  ;;  %v12684_v14 = vld [vmem:[#allocation78_spill] sm:$0xff] }
 0x4c6   :  { %v2722_v57 = vsel %vm2719_vm11, %v2721_v51, %v2717_v56  ;;  %v2745_v18 = vmul.f32 %v8893_v17, %v2703_v7  ;;  %3020 = vmatpush.bf16.msra.mxu1 %v9417_v21  ;;  %3046 = vmatpush.bf16.msra.mxu3 %v9419_v22  ;;  %v2738_v21 = vand.u32 2147483647, %v10443_v5  ;;  %v12673_v5 = vld [vmem:[#allocation41_spill] sm:$0xff] }
 0x4c7   :  { %v2744_v11 = vmul.f32 %v2722_v57, %v10355_v19  ;;  %v2732_v2 = vmul.f32 %v8891_v41, %v2731_v25  ;;  %v12670_v19 = vld [vmem:[#allocation38_spill] sm:$0xff] }
 0x4c8   :  { %vm2739_vm15 = vcmp.eq.f32.partialorder %v2738_v21, 8.507059e+37 }
 0x4c9   :  { %v10463_v12 = vadd.f32 %v2745_v18, %v2744_v11  ;;  %v2733_v24 = vadd.f32 %v8891_v41, %v2732_v2  ;;  %3008 = vmatpush.bf16.msra.mxu0 %v9436_v30  ;;  %3034 = vmatpush.bf16.msra.mxu2 %v12428_v43  ;;  %v2741_v30 = vor.u32 1.1754944e-38, %v2740_v16  ;;  %v12685_v16 = vld [vmem:[#allocation76_spill] sm:$0xff] }
 0x4ca   :  { %3021 = vmatpush.bf16.msra.mxu1 %v9438_v34  ;;  %3047 = vmatpush.bf16.msra.mxu3 %v9440_v36 }
 0x4cb   :  { %8894 = vtanh.f32 %v10463_v12  ;;  %v2737_v22 = vsel %vm2736_vm14, %v8891_v41, %v2733_v24 }
 0x4cc   :  { %v2742_v34 = vsel %vm2739_vm15, %v2741_v30, %v2737_v22 }
 0x4cd   :  { %3009 = vmatpush.bf16.msra.mxu0 %v9447_v44  ;;  %3035 = vmatpush.bf16.msra.mxu2 %v9461_v54  ;;  %v12651_v44 = vld [vmem:[#allocation17_spill] sm:$0xff] }
 0x4ce   :  { %3022 = vmatpush.bf16.msra.mxu1 %v9449_v45  ;;  %3048 = vmatpush.bf16.msra.mxu3 %v12430_v58  ;;  %v12652_v45 = vld [vmem:[#allocation19_spill] sm:$0xff]  ;;  %v12653_v54 = vld [vmem:[#allocation21_spill] sm:$0xff] }
 0x4cf   :  { %v12668_v58 = vld [vmem:[#allocation35_spill] sm:$0xff] }
 0x4d1   :  { %v8895_v40 = vpop.eup %8894  ;;  %3010 = vmatpush.bf16.msra.mxu0 %v12431_v20  ;;  %3036 = vmatpush.bf16.msra.mxu2 %v9471_v63  ;;  %v12655_v63 = vld [vmem:[#allocation24_spill] sm:$0xff]  ;;  %v12669_v20 = vld [vmem:[#allocation37_spill] sm:$0xff] }
 0x4d2   :  { %v10477_v43 = vmul.f32 %v8895_v40, %v2742_v34  ;;  %3023 = vmatpush.bf16.msra.mxu1 %v9469_v62  ;;  %3049 = vmatpush.bf16.msra.mxu3 %v9474_v35  ;;  %v12654_v62 = vld [vmem:[#allocation22_spill] sm:$0xff]  ;;  %v12656_v35 = vld [vmem:[#allocation23_spill] sm:$0xff]  ;;  %v12686_v34 = vld [vmem:[#allocation80_spill] sm:$0xff] }
 0x4d4   :  { %v2816_v36 = vpack.c.bf16 %v10477_v43, %v10477_v43 }
 0x4d5   :  { %3011 = vmatpush.bf16.msra.mxu0 %v9478_v8  ;;  %3037 = vmatpush.bf16.msra.mxu2 %v9483_v15  ;;  %v12657_v8 = vld [vmem:[#allocation25_spill] sm:$0xff]  ;;  %v12659_v15 = vld [vmem:[#allocation28_spill] sm:$0xff] }
 0x4d6   :  { %2825 = vmatmul.bf16.vlgmr.msrb.gmra.mxu0 %v2816_v36  ;;  %2838 = vmatmul.bf16.vlgmr.msrb.gmra.mxu1 %v2816_v36 }
 0x4d7   :  { %2851 = vmatmul.bf16.vlgmr.msrb.gmra.mxu2 %v2816_v36  ;;  %2864 = vmatmul.bf16.vlgmr.msrb.gmra.mxu3 %v2816_v36  ;;  %v12687_v36 = vld [vmem:[#allocation89_spill] sm:$0xff] }
 0x4d8   :  { %3024 = vmatpush.bf16.msra.mxu1 %v9480_v9  ;;  %3050 = vmatpush.bf16.msra.mxu3 %v9485_v23  ;;  %v12658_v9 = vld [vmem:[#allocation26_spill] sm:$0xff]  ;;  %v12660_v23 = vld [vmem:[#allocation27_spill] sm:$0xff] }
 0x4d9   :  { %3012 = vmatpush.bf16.msra.mxu0 %v9488_v29  ;;  %3038 = vmatpush.bf16.msra.mxu2 %v9494_v38  ;;  %v12661_v29 = vld [vmem:[#allocation29_spill] sm:$0xff]  ;;  %v12663_v38 = vld [vmem:[#allocation32_spill] sm:$0xff] }
 0x4dc   :  { %3025 = vmatpush.bf16.msra.mxu1 %v9492_v37  ;;  %3051 = vmatpush.bf16.msra.mxu3 %v9497_v39  ;;  %v12662_v37 = vld [vmem:[#allocation30_spill] sm:$0xff]  ;;  %v12664_v39 = vld [vmem:[#allocation31_spill] sm:$0xff] }
 0x4dd   :  { %3013 = vmatpush.bf16.msra.mxu0 %v9504_v46  ;;  %3039 = vmatpush.bf16.msra.mxu2 %v9510_v53  ;;  %v12665_v46 = vld [vmem:[#allocation33_spill] sm:$0xff]  ;;  %v12667_v53 = vld [vmem:[#allocation36_spill] sm:$0xff] }
 0x4e0   :  { %3026 = vmatpush.bf16.msra.mxu1 %v9508_v52  ;;  %3052 = vmatpush.bf16.msra.mxu3 %v12651_v44  ;;  %v12666_v52 = vld [vmem:[#allocation34_spill] sm:$0xff]  ;;  %v652_v44 = vadd.f32 %v12687_v36, %v12686_v34  ;;  %v12693_v34 = vld [vmem:[#allocation92_spill] sm:$0xff] }
 0x4e1   :  { %3067 = vmatpush.bf16.msrb.mxu0 %v12607_v60  ;;  %3093 = vmatpush.bf16.msrb.mxu2 %v12609_v4  ;;  %v12671_v60 = vld [vmem:[#allocation40_spill] sm:$0xff]  ;;  %v12672_v4 = vld [vmem:[#allocation39_spill] sm:$0xff] }
 0x4e4   :  { %3080 = vmatpush.bf16.msrb.mxu1 %v12652_v45  ;;  %3106 = vmatpush.bf16.msrb.mxu3 %v12653_v54  ;;  %v12688_v45 = vld [vmem:[#allocation81_spill] sm:$0xff]  ;;  %v12689_v54 = vld [vmem:[#allocation91_spill] sm:$0xff] }
 0x4e5   :  { %3068 = vmatpush.bf16.msrb.mxu0 %v12654_v62  ;;  %3094 = vmatpush.bf16.msrb.mxu2 %v12655_v63  ;;  %v681_v62 = vadd.f32 %v12689_v54, %v12688_v45 }
 0x4e8   :  { %3081 = vmatpush.bf16.msrb.mxu1 %v12656_v35  ;;  %3107 = vmatpush.bf16.msrb.mxu3 %v12657_v8 }
 0x4e9   :  { %3069 = vmatpush.bf16.msrb.mxu0 %v12658_v9  ;;  %3095 = vmatpush.bf16.msrb.mxu2 %v12659_v15 }
 0x4ec   :  { %3082 = vmatpush.bf16.msrb.mxu1 %v12660_v23  ;;  %3108 = vmatpush.bf16.msrb.mxu3 %v12661_v29 }
 0x4ed   :  { %3070 = vmatpush.bf16.msrb.mxu0 %v12662_v37  ;;  %3096 = vmatpush.bf16.msrb.mxu2 %v12663_v38 }
 0x4f0   :  { %3083 = vmatpush.bf16.msrb.mxu1 %v12664_v39  ;;  %3109 = vmatpush.bf16.msrb.mxu3 %v12665_v46 }
 0x4f1   :  { %3071 = vmatpush.bf16.msrb.mxu0 %v12666_v52  ;;  %3097 = vmatpush.bf16.msrb.mxu2 %v12667_v53 }
 0x4f4   :  { %3084 = vmatpush.bf16.msrb.mxu1 %v12668_v58  ;;  %3110 = vmatpush.bf16.msrb.mxu3 %v12669_v20 }
 0x4f5   :  { %3072 = vmatpush.bf16.msrb.mxu0 %v12670_v19  ;;  %3098 = vmatpush.bf16.msrb.mxu2 %v12671_v60 }
 0x4f8   :  { %3085 = vmatpush.bf16.msrb.mxu1 %v12672_v4  ;;  %3111 = vmatpush.bf16.msrb.mxu3 %v12673_v5 }
 0x4f9   :  { %3073 = vmatpush.bf16.msrb.mxu0 %v12674_v0  ;;  %3099 = vmatpush.bf16.msrb.mxu2 %v12675_v28 }
 0x4fc   :  { %3086 = vmatpush.bf16.msrb.mxu1 %v12676_v47  ;;  %3112 = vmatpush.bf16.msrb.mxu3 %v12677_v3  ;;  %v12690_v3 = vld [vmem:[#allocation87_spill] sm:$0xff] }
 0x4fd   :  { %3074 = vmatpush.bf16.msrb.mxu0 %v12678_v32  ;;  %3100 = vmatpush.bf16.msrb.mxu2 %v12679_v31  ;;  %v12691_v32 = vld [vmem:[#allocation93_spill] sm:$0xff] }
 0x4fe   :  { %v739_v31 = vadd.f32 %v12691_v32, %v12690_v3  ;;  %v7717_v32 = vld [vmem:[#allocation8 + $0x140] sm:$0xf] }
 0x500   :  { %3087 = vmatpush.bf16.msrb.mxu1 %v12680_v59  ;;  %3113 = vmatpush.bf16.msrb.mxu3 %v12681_v27 }
 0x53c   :  { %v2765_v6 = vpop.f32.mrf.mxu0  ;;  %v2778_v61 = vpop.f32.mrf.mxu1 }
 0x53d   :  { %v2808_v49 = vadd.f32 %v2765_v6, %v12682_v33  ;;  %v2809_v50 = vadd.f32 %v2778_v61, %v12683_v48 }
 0x53f   :  { %v7543_v41 = vmul.f32 -1.442695, %v2808_v49  ;;  %v7544_v13 = vmul.f32 -1.442695, %v2809_v50 }
 0x541   :  { %8896 = vpow2.f32 %v7543_v41 }
 0x542   :  { %8898 = vpow2.f32 %v7544_v13 }
 0x543   :  { %v2791_v55 = vpop.f32.mrf.mxu2  ;;  %v2804_v26 = vpop.f32.mrf.mxu3 }
 0x544   :  { %v2811_v51 = vadd.f32 %v2804_v26, %v12684_v14  ;;  %v2767_v1 = vpop.f32.mrf.mxu0  ;;  %v2780_v17 = vpop.f32.mrf.mxu1  ;;  %v2810_v21 = vadd.f32 %v2791_v55, %v12685_v16 }
 0x546   :  { %v7545_v7 = vmul.f32 -1.442695, %v2811_v51 }
 0x547   :  { %v8897_v56 = vpop.eup %8896 }
 0x548   :  { %v8899_v25 = vpop.eup %8898  ;;  %v2876_v57 = vadd.f32 1.0, %v8897_v56  ;;  %8900 = vpow2.f32 %v7545_v7 }
 0x549   :  { %v2895_v18 = vadd.f32 1.0, %v8899_v25 }
 0x54a   :  { %8902 = vrcp.f32 %v2876_v57  ;;  %v2886_v39 = vand.u32 2147483647, %v2876_v57  ;;  %v2888_v46 = vand.u32 2147483648, %v2876_v57  ;;  %vm2882_vm3 = vweird.f32 %v2876_v57 }
 0x54b   :  { %8904 = vrcp.f32 %v2895_v18  ;;  %v2793_v11 = vpop.f32.mrf.mxu2  ;;  %v2806_v2 = vpop.f32.mrf.mxu3  ;;  %v2907_v38 = vand.u32 2147483648, %v2895_v18  ;;  %v2905_v19 = vand.u32 2147483647, %v2895_v18  ;;  %vm2901_vm2 = vweird.f32 %v2895_v18 }
 0x54c   :  { %v2889_v5 = vor.u32 1.1754944e-38, %v2888_v46  ;;  %vm2887_vm6 = vcmp.eq.f32.partialorder %v2886_v39, 8.507059e+37 }
 0x54d   :  { %v2908_v59 = vor.u32 1.1754944e-38, %v2907_v38  ;;  %vm2906_vm7 = vcmp.eq.f32.partialorder %v2905_v19, 8.507059e+37 }
 0x54e   :  { %v8901_v24 = vpop.eup %8900 }
 0x54f   :  { %v10533_v22 = vadd.f32 1.0, %v8901_v24 }
 0x550   :  { %v8903_v30 = vpop.eup %8902 }
 0x551   :  { %v8905_v40 = vpop.eup %8904  ;;  %v2878_v63 = vmul.f32 %v8903_v30, %v2876_v57  ;;  %8906 = vrcp.f32 %v10533_v22  ;;  %vm2883_vm0 = vweird.f32 %v8903_v30  ;;  %v2927_v11 = vand.u32 2147483648, %v10533_v22 }
 0x552   :  { %v2897_v35 = vmul.f32 %v8905_v40, %v2895_v18  ;;  %8908 = vtanh.f32 %v2810_v21  ;;  %vm2902_vm1 = vweird.f32 %v8905_v40  ;;  %vm2884_vm4 = vmor %vm2882_vm3, %vm2883_vm0  ;;  %vm2921_vm9 = vweird.f32 %v10533_v22 }
 0x553   :  { %v2826_v8 = vpop.f32.mrf.mxu0  ;;  %v2839_v9 = vpop.f32.mrf.mxu1  ;;  %v2879_v15 = vsub.f32 1.0, %v2878_v63  ;;  %vm2903_vm5 = vmor %vm2901_vm2, %vm2902_vm1  ;;  %v2928_v21 = vor.u32 1.1754944e-38, %v2927_v11 }
 0x554   :  { %v2869_v23 = vadd.f32 %v2826_v8, %v652_v44  ;;  %v2870_v29 = vadd.f32 %v2839_v9, %v681_v62  ;;  %v2898_v37 = vsub.f32 1.0, %v2897_v35  ;;  %v7781_v62 = vld [vmem:[#allocation8 + $0x1c0] sm:$0xf]  ;;  %v8559_v9 = vld [vmem:[#allocation8 + $0x1c4] sm:$0xf] }
 0x555   :  { %v2880_v52 = vmul.f32 %v8903_v30, %v2879_v15  ;;  %v8563_v8 = vld [vmem:[#allocation8 + $0x1dc] sm:$0xf0]  ;;  %v7783_v15 = vld [vmem:[#allocation8 + $0x1e0] sm:$0xf0] }
 0x556   :  { %v7546_v53 = vmul.f32 -1.442695, %v2869_v23  ;;  %v7547_v58 = vmul.f32 -1.442695, %v2870_v29  ;;  %v2899_v20 = vmul.f32 %v8905_v40, %v2898_v37  ;;  %v7782_v46 = vor.u32 %v8563_v8, %v7781_v62  ;;  %v8527_v62 = vld [vmem:[#allocation8 + $0xc4] sm:$0xf] }
 0x557   :  { %v8907_v60 = vpop.eup %8906  ;;  %v2881_v4 = vadd.f32 %v8903_v30, %v2880_v52  ;;  %v7786_v52 = vor.u32 %v8559_v9, %v7783_v15 }
 0x558   :  { %8910 = vpow2.f32 %v7546_v53  ;;  %v2900_v0 = vadd.f32 %v8905_v40, %v2899_v20  ;;  %v2917_v28 = vmul.f32 %v8907_v60, %v10533_v22  ;;  %v8909_v47 = vpop.eup %8908  ;;  %vm2922_vm8 = vweird.f32 %v8907_v60  ;;  %v7749_v53 = vld [vmem:[#allocation8 + $0x180] sm:$0xf] }
 0x559   :  { %8912 = vpow2.f32 %v7547_v58  ;;  %v2885_v27 = vsel %vm2884_vm4, %v8903_v30, %v2881_v4  ;;  %vm2923_vm10 = vmor %vm2921_vm9, %vm2922_vm8  ;;  %v8555_v58 = vld [vmem:[#allocation8 + $0x19c] sm:$0xf0]  ;;  %v7751_v4 = vld [vmem:[#allocation8 + $0x1a0] sm:$0xf0] }
 0x55a   :  { %v2852_v6 = vpop.f32.mrf.mxu2  ;;  %v2865_v61 = vpop.f32.mrf.mxu3  ;;  %v2890_v33 = vsel %vm2887_vm6, %v2889_v5, %v2885_v27  ;;  %v2904_v49 = vsel %vm2903_vm5, %v8905_v40, %v2900_v0  ;;  %v2918_v48 = vsub.f32 1.0, %v2917_v28  ;;  %v12692_v40 = vld [vmem:[#allocation86_spill] sm:$0xff] }
 0x55b   :  { %v2828_v50 = vpop.f32.mrf.mxu0  ;;  %v2841_v41 = vpop.f32.mrf.mxu1  ;;  %v2909_v13 = vsel %vm2906_vm7, %v2908_v59, %v2904_v49  ;;  %v2932_v55 = vmul.f32 %v8909_v47, %v2890_v33  ;;  %v2872_v26 = vadd.f32 %v2865_v61, %v739_v31  ;;  %v710_v36 = vadd.f32 %v12693_v34, %v12692_v40  ;;  %v8547_v31 = vld [vmem:[#allocation8 + $0x15c] sm:$0xf0] }
 0x55c   :  { %v2931_v14 = vmul.f32 %v2909_v13, %v10437_v42  ;;  %v2919_v51 = vmul.f32 %v8907_v60, %v2918_v48  ;;  %v2925_v42 = vand.u32 2147483647, %v10533_v22  ;;  %v8543_v50 = vld [vmem:[#allocation8 + $0x144] sm:$0xf] }
 0x55d   :  { %v7548_v17 = vmul.f32 -1.442695, %v2872_v26  ;;  %v2871_v63 = vadd.f32 %v2852_v6, %v710_v36  ;;  %v7750_v6 = vor.u32 %v8555_v58, %v7749_v53  ;;  %v7719_v41 = vld [vmem:[#allocation8 + $0x160] sm:$0xf0]  ;;  %v7718_v26 = vor.u32 %v8547_v31, %v7717_v32  ;;  %v7653_v36 = vld [vmem:[#allocation8 + $0xc0] sm:$0xf] }
 0x55e   :  { %v8911_v1 = vpop.eup %8910  ;;  %v10544_v56 = vadd.f32 %v2932_v55, %v2931_v14  ;;  %v2920_v57 = vadd.f32 %v8907_v60, %v2919_v51  ;;  %vm2926_vm11 = vcmp.eq.f32.partialorder %v2925_v42, 8.507059e+37  ;;  %v7559_v32 = vld [vmem:[#allocation8 + $0x20] sm:$0xf0] }
 0x55f   :  { %v8913_v7 = vpop.eup %8912  ;;  %v10546_v25 = vadd.f32 1.0, %v8911_v1  ;;  %8914 = vpow2.f32 %v7548_v17 }
 0x560   :  { %v10548_v18 = vadd.f32 1.0, %v8913_v7  ;;  %8916 = vtanh.f32 %v10544_v56  ;;  %v2924_v16 = vsel %vm2923_vm10, %v8907_v60, %v2920_v57  ;;  %v8551_v60 = vld [vmem:[#allocation8 + $0x184] sm:$0xf]  ;;  %v7722_v57 = vor.u32 %v8543_v50, %v7719_v41 }
 0x561   :  { %8918 = vrcp.f32 %v10546_v25  ;;  %v2929_v54 = vsel %vm2926_vm11, %v2928_v21, %v2924_v16  ;;  %v2951_v19 = vand.u32 2147483648, %v10546_v25  ;;  %v2949_v28 = vand.u32 2147483647, %v10546_v25  ;;  %v7687_v16 = vld [vmem:[#allocation8 + $0x120] sm:$0xf0] }
 0x562   :  { %v2854_v2 = vpop.f32.mrf.mxu2  ;;  %v2867_v24 = vpop.f32.mrf.mxu3  ;;  %8920 = vrcp.f32 %v10548_v18  ;;  %v2970_v5 = vand.u32 2147483648, %v10548_v18  ;;  %v2968_v3 = vand.u32 2147483647, %v10548_v18  ;;  %vm2945_vm14 = vweird.f32 %v10546_v25  ;;  %v12698_v50 = vld [vmem:[#allocation110_spill] sm:$0xff] }
 0x563   :  { %v7754_v61 = vor.u32 %v8551_v60, %v7751_v4  ;;  %vm2964_vm15 = vweird.f32 %v10548_v18  ;;  %v2952_v33 = vor.u32 1.1754944e-38, %v2951_v19  ;;  %vm2950_vm2 = vcmp.eq.f32.partialorder %v2949_v28, 8.507059e+37  ;;  %v8539_v2 = vld [vmem:[#allocation8 + $0x11c] sm:$0xf0]  ;;  %v8535_v24 = vld [vmem:[#allocation8 + $0x104] sm:$0xf] }
 0x564   :  { %v2971_v13 = vor.u32 1.1754944e-38, %v2970_v5  ;;  %vm2969_vm3 = vcmp.eq.f32.partialorder %v2968_v3, 8.507059e+37  ;;  %v7690_v34 = vor.u32 %v8535_v24, %v7687_v16  ;;  %v8515_v19 = vld [vmem:[#allocation8 + $0x5c] sm:$0xf0]  ;;  %v8511_v60 = vld [vmem:[#allocation8 + $0x44] sm:$0xf]  ;;  %v10601_v41 = vpack.c.bf16 %v10446_v10, %v12698_v50 }
 0x565   :  { %v8915_v30 = vpop.eup %8914  ;;  %v7591_v4 = vld [vmem:[#allocation8 + $0x60] sm:$0xf0]  ;;  %v7557_v28 = vld [vmem:[#allocation8] sm:$0xf]  ;;  %v12704_v10 = vld [vmem:[#allocation83_spill] sm:$0xff] }
 0x566   :  { %v8917_v44 = vpop.eup %8916  ;;  %v10558_v45 = vadd.f32 1.0, %v8915_v30  ;;  %v8503_v3 = vld [vmem:[#allocation8 + $0x4] sm:$0xf]  ;;  %v8037_v24 = vld [vmem:[#allocation8 + $0x3c0] sm:$0xf] }
 0x567   :  { %v8919_v22 = vpop.eup %8918  ;;  %v10560_v35 = vmul.f32 %v8917_v44, %v2929_v54  ;;  %v8531_v44 = vld [vmem:[#allocation8 + $0xdc] sm:$0xf0] }
 0x568   :  { %v8921_v23 = vpop.eup %8920  ;;  %v2941_v29 = vmul.f32 %v8919_v22, %v10546_v25  ;;  %8922 = vrcp.f32 %v10558_v45  ;;  %vm2946_vm12 = vweird.f32 %v8919_v22  ;;  %v2990_v54 = vand.u32 2147483648, %v10558_v45  ;;  %v8627_v16 = vld [vmem:[#allocation8 + $0x3dc] sm:$0xf0] }
 0x569   :  { %v2960_v37 = vmul.f32 %v8921_v23, %v10548_v18  ;;  %v3005_v39 = vpack.c.bf16 %v10560_v35, %v10560_v35  ;;  %8924 = vtanh.f32 %v2871_v63  ;;  %vm2965_vm13 = vweird.f32 %v8921_v23  ;;  %vm2947_vm0 = vmor %vm2945_vm14, %vm2946_vm12  ;;  %v7685_v18 = vld [vmem:[#allocation8 + $0x100] sm:$0xf] }
 0x56a   :  { %v2942_v38 = vsub.f32 1.0, %v2941_v29  ;;  %vm2966_vm1 = vmor %vm2964_vm15, %vm2965_vm13  ;;  %v7686_v40 = vor.u32 %v8539_v2, %v7685_v18  ;;  %vm2984_vm5 = vweird.f32 %v10558_v45  ;;  %v7654_v8 = vor.u32 %v8531_v44, %v7653_v36  ;;  %v8039_v44 = vld [vmem:[#allocation8 + $0x3e0] sm:$0xf0] }
 0x56b   :  { %v2961_v20 = vsub.f32 1.0, %v2960_v37  ;;  %3014 = vmatmul.bf16.vlgmr.msra.gmra.mxu0 %v3005_v39  ;;  %3027 = vmatmul.bf16.vlgmr.msra.gmra.mxu1 %v3005_v39  ;;  %v2991_v15 = vor.u32 1.1754944e-38, %v2990_v54  ;;  %v8038_v36 = vor.u32 %v8627_v16, %v8037_v24  ;;  %v7789_v54 = vld [vmem:[#allocation8 + $0x1c8] sm:$0xf]  ;;  %v7941_v16 = vld [vmem:[#allocation8 + $0x300] sm:$0xf] }
 0x56c   :  { %v2943_v0 = vmul.f32 %v8919_v22, %v2942_v38  ;;  %3040 = vmatmul.bf16.vlgmr.msra.gmra.mxu2 %v3005_v39  ;;  %3053 = vmatmul.bf16.vlgmr.msra.gmra.mxu3 %v3005_v39  ;;  %v8523_v38 = vld [vmem:[#allocation8 + $0x9c] sm:$0xf0]  ;;  %v8519_v39 = vld [vmem:[#allocation8 + $0x84] sm:$0xf] }
 0x56d   :  { %v2962_v47 = vmul.f32 %v8921_v23, %v2961_v20  ;;  %4061 = vmatpush.bf16.msra.mxu0 %v7782_v46  ;;  %4119 = vmatpush.bf16.msra.mxu2 %v7786_v52  ;;  %v7623_v46 = vld [vmem:[#allocation8 + $0xa0] sm:$0xf0]  ;;  %v7589_v20 = vld [vmem:[#allocation8 + $0x40] sm:$0xf] }
 0x56e   :  { %v8923_v59 = vpop.eup %8922  ;;  %v2944_v27 = vadd.f32 %v8919_v22, %v2943_v0  ;;  %v7626_v58 = vor.u32 %v8519_v39, %v7623_v46  ;;  %v7590_v5 = vor.u32 %v8515_v19, %v7589_v20  ;;  %v7594_v0 = vor.u32 %v8511_v60, %v7591_v4  ;;  %4090 = vmatpush.bf16.msra.mxu1 %v8038_v36  ;;  %v8619_v39 = vld [vmem:[#allocation8 + $0x39c] sm:$0xf0]  ;;  %v7757_v20 = vld [vmem:[#allocation8 + $0x188] sm:$0xf] }
 0x56f   :  { %v2963_v49 = vadd.f32 %v8921_v23, %v2962_v47  ;;  %v2980_v48 = vmul.f32 %v8923_v59, %v10558_v45  ;;  %v8925_v14 = vpop.eup %8924  ;;  %vm2985_vm4 = vweird.f32 %v8923_v59  ;;  %v8507_v47 = vld [vmem:[#allocation8 + $0x1c] sm:$0xf0] }
 0x570   :  { %v2948_v55 = vsel %vm2947_vm0, %v8919_v22, %v2944_v27  ;;  %v2988_v22 = vand.u32 2147483647, %v10558_v45  ;;  %vm2986_vm6 = vmor %vm2984_vm5, %vm2985_vm4  ;;  %v7558_v31 = vor.u32 %v8507_v47, %v7557_v28  ;;  %v12694_v27 = vld [vmem:[#allocation114_spill] sm:$0xff]  ;;  %v8552_v47 = vld [vmem:[#allocation8 + $0x18c] sm:$0xf] }
 0x571   :  { %v2953_v51 = vsel %vm2950_vm2, %v2952_v33, %v2948_v55  ;;  %v2967_v1 = vsel %vm2966_vm1, %v8921_v23, %v2963_v49  ;;  %v2981_v17 = vsub.f32 1.0, %v2980_v48  ;;  %4062 = vmatpush.bf16.msra.mxu0 %v7750_v6  ;;  %4120 = vmatpush.bf16.msra.mxu2 %v7754_v61  ;;  %v7621_v23 = vld [vmem:[#allocation8 + $0x80] sm:$0xf]  ;;  %v12695_v6 = vld [vmem:[#allocation15_spill] sm:$0xff]  ;;  %v12700_v55 = vld [vmem:[#allocation77_spill] sm:$0xff] }
 0x572   :  { %v2972_v7 = vsel %vm2969_vm3, %v2971_v13, %v2967_v1  ;;  %v2995_v25 = vmul.f32 %v8925_v14, %v2953_v51  ;;  %vm2989_vm7 = vcmp.eq.f32.partialorder %v2988_v22, 8.507059e+37  ;;  %v7622_v53 = vor.u32 %v8523_v38, %v7621_v23  ;;  %v12696_v33 = vld [vmem:[#allocation50_spill] sm:$0xff]  ;;  %v12697_v49 = vld [vmem:[#allocation55_spill] sm:$0xff]  ;;  %v12699_v13 = vld [vmem:[#allocation52_spill] sm:$0xff] }
 0x573   :  { %v2994_v11 = vmul.f32 %v2972_v7, %v10463_v12  ;;  %v2982_v42 = vmul.f32 %v8923_v59, %v2981_v17  ;;  %v7655_v12 = vld [vmem:[#allocation8 + $0xe0] sm:$0xf0]  ;;  %v10589_v61 = vpack.c.bf16 %v12695_v6, %v12694_v27  ;;  %v10595_v48 = vpack.c.bf16 %v12697_v49, %v12696_v33  ;;  %v12702_v51 = vld [vmem:[#allocation79_spill] sm:$0xff]  ;;  %v8005_v38 = vld [vmem:[#allocation8 + $0x380] sm:$0xf] }
 0x574   :  { %v7658_v9 = vor.u32 %v8527_v62, %v7655_v12  ;;  %v12701_v14 = vld [vmem:[#allocation54_spill] sm:$0xff]  ;;  %v8564_v62 = vld [vmem:[#allocation8 + $0x1e4] sm:$0xf0]  ;;  %v7791_v23 = vld [vmem:[#allocation8 + $0x1e8] sm:$0xf0] }
 0x575   :  { %v10577_v21 = vadd.f32 %v2995_v25, %v2994_v11  ;;  %v2983_v30 = vadd.f32 %v8923_v59, %v2982_v42  ;;  %4063 = vmatpush.bf16.msra.mxu0 %v7718_v26  ;;  %4121 = vmatpush.bf16.msra.mxu2 %v7722_v57  ;;  %v551_v26 = vadd.f32 %v12700_v55, %v12699_v13  ;;  %v12703_v42 = vld [vmem:[#allocation59_spill] sm:$0xff]  ;;  %v8611_v27 = vld [vmem:[#allocation8 + $0x35c] sm:$0xf0]  ;;  %v8607_v55 = vld [vmem:[#allocation8 + $0x344] sm:$0xf] }
 0x576   :  { %v580_v1 = vadd.f32 %v12702_v51, %v12701_v14  ;;  %v638_v2 = vadd.f32 %v12704_v10, %v12703_v42  ;;  %v12705_v6 = vld [vmem:[#allocation58_spill] sm:$0xff] }
 0x577   :  { %8926 = vtanh.f32 %v10577_v21  ;;  %v2987_v63 = vsel %vm2986_vm6, %v8923_v59, %v2983_v30  ;;  %v7562_v59 = vor.u32 %v8503_v3, %v7559_v32  ;;  %v8623_v30 = vld [vmem:[#allocation8 + $0x3c4] sm:$0xf]  ;;  %v7759_v3 = vld [vmem:[#allocation8 + $0x1a8] sm:$0xf0]  ;;  %v7973_v32 = vld [vmem:[#allocation8 + $0x340] sm:$0xf] }
 0x578   :  { %v2992_v37 = vsel %vm2989_vm7, %v2991_v15, %v2987_v63  ;;  %v8560_v15 = vld [vmem:[#allocation8 + $0x1cc] sm:$0xf]  ;;  %v12706_v33 = vld [vmem:[#allocation82_spill] sm:$0xff]  ;;  %v7762_v13 = vor.u32 %v8552_v47, %v7759_v3  ;;  %v7974_v14 = vor.u32 %v8611_v27, %v7973_v32 }
 0x579   :  { %4064 = vmatpush.bf16.msra.mxu0 %v7686_v40  ;;  %4122 = vmatpush.bf16.msra.mxu2 %v7690_v34  ;;  %v609_v49 = vadd.f32 %v12706_v33, %v12705_v6  ;;  %v7975_v51 = vld [vmem:[#allocation8 + $0x360] sm:$0xf0] }
 0x57a   :  { %v7911_v32 = vld [vmem:[#allocation8 + $0x2e0] sm:$0xf0] }
 0x57d   :  { %v8927_v29 = vpop.eup %8926  ;;  %4065 = vmatpush.bf16.msra.mxu0 %v7654_v8  ;;  %4123 = vmatpush.bf16.msra.mxu2 %v7658_v9  ;;  %v8042_v8 = vor.u32 %v8623_v30, %v8039_v44  ;;  %v7790_v9 = vor.u32 %v8564_v62, %v7789_v54  ;;  %v8603_v30 = vld [vmem:[#allocation8 + $0x31c] sm:$0xf0]  ;;  %v8599_v44 = vld [vmem:[#allocation8 + $0x304] sm:$0xf] }
 0x57e   :  { %v10583_v52 = vmul.f32 %v8927_v29, %v2992_v37  ;;  %v7794_v29 = vor.u32 %v8560_v15, %v7791_v23  ;;  %v7943_v54 = vld [vmem:[#allocation8 + $0x320] sm:$0xf0] }
 0x57f   :  { %4148 = vmatpush.bf16.msra.mxu3 %v8042_v8  ;;  %v8540_v8 = vld [vmem:[#allocation8 + $0x124] sm:$0xf0] }
 0x580   :  { %v3066_v45 = vpack.c.bf16 %v10583_v52, %v10583_v52 }
 0x581   :  { %4066 = vmatpush.bf16.msra.mxu0 %v7622_v53  ;;  %4124 = vmatpush.bf16.msra.mxu2 %v7626_v58  ;;  %v8615_v53 = vld [vmem:[#allocation8 + $0x384] sm:$0xf] }
 0x582   :  { %3075 = vmatmul.bf16.vlgmr.msrb.gmra.mxu0 %v3066_v45  ;;  %3088 = vmatmul.bf16.vlgmr.msrb.gmra.mxu1 %v3066_v45  ;;  %v8007_v58 = vld [vmem:[#allocation8 + $0x3a0] sm:$0xf0] }
 0x583   :  { %3101 = vmatmul.bf16.vlgmr.msrb.gmra.mxu2 %v3066_v45  ;;  %3114 = vmatmul.bf16.vlgmr.msrb.gmra.mxu3 %v3066_v45  ;;  %v8006_v45 = vor.u32 %v8619_v39, %v8005_v38  ;;  %v8010_v4 = vor.u32 %v8615_v53, %v8007_v58  ;;  %v7909_v38 = vld [vmem:[#allocation8 + $0x2c0] sm:$0xf]  ;;  %v12710_v53 = vld [vmem:[#allocation85_spill] sm:$0xff] }
 0x585   :  { %4067 = vmatpush.bf16.msra.mxu0 %v7590_v5  ;;  %4125 = vmatpush.bf16.msra.mxu2 %v7594_v0  ;;  %v8556_v5 = vld [vmem:[#allocation8 + $0x1a4] sm:$0xf0] }
 0x586   :  { %4091 = vmatpush.bf16.msra.mxu1 %v8006_v45  ;;  %v7758_v28 = vor.u32 %v8556_v5, %v7757_v20  ;;  %4149 = vmatpush.bf16.msra.mxu3 %v8010_v4  ;;  %v7946_v20 = vor.u32 %v8599_v44, %v7943_v54  ;;  %v8591_v4 = vld [vmem:[#allocation8 + $0x2c4] sm:$0xf] }
 0x589   :  { %4068 = vmatpush.bf16.msra.mxu0 %v7558_v31  ;;  %4126 = vmatpush.bf16.msra.mxu2 %v7562_v59 }
 0x58a   :  { %4092 = vmatpush.bf16.msra.mxu1 %v7974_v14  ;;  %v8528_v14 = vld [vmem:[#allocation8 + $0xcc] sm:$0xf] }
 0x58d   :  { %4177 = vmatpush.bf16.msrb.mxu0 %v7790_v9  ;;  %4235 = vmatpush.bf16.msrb.mxu2 %v7794_v29  ;;  %v8536_v29 = vld [vmem:[#allocation8 + $0x10c] sm:$0xf] }
 0x591   :  { %4178 = vmatpush.bf16.msrb.mxu0 %v7758_v28  ;;  %4236 = vmatpush.bf16.msrb.mxu2 %v7762_v13 }
 0x592   :  { %4069 = vmatmul.bf16.vlgmr.msra.gmra.mxu0 %v10589_v61 }
 0x593   :  { %4127 = vmatmul.bf16.vlgmr.msra.gmra.mxu2 %v10589_v61 }
 0x5a2   :  { %4074 = vmatmul.bf16.gmra.mxu0 %v10595_v48 }
 0x5a3   :  { %4132 = vmatmul.bf16.gmra.mxu2 %v10595_v48 }
 0x5b2   :  { %4079 = vmatmul.bf16.gmra.mxu0 %v10601_v41 }
 0x5b3   :  { %4137 = vmatmul.bf16.gmra.mxu2 %v10601_v41 }
 0x5e8   :  { %v3015_v17 = vpop.f32.mrf.mxu0  ;;  %v3028_v7 = vpop.f32.mrf.mxu1 }
 0x5e9   :  { %v3058_v25 = vadd.f32 %v3015_v17, %v551_v26  ;;  %v3059_v57 = vadd.f32 %v3028_v7, %v580_v1  ;;  %v7725_v1 = vld [vmem:[#allocation8 + $0x148] sm:$0xf] }
 0x5eb   :  { %v7549_v18 = vmul.f32 -1.442695, %v3058_v25  ;;  %v7550_v11 = vmul.f32 -1.442695, %v3059_v57  ;;  %v7978_v25 = vor.u32 %v8607_v55, %v7975_v51  ;;  %v8548_v57 = vld [vmem:[#allocation8 + $0x164] sm:$0xf0]  ;;  %v7914_v55 = vor.u32 %v8591_v4, %v7911_v32 }
 0x5ec   :  { %v7663_v51 = vld [vmem:[#allocation8 + $0xe8] sm:$0xf0]  ;;  %v7847_v4 = vld [vmem:[#allocation8 + $0x260] sm:$0xf0]  ;;  %v8516_v32 = vld [vmem:[#allocation8 + $0x64] sm:$0xf0] }
 0x5ed   :  { %8928 = vpow2.f32 %v7549_v18  ;;  %v8544_v18 = vld [vmem:[#allocation8 + $0x14c] sm:$0xf]  ;;  %4150 = vmatpush.bf16.msra.mxu3 %v7978_v25  ;;  %v7877_v25 = vld [vmem:[#allocation8 + $0x280] sm:$0xf] }
 0x5ee   :  { %8930 = vpow2.f32 %v7550_v11  ;;  %v7727_v11 = vld [vmem:[#allocation8 + $0x168] sm:$0xf0] }
 0x5ef   :  { %v3041_v40 = vpop.f32.mrf.mxu2  ;;  %v3054_v34 = vpop.f32.mrf.mxu3  ;;  %v7730_v24 = vor.u32 %v8544_v18, %v7727_v11  ;;  %v8583_v18 = vld [vmem:[#allocation8 + $0x284] sm:$0xf] }
 0x5f0   :  { %v3061_v12 = vadd.f32 %v3054_v34, %v638_v2  ;;  %v3017_v22 = vpop.f32.mrf.mxu0  ;;  %v3030_v63 = vpop.f32.mrf.mxu1  ;;  %v3060_v7 = vadd.f32 %v3041_v40, %v609_v49  ;;  %v7726_v2 = vor.u32 %v8548_v57, %v7725_v1  ;;  %v7942_v40 = vor.u32 %v8603_v30, %v7941_v16  ;;  %v7661_v49 = vld [vmem:[#allocation8 + $0xc8] sm:$0xf]  ;;  %v8587_v57 = vld [vmem:[#allocation8 + $0x29c] sm:$0xf0] }
 0x5f1   :  { %v7693_v63 = vld [vmem:[#allocation8 + $0x108] sm:$0xf]  ;;  %4237 = vmatpush.bf16.msrb.mxu2 %v7730_v24  ;;  %4151 = vmatpush.bf16.msra.mxu3 %v7946_v20  ;;  %v7879_v24 = vld [vmem:[#allocation8 + $0x2a0] sm:$0xf0] }
 0x5f2   :  { %v7551_v37 = vmul.f32 -1.442695, %v3061_v12  ;;  %4179 = vmatpush.bf16.msrb.mxu0 %v7726_v2  ;;  %4093 = vmatpush.bf16.msra.mxu1 %v7942_v40  ;;  %v7694_v3 = vor.u32 %v8540_v8, %v7693_v63  ;;  %v7629_v16 = vld [vmem:[#allocation8 + $0x88] sm:$0xf]  ;;  %v7878_v8 = vor.u32 %v8587_v57, %v7877_v25  ;;  %v7815_v25 = vld [vmem:[#allocation8 + $0x220] sm:$0xf0] }
 0x5f3   :  { %v8929_v46 = vpop.eup %8928  ;;  %v8524_v30 = vld [vmem:[#allocation8 + $0xa4] sm:$0xf0] }
 0x5f4   :  { %v8931_v19 = vpop.eup %8930  ;;  %v10611_v60 = vadd.f32 1.0, %v8929_v46  ;;  %8932 = vpow2.f32 %v7551_v37  ;;  %v7695_v37 = vld [vmem:[#allocation8 + $0x128] sm:$0xf0]  ;;  %v12709_v46 = vld [vmem:[#allocation84_spill] sm:$0xff]  ;;  %v7565_v57 = vld [vmem:[#allocation8 + $0x8] sm:$0xf] }
 0x5f5   :  { %v10613_v0 = vadd.f32 1.0, %v8931_v19  ;;  %v8595_v19 = vld [vmem:[#allocation8 + $0x2dc] sm:$0xf0]  ;;  %v7698_v33 = vor.u32 %v8536_v29, %v7695_v37  ;;  %4152 = vmatpush.bf16.msra.mxu3 %v7914_v55  ;;  %v8045_v40 = vld [vmem:[#allocation8 + $0x3c8] sm:$0xf] }
 0x5f6   :  { %8934 = vrcp.f32 %v10611_v60  ;;  %v3136_v50 = vand.u32 2147483647, %v10611_v60  ;;  %v3138_v26 = vand.u32 2147483648, %v10611_v60  ;;  %vm3132_vm9 = vweird.f32 %v10611_v60  ;;  %4180 = vmatpush.bf16.msrb.mxu0 %v7694_v3  ;;  %v7813_v55 = vld [vmem:[#allocation8 + $0x200] sm:$0xf] }
 0x5f7   :  { %8936 = vrcp.f32 %v10613_v0  ;;  %v3043_v31 = vpop.f32.mrf.mxu2  ;;  %v3056_v59 = vpop.f32.mrf.mxu3  ;;  %v3157_v42 = vand.u32 2147483648, %v10613_v0  ;;  %v3155_v36 = vand.u32 2147483647, %v10613_v0  ;;  %v7910_v13 = vor.u32 %v8595_v19, %v7909_v38  ;;  %4238 = vmatpush.bf16.msrb.mxu2 %v7698_v33  ;;  %v8575_v19 = vld [vmem:[#allocation8 + $0x244] sm:$0xf] }
 0x5f8   :  { %vm10631_vm8 = vcmp.eq.f32.partialorder %v3136_v50, 8.507059e+37  ;;  %v3139_v47 = vor.u32 1.1754944e-38, %v3138_v26  ;;  %v8532_v26 = vld [vmem:[#allocation8 + $0xe4] sm:$0xf0]  ;;  %vm3151_vm13 = vweird.f32 %v10613_v0  ;;  %v7630_v38 = vor.u32 %v8524_v30, %v7629_v16  ;;  %v7599_v59 = vld [vmem:[#allocation8 + $0x68] sm:$0xf0] }
 0x5f9   :  { %v3158_v28 = vor.u32 1.1754944e-38, %v3157_v42  ;;  %4094 = vmatpush.bf16.msra.mxu1 %v7910_v13  ;;  %vm10671_vm15 = vcmp.eq.f32.partialorder %v3155_v36, 8.507059e+37  ;;  %v7850_v33 = vor.u32 %v8575_v19, %v7847_v4  ;;  %v7567_v16 = vld [vmem:[#allocation8 + $0x28] sm:$0xf0]  ;;  %v7949_v30 = vld [vmem:[#allocation8 + $0x308] sm:$0xf] }
 0x5fa   :  { %v8933_v17 = vpop.eup %8932 }
 0x5fb   :  { %v10622_v10 = vadd.f32 1.0, %v8933_v17  ;;  %v7662_v17 = vor.u32 %v8532_v26, %v7661_v49  ;;  %v8571_v26 = vld [vmem:[#allocation8 + $0x21c] sm:$0xf0] }
 0x5fc   :  { %v10624_v34 = vpop.eup %8934 }
 0x5fd   :  { %v10627_v62 = vpop.eup %8936  ;;  %v3128_v12 = vmul.f32 %v10624_v34, %v10611_v60  ;;  %8938 = vrcp.f32 %v10622_v10  ;;  %vm3133_vm10 = vweird.f32 %v10624_v34  ;;  %4181 = vmatpush.bf16.msrb.mxu0 %v7662_v17  ;;  %4095 = vmatpush.bf16.msra.mxu1 %v7878_v8  ;;  %v8567_v17 = vld [vmem:[#allocation8 + $0x204] sm:$0xf]  ;;  %vm3171_vm1 = vweird.f32 %v10622_v10  ;;  %v8624_v8 = vld [vmem:[#allocation8 + $0x3cc] sm:$0xf] }
 0x5fe   :  { %v3147_v9 = vmul.f32 %v10627_v62, %v10613_v0  ;;  %8940 = vtanh.f32 %v3060_v7  ;;  %vm10647_vm11 = vmor %vm3132_vm9, %vm3133_vm10  ;;  %vm3152_vm12 = vweird.f32 %v10627_v62  ;;  %v7666_v7 = vor.u32 %v8528_v14, %v7663_v51 }
 0x5ff   :  { %v3076_v15 = vpop.f32.mrf.mxu0  ;;  %v3089_v23 = vpop.f32.mrf.mxu1  ;;  %v3129_v39 = vsub.f32 1.0, %v3128_v12  ;;  %vm10662_vm14 = vmor %vm3151_vm13, %vm3152_vm12 }
 0x600   :  { %v3119_v45 = vadd.f32 %v3076_v15, %v12709_v46  ;;  %v3120_v58 = vadd.f32 %v3089_v23, %v12710_v53  ;;  %v3148_v5 = vsub.f32 1.0, %v3147_v9  ;;  %v7882_v9 = vor.u32 %v8583_v18, %v7879_v24  ;;  %v8520_v15 = vld [vmem:[#allocation8 + $0x8c] sm:$0xf]  ;;  %v8579_v46 = vld [vmem:[#allocation8 + $0x25c] sm:$0xf0]  ;;  %4239 = vmatpush.bf16.msrb.mxu2 %v7666_v7 }
 0x601   :  { %v3130_v31 = vmul.f32 %v10624_v34, %v3129_v39  ;;  %v7631_v23 = vld [vmem:[#allocation8 + $0xa8] sm:$0xf0]  ;;  %v7845_v39 = vld [vmem:[#allocation8 + $0x240] sm:$0xf]  ;;  %4182 = vmatpush.bf16.msrb.mxu0 %v7630_v38  ;;  %v7814_v7 = vor.u32 %v8571_v26, %v7813_v55  ;;  %v8508_v18 = vld [vmem:[#allocation8 + $0x24] sm:$0xf0] }
 0x602   :  { %v7552_v27 = vmul.f32 -1.442695, %v3119_v45  ;;  %v7553_v6 = vmul.f32 -1.442695, %v3120_v58  ;;  %v3149_v50 = vmul.f32 %v10627_v62, %v3148_v5  ;;  %v12717_v58 = vld [vmem:[#allocation90_spill] sm:$0xff]  ;;  %v7634_v22 = vor.u32 %v8520_v15, %v7631_v23  ;;  %4153 = vmatpush.bf16.msra.mxu3 %v7882_v9 }
 0x603   :  { %v10653_v60 = vpop.eup %8938  ;;  %v3131_v1 = vadd.f32 %v10624_v34, %v3130_v31  ;;  %v7597_v5 = vld [vmem:[#allocation8 + $0x48] sm:$0xf]  ;;  %v7846_v3 = vor.u32 %v8579_v46, %v7845_v39  ;;  %v8512_v31 = vld [vmem:[#allocation8 + $0x4c] sm:$0xf]  ;;  %v7566_v54 = vor.u32 %v8508_v18, %v7565_v57  ;;  %v12720_v46 = vld [vmem:[#allocation88_spill] sm:$0xff] }
 0x604   :  { %8942 = vpow2.f32 %v7552_v27  ;;  %v8941_v11 = vpop.eup %8940  ;;  %v3150_v42 = vadd.f32 %v10627_v62, %v3149_v50  ;;  %v3167_v2 = vmul.f32 %v10653_v60, %v10622_v10  ;;  %vm3172_vm0 = vweird.f32 %v10653_v60  ;;  %4240 = vmatpush.bf16.msrb.mxu2 %v7634_v22  ;;  %v8504_v24 = vld [vmem:[#allocation8 + $0xc] sm:$0xf] }
 0x605   :  { %8944 = vpow2.f32 %v7553_v6  ;;  %v3135_v44 = vsel %vm10647_vm11, %v10624_v34, %v3131_v1  ;;  %v7602_v1 = vor.u32 %v8512_v31, %v7599_v59  ;;  %4096 = vmatpush.bf16.msra.mxu1 %v7846_v3  ;;  %vm10699_vm2 = vmor %vm3171_vm1, %vm3172_vm0  ;;  %v7570_v15 = vor.u32 %v8504_v24, %v7567_v16  ;;  %v8015_v31 = vld [vmem:[#allocation8 + $0x3a8] sm:$0xf0] }
 0x606   :  { %v10675_v12 = vpop.f32.mrf.mxu2  ;;  %v3115_v63 = vpop.f32.mrf.mxu3  ;;  %v3140_v29 = vsel %vm10631_vm8, %v3139_v47, %v3135_v44  ;;  %v3154_v34 = vsel %vm10662_vm14, %v10627_v62, %v3150_v42  ;;  %v3168_v0 = vsub.f32 1.0, %v3167_v2  ;;  %4154 = vmatpush.bf16.msra.mxu3 %v7850_v33  ;;  %v7818_v44 = vor.u32 %v8567_v17, %v7815_v25  ;;  %v7983_v16 = vld [vmem:[#allocation8 + $0x368] sm:$0xf0] }
 0x607   :  { %v3078_v36 = vpop.f32.mrf.mxu0  ;;  %v3091_v37 = vpop.f32.mrf.mxu1  ;;  %v3159_v45 = vsel %vm10671_vm15, %v3158_v28, %v3154_v34  ;;  %v3182_v53 = vmul.f32 %v8941_v11, %v3140_v29  ;;  %v3122_v20 = vadd.f32 %v3115_v63, %v12717_v58  ;;  %v3177_v28 = vand.u32 2147483648, %v10622_v10  ;;  %v8628_v63 = vld [vmem:[#allocation8 + $0x3e4] sm:$0xf0]  ;;  %v8047_v29 = vld [vmem:[#allocation8 + $0x3e8] sm:$0xf0] }
 0x608   :  { %v3181_v62 = vmul.f32 %v3159_v45, %v10544_v56  ;;  %v3169_v47 = vmul.f32 %v10653_v60, %v3168_v0  ;;  %v7598_v56 = vor.u32 %v8516_v32, %v7597_v5  ;;  %v3175_v11 = vand.u32 2147483647, %v10622_v10  ;;  %4241 = vmatpush.bf16.msrb.mxu2 %v7602_v1  ;;  %v8013_v5 = vld [vmem:[#allocation8 + $0x388] sm:$0xf]  ;;  %v8616_v32 = vld [vmem:[#allocation8 + $0x38c] sm:$0xf] }
 0x609   :  { %v7554_v6 = vmul.f32 -1.442695, %v3122_v20  ;;  %v3178_v9 = vor.u32 1.1754944e-38, %v3177_v28  ;;  %4097 = vmatpush.bf16.msra.mxu1 %v7814_v7  ;;  %v8046_v23 = vor.u32 %v8628_v63, %v8045_v40  ;;  %v8050_v0 = vor.u32 %v8624_v8, %v8047_v29  ;;  %v8604_v40 = vld [vmem:[#allocation8 + $0x324] sm:$0xf0] }
 0x60a   :  { %v8943_v27 = vpop.eup %8942  ;;  %v3183_v50 = vadd.f32 %v3182_v53, %v3181_v62  ;;  %v3170_v14 = vadd.f32 %v10653_v60, %v3169_v47  ;;  %4183 = vmatpush.bf16.msrb.mxu0 %v7598_v56  ;;  %vm3176_vm3 = vcmp.eq.f32.partialorder %v3175_v11, 8.507059e+37  ;;  %4155 = vmatpush.bf16.msra.mxu3 %v7818_v44  ;;  %v3121_v45 = vadd.f32 %v10675_v12, %v12720_v46  ;;  %v8620_v62 = vld [vmem:[#allocation8 + $0x3a4] sm:$0xf0]  ;;  %v8600_v44 = vld [vmem:[#allocation8 + $0x30c] sm:$0xf] }
 0x60b   :  { %v8945_v49 = vpop.eup %8944  ;;  %v10689_v13 = vadd.f32 1.0, %v8943_v27  ;;  %8946 = vpow2.f32 %v7554_v6  ;;  %v8014_v3 = vor.u32 %v8620_v62, %v8013_v5  ;;  %v8018_v27 = vor.u32 %v8616_v32, %v8015_v31  ;;  %v8612_v11 = vld [vmem:[#allocation8 + $0x364] sm:$0xf0]  ;;  %v7797_v46 = vld [vmem:[#allocation8 + $0x1d0] sm:$0xf] }
 0x60c   :  { %v10692_v51 = vadd.f32 1.0, %v8945_v49  ;;  %8948 = vtanh.f32 %v3183_v50  ;;  %v3174_v10 = vsel %vm10699_vm2, %v10653_v60, %v3170_v14  ;;  %4242 = vmatpush.bf16.msrb.mxu2 %v7570_v15  ;;  %v7950_v8 = vor.u32 %v8604_v40, %v7949_v30  ;;  %v8592_v5 = vld [vmem:[#allocation8 + $0x2cc] sm:$0xf]  ;;  %v7767_v32 = vld [vmem:[#allocation8 + $0x1b0] sm:$0xf0] }
 0x60d   :  { %8950 = vrcp.f32 %v10689_v13  ;;  %v3179_v37 = vsel %vm3176_vm3, %v3178_v9, %v3174_v10  ;;  %4206 = vmatpush.bf16.msrb.mxu1 %v8046_v23  ;;  %v3199_v19 = vand.u32 2147483647, %v10689_v13  ;;  %v3201_v12 = vand.u32 2147483648, %v10689_v13  ;;  %v7919_v62 = vld [vmem:[#allocation8 + $0x2e8] sm:$0xf0] }
 0x60e   :  { %v3104_v42 = vpop.f32.mrf.mxu2  ;;  %v3117_v2 = vpop.f32.mrf.mxu3  ;;  %8952 = vrcp.f32 %v10692_v51  ;;  %4184 = vmatpush.bf16.msrb.mxu0 %v7566_v54  ;;  %4264 = vmatpush.bf16.msrb.mxu3 %v8050_v0  ;;  %v3218_v6 = vand.u32 2147483647, %v10692_v51  ;;  %vm3195_vm6 = vweird.f32 %v10689_v13  ;;  %vm3214_vm7 = vweird.f32 %v10692_v51  ;;  %v7951_v54 = vld [vmem:[#allocation8 + $0x328] sm:$0xf0]  ;;  %v8533_v30 = vld [vmem:[#allocation8 + $0xec] sm:$0xf0] }
 0x60f   :  { %v3202_v50 = vor.u32 1.1754944e-38, %v3201_v12  ;;  %vm3200_vm10 = vcmp.eq.f32.partialorder %v3199_v19, 8.507059e+37  ;;  %v8608_v42 = vld [vmem:[#allocation8 + $0x34c] sm:$0xf]  ;;  %v7954_v15 = vor.u32 %v8600_v44, %v7951_v54  ;;  %v7922_v12 = vor.u32 %v8592_v5, %v7919_v62  ;;  %v8529_v40 = vld [vmem:[#allocation8 + $0xd4] sm:$0xf] }
 0x610   :  { %vm3219_vm11 = vcmp.eq.f32.partialorder %v3218_v6, 8.507059e+37  ;;  %v7986_v10 = vor.u32 %v8608_v42, %v7983_v16  ;;  %v7573_v5 = vld [vmem:[#allocation8 + $0x10] sm:$0xf] }
 0x611   :  { %v8947_v34 = vpop.eup %8946  ;;  %4207 = vmatpush.bf16.msrb.mxu1 %v8014_v3  ;;  %v8553_v3 = vld [vmem:[#allocation8 + $0x194] sm:$0xf]  ;;  %v8509_v62 = vld [vmem:[#allocation8 + $0x2c] sm:$0xf0] }
 0x612   :  { %v8949_v36 = vpop.eup %8948  ;;  %v10707_v38 = vadd.f32 1.0, %v8947_v34  ;;  %4265 = vmatpush.bf16.msrb.mxu3 %v8018_v27  ;;  %v8588_v27 = vld [vmem:[#allocation8 + $0x2a4] sm:$0xf0] }
 0x613   :  { %v8951_v60 = vpop.eup %8950  ;;  %v3185_v39 = vmul.f32 %v8949_v36, %v3179_v37 }
 0x614   :  { %v8953_v53 = vpop.eup %8952  ;;  %v3191_v58 = vmul.f32 %v8951_v60, %v10689_v13  ;;  %8954 = vrcp.f32 %v10707_v38  ;;  %vm3196_vm4 = vweird.f32 %v8951_v60  ;;  %v7981_v13 = vld [vmem:[#allocation8 + $0x348] sm:$0xf]  ;;  %v3240_v23 = vand.u32 2147483648, %v10707_v38 }
 0x615   :  { %v10714_v20 = vpack.c.bf16 %v3185_v39, %v10560_v35  ;;  %v3210_v22 = vmul.f32 %v8953_v53, %v10692_v51  ;;  %8956 = vtanh.f32 %v3121_v45  ;;  %v3220_v35 = vand.u32 2147483648, %v10692_v51  ;;  %vm3197_vm8 = vmor %vm3195_vm6, %vm3196_vm4  ;;  %v8596_v39 = vld [vmem:[#allocation8 + $0x2e4] sm:$0xf0] }
 0x616   :  { %v3192_v4 = vsub.f32 1.0, %v3191_v58  ;;  %vm3215_vm5 = vweird.f32 %v8953_v53  ;;  %v7982_v24 = vor.u32 %v8612_v11, %v7981_v13  ;;  %4266 = vmatpush.bf16.msrb.mxu3 %v7986_v10  ;;  %vm3234_vm13 = vweird.f32 %v10707_v38  ;;  %v8561_v58 = vld [vmem:[#allocation8 + $0x1d4] sm:$0xf]  ;;  %v12721_v11 = vld [vmem:[#allocation111_spill] sm:$0xff] }
 0x617   :  { %v3211_v47 = vsub.f32 1.0, %v3210_v22  ;;  %4084 = vmatmul.bf16.gmra.mxu0 %v10714_v20  ;;  %4142 = vmatmul.bf16.gmra.mxu2 %v10714_v20  ;;  %vm3216_vm9 = vmor %vm3214_vm7, %vm3215_vm5  ;;  %v3221_v26 = vor.u32 1.1754944e-38, %v3220_v35  ;;  %v3241_v34 = vor.u32 1.1754944e-38, %v3240_v23  ;;  %v7799_v22 = vld [vmem:[#allocation8 + $0x1f0] sm:$0xf0]  ;;  %v7770_v35 = vor.u32 %v8553_v3, %v7767_v32  ;;  %v12723_v3 = vld [vmem:[#allocation51_spill] sm:$0xff] }
 0x618   :  { %v3193_v59 = vmul.f32 %v8951_v60, %v3192_v4  ;;  %4208 = vmatpush.bf16.msrb.mxu1 %v7982_v24  ;;  %v7802_v4 = vor.u32 %v8561_v58, %v7799_v22  ;;  %v10741_v42 = vpack.c.bf16 %v12721_v11, %v10477_v43  ;;  %v7669_v24 = vld [vmem:[#allocation8 + $0xd0] sm:$0xf]  ;;  %v7671_v10 = vld [vmem:[#allocation8 + $0xf0] sm:$0xf0] }
 0x619   :  { %v3212_v28 = vmul.f32 %v8953_v53, %v3211_v47  ;;  %v7765_v47 = vld [vmem:[#allocation8 + $0x190] sm:$0xf]  ;;  %v7670_v44 = vor.u32 %v8533_v30, %v7669_v24  ;;  %v7674_v54 = vor.u32 %v8529_v40, %v7671_v10  ;;  %v8521_v23 = vld [vmem:[#allocation8 + $0x94] sm:$0xf]  ;;  %v10763_v30 = vpop.f32.mrf.mxu2 }
 0x61a   :  { %v8955_v33 = vpop.eup %8954  ;;  %v3194_v49 = vadd.f32 %v8951_v60, %v3193_v59  ;;  %4267 = vmatpush.bf16.msrb.mxu3 %v7954_v15  ;;  %4351 = vmatpush.bf16.msra.mxu2 %v7802_v4  ;;  %v7885_v59 = vld [vmem:[#allocation8 + $0x288] sm:$0xf]  ;;  %v8525_v15 = vld [vmem:[#allocation8 + $0xac] sm:$0xf0]  ;;  %v7607_v58 = vld [vmem:[#allocation8 + $0x70] sm:$0xf0] }
 0x61b   :  { %v3213_v56 = vadd.f32 %v8953_v53, %v3212_v28  ;;  %v3230_v55 = vmul.f32 %v8955_v33, %v10707_v38  ;;  %v8957_v1 = vpop.eup %8956  ;;  %vm3235_vm12 = vweird.f32 %v8955_v33  ;;  %v7733_v28 = vld [vmem:[#allocation8 + $0x150] sm:$0xf]  ;;  %v7886_v6 = vor.u32 %v8588_v27, %v7885_v59  ;;  %v8609_v11 = vld [vmem:[#allocation8 + $0x354] sm:$0xf] }
 0x61c   :  { %v3198_v14 = vsel %vm3197_vm8, %v8951_v60, %v3194_v49  ;;  %vm3236_vm14 = vmor %vm3234_vm13, %vm3235_vm12  ;;  %4209 = vmatpush.bf16.msrb.mxu1 %v7950_v8  ;;  %v8545_v49 = vld [vmem:[#allocation8 + $0x154] sm:$0xf]  ;;  %v7855_v8 = vld [vmem:[#allocation8 + $0x268] sm:$0xf0] }
 0x61d   :  { %v3203_v17 = vsel %vm3200_vm10, %v3202_v50, %v3198_v14  ;;  %v3217_v7 = vsel %vm3216_vm9, %v8953_v53, %v3213_v56  ;;  %v3231_v25 = vsub.f32 1.0, %v3230_v55  ;;  %v8565_v53 = vld [vmem:[#allocation8 + $0x1ec] sm:$0xf0]  ;;  %v7735_v50 = vld [vmem:[#allocation8 + $0x170] sm:$0xf0] }
 0x61e   :  { %v3222_v57 = vsel %vm3219_vm11, %v3221_v26, %v3217_v7  ;;  %v3245_v18 = vmul.f32 %v8957_v1, %v3203_v17  ;;  %v7798_v19 = vor.u32 %v8565_v53, %v7797_v46  ;;  %4268 = vmatpush.bf16.msrb.mxu3 %v7922_v12  ;;  %v8584_v56 = vld [vmem:[#allocation8 + $0x28c] sm:$0xf]  ;;  %4352 = vmatpush.bf16.msra.mxu2 %v7770_v35  ;;  %v7701_v17 = vld [vmem:[#allocation8 + $0x110] sm:$0xf]  ;;  %v8513_v53 = vld [vmem:[#allocation8 + $0x54] sm:$0xf] }
 0x61f   :  { %v3244_v51 = vmul.f32 %v3222_v57, %v10577_v21  ;;  %v3232_v2 = vmul.f32 %v8955_v33, %v3231_v25  ;;  %v3238_v21 = vand.u32 2147483647, %v10707_v38  ;;  %v7917_v38 = vld [vmem:[#allocation8 + $0x2c8] sm:$0xf]  ;;  %v7887_v55 = vld [vmem:[#allocation8 + $0x2a8] sm:$0xf0]  ;;  %v7738_v1 = vor.u32 %v8545_v49, %v7735_v50 }
 0x620   :  { %v7918_v45 = vor.u32 %v8596_v39, %v7917_v38  ;;  %4293 = vmatpush.bf16.msra.mxu0 %v7798_v19  ;;  %v7890_v26 = vor.u32 %v8584_v56, %v7887_v55  ;;  %v8541_v7 = vld [vmem:[#allocation8 + $0x12c] sm:$0xf0]  ;;  %v8537_v25 = vld [vmem:[#allocation8 + $0x114] sm:$0xf]  ;;  %v8568_v39 = vld [vmem:[#allocation8 + $0x20c] sm:$0xf]  ;;  %v7610_v4 = vor.u32 %v8513_v53, %v7607_v58 }
 0x621   :  { %v3246_v63 = vadd.f32 %v3245_v18, %v3244_v51  ;;  %v3233_v9 = vadd.f32 %v8955_v33, %v3232_v2  ;;  %vm3239_vm15 = vcmp.eq.f32.partialorder %v3238_v21, 8.507059e+37  ;;  %v7703_v57 = vld [vmem:[#allocation8 + $0x130] sm:$0xf0]  ;;  %v7702_v18 = vor.u32 %v8541_v7, %v7701_v17  ;;  %v7853_v51 = vld [vmem:[#allocation8 + $0x248] sm:$0xf]  ;;  %v10755_v17 = vpop.f32.mrf.mxu0 }
 0x622   :  { %4210 = vmatpush.bf16.msrb.mxu1 %v7918_v45  ;;  %4269 = vmatpush.bf16.msrb.mxu3 %v7890_v26  ;;  %v7706_v13 = vor.u32 %v8537_v25, %v7703_v57  ;;  %v8580_v2 = vld [vmem:[#allocation8 + $0x264] sm:$0xf0]  ;;  %v7639_v21 = vld [vmem:[#allocation8 + $0xb0] sm:$0xf0]  ;;  %v7605_v38 = vld [vmem:[#allocation8 + $0x50] sm:$0xf] }
 0x623   :  { %8958 = vtanh.f32 %v3246_v63  ;;  %v3237_v29 = vsel %vm3236_vm14, %v8955_v33, %v3233_v9  ;;  %v8549_v33 = vld [vmem:[#allocation8 + $0x16c] sm:$0xf0]  ;;  %4353 = vmatpush.bf16.msra.mxu2 %v7738_v1  ;;  %v7854_v16 = vor.u32 %v8580_v2, %v7853_v51  ;;  %v8576_v63 = vld [vmem:[#allocation8 + $0x24c] sm:$0xf]  ;;  %v7575_v12 = vld [vmem:[#allocation8 + $0x30] sm:$0xf0] }
 0x624   :  { %v3242_v36 = vsel %vm3239_vm15, %v3241_v34, %v3237_v29  ;;  %v7734_v14 = vor.u32 %v8549_v33, %v7733_v28  ;;  %v7637_v9 = vld [vmem:[#allocation8 + $0x90] sm:$0xf]  ;;  %v7858_v43 = vor.u32 %v8576_v63, %v7855_v8  ;;  %v7821_v29 = vld [vmem:[#allocation8 + $0x208] sm:$0xf]  ;;  %v7823_v46 = vld [vmem:[#allocation8 + $0x228] sm:$0xf0] }
 0x625   :  { %v8572_v34 = vld [vmem:[#allocation8 + $0x224] sm:$0xf0]  ;;  %v8517_v45 = vld [vmem:[#allocation8 + $0x6c] sm:$0xf0]  ;;  %v7826_v22 = vor.u32 %v8568_v39, %v7823_v46  ;;  %v8625_v28 = vld [vmem:[#allocation8 + $0x3d4] sm:$0xf] }
 0x626   :  { %4211 = vmatpush.bf16.msrb.mxu1 %v7886_v6  ;;  %4270 = vmatpush.bf16.msrb.mxu3 %v7858_v43  ;;  %v7606_v19 = vor.u32 %v8517_v45, %v7605_v38  ;;  %v8053_v59 = vld [vmem:[#allocation8 + $0x3d0] sm:$0xf]  ;;  %v8055_v33 = vld [vmem:[#allocation8 + $0x3f0] sm:$0xf0]  ;;  %v12725_v25 = vld [vmem:[#allocation14_spill] sm:$0xff] }
 0x627   :  { %4185 = vmatmul.bf16.vlgmr.msrb.gmra.mxu0 %v10589_v61  ;;  %4243 = vmatmul.bf16.vlgmr.msrb.gmra.mxu2 %v10589_v61  ;;  %v8629_v27 = vld [vmem:[#allocation8 + $0x3ec] sm:$0xf0]  ;;  %v8058_v56 = vor.u32 %v8625_v28, %v8055_v33  ;;  %v8617_v55 = vld [vmem:[#allocation8 + $0x394] sm:$0xf]  ;;  %v7773_v45 = vld [vmem:[#allocation8 + $0x198] sm:$0xf] }
 0x628   :  { %4354 = vmatpush.bf16.msra.mxu2 %v7706_v13  ;;  %v8054_v6 = vor.u32 %v8629_v27, %v8053_v59  ;;  %v8021_v49 = vld [vmem:[#allocation8 + $0x390] sm:$0xf]  ;;  %v8023_v26 = vld [vmem:[#allocation8 + $0x3b0] sm:$0xf0]  ;;  %v8558_v58 = vld [vmem:[#allocation8 + $0x1b4] sm:$0xf0] }
 0x629   :  { %v8959_v0 = vpop.eup %8958  ;;  %v8621_v50 = vld [vmem:[#allocation8 + $0x3ac] sm:$0xf0]  ;;  %v8026_v1 = vor.u32 %v8617_v55, %v8023_v26  ;;  %v7991_v2 = vld [vmem:[#allocation8 + $0x370] sm:$0xf0]  ;;  %v10765_v8 = vpop.f32.mrf.mxu0  ;;  %v8542_v55 = vld [vmem:[#allocation8 + $0x134] sm:$0xf0] }
 0x62a   :  { %v3248_v37 = vmul.f32 %v8959_v0, %v3242_v36  ;;  %4212 = vmatpush.bf16.msrb.mxu1 %v7854_v16  ;;  %v7822_v0 = vor.u32 %v8572_v34, %v7821_v29  ;;  %v7638_v36 = vor.u32 %v8525_v15, %v7637_v9  ;;  %4271 = vmatpush.bf16.msrb.mxu3 %v7826_v22  ;;  %v12724_v7 = vld [vmem:[#allocation16_spill] sm:$0xff]  ;;  %v10769_v9 = vpop.f32.mrf.mxu2  ;;  %v8566_v34 = vld [vmem:[#allocation8 + $0x1f4] sm:$0xf0]  ;;  %v8554_v22 = vld [vmem:[#allocation8 + $0x19c] sm:$0xf] }
 0x62b   :  { %v10759_v57 = vpack.c.bf16 %v12725_v25, %v12724_v7  ;;  %v8613_v13 = vld [vmem:[#allocation8 + $0x36c] sm:$0xf0]  ;;  %v7994_v40 = vor.u32 %v8609_v11, %v7991_v2  ;;  %v8601_v10 = vld [vmem:[#allocation8 + $0x314] sm:$0xf]  ;;  %12726 = vst [vmem:[#allocation113_spill] sm:$0xff] %v10765_v8 }
 0x62c   :  { %v10733_v60 = vpack.c.bf16 %v10583_v52, %v3248_v37  ;;  %v8557_v52 = vld [vmem:[#allocation8 + $0x1ac] sm:$0xf0]  ;;  %4355 = vmatpush.bf16.msra.mxu2 %v7674_v54  ;;  %v7642_v37 = vor.u32 %v8521_v23, %v7639_v21  ;;  %12727 = vst [vmem:[#allocation112_spill] sm:$0xff] %v10769_v9  ;;  %v7805_v21 = vld [vmem:[#allocation8 + $0x1d8] sm:$0xf] }
 0x62d   :  { %v7766_v31 = vor.u32 %v8557_v52, %v7765_v47  ;;  %v8505_v47 = vld [vmem:[#allocation8 + $0x14] sm:$0xf]  ;;  %v12722_v52 = vld [vmem:[#allocation53_spill] sm:$0xff]  ;;  %v7957_v24 = vld [vmem:[#allocation8 + $0x310] sm:$0xf] }
 0x62e   :  { %4098 = vmatmul.bf16.vlgmr.msra.gmra.mxu1 %v10733_v60  ;;  %4156 = vmatmul.bf16.vlgmr.msra.gmra.mxu3 %v10733_v60  ;;  %v10749_v32 = vpack.c.bf16 %v12723_v3, %v12722_v52  ;;  %v7578_v35 = vor.u32 %v8505_v47, %v7575_v12  ;;  %v8605_v16 = vld [vmem:[#allocation8 + $0x32c] sm:$0xf0]  ;;  %v8593_v39 = vld [vmem:[#allocation8 + $0x2d4] sm:$0xf]  ;;  %v7741_v12 = vld [vmem:[#allocation8 + $0x158] sm:$0xf] }
 0x62f   :  { %4294 = vmatpush.bf16.msra.mxu0 %v7766_v31  ;;  %4213 = vmatpush.bf16.msrb.mxu1 %v7822_v0  ;;  %v7574_v31 = vor.u32 %v8509_v62, %v7573_v5  ;;  %v7958_v54 = vor.u32 %v8605_v16, %v7957_v24  ;;  %v7925_v15 = vld [vmem:[#allocation8 + $0x2d0] sm:$0xf]  ;;  %v8562_v0 = vld [vmem:[#allocation8 + $0x1dc] sm:$0xf]  ;;  %v7927_v46 = vld [vmem:[#allocation8 + $0x2f0] sm:$0xf0] }
 0x630   :  { %4356 = vmatpush.bf16.msra.mxu2 %v7642_v37  ;;  %4380 = vmatpush.bf16.msra.mxu3 %v8058_v56  ;;  %v8597_v23 = vld [vmem:[#allocation8 + $0x2ec] sm:$0xf0]  ;;  %v7806_v37 = vor.u32 %v8566_v34, %v7805_v21  ;;  %v7930_v53 = vor.u32 %v8593_v39, %v7927_v46  ;;  %v8550_v3 = vld [vmem:[#allocation8 + $0x174] sm:$0xf0]  ;;  %v8585_v27 = vld [vmem:[#allocation8 + $0x294] sm:$0xf] }
 0x631   :  { %v10771_v43 = vpop.f32.mrf.mxu0  ;;  %v7926_v29 = vor.u32 %v8597_v23, %v7925_v15  ;;  %v7893_v62 = vld [vmem:[#allocation8 + $0x290] sm:$0xf]  ;;  %v7895_v28 = vld [vmem:[#allocation8 + $0x2b0] sm:$0xf0]  ;;  %v8538_v26 = vld [vmem:[#allocation8 + $0x11c] sm:$0xf] }
 0x632   :  { %v8589_v47 = vld [vmem:[#allocation8 + $0x2ac] sm:$0xf0]  ;;  %v10775_v59 = vpop.f32.mrf.mxu2  ;;  %v7677_v11 = vld [vmem:[#allocation8 + $0xd8] sm:$0xf]  ;;  %v8530_v24 = vld [vmem:[#allocation8 + $0xdc] sm:$0xf] }
 0x633   :  { %4295 = vmatpush.bf16.msra.mxu0 %v7734_v14  ;;  %4322 = vmatpush.bf16.msra.mxu1 %v8054_v6  ;;  %v8022_v14 = vor.u32 %v8621_v50, %v8021_v49  ;;  %v7894_v52 = vor.u32 %v8589_v47, %v7893_v62  ;;  %v7742_v6 = vor.u32 %v8550_v3, %v7741_v12  ;;  %v7709_v50 = vld [vmem:[#allocation8 + $0x118] sm:$0xf]  ;;  %v7679_v16 = vld [vmem:[#allocation8 + $0xf8] sm:$0xf0]  ;;  %v7831_v62 = vld [vmem:[#allocation8 + $0x230] sm:$0xf0] }
 0x634   :  { %4357 = vmatpush.bf16.msra.mxu2 %v7610_v4  ;;  %4381 = vmatpush.bf16.msra.mxu3 %v8026_v1  ;;  %v7774_v4 = vor.u32 %v8558_v58, %v7773_v45  ;;  %v7898_v49 = vor.u32 %v8585_v27, %v7895_v28  ;;  %v7710_v1 = vor.u32 %v8542_v55, %v7709_v50  ;;  %v8534_v2 = vld [vmem:[#allocation8 + $0xf4] sm:$0xf0]  ;;  %v8522_v21 = vld [vmem:[#allocation8 + $0x9c] sm:$0xf] }
 0x635   :  { %v8526_v23 = vld [vmem:[#allocation8 + $0xb4] sm:$0xf0]  ;;  %v7615_v58 = vld [vmem:[#allocation8 + $0x78] sm:$0xf0] }
 0x636   :  { %v7613_v46 = vld [vmem:[#allocation8 + $0x58] sm:$0xf]  ;;  %v8506_v3 = vld [vmem:[#allocation8 + $0x1c] sm:$0xf] }
 0x637   :  { %4190 = vmatmul.bf16.gmra.mxu0 %v10595_v48  ;;  %4248 = vmatmul.bf16.gmra.mxu2 %v10595_v48  ;;  %v8518_v45 = vld [vmem:[#allocation8 + $0x74] sm:$0xf0] }
 0x638   :  { %4296 = vmatpush.bf16.msra.mxu0 %v7702_v18  ;;  %4358 = vmatpush.bf16.msra.mxu2 %v7578_v35  ;;  %v7989_v18 = vld [vmem:[#allocation8 + $0x350] sm:$0xf]  ;;  %v7743_v35 = vld [vmem:[#allocation8 + $0x178] sm:$0xf0]  ;;  %v7581_v47 = vld [vmem:[#allocation8 + $0x18] sm:$0xf] }
 0x639   :  { %4323 = vmatpush.bf16.msra.mxu1 %v8022_v14  ;;  %v7990_v51 = vor.u32 %v8613_v13, %v7989_v18  ;;  %4382 = vmatpush.bf16.msra.mxu3 %v7994_v40  ;;  %v10779_v56 = vpop.f32.mrf.mxu0  ;;  %v7711_v14 = vld [vmem:[#allocation8 + $0x138] sm:$0xf0]  ;;  %v7861_v18 = vld [vmem:[#allocation8 + $0x250] sm:$0xf]  ;;  %v7678_v40 = vor.u32 %v8534_v2, %v7677_v11 }
 0x63a   :  { %12728 = vst [vmem:[#allocation56_spill] sm:$0xff] %v10779_v56  ;;  %v7714_v7 = vor.u32 %v8538_v26, %v7711_v14  ;;  %v10781_v25 = vpop.f32.mrf.mxu2  ;;  %v8581_v13 = vld [vmem:[#allocation8 + $0x26c] sm:$0xf0]  ;;  %v8626_v26 = vld [vmem:[#allocation8 + $0x3dc] sm:$0xf] }
 0x63b   :  { %12729 = vst [vmem:[#allocation57_spill] sm:$0xff] %v10781_v25  ;;  %v8063_v14 = vld [vmem:[#allocation8 + $0x3f8] sm:$0xf0]  ;;  %v8638_v25 = vld [vmem:[#allocation9 + $0x34] sm:$0xf0] }
 0x63c   :  { %4297 = vmatpush.bf16.msra.mxu0 %v7670_v44  ;;  %v7959_v44 = vld [vmem:[#allocation8 + $0x330] sm:$0xf0]  ;;  %v8618_v2 = vld [vmem:[#allocation8 + $0x39c] sm:$0xf]  ;;  %v8277_v56 = vld [vmem:[#allocation9 + $0x1a0] sm:$0xf] }
 0x63d   :  { %4324 = vmatpush.bf16.msra.mxu1 %v7990_v51  ;;  %v7962_v63 = vor.u32 %v8601_v10, %v7959_v44  ;;  %v7862_v51 = vor.u32 %v8581_v13, %v7861_v18  ;;  %v7682_v10 = vor.u32 %v8530_v24, %v7679_v16  ;;  %v8577_v44 = vld [vmem:[#allocation8 + $0x254] sm:$0xf]  ;;  %v8622_v18 = vld [vmem:[#allocation8 + $0x3b4] sm:$0xf0]  ;;  %v8031_v24 = vld [vmem:[#allocation8 + $0x3b8] sm:$0xf0] }
 0x63e   :  { %4103 = vmatmul.bf16.gmra.mxu1 %v10741_v42  ;;  %4161 = vmatmul.bf16.gmra.mxu3 %v10741_v42  ;;  %v8034_v16 = vor.u32 %v8618_v2, %v8031_v24  ;;  %v8662_v2 = vld [vmem:[#allocation9 + $0xf4] sm:$0xf0] }
 0x63f   :  { %4383 = vmatpush.bf16.msra.mxu3 %v7962_v63  ;;  %v7645_v63 = vld [vmem:[#allocation8 + $0x98] sm:$0xf] }
 0x640   :  { %4298 = vmatpush.bf16.msra.mxu0 %v7638_v36  ;;  %v7807_v36 = vld [vmem:[#allocation8 + $0x1f8] sm:$0xf0] }
 0x641   :  { %4325 = vmatpush.bf16.msra.mxu1 %v7958_v54  ;;  %v7810_v38 = vor.u32 %v8562_v0, %v7807_v36  ;;  %v7863_v54 = vld [vmem:[#allocation8 + $0x270] sm:$0xf0]  ;;  %v10785_v34 = vpop.f32.mrf.mxu0  ;;  %v7829_v0 = vld [vmem:[#allocation8 + $0x210] sm:$0xf] }
 0x642   :  { %v7866_v15 = vor.u32 %v8577_v44, %v7863_v54  ;;  %v8573_v36 = vld [vmem:[#allocation8 + $0x22c] sm:$0xf0]  ;;  %v8181_v54 = vld [vmem:[#allocation9 + $0xe0] sm:$0xf] }
 0x643   :  { %4467 = vmatpush.bf16.msrb.mxu2 %v7810_v38  ;;  %4384 = vmatpush.bf16.msra.mxu3 %v7930_v53  ;;  %v7646_v38 = vor.u32 %v8526_v23, %v7645_v63  ;;  %v8514_v53 = vld [vmem:[#allocation8 + $0x5c] sm:$0xf]  ;;  %v8661_v63 = vld [vmem:[#allocation9 + $0xec] sm:$0xf0] }
 0x644   :  { %4299 = vmatpush.bf16.msra.mxu0 %v7606_v19  ;;  %v7775_v19 = vld [vmem:[#allocation8 + $0x1b8] sm:$0xf0]  ;;  %v10809_v23 = vor.u32 %v8661_v63, %v8181_v54  ;;  %v8645_v54 = vld [vmem:[#allocation9 + $0x6c] sm:$0xf0] }
 0x645   :  { %4326 = vmatpush.bf16.msra.mxu1 %v7926_v29  ;;  %v7778_v5 = vor.u32 %v8554_v22, %v7775_v19  ;;  %v7647_v29 = vld [vmem:[#allocation8 + $0xb8] sm:$0xf0]  ;;  %v10789_v22 = vpop.f32.mrf.mxu2  ;;  %v7614_v19 = vor.u32 %v8518_v45, %v7613_v46  ;;  %v8165_v46 = vld [vmem:[#allocation9 + $0xc0] sm:$0xf]  ;;  %v8657_v45 = vld [vmem:[#allocation9 + $0xcc] sm:$0xf0] }
 0x646   :  { %v7650_v39 = vor.u32 %v8522_v21, %v7647_v29  ;;  %12732 = vst [vmem:[#allocation107_spill] sm:$0xff] %v10809_v23  ;;  %v10814_v21 = vld [vmem:[%s12089_s6] sm:$0xff] }
 0x647   :  { %4195 = vmatmul.bf16.gmra.mxu0 %v10601_v41  ;;  %4253 = vmatmul.bf16.gmra.mxu2 %v10601_v41 }
 0x648   :  { %4300 = vmatpush.bf16.msra.mxu0 %v7574_v31  ;;  %v8546_v31 = vld [vmem:[#allocation8 + $0x15c] sm:$0xf]  ;;  %4468 = vmatpush.bf16.msrb.mxu2 %v7778_v5  ;;  %v8569_v5 = vld [vmem:[#allocation8 + $0x214] sm:$0xf] }
 0x649   :  { %4327 = vmatpush.bf16.msra.mxu1 %v7894_v52  ;;  %v7746_v33 = vor.u32 %v8546_v31, %v7743_v35  ;;  %4385 = vmatpush.bf16.msra.mxu3 %v7898_v49  ;;  %v7834_v12 = vor.u32 %v8569_v5, %v7831_v62  ;;  %v8510_v52 = vld [vmem:[#allocation8 + $0x34] sm:$0xf0]  ;;  %v7583_v31 = vld [vmem:[#allocation8 + $0x38] sm:$0xf0]  ;;  %v10791_v35 = vpop.f32.mrf.mxu0  ;;  %v8653_v5 = vld [vmem:[#allocation9 + $0xac] sm:$0xf0] }
 0x64a   :  { %12730 = vst [vmem:[#allocation62_spill] sm:$0xff] %v10791_v35  ;;  %v7582_v27 = vor.u32 %v8510_v52, %v7581_v47  ;;  %v7586_v28 = vor.u32 %v8506_v3, %v7583_v31  ;;  %v10834_v3 = vperm.slane %v10814_v21, 2  ;;  %v10837_v31 = vperm.slane %v10814_v21, 1  ;;  %v8093_v35 = vld [vmem:[#allocation9 + $0x28] sm:$0xf] }
 0x64c   :  { %4409 = vmatpush.bf16.msrb.mxu0 %v7806_v37  ;;  %4469 = vmatpush.bf16.msrb.mxu2 %v7746_v33  ;;  %v7830_v37 = vor.u32 %v8573_v36, %v7829_v0  ;;  %v8630_v33 = vld [vmem:[#allocation8 + $0x3f4] sm:$0xf0]  ;;  %v8610_v0 = vld [vmem:[#allocation8 + $0x35c] sm:$0xf]  ;;  %12736 = vst [vmem:[#allocation61_spill] sm:$0xff] %v10834_v3  ;;  %v4129_v24 = vadd.f32 %v10763_v30, %v10837_v31 }
 0x64d   :  { %4328 = vmatpush.bf16.msra.mxu1 %v7862_v51  ;;  %4386 = vmatpush.bf16.msra.mxu3 %v7866_v15  ;;  %v10795_v50 = vpop.f32.mrf.mxu2  ;;  %v7999_v36 = vld [vmem:[#allocation8 + $0x378] sm:$0xf0]  ;;  %12737 = vst [vmem:[#allocation63_spill] sm:$0xff] %v10837_v31  ;;  %v8658_v30 = vld [vmem:[#allocation9 + $0xd4] sm:$0xf0] }
 0x64e   :  { %4108 = vmatmul.bf16.gmra.mxu1 %v10749_v32  ;;  %4166 = vmatmul.bf16.gmra.mxu3 %v10749_v32  ;;  %12731 = vst [vmem:[#allocation105_spill] sm:$0xff] %v10795_v50  ;;  %v8574_v50 = vld [vmem:[#allocation8 + $0x234] sm:$0xf0] }
 0x650   :  { %4410 = vmatpush.bf16.msrb.mxu0 %v7774_v4  ;;  %4470 = vmatpush.bf16.msrb.mxu2 %v7714_v7  ;;  %v7618_v4 = vor.u32 %v8514_v53, %v7615_v58  ;;  %v8066_v7 = vor.u32 %v8626_v26, %v8063_v14  ;;  %v10820_v53 = vperm.slane %v10814_v21, 0  ;;  %v8649_v26 = vld [vmem:[#allocation9 + $0x8c] sm:$0xf0]  ;;  %v7933_v14 = vld [vmem:[#allocation8 + $0x2d8] sm:$0xf] }
 0x651   :  { %4329 = vmatpush.bf16.msra.mxu1 %v7830_v37  ;;  %4387 = vmatpush.bf16.msra.mxu3 %v7834_v12  ;;  %v7965_v37 = vld [vmem:[#allocation8 + $0x318] sm:$0xf] }
 0x652   :  { %12733 = vst [vmem:[#allocation60_spill] sm:$0xff] %v10820_v53  ;;  %v4071_v62 = vadd.f32 %v10755_v17, %v10820_v53 }
 0x654   :  { %4411 = vmatpush.bf16.msrb.mxu0 %v7742_v6  ;;  %4471 = vmatpush.bf16.msrb.mxu2 %v7682_v10  ;;  %v8061_v6 = vld [vmem:[#allocation8 + $0x3d8] sm:$0xf] }
 0x655   :  { %v8062_v49 = vor.u32 %v8630_v33, %v8061_v6  ;;  %v8614_v10 = vld [vmem:[#allocation8 + $0x374] sm:$0xf0]  ;;  %v7967_v6 = vld [vmem:[#allocation8 + $0x338] sm:$0xf0] }
 0x657   :  { %4200 = vmatmul.bf16.gmra.mxu0 %v10714_v20  ;;  %4258 = vmatmul.bf16.gmra.mxu2 %v10714_v20 }
 0x658   :  { %4412 = vmatpush.bf16.msrb.mxu0 %v7710_v1  ;;  %4472 = vmatpush.bf16.msrb.mxu2 %v7650_v39  ;;  %v8029_v1 = vld [vmem:[#allocation8 + $0x398] sm:$0xf] }
 0x659   :  { %v8030_v13 = vor.u32 %v8622_v18, %v8029_v1  ;;  %v8606_v39 = vld [vmem:[#allocation8 + $0x334] sm:$0xf0]  ;;  %v8189_v18 = vld [vmem:[#allocation9 + $0xe8] sm:$0xf] }
 0x65a   :  { %v7966_v58 = vor.u32 %v8606_v39, %v7965_v37  ;;  %v8598_v1 = vld [vmem:[#allocation8 + $0x2f4] sm:$0xf0]  ;;  %v8173_v37 = vld [vmem:[#allocation9 + $0xc8] sm:$0xf] }
 0x65c   :  { %4413 = vmatpush.bf16.msrb.mxu0 %v7678_v40  ;;  %4473 = vmatpush.bf16.msrb.mxu2 %v7618_v4  ;;  %v7997_v40 = vld [vmem:[#allocation8 + $0x358] sm:$0xf]  ;;  %v8149_v4 = vld [vmem:[#allocation9 + $0xa0] sm:$0xf] }
 0x65d   :  { %v7998_v44 = vor.u32 %v8614_v10, %v7997_v40  ;;  %v10831_v12 = vor.u32 %v8653_v5, %v8149_v4  ;;  %v10854_v10 = vperm.slane %v10814_v21, 3  ;;  %v7935_v4 = vld [vmem:[#allocation8 + $0x2f8] sm:$0xf0]  ;;  %v7901_v5 = vld [vmem:[#allocation8 + $0x298] sm:$0xf] }
 0x65e   :  { %4113 = vmatmul.bf16.gmra.mxu1 %v10759_v57  ;;  %4171 = vmatmul.bf16.gmra.mxu3 %v10759_v57 }
 0x65f   :  { %12735 = vst [vmem:[#allocation108_spill] sm:$0xff] %v10831_v12 }
 0x660   :  { %4414 = vmatpush.bf16.msrb.mxu0 %v7646_v38  ;;  %4474 = vmatpush.bf16.msrb.mxu2 %v7586_v28  ;;  %v8002_v38 = vor.u32 %v8610_v0, %v7999_v36  ;;  %v8602_v28 = vld [vmem:[#allocation8 + $0x31c] sm:$0xf]  ;;  %12740 = vst [vmem:[#allocation102_spill] sm:$0xff] %v10854_v10 }
 0x661   :  { %v7970_v17 = vor.u32 %v8602_v28, %v7967_v6  ;;  %v8101_v28 = vld [vmem:[#allocation9 + $0x40] sm:$0xf]  ;;  %v8641_v6 = vld [vmem:[#allocation9 + $0x4c] sm:$0xf0] }
 0x664   :  { %4415 = vmatpush.bf16.msrb.mxu0 %v7614_v19  ;;  %v10822_v19 = vor.u32 %v8657_v45, %v8165_v46  ;;  %v10867_v46 = vor.u32 %v8658_v30, %v8173_v37 }
 0x666   :  { %12734 = vst [vmem:[#allocation109_spill] sm:$0xff] %v10822_v19 }
 0x667   :  { %4301 = vmatmul.bf16.vlgmr.msra.gmra.mxu0 %v10589_v61  ;;  %4359 = vmatmul.bf16.vlgmr.msra.gmra.mxu2 %v10589_v61 }
 0x668   :  { %4416 = vmatpush.bf16.msrb.mxu0 %v7582_v27 }
 0x66c   :  { %4818 = vmatpush.bf16.msra.mxu0 %v10809_v23 }
 0x66e   :  { %4214 = vmatmul.bf16.vlgmr.msrb.gmra.mxu1 %v10733_v60  ;;  %4272 = vmatmul.bf16.vlgmr.msrb.gmra.mxu3 %v10733_v60 }
 0x66f   :  { %4438 = vmatpush.bf16.msrb.mxu1 %v8062_v49  ;;  %4496 = vmatpush.bf16.msrb.mxu3 %v8066_v7  ;;  %v8133_v49 = vld [vmem:[#allocation9 + $0x80] sm:$0xf] }
 0x670   :  { %4819 = vmatpush.bf16.msra.mxu0 %v10822_v19  ;;  %v10847_v7 = vor.u32 %v8649_v26, %v8133_v49  ;;  %v10874_v49 = vor.u32 %v8641_v6, %v8101_v28  ;;  %v8157_v26 = vld [vmem:[#allocation9 + $0xa8] sm:$0xf]  ;;  %v8633_v28 = vld [vmem:[#allocation9 + $0xc] sm:$0xf0]  ;;  %v7869_v6 = vld [vmem:[#allocation8 + $0x258] sm:$0xf] }
 0x672   :  { %12739 = vst [vmem:[#allocation64_spill] sm:$0xff] %v10847_v7 }
 0x673   :  { %4439 = vmatpush.bf16.msrb.mxu1 %v8030_v13  ;;  %4497 = vmatpush.bf16.msrb.mxu3 %v8034_v16  ;;  %v7934_v13 = vor.u32 %v8598_v1, %v7933_v14  ;;  %v10851_v16 = vor.u32 %v8662_v2, %v8189_v18  ;;  %12744 = vst [vmem:[#allocation66_spill] sm:$0xff] %v10874_v49  ;;  %v8654_v14 = vld [vmem:[#allocation9 + $0xb4] sm:$0xf0]  ;;  %v8637_v2 = vld [vmem:[#allocation9 + $0x2c] sm:$0xf0] }
 0x674   :  { %4820 = vmatpush.bf16.msra.mxu0 %v10831_v12  ;;  %v10878_v1 = vor.u32 %v8654_v14, %v8157_v26  ;;  %v8125_v14 = vld [vmem:[#allocation9 + $0x68] sm:$0xf] }
 0x675   :  { %4844 = vmatpush.bf16.msra.mxu2 %v10851_v16 }
 0x677   :  { %4306 = vmatmul.bf16.gmra.mxu0 %v10595_v48  ;;  %4364 = vmatmul.bf16.gmra.mxu2 %v10595_v48 }
 0x678   :  { %4440 = vmatpush.bf16.msrb.mxu1 %v7998_v44  ;;  %4498 = vmatpush.bf16.msrb.mxu3 %v8002_v38  ;;  %v8117_v44 = vld [vmem:[#allocation9 + $0x60] sm:$0xf] }
 0x679   :  { %4821 = vmatpush.bf16.msra.mxu0 %v10847_v7  ;;  %v10860_v36 = vor.u32 %v8645_v54, %v8117_v44  ;;  %4845 = vmatpush.bf16.msra.mxu2 %v10867_v46  ;;  %v8141_v54 = vld [vmem:[#allocation9 + $0x88] sm:$0xf] }
 0x67b   :  { %12742 = vst [vmem:[#allocation106_spill] sm:$0xff] %v10860_v36 }
 0x67c   :  { %4441 = vmatpush.bf16.msrb.mxu1 %v7966_v58  ;;  %4499 = vmatpush.bf16.msrb.mxu3 %v7970_v17  ;;  %v8594_v58 = vld [vmem:[#allocation8 + $0x2dc] sm:$0xf] }
 0x67d   :  { %4822 = vmatpush.bf16.msra.mxu0 %v10860_v36  ;;  %4846 = vmatpush.bf16.msra.mxu2 %v10878_v1 }
 0x67e   :  { %4219 = vmatmul.bf16.gmra.mxu1 %v10741_v42  ;;  %4277 = vmatmul.bf16.gmra.mxu3 %v10741_v42 }
 0x680   :  { %4442 = vmatpush.bf16.msrb.mxu1 %v7934_v13  ;;  %v8085_v13 = vld [vmem:[#allocation9 + $0x20] sm:$0xf] }
 0x681   :  { %4823 = vmatpush.bf16.msra.mxu0 %v10874_v49  ;;  %v10886_v44 = vor.u32 %v8637_v2, %v8085_v13  ;;  %v8646_v2 = vld [vmem:[#allocation9 + $0x74] sm:$0xf0] }
 0x683   :  { %12746 = vst [vmem:[#allocation70_spill] sm:$0xff] %v10886_v44 }
 0x685   :  { %4824 = vmatpush.bf16.msra.mxu0 %v10886_v44 }
 0x687   :  { %4311 = vmatmul.bf16.gmra.mxu0 %v10601_v41  ;;  %4369 = vmatmul.bf16.gmra.mxu2 %v10601_v41 }
 0x68e   :  { %4224 = vmatmul.bf16.gmra.mxu1 %v10749_v32  ;;  %4282 = vmatmul.bf16.gmra.mxu3 %v10749_v32 }
 0x694   :  { %v10797_v55 = vpop.f32.mrf.mxu0 }
 0x697   :  { %4316 = vmatmul.bf16.gmra.mxu0 %v10714_v20  ;;  %4374 = vmatmul.bf16.gmra.mxu2 %v10714_v20 }
 0x69a   :  { %v10801_v11 = vpop.f32.mrf.mxu2 }
 0x69c   :  { %v10803_v51 = vpop.f32.mrf.mxu0 }
 0x69e   :  { %4229 = vmatmul.bf16.gmra.mxu1 %v10759_v57  ;;  %4287 = vmatmul.bf16.gmra.mxu3 %v10759_v57 }
 0x6a2   :  { %v10807_v15 = vpop.f32.mrf.mxu2 }
 0x6a4   :  { %v10816_v29 = vpop.f32.mrf.mxu0 }
 0x6a7   :  { %4417 = vmatmul.bf16.vlgmr.msrb.gmra.mxu0 %v10589_v61  ;;  %4475 = vmatmul.bf16.vlgmr.msrb.gmra.mxu2 %v10589_v61 }
 0x6aa   :  { %v10829_v47 = vpop.f32.mrf.mxu2 }
 0x6ab   :  { %v4099_v52 = vpop.f32.mrf.mxu1 }
 0x6ac   :  { %v10839_v61 = vadd.f32 %v4099_v52, %v4071_v62  ;;  %v4188_v27 = vpop.f32.mrf.mxu0  ;;  %v7938_v52 = vor.u32 %v8594_v58, %v7935_v4  ;;  %v8586_v4 = vld [vmem:[#allocation8 + $0x29c] sm:$0xf] }
 0x6ad   :  { %v10842_v33 = vadd.f32 %v4188_v27, %v10834_v3  ;;  %v8590_v27 = vld [vmem:[#allocation8 + $0x2b4] sm:$0xf0] }
 0x6ae   :  { %12738 = vst [vmem:[#allocation65_spill] sm:$0xff] %v10839_v61  ;;  %4330 = vmatmul.bf16.vlgmr.msra.gmra.mxu1 %v10733_v60  ;;  %4388 = vmatmul.bf16.vlgmr.msra.gmra.mxu3 %v10733_v60  ;;  %v7902_v17 = vor.u32 %v8590_v27, %v7901_v5  ;;  %v7903_v5 = vld [vmem:[#allocation8 + $0x2b8] sm:$0xf0]  ;;  %v8069_v27 = vld [vmem:[#allocation9] sm:$0xf] }
 0x6af   :  { %4500 = vmatpush.bf16.msrb.mxu3 %v7938_v52  ;;  %v7906_v52 = vor.u32 %v8586_v4, %v7903_v5  ;;  %v10901_v26 = vor.u32 %v8633_v28, %v8069_v27  ;;  %v8642_v27 = vld [vmem:[#allocation9 + $0x54] sm:$0xf0]  ;;  %v8293_v28 = vld [vmem:[#allocation9 + $0x1c0] sm:$0xf] }
 0x6b0   :  { %4443 = vmatpush.bf16.msrb.mxu1 %v7902_v17  ;;  %v8582_v17 = vld [vmem:[#allocation8 + $0x274] sm:$0xf0] }
 0x6b1   :  { %v4157_v40 = vpop.f32.mrf.mxu3  ;;  %12748 = vst [vmem:[#allocation97_spill] sm:$0xff] %v10901_v26  ;;  %v7870_v13 = vor.u32 %v8582_v17, %v7869_v6  ;;  %4825 = vmatpush.bf16.msra.mxu0 %v10901_v26 }
 0x6b2   :  { %v10857_v63 = vadd.f32 %v4157_v40, %v4129_v24  ;;  %v4246_v0 = vpop.f32.mrf.mxu2  ;;  %v4076_v24 = vadd.f32 %v10771_v43, %v10820_v53 }
 0x6b3   :  { %v10862_v38 = vpop.f32.mrf.mxu1  ;;  %v10865_v39 = vadd.f32 %v4246_v0, %v10854_v10  ;;  %4501 = vmatpush.bf16.msrb.mxu3 %v7906_v52  ;;  %v8109_v52 = vld [vmem:[#allocation9 + $0x48] sm:$0xf] }
 0x6b4   :  { %12741 = vst [vmem:[#allocation103_spill] sm:$0xff] %v10857_v63  ;;  %v4191_v45 = vpop.f32.mrf.mxu0  ;;  %4444 = vmatpush.bf16.msrb.mxu1 %v7870_v13  ;;  %v10919_v13 = vor.u32 %v8642_v27, %v8109_v52  ;;  %v10932_v27 = vor.u32 %v8638_v25, %v8093_v35  ;;  %v8261_v25 = vld [vmem:[#allocation9 + $0x180] sm:$0xf]  ;;  %v8681_v35 = vld [vmem:[#allocation9 + $0x18c] sm:$0xf0] }
 0x6b5   :  { %12743 = vst [vmem:[#allocation104_spill] sm:$0xff] %v10862_v38  ;;  %v10870_v62 = vadd.f32 %v4191_v45, %v10834_v3  ;;  %v8151_v63 = vld [vmem:[#allocation9 + $0xb0] sm:$0xf0] }
 0x6b7   :  { %4422 = vmatmul.bf16.gmra.mxu0 %v10595_v48  ;;  %4480 = vmatmul.bf16.gmra.mxu2 %v10595_v48  ;;  %v8650_v48 = vld [vmem:[#allocation9 + $0x94] sm:$0xf0] }
 0x6b8   :  { %v10891_v30 = vor.u32 %v8650_v48, %v8141_v54  ;;  %v4134_v54 = vadd.f32 %v10775_v59, %v10837_v31  ;;  %v10906_v48 = vor.u32 %v8646_v2, %v8125_v14  ;;  %v8689_v59 = vld [vmem:[#allocation9 + $0x1cc] sm:$0xf0]  ;;  %v8578_v14 = vld [vmem:[#allocation8 + $0x25c] sm:$0xf] }
 0x6b9   :  { %v10880_v18 = vpop.f32.mrf.mxu3  ;;  %v7871_v2 = vld [vmem:[#allocation8 + $0x278] sm:$0xf0] }
 0x6ba   :  { %12745 = vst [vmem:[#allocation67_spill] sm:$0xff] %v10880_v18  ;;  %v4249_v40 = vpop.f32.mrf.mxu2  ;;  %4847 = vmatpush.bf16.msra.mxu2 %v10891_v30 }
 0x6bb   :  { %v4104_v0 = vpop.f32.mrf.mxu1  ;;  %v10889_v37 = vadd.f32 %v4249_v40, %v10854_v10  ;;  %v8693_v40 = vld [vmem:[#allocation9 + $0x1ec] sm:$0xf0] }
 0x6bc   :  { %v10893_v45 = vadd.f32 %v4104_v0, %v4076_v24  ;;  %v4193_v58 = vpop.f32.mrf.mxu0  ;;  %v8309_v24 = vld [vmem:[#allocation9 + $0x1e0] sm:$0xf] }
 0x6bd   :  { %v10896_v43 = vadd.f32 %v4193_v58, %v10834_v3  ;;  %v10908_v0 = vor.u32 %v8693_v40, %v8309_v24  ;;  %v10921_v24 = vor.u32 %v8689_v59, %v8293_v28  ;;  %v7837_v40 = vld [vmem:[#allocation8 + $0x218] sm:$0xf]  ;;  %v4081_v59 = vadd.f32 %v10785_v34, %v10820_v53 }
 0x6be   :  { %12747 = vst [vmem:[#allocation68_spill] sm:$0xff] %v10893_v45  ;;  %4335 = vmatmul.bf16.gmra.mxu1 %v10741_v42  ;;  %4393 = vmatmul.bf16.gmra.mxu3 %v10741_v42 }
 0x6bf   :  { %12749 = vst [vmem:[#allocation99_spill] sm:$0xff] %v10908_v0  ;;  %5038 = vmatpush.bf16.msrb.mxu0 %v10908_v0  ;;  %4848 = vmatpush.bf16.msra.mxu2 %v10906_v48 }
 0x6c0   :  { %12752 = vst [vmem:[#allocation18_spill] sm:$0xff] %v10921_v24 }
 0x6c1   :  { %v4162_v58 = vpop.f32.mrf.mxu3 }
 0x6c2   :  { %v10911_v4 = vadd.f32 %v4162_v58, %v4134_v54  ;;  %v10913_v5 = vpop.f32.mrf.mxu2  ;;  %v7874_v58 = vor.u32 %v8578_v14, %v7871_v2  ;;  %v7839_v14 = vld [vmem:[#allocation8 + $0x238] sm:$0xf0]  ;;  %v8077_v2 = vld [vmem:[#allocation9 + $0x8] sm:$0xf] }
 0x6c3   :  { %v10916_v6 = vpop.f32.mrf.mxu1  ;;  %5039 = vmatpush.bf16.msrb.mxu0 %v10921_v24  ;;  %4849 = vmatpush.bf16.msra.mxu2 %v10919_v13 }
 0x6c4   :  { %12750 = vst [vmem:[#allocation101_spill] sm:$0xff] %v10911_v4  ;;  %v4196_v17 = vpop.f32.mrf.mxu0  ;;  %v8685_v4 = vld [vmem:[#allocation9 + $0x1ac] sm:$0xf0]  ;;  %4502 = vmatpush.bf16.msrb.mxu3 %v7874_v58 }
 0x6c5   :  { %12751 = vst [vmem:[#allocation100_spill] sm:$0xff] %v10916_v6  ;;  %v10924_v54 = vadd.f32 %v4196_v17, %v10834_v3  ;;  %v7838_v6 = vor.u32 %v8574_v50, %v7837_v40  ;;  %v10929_v52 = vor.u32 %v8685_v4, %v8277_v56  ;;  %v8570_v17 = vld [vmem:[#allocation8 + $0x21c] sm:$0xf]  ;;  %v8634_v40 = vld [vmem:[#allocation9 + $0x14] sm:$0xf0] }
 0x6c6   :  { %v7842_v4 = vor.u32 %v8570_v17, %v7839_v14  ;;  %v10947_v34 = vor.u32 %v8634_v40, %v8077_v2  ;;  %v8183_v17 = vld [vmem:[#allocation9 + $0xf0] sm:$0xf0]  ;;  %v8245_v14 = vld [vmem:[#allocation9 + $0x160] sm:$0xf] }
 0x6c7   :  { %4427 = vmatmul.bf16.gmra.mxu0 %v10601_v41  ;;  %4485 = vmatmul.bf16.gmra.mxu2 %v10601_v41  ;;  %12753 = vst [vmem:[#allocation20_spill] sm:$0xff] %v10929_v52 }
 0x6c8   :  { %4445 = vmatpush.bf16.msrb.mxu1 %v7838_v6  ;;  %5040 = vmatpush.bf16.msrb.mxu0 %v10929_v52 }
 0x6c9   :  { %v10934_v28 = vpop.f32.mrf.mxu3  ;;  %4850 = vmatpush.bf16.msra.mxu2 %v10932_v27  ;;  %4503 = vmatpush.bf16.msrb.mxu3 %v7842_v4 }
 0x6ca   :  { %12754 = vst [vmem:[#allocation69_spill] sm:$0xff] %v10934_v28  ;;  %v4254_v50 = vpop.f32.mrf.mxu2  ;;  %v10949_v28 = vor.u32 %v8681_v35, %v8261_v25  ;;  %v8229_v35 = vld [vmem:[#allocation9 + $0x140] sm:$0xf] }
 0x6cb   :  { %v4109_v41 = vpop.f32.mrf.mxu1  ;;  %v10940_v56 = vadd.f32 %v4254_v50, %v10854_v10  ;;  %v8659_v50 = vld [vmem:[#allocation9 + $0xe4] sm:$0xf] }
 0x6cc   :  { %v10942_v58 = vadd.f32 %v4109_v41, %v4081_v59  ;;  %v10944_v6 = vpop.f32.mrf.mxu0  ;;  %12757 = vst [vmem:[#allocation72_spill] sm:$0xff] %v10949_v28  ;;  %5041 = vmatpush.bf16.msrb.mxu0 %v10949_v28  ;;  %v10954_v59 = vor.u32 %v8659_v50, %v8183_v17  ;;  %v8677_v41 = vld [vmem:[#allocation9 + $0x16c] sm:$0xf0]  ;;  %v8660_v17 = vld [vmem:[#allocation9 + $0xec] sm:$0xf] }
 0x6cd   :  { %12756 = vst [vmem:[#allocation73_spill] sm:$0xff] %v10944_v6  ;;  %v4139_v6 = vadd.f32 %v10789_v22, %v10837_v31  ;;  %4851 = vmatpush.bf16.msra.mxu2 %v10947_v34  ;;  %v10959_v2 = vor.u32 %v8677_v41, %v8245_v14  ;;  %v8191_v22 = vld [vmem:[#allocation9 + $0xf8] sm:$0xf0]  ;;  %v8655_v14 = vld [vmem:[#allocation9 + $0xc4] sm:$0xf] }
 0x6ce   :  { %12755 = vst [vmem:[#allocation71_spill] sm:$0xff] %v10942_v58  ;;  %4340 = vmatmul.bf16.gmra.mxu1 %v10749_v32  ;;  %4398 = vmatmul.bf16.gmra.mxu3 %v10749_v32  ;;  %v8673_v58 = vld [vmem:[#allocation9 + $0x14c] sm:$0xf0]  ;;  %v10974_v38 = vor.u32 %v8660_v17, %v8191_v22  ;;  %v8197_v22 = vld [vmem:[#allocation9 + $0x100] sm:$0xf] }
 0x6cf   :  { %12758 = vst [vmem:[#allocation94_spill] sm:$0xff] %v10954_v59  ;;  %4831 = vmatpush.bf16.msra.mxu1 %v10954_v59  ;;  %v10969_v18 = vor.u32 %v8673_v58, %v8229_v35 }
 0x6d0   :  { %12759 = vst [vmem:[#allocation95_spill] sm:$0xff] %v10959_v2  ;;  %5042 = vmatpush.bf16.msrb.mxu0 %v10959_v2  ;;  %4857 = vmatpush.bf16.msra.mxu3 %v10974_v38 }
 0x6d1   :  { %v4167_v4 = vpop.f32.mrf.mxu3  ;;  %12763 = vst [vmem:[#allocation19_spill] sm:$0xff] %v10969_v18 }
 0x6d2   :  { %v10962_v40 = vadd.f32 %v4167_v4, %v4139_v6  ;;  %v10964_v25 = vpop.f32.mrf.mxu2  ;;  %12764 = vst [vmem:[#allocation21_spill] sm:$0xff] %v10974_v38  ;;  %v8167_v6 = vld [vmem:[#allocation9 + $0xd0] sm:$0xf0]  ;;  %v8213_v4 = vld [vmem:[#allocation9 + $0x120] sm:$0xf] }
 0x6d3   :  { %12761 = vst [vmem:[#allocation96_spill] sm:$0xff] %v10964_v25  ;;  %v10966_v45 = vpop.f32.mrf.mxu1  ;;  %v8669_v25 = vld [vmem:[#allocation9 + $0x12c] sm:$0xf0]  ;;  %v8647_v38 = vld [vmem:[#allocation9 + $0x84] sm:$0xf] }
 0x6d4   :  { %12760 = vst [vmem:[#allocation98_spill] sm:$0xff] %v10962_v40  ;;  %v4201_v50 = vpop.f32.mrf.mxu0  ;;  %v10976_v40 = vor.u32 %v8655_v14, %v8167_v6  ;;  %5043 = vmatpush.bf16.msrb.mxu0 %v10969_v18  ;;  %v10982_v58 = vor.u32 %v8669_v25, %v8213_v4  ;;  %v8665_v14 = vld [vmem:[#allocation9 + $0x10c] sm:$0xf0]  ;;  %v8656_v25 = vld [vmem:[#allocation9 + $0xcc] sm:$0xf] }
 0x6d5   :  { %12762 = vst [vmem:[#allocation17_spill] sm:$0xff] %v10966_v45  ;;  %v10972_v41 = vadd.f32 %v4201_v50, %v10834_v3  ;;  %v4086_v50 = vadd.f32 %v10797_v55, %v10820_v53  ;;  %v8175_v4 = vld [vmem:[#allocation9 + $0xd8] sm:$0xf0]  ;;  %v8651_v55 = vld [vmem:[#allocation9 + $0xa4] sm:$0xf] }
 0x6d6   :  { %12765 = vst [vmem:[#allocation22_spill] sm:$0xff] %v10976_v40  ;;  %4832 = vmatpush.bf16.msra.mxu1 %v10976_v40  ;;  %v10999_v8 = vor.u32 %v8656_v25, %v8175_v4  ;;  %v8159_v40 = vld [vmem:[#allocation9 + $0xb8] sm:$0xf0] }
 0x6d7   :  { %4432 = vmatmul.bf16.gmra.mxu0 %v10714_v20  ;;  %4490 = vmatmul.bf16.gmra.mxu2 %v10714_v20  ;;  %12766 = vst [vmem:[#allocation24_spill] sm:$0xff] %v10982_v58 }
 0x6d8   :  { %5044 = vmatpush.bf16.msrb.mxu0 %v10982_v58  ;;  %12771 = vst [vmem:[#allocation27_spill] sm:$0xff] %v10999_v8  ;;  %4858 = vmatpush.bf16.msra.mxu3 %v10999_v8  ;;  %v8652_v8 = vld [vmem:[#allocation9 + $0xac] sm:$0xf] }
 0x6d9   :  { %v10984_v35 = vpop.f32.mrf.mxu3  ;;  %v11026_v59 = vor.u32 %v8652_v8, %v8159_v40  ;;  %v4146_v8 = vadd.f32 %v10807_v15, %v10837_v31 }
 0x6da   :  { %12767 = vst [vmem:[#allocation23_spill] sm:$0xff] %v10984_v35  ;;  %v4259_v17 = vpop.f32.mrf.mxu2  ;;  %v10997_v35 = vor.u32 %v8665_v14, %v8197_v22  ;;  %v11010_v22 = vperm.slane %v10814_v21, 4  ;;  %v4088_v14 = vadd.f32 %v10803_v51, %v10820_v53  ;;  %v8135_v51 = vld [vmem:[#allocation9 + $0x90] sm:$0xf0]  ;;  %v8648_v53 = vld [vmem:[#allocation9 + $0x8c] sm:$0xf] }
 0x6db   :  { %v4114_v6 = vpop.f32.mrf.mxu1  ;;  %v10990_v45 = vadd.f32 %v4259_v17, %v10854_v10  ;;  %v4144_v17 = vadd.f32 %v10801_v11, %v10837_v31 }
 0x6dc   :  { %v10992_v20 = vadd.f32 %v4114_v6, %v4086_v50  ;;  %v10994_v9 = vpop.f32.mrf.mxu0  ;;  %12770 = vst [vmem:[#allocation28_spill] sm:$0xff] %v10997_v35  ;;  %v11004_v50 = vor.u32 %v8651_v55, %v8151_v63  ;;  %5045 = vmatpush.bf16.msrb.mxu0 %v10997_v35  ;;  %v8317_v63 = vld [vmem:[#allocation9 + $0x1e8] sm:$0xf]  ;;  %v8694_v55 = vld [vmem:[#allocation9 + $0x1f4] sm:$0xf0]  ;;  %4859 = vmatpush.bf16.msra.mxu3 %v11026_v59 }
 0x6dd   :  { %12769 = vst [vmem:[#allocation26_spill] sm:$0xff] %v10994_v9 }
 0x6de   :  { %12768 = vst [vmem:[#allocation25_spill] sm:$0xff] %v10992_v20  ;;  %4345 = vmatmul.bf16.gmra.mxu1 %v10759_v57  ;;  %4403 = vmatmul.bf16.gmra.mxu3 %v10759_v57  ;;  %v11019_v20 = vor.u32 %v8694_v55, %v8317_v63 }
 0x6df   :  { %12772 = vst [vmem:[#allocation29_spill] sm:$0xff] %v11004_v50  ;;  %4833 = vmatpush.bf16.msra.mxu1 %v11004_v50 }
 0x6e0   :  { %12773 = vst [vmem:[#allocation30_spill] sm:$0xff] %v11010_v22  ;;  %5064 = vmatpush.bf16.msrb.mxu2 %v11019_v20 }
 0x6e1   :  { %v4172_v6 = vpop.f32.mrf.mxu3  ;;  %12776 = vst [vmem:[#allocation33_spill] sm:$0xff] %v11019_v20 }
 0x6e2   :  { %v11015_v25 = vadd.f32 %v4172_v6, %v4144_v17  ;;  %v11017_v4 = vpop.f32.mrf.mxu2  ;;  %v8301_v17 = vld [vmem:[#allocation9 + $0x1c8] sm:$0xf]  ;;  %v8690_v6 = vld [vmem:[#allocation9 + $0x1d4] sm:$0xf0] }
 0x6e3   :  { %12775 = vst [vmem:[#allocation31_spill] sm:$0xff] %v11017_v4  ;;  %v4116_v9 = vpop.f32.mrf.mxu1  ;;  %v11029_v4 = vor.u32 %v8647_v38, %v8135_v51  ;;  %v11031_v63 = vor.u32 %v8690_v6, %v8301_v17  ;;  %v4187_v38 = vadd.f32 %v10816_v29, %v10834_v3  ;;  %v8285_v51 = vld [vmem:[#allocation9 + $0x1a8] sm:$0xf]  ;;  %v8686_v17 = vld [vmem:[#allocation9 + $0x1b4] sm:$0xf0] }
 0x6e4   :  { %12774 = vst [vmem:[#allocation32_spill] sm:$0xff] %v11015_v25  ;;  %v11021_v11 = vadd.f32 %v4116_v9, %v4088_v14  ;;  %v4302_v61 = vpop.f32.mrf.mxu0  ;;  %v12780_v9 = vmov 0   ;;  %v11036_v14 = vperm.slane %v10814_v21, 5  ;;  %v8643_v29 = vld [vmem:[#allocation9 + $0x64] sm:$0xf] }
 0x6e5   :  { %v11024_v50 = vadd.f32 %v4302_v61, %v11010_v22  ;;  %12778 = vst [vmem:[#allocation36_spill] sm:$0xff] %v11029_v4  ;;  %4834 = vmatpush.bf16.msra.mxu1 %v11029_v4  ;;  %5065 = vmatpush.bf16.msrb.mxu2 %v11031_v63 }
 0x6e6   :  { %12777 = vst [vmem:[#allocation34_spill] sm:$0xff] %v11021_v11  ;;  %v11051_v11 = vor.u32 %v8686_v17, %v8285_v51  ;;  %v8644_v17 = vld [vmem:[#allocation9 + $0x6c] sm:$0xf] }
 0x6e7   :  { %12779 = vst [vmem:[#allocation35_spill] sm:$0xff] %v11031_v63  ;;  %4826 = vmatmul.bf16.vlgmr.msra.gmra.mxu0 %v12780_v9  ;;  %4852 = vmatmul.bf16.vlgmr.msra.gmra.mxu2 %v12780_v9 }
 0x6e8   :  { %12781 = vst [vmem:[#allocation37_spill] sm:$0xff] %v11036_v14  ;;  %5225 = vmatpush.bf16.msra.mxu0 %v10809_v23  ;;  %v8143_v23 = vld [vmem:[#allocation9 + $0x98] sm:$0xf0] }
 0x6e9   :  { %v4174_v61 = vpop.f32.mrf.mxu3  ;;  %12783 = vst [vmem:[#allocation40_spill] sm:$0xff] %v11051_v11  ;;  %v11057_v4 = vor.u32 %v8648_v53, %v8143_v23  ;;  %5066 = vmatpush.bf16.msrb.mxu2 %v11051_v11  ;;  %v4245_v23 = vadd.f32 %v10829_v47, %v10854_v10 }
 0x6ea   :  { %v11046_v40 = vadd.f32 %v4174_v61, %v4146_v8  ;;  %v4360_v55 = vpop.f32.mrf.mxu2  ;;  %v8119_v8 = vld [vmem:[#allocation9 + $0x70] sm:$0xf0]  ;;  %v8269_v61 = vld [vmem:[#allocation9 + $0x188] sm:$0xf] }
 0x6eb   :  { %v4215_v6 = vpop.f32.mrf.mxu1  ;;  %v11049_v15 = vadd.f32 %v4360_v55, %v11036_v14  ;;  %4860 = vmatpush.bf16.msra.mxu3 %v11057_v4  ;;  %v8682_v55 = vld [vmem:[#allocation9 + $0x194] sm:$0xf0] }
 0x6ec   :  { %12782 = vst [vmem:[#allocation38_spill] sm:$0xff] %v11046_v40  ;;  %v11053_v25 = vadd.f32 %v4215_v6, %v4187_v38  ;;  %v11055_v31 = vpop.f32.mrf.mxu0  ;;  %5226 = vmatpush.bf16.msra.mxu0 %v10822_v19  ;;  %v11064_v38 = vor.u32 %v8643_v29, %v8119_v8  ;;  %v11068_v53 = vor.u32 %v8682_v55, %v8269_v61  ;;  %v8127_v6 = vld [vmem:[#allocation9 + $0x78] sm:$0xf0]  ;;  %v8253_v8 = vld [vmem:[#allocation9 + $0x168] sm:$0xf] }
 0x6ed   :  { %12785 = vst [vmem:[#allocation41_spill] sm:$0xff] %v11055_v31  ;;  %v11077_v29 = vor.u32 %v8644_v17, %v8127_v6  ;;  %v8678_v31 = vld [vmem:[#allocation9 + $0x174] sm:$0xf0]  ;;  %v8111_v17 = vld [vmem:[#allocation9 + $0x58] sm:$0xf0] }
 0x6ee   :  { %12784 = vst [vmem:[#allocation39_spill] sm:$0xff] %v11053_v25  ;;  %4446 = vmatmul.bf16.vlgmr.msrb.gmra.mxu1 %v10733_v60  ;;  %4504 = vmatmul.bf16.vlgmr.msrb.gmra.mxu3 %v10733_v60  ;;  %v11079_v61 = vor.u32 %v8678_v31, %v8253_v8  ;;  %v8237_v6 = vld [vmem:[#allocation9 + $0x148] sm:$0xf]  ;;  %v8087_v8 = vld [vmem:[#allocation9 + $0x30] sm:$0xf0] }
 0x6ef   :  { %12786 = vst [vmem:[#allocation42_spill] sm:$0xff] %v11068_v53  ;;  %4835 = vmatpush.bf16.msra.mxu1 %v11064_v38  ;;  %5067 = vmatpush.bf16.msrb.mxu2 %v11068_v53 }
 0x6f0   :  { %5227 = vmatpush.bf16.msra.mxu0 %v10831_v12  ;;  %12789 = vst [vmem:[#allocation45_spill] sm:$0xff] %v11079_v61  ;;  %4861 = vmatpush.bf16.msra.mxu3 %v11077_v29  ;;  %v8639_v12 = vld [vmem:[#allocation9 + $0x44] sm:$0xf] }
 0x6f1   :  { %v4273_v51 = vpop.f32.mrf.mxu3 }
 0x6f2   :  { %v11072_v60 = vadd.f32 %v4273_v51, %v4245_v23  ;;  %v11074_v40 = vpop.f32.mrf.mxu2  ;;  %v8103_v23 = vld [vmem:[#allocation9 + $0x50] sm:$0xf0]  ;;  %v8640_v51 = vld [vmem:[#allocation9 + $0x4c] sm:$0xf] }
 0x6f3   :  { %12788 = vst [vmem:[#allocation43_spill] sm:$0xff] %v11074_v40  ;;  %v4217_v47 = vpop.f32.mrf.mxu1  ;;  %v11088_v19 = vor.u32 %v8639_v12, %v8103_v23  ;;  %5068 = vmatpush.bf16.msrb.mxu2 %v11079_v61  ;;  %v11092_v31 = vor.u32 %v8640_v51, %v8111_v17  ;;  %v8635_v12 = vld [vmem:[#allocation9 + $0x24] sm:$0xf]  ;;  %v8095_v51 = vld [vmem:[#allocation9 + $0x38] sm:$0xf0] }
 0x6f4   :  { %12787 = vst [vmem:[#allocation44_spill] sm:$0xff] %v11072_v60  ;;  %v11082_v55 = vadd.f32 %v4217_v47, %v10842_v33  ;;  %v4307_v3 = vpop.f32.mrf.mxu0  ;;  %v8674_v60 = vld [vmem:[#allocation9 + $0x154] sm:$0xf0]  ;;  %5228 = vmatpush.bf16.msra.mxu0 %v10847_v7  ;;  %v8636_v47 = vld [vmem:[#allocation9 + $0x2c] sm:$0xf] }
 0x6f5   :  { %v11086_v40 = vadd.f32 %v4307_v3, %v11010_v22  ;;  %12791 = vst [vmem:[#allocation48_spill] sm:$0xff] %v11088_v19  ;;  %v11094_v33 = vor.u32 %v8674_v60, %v8237_v6  ;;  %4836 = vmatpush.bf16.msra.mxu1 %v11088_v19  ;;  %4862 = vmatpush.bf16.msra.mxu3 %v11092_v31  ;;  %v8221_v17 = vld [vmem:[#allocation9 + $0x128] sm:$0xf]  ;;  %v8670_v6 = vld [vmem:[#allocation9 + $0x134] sm:$0xf0] }
 0x6f6   :  { %12790 = vst [vmem:[#allocation46_spill] sm:$0xff] %v11082_v55  ;;  %v11104_v60 = vor.u32 %v8635_v12, %v8087_v8  ;;  %v11111_v19 = vor.u32 %v8670_v6, %v8221_v17  ;;  %v8071_v12 = vld [vmem:[#allocation9 + $0x10] sm:$0xf0]  ;;  %v8632_v8 = vld [vmem:[#allocation9 + $0xc] sm:$0xf] }
 0x6f7   :  { %12792 = vst [vmem:[#allocation47_spill] sm:$0xff] %v11092_v31  ;;  %5046 = vmatmul.bf16.vlgmr.msrb.gmra.mxu0 %v12780_v9  ;;  %5069 = vmatpush.bf16.msrb.mxu2 %v11094_v33  ;;  %v11109_v31 = vor.u32 %v8636_v47, %v8095_v51  ;;  %v8079_v47 = vld [vmem:[#allocation9 + $0x18] sm:$0xf0]  ;;  %v8205_v6 = vld [vmem:[#allocation9 + $0x108] sm:$0xf] }
 0x6f8   :  { %12793 = vst [vmem:[#allocation49_spill] sm:$0xff] %v11094_v33  ;;  %5229 = vmatpush.bf16.msra.mxu0 %v10860_v36  ;;  %v11126_v51 = vor.u32 %v8632_v8, %v8079_v47  ;;  %v8687_v47 = vld [vmem:[#allocation9 + $0x1c4] sm:$0xf] }
 0x6f9   :  { %v4275_v3 = vpop.f32.mrf.mxu3  ;;  %12795 = vst [vmem:[#allocation75_spill] sm:$0xff] %v11111_v19  ;;  %4837 = vmatpush.bf16.msra.mxu1 %v11104_v60  ;;  %4863 = vmatpush.bf16.msra.mxu3 %v11109_v31 }
 0x6fa   :  { %v11101_v23 = vadd.f32 %v4275_v3, %v10865_v39  ;;  %v4365_v55 = vpop.f32.mrf.mxu2  ;;  %v8631_v3 = vld [vmem:[#allocation9 + $0x4] sm:$0xf]  ;;  %12798 = vst [vmem:[#allocation80_spill] sm:$0xff] %v11126_v51 }
 0x6fb   :  { %v4220_v7 = vpop.f32.mrf.mxu1  ;;  %v11107_v25 = vadd.f32 %v4365_v55, %v11036_v14  ;;  %v11123_v55 = vor.u32 %v8631_v3, %v8071_v12  ;;  %5070 = vmatpush.bf16.msrb.mxu2 %v11111_v19 }
 0x6fc   :  { %12794 = vst [vmem:[#allocation74_spill] sm:$0xff] %v11101_v23  ;;  %v11114_v36 = vadd.f32 %v4220_v7, %v10870_v62  ;;  %v11116_v39 = vpop.f32.mrf.mxu0  ;;  %5230 = vmatpush.bf16.msra.mxu0 %v10874_v49  ;;  %v8691_v7 = vld [vmem:[#allocation9 + $0x1e4] sm:$0xf]  ;;  %v8311_v62 = vld [vmem:[#allocation9 + $0x1f0] sm:$0xf0] }
 0x6fd   :  { %12797 = vst [vmem:[#allocation76_spill] sm:$0xff] %v11116_v39  ;;  %v11128_v17 = vor.u32 %v8691_v7, %v8311_v62  ;;  %v8666_v39 = vld [vmem:[#allocation9 + $0x114] sm:$0xf0]  ;;  %4838 = vmatpush.bf16.msra.mxu1 %v11123_v55  ;;  %v8319_v49 = vld [vmem:[#allocation9 + $0x1f8] sm:$0xf0]  ;;  %4864 = vmatpush.bf16.msra.mxu3 %v11126_v51 }
 0x6fe   :  { %12796 = vst [vmem:[#allocation78_spill] sm:$0xff] %v11114_v36  ;;  %4451 = vmatmul.bf16.gmra.mxu1 %v10741_v42  ;;  %4509 = vmatmul.bf16.gmra.mxu3 %v10741_v42  ;;  %v8692_v36 = vld [vmem:[#allocation9 + $0x1ec] sm:$0xf]  ;;  %v11131_v23 = vor.u32 %v8666_v39, %v8205_v6  ;;  %v8295_v7 = vld [vmem:[#allocation9 + $0x1d0] sm:$0xf0] }
 0x6ff   :  { %12799 = vst [vmem:[#allocation89_spill] sm:$0xff] %v11128_v17  ;;  %v11135_v3 = vor.u32 %v8692_v36, %v8319_v49  ;;  %v8688_v62 = vld [vmem:[#allocation9 + $0x1cc] sm:$0xf]  ;;  %v11145_v6 = vor.u32 %v8687_v47, %v8295_v7  ;;  %v8287_v47 = vld [vmem:[#allocation9 + $0x1b8] sm:$0xf0] }
 0x700   :  { %12800 = vst [vmem:[#allocation81_spill] sm:$0xff] %v11131_v23  ;;  %5231 = vmatpush.bf16.msra.mxu0 %v10886_v44  ;;  %5071 = vmatpush.bf16.msrb.mxu2 %v11131_v23 }
 0x701   :  { %v4278_v42 = vpop.f32.mrf.mxu3  ;;  %5051 = vmatpush.bf16.msrb.mxu1 %v11128_v17  ;;  %12801 = vst [vmem:[#allocation91_spill] sm:$0xff] %v11135_v3  ;;  %5077 = vmatpush.bf16.msrb.mxu3 %v11135_v3  ;;  %v8303_v17 = vld [vmem:[#allocation9 + $0x1d8] sm:$0xf0] }
 0x702   :  { %v11138_v12 = vadd.f32 %v4278_v42, %v10889_v37  ;;  %v11140_v8 = vpop.f32.mrf.mxu2  ;;  %12804 = vst [vmem:[#allocation86_spill] sm:$0xff] %v11145_v6  ;;  %v11150_v37 = vor.u32 %v8688_v62, %v8303_v17  ;;  %v8683_v42 = vld [vmem:[#allocation9 + $0x1a4] sm:$0xf]  ;;  %v4252_v17 = vadd.f32 %v10913_v5, %v10854_v10  ;;  %v8271_v5 = vld [vmem:[#allocation9 + $0x198] sm:$0xf0] }
 0x703   :  { %12803 = vst [vmem:[#allocation93_spill] sm:$0xff] %v11140_v8  ;;  %v4222_v39 = vpop.f32.mrf.mxu1  ;;  %v8279_v8 = vld [vmem:[#allocation9 + $0x1b0] sm:$0xf0]  ;;  %5072 = vmatmul.bf16.vlgmr.msrb.gmra.mxu2 %v12780_v9 }
 0x704   :  { %12802 = vst [vmem:[#allocation87_spill] sm:$0xff] %v11138_v12  ;;  %v11148_v36 = vadd.f32 %v4222_v39, %v10896_v43  ;;  %v4312_v49 = vpop.f32.mrf.mxu0  ;;  %v8684_v12 = vld [vmem:[#allocation9 + $0x1ac] sm:$0xf]  ;;  %5251 = vmatpush.bf16.msra.mxu2 %v10851_v16  ;;  %v11157_v3 = vor.u32 %v8683_v42, %v8279_v8  ;;  %5232 = vmatpush.bf16.msra.mxu0 %v10901_v26  ;;  %v8679_v39 = vld [vmem:[#allocation9 + $0x184] sm:$0xf] }
 0x705   :  { %12806 = vst [vmem:[#allocation114_spill] sm:$0xff] %v11150_v37  ;;  %v11154_v44 = vadd.f32 %v4312_v49, %v11010_v22  ;;  %5052 = vmatpush.bf16.msrb.mxu1 %v11145_v6  ;;  %5078 = vmatpush.bf16.msrb.mxu3 %v11150_v37  ;;  %v11162_v43 = vor.u32 %v8684_v12, %v8287_v47  ;;  %v8263_v49 = vld [vmem:[#allocation9 + $0x190] sm:$0xf0]  ;;  %v8680_v42 = vld [vmem:[#allocation9 + $0x18c] sm:$0xf] }
 0x706   :  { %12805 = vst [vmem:[#allocation92_spill] sm:$0xff] %v11148_v36  ;;  %v11175_v47 = vor.u32 %v8679_v39, %v8263_v49  ;;  %v8247_v39 = vld [vmem:[#allocation9 + $0x170] sm:$0xf0]  ;;  %v8676_v49 = vld [vmem:[#allocation9 + $0x16c] sm:$0xf] }
 0x707   :  { %12807 = vst [vmem:[#allocation15_spill] sm:$0xff] %v11157_v3 }
 0x708   :  { %12808 = vst [vmem:[#allocation50_spill] sm:$0xff] %v11162_v43  ;;  %5286 = vmatpush.bf16.msrb.mxu0 %v10908_v0  ;;  %5252 = vmatpush.bf16.msra.mxu2 %v10867_v46  ;;  %v8667_v0 = vld [vmem:[#allocation9 + $0x124] sm:$0xf] }
 0x709   :  { %v4280_v7 = vpop.f32.mrf.mxu3  ;;  %5053 = vmatpush.bf16.msrb.mxu1 %v11157_v3  ;;  %5079 = vmatpush.bf16.msrb.mxu3 %v11162_v43  ;;  %12810 = vst [vmem:[#allocation110_spill] sm:$0xff] %v11175_v47 }
 0x70a   :  { %v11169_v8 = vadd.f32 %v4280_v7, %v4252_v17  ;;  %v4370_v62 = vpop.f32.mrf.mxu2  ;;  %v11183_v7 = vor.u32 %v8680_v42, %v8271_v5 }
 0x70b   :  { %v4225_v36 = vpop.f32.mrf.mxu1  ;;  %v11172_v12 = vadd.f32 %v4370_v62, %v11036_v14  ;;  %v8675_v62 = vld [vmem:[#allocation9 + $0x164] sm:$0xf] }
 0x70c   :  { %12809 = vst [vmem:[#allocation55_spill] sm:$0xff] %v11169_v8  ;;  %5287 = vmatpush.bf16.msrb.mxu0 %v10921_v24  ;;  %v11179_v10 = vadd.f32 %v4225_v36, %v10924_v54  ;;  %v11181_v17 = vpop.f32.mrf.mxu0  ;;  %5253 = vmatpush.bf16.msra.mxu2 %v10878_v1  ;;  %v11190_v8 = vor.u32 %v8675_v62, %v8247_v39  ;;  %v8255_v54 = vld [vmem:[#allocation9 + $0x178] sm:$0xf0]  ;;  %v8672_v39 = vld [vmem:[#allocation9 + $0x14c] sm:$0xf] }
 0x70d   :  { %12812 = vst [vmem:[#allocation77_spill] sm:$0xff] %v11181_v17  ;;  %5054 = vmatpush.bf16.msrb.mxu1 %v11175_v47  ;;  %5080 = vmatpush.bf16.msrb.mxu3 %v11183_v7  ;;  %v11193_v36 = vor.u32 %v8676_v49, %v8255_v54  ;;  %v8231_v17 = vld [vmem:[#allocation9 + $0x150] sm:$0xf0]  ;;  %v8239_v49 = vld [vmem:[#allocation9 + $0x158] sm:$0xf0] }
 0x70e   :  { %12811 = vst [vmem:[#allocation52_spill] sm:$0xff] %v11179_v10  ;;  %4456 = vmatmul.bf16.gmra.mxu1 %v10749_v32  ;;  %4514 = vmatmul.bf16.gmra.mxu3 %v10749_v32  ;;  %v8671_v10 = vld [vmem:[#allocation9 + $0x144] sm:$0xf] }
 0x70f   :  { %12813 = vst [vmem:[#allocation54_spill] sm:$0xff] %v11183_v7  ;;  %v11205_v62 = vor.u32 %v8671_v10, %v8231_v17  ;;  %v8223_v10 = vld [vmem:[#allocation9 + $0x138] sm:$0xf0] }
 0x710   :  { %12814 = vst [vmem:[#allocation79_spill] sm:$0xff] %v11190_v8  ;;  %5288 = vmatpush.bf16.msrb.mxu0 %v10929_v52  ;;  %5254 = vmatpush.bf16.msra.mxu2 %v10891_v30  ;;  %v11208_v52 = vor.u32 %v8672_v39, %v8239_v49 }
 0x711   :  { %12815 = vst [vmem:[#allocation59_spill] sm:$0xff] %v11193_v36  ;;  %v4283_v42 = vpop.f32.mrf.mxu3  ;;  %5055 = vmatpush.bf16.msrb.mxu1 %v11190_v8  ;;  %5081 = vmatpush.bf16.msrb.mxu3 %v11193_v36 }
 0x712   :  { %v11198_v5 = vadd.f32 %v4283_v42, %v10940_v56  ;;  %v11200_v32 = vpop.f32.mrf.mxu2  ;;  %12819 = vst [vmem:[#allocation84_spill] sm:$0xff] %v11205_v62  ;;  %v8215_v56 = vld [vmem:[#allocation9 + $0x130] sm:$0xf0]  ;;  %v8668_v42 = vld [vmem:[#allocation9 + $0x12c] sm:$0xf] }
 0x713   :  { %12817 = vst [vmem:[#allocation58_spill] sm:$0xff] %v11200_v32  ;;  %v11202_v24 = vpop.f32.mrf.mxu1  ;;  %v11218_v17 = vor.u32 %v8668_v42, %v8223_v10  ;;  %v8199_v32 = vld [vmem:[#allocation9 + $0x110] sm:$0xf0]  ;;  %v8207_v42 = vld [vmem:[#allocation9 + $0x118] sm:$0xf0] }
 0x714   :  { %12816 = vst [vmem:[#allocation83_spill] sm:$0xff] %v11198_v5  ;;  %5289 = vmatpush.bf16.msrb.mxu0 %v10949_v28  ;;  %v4317_v54 = vpop.f32.mrf.mxu0  ;;  %5255 = vmatpush.bf16.msra.mxu2 %v10906_v48  ;;  %v8664_v28 = vld [vmem:[#allocation9 + $0x10c] sm:$0xf] }
 0x715   :  { %12818 = vst [vmem:[#allocation82_spill] sm:$0xff] %v11202_v24  ;;  %v11212_v5 = vadd.f32 %v4317_v54, %v11010_v22  ;;  %5056 = vmatpush.bf16.msrb.mxu1 %v11205_v62  ;;  %v11215_v24 = vor.u32 %v8667_v0, %v8215_v56  ;;  %5082 = vmatpush.bf16.msrb.mxu3 %v11208_v52  ;;  %v8663_v54 = vld [vmem:[#allocation9 + $0x104] sm:$0xf] }
 0x716   :  { %12820 = vst [vmem:[#allocation85_spill] sm:$0xff] %v11208_v52  ;;  %v11229_v56 = vor.u32 %v8663_v54, %v8199_v32 }
 0x717   :  { %12821 = vst [vmem:[#allocation90_spill] sm:$0xff] %v11215_v24 }
 0x718   :  { %12822 = vst [vmem:[#allocation88_spill] sm:$0xff] %v11218_v17  ;;  %5290 = vmatpush.bf16.msrb.mxu0 %v10959_v2  ;;  %5256 = vmatpush.bf16.msra.mxu2 %v10919_v13  ;;  %v11237_v2 = vor.u32 %v8664_v28, %v8207_v42  ;;  %v11263_v42 = vperm.slane %v10814_v21, 7 }
 0x719   :  { %v11222_v39 = vpop.f32.mrf.mxu3  ;;  %5057 = vmatpush.bf16.msrb.mxu1 %v11215_v24  ;;  %5083 = vmatpush.bf16.msrb.mxu3 %v11218_v17  ;;  %12824 = vst [vmem:[#allocation53_spill] sm:$0xff] %v11229_v56 }
 0x71a   :  { %12823 = vst [vmem:[#allocation111_spill] sm:$0xff] %v11222_v39  ;;  %v4375_v49 = vpop.f32.mrf.mxu2 }
 0x71b   :  { %v4230_v26 = vpop.f32.mrf.mxu1  ;;  %v11226_v0 = vadd.f32 %v4375_v49, %v11036_v14  ;;  %12826 = vst [vmem:[#allocation16_spill] sm:$0xff] %v11237_v2 }
 0x71c   :  { %5291 = vmatpush.bf16.msrb.mxu0 %v10969_v18  ;;  %v11233_v10 = vadd.f32 %v4230_v26, %v10972_v41  ;;  %v11235_v39 = vpop.f32.mrf.mxu0  ;;  %5257 = vmatpush.bf16.msra.mxu2 %v10932_v27  ;;  %v11247_v41 = vperm.slane %v10814_v21, 6  ;;  %12830 = vst [vmem:[#allocation117_spill] sm:$0xff] %v11263_v42  ;;  %v12834_v21 = vld [vmem:[#allocation94_spill] sm:$0xff] }
 0x71d   :  { %5058 = vmatpush.bf16.msrb.mxu1 %v11229_v56  ;;  %5084 = vmatpush.bf16.msrb.mxu3 %v11237_v2 }
 0x71e   :  { %12825 = vst [vmem:[#allocation51_spill] sm:$0xff] %v11233_v10  ;;  %4461 = vmatmul.bf16.gmra.mxu1 %v10759_v57  ;;  %4519 = vmatmul.bf16.gmra.mxu3 %v10759_v57 }
 0x71f   :  { %12827 = vst [vmem:[#allocation14_spill] sm:$0xff] %v11247_v41 }
 0x720   :  { %5292 = vmatpush.bf16.msrb.mxu0 %v10982_v58  ;;  %5258 = vmatpush.bf16.msra.mxu2 %v10947_v34 }
 0x721   :  { %v4288_v26 = vpop.f32.mrf.mxu3 }
 0x722   :  { %v11251_v28 = vadd.f32 %v4288_v26, %v10990_v45  ;;  %v11253_v32 = vpop.f32.mrf.mxu2 }
 0x723   :  { %v11255_v49 = vpop.f32.mrf.mxu1 }
 0x724   :  { %5312 = vmatpush.bf16.msrb.mxu2 %v11019_v20  ;;  %12828 = vst [vmem:[#allocation115_spill] sm:$0xff] %v11251_v28  ;;  %5293 = vmatpush.bf16.msrb.mxu0 %v10997_v35  ;;  %v4418_v57 = vpop.f32.mrf.mxu0 }
 0x725   :  { %12829 = vst [vmem:[#allocation116_spill] sm:$0xff] %v11255_v49  ;;  %v11259_v54 = vadd.f32 %v4418_v57, %v11247_v41  ;;  %v12835_v57 = vld [vmem:[#allocation21_spill] sm:$0xff] }
 0x728   :  { %5313 = vmatpush.bf16.msrb.mxu2 %v11031_v63 }
 0x729   :  { %v11265_v10 = vpop.f32.mrf.mxu3 }
 0x72a   :  { %12831 = vst [vmem:[#allocation118_spill] sm:$0xff] %v11265_v10  ;;  %v4476_v45 = vpop.f32.mrf.mxu2 }
 0x72b   :  { %v4331_v26 = vpop.f32.mrf.mxu1  ;;  %v11269_v28 = vadd.f32 %v4476_v45, %v11263_v42 }
 0x72c   :  { %5314 = vmatpush.bf16.msrb.mxu2 %v11051_v11  ;;  %v11272_v49 = vadd.f32 %v4331_v26, %v11024_v50  ;;  %v11274_v35 = vpop.f32.mrf.mxu0 }
 0x72d   :  { %12833 = vst [vmem:[#allocation120_spill] sm:$0xff] %v11274_v35  ;;  %v12840_v35 = vld [vmem:[#allocation27_spill] sm:$0xff] }
 0x72e   :  { %12832 = vst [vmem:[#allocation119_spill] sm:$0xff] %v11272_v49  ;;  %4839 = vmatmul.bf16.vlgmr.msra.gmra.mxu1 %v12780_v9  ;;  %4865 = vmatmul.bf16.vlgmr.msra.gmra.mxu3 %v12780_v9  ;;  %v12839_v49 = vld [vmem:[#allocation22_spill] sm:$0xff] }
 0x72f   :  { %5238 = vmatpush.bf16.msra.mxu1 %v12834_v21  ;;  %5264 = vmatpush.bf16.msra.mxu3 %v12835_v57 }
 0x730   :  { %5315 = vmatpush.bf16.msrb.mxu2 %v11068_v53  ;;  %v12841_v53 = vld [vmem:[#allocation29_spill] sm:$0xff] }
 0x731   :  { %v4389_v10 = vpop.f32.mrf.mxu3 }
 0x732   :  { %v11283_v45 = vadd.f32 %v4389_v10, %v11049_v15  ;;  %v11285_v50 = vpop.f32.mrf.mxu2 }
 0x733   :  { %12837 = vst [vmem:[#allocation21_spill] sm:$0xff] %v11285_v50  ;;  %v11287_v26 = vpop.f32.mrf.mxu1  ;;  %5239 = vmatpush.bf16.msra.mxu1 %v12839_v49  ;;  %5265 = vmatpush.bf16.msra.mxu3 %v12840_v35 }
 0x734   :  { %5316 = vmatpush.bf16.msrb.mxu2 %v11079_v61  ;;  %12836 = vst [vmem:[#allocation94_spill] sm:$0xff] %v11283_v45  ;;  %v4423_v58 = vpop.f32.mrf.mxu0  ;;  %v12855_v61 = vld [vmem:[#allocation91_spill] sm:$0xff] }
 0x735   :  { %12838 = vst [vmem:[#allocation121_spill] sm:$0xff] %v11287_v26  ;;  %v11292_v18 = vadd.f32 %v4423_v58, %v11247_v41  ;;  %v12843_v26 = vld [vmem:[#allocation36_spill] sm:$0xff] }
 0x737   :  { %5240 = vmatpush.bf16.msra.mxu1 %v12841_v53  ;;  %5266 = vmatpush.bf16.msra.mxu3 %v11026_v59 }
 0x738   :  { %5317 = vmatpush.bf16.msrb.mxu2 %v11094_v33 }
 0x739   :  { %v11297_v15 = vpop.f32.mrf.mxu3 }
 0x73a   :  { %12842 = vst [vmem:[#allocation22_spill] sm:$0xff] %v11297_v15  ;;  %v4481_v10 = vpop.f32.mrf.mxu2 }
 0x73b   :  { %v4336_v45 = vpop.f32.mrf.mxu1  ;;  %v11301_v50 = vadd.f32 %v4481_v10, %v11263_v42  ;;  %5241 = vmatpush.bf16.msra.mxu1 %v12843_v26  ;;  %5267 = vmatpush.bf16.msra.mxu3 %v11057_v4 }
 0x73c   :  { %5318 = vmatpush.bf16.msrb.mxu2 %v11111_v19  ;;  %v11306_v58 = vadd.f32 %v4336_v45, %v11086_v40  ;;  %v11308_v33 = vpop.f32.mrf.mxu0  ;;  %v12849_v45 = vld [vmem:[#allocation48_spill] sm:$0xff] }
 0x73d   :  { %12845 = vst [vmem:[#allocation29_spill] sm:$0xff] %v11308_v33 }
 0x73e   :  { %12844 = vst [vmem:[#allocation27_spill] sm:$0xff] %v11306_v58  ;;  %5059 = vmatmul.bf16.vlgmr.msrb.gmra.mxu1 %v12780_v9  ;;  %5085 = vmatmul.bf16.vlgmr.msrb.gmra.mxu3 %v12780_v9  ;;  %v12850_v58 = vld [vmem:[#allocation47_spill] sm:$0xff] }
 0x73f   :  { %5242 = vmatpush.bf16.msra.mxu1 %v11064_v38  ;;  %5268 = vmatpush.bf16.msra.mxu3 %v11077_v29 }
 0x740   :  { %5319 = vmatpush.bf16.msrb.mxu2 %v11131_v23 }
 0x741   :  { %v4394_v10 = vpop.f32.mrf.mxu3 }
 0x742   :  { %v11316_v15 = vadd.f32 %v4394_v10, %v11107_v25  ;;  %v11318_v19 = vpop.f32.mrf.mxu2 }
 0x743   :  { %12847 = vst [vmem:[#allocation122_spill] sm:$0xff] %v11318_v19  ;;  %v11320_v40 = vpop.f32.mrf.mxu1  ;;  %5243 = vmatpush.bf16.msra.mxu1 %v12849_v45  ;;  %5269 = vmatpush.bf16.msra.mxu3 %v12850_v58 }
 0x744   :  { %12846 = vst [vmem:[#allocation36_spill] sm:$0xff] %v11316_v15  ;;  %v4428_v33 = vpop.f32.mrf.mxu0 }
 0x745   :  { %12848 = vst [vmem:[#allocation123_spill] sm:$0xff] %v11320_v40  ;;  %v11325_v23 = vadd.f32 %v4428_v33, %v11247_v41  ;;  %v12854_v40 = vld [vmem:[#allocation89_spill] sm:$0xff] }
 0x747   :  { %5244 = vmatpush.bf16.msra.mxu1 %v11104_v60  ;;  %5270 = vmatpush.bf16.msra.mxu3 %v11109_v31 }
 0x749   :  { %v11329_v9 = vpop.f32.mrf.mxu3 }
 0x74a   :  { %12851 = vst [vmem:[#allocation48_spill] sm:$0xff] %v11329_v9  ;;  %v4486_v25 = vpop.f32.mrf.mxu2 }
 0x74b   :  { %v4341_v10 = vpop.f32.mrf.mxu1  ;;  %v11332_v15 = vadd.f32 %v4486_v25, %v11263_v42  ;;  %5245 = vmatpush.bf16.msra.mxu1 %v11123_v55  ;;  %5271 = vmatpush.bf16.msra.mxu3 %v11126_v51 }
 0x74c   :  { %v11337_v19 = vadd.f32 %v4341_v10, %v11154_v44  ;;  %v11339_v33 = vpop.f32.mrf.mxu0 }
 0x74d   :  { %12853 = vst [vmem:[#allocation124_spill] sm:$0xff] %v11339_v33 }
 0x74e   :  { %12852 = vst [vmem:[#allocation47_spill] sm:$0xff] %v11337_v19 }
 0x74f   :  { %5299 = vmatpush.bf16.msrb.mxu1 %v12854_v40  ;;  %5325 = vmatpush.bf16.msrb.mxu3 %v12855_v61 }
 0x751   :  { %v4399_v9 = vpop.f32.mrf.mxu3 }
 0x752   :  { %v11346_v25 = vadd.f32 %v4399_v9, %v11172_v12  ;;  %v11348_v11 = vpop.f32.mrf.mxu2 }
 0x753   :  { %5300 = vmatpush.bf16.msrb.mxu1 %v11145_v6  ;;  %5326 = vmatpush.bf16.msrb.mxu3 %v11150_v37  ;;  %12857 = vst [vmem:[#allocation126_spill] sm:$0xff] %v11348_v11  ;;  %v11350_v63 = vpop.f32.mrf.mxu1 }
 0x754   :  { %12856 = vst [vmem:[#allocation125_spill] sm:$0xff] %v11346_v25  ;;  %v4433_v44 = vpop.f32.mrf.mxu0 }
 0x755   :  { %12858 = vst [vmem:[#allocation127_spill] sm:$0xff] %v11350_v63  ;;  %v11355_v10 = vadd.f32 %v4433_v44, %v11247_v41 }
 0x757   :  { %5301 = vmatpush.bf16.msrb.mxu1 %v11157_v3  ;;  %5327 = vmatpush.bf16.msrb.mxu3 %v11162_v43 }
 0x759   :  { %v11359_v19 = vpop.f32.mrf.mxu3 }
 0x75a   :  { %12859 = vst [vmem:[#allocation128_spill] sm:$0xff] %v11359_v19  ;;  %v4491_v12 = vpop.f32.mrf.mxu2 }
 0x75b   :  { %5302 = vmatpush.bf16.msrb.mxu1 %v11175_v47  ;;  %5328 = vmatpush.bf16.msrb.mxu3 %v11183_v7  ;;  %v4346_v9 = vpop.f32.mrf.mxu1  ;;  %v11362_v25 = vadd.f32 %v4491_v12, %v11263_v42 }
 0x75c   :  { %v11365_v33 = vadd.f32 %v4346_v9, %v11212_v5  ;;  %v11367_v11 = vpop.f32.mrf.mxu0  ;;  %v12862_v5 = vld [vmem:[#allocation65_spill] sm:$0xff] }
 0x75e   :  { %12860 = vst [vmem:[#allocation129_spill] sm:$0xff] %v11365_v33 }
 0x75f   :  { %5303 = vmatpush.bf16.msrb.mxu1 %v11190_v8  ;;  %5329 = vmatpush.bf16.msrb.mxu3 %v11193_v36 }
 0x761   :  { %v4404_v44 = vpop.f32.mrf.mxu3 }
 0x762   :  { %v11374_v19 = vadd.f32 %v4404_v44, %v11226_v0  ;;  %v11376_v63 = vpop.f32.mrf.mxu2 }
 0x763   :  { %5304 = vmatpush.bf16.msrb.mxu1 %v11205_v62  ;;  %5330 = vmatpush.bf16.msrb.mxu3 %v11208_v52  ;;  %v4348_v12 = vpop.f32.mrf.mxu1 }
 0x764   :  { %12861 = vst [vmem:[#allocation130_spill] sm:$0xff] %v11374_v19  ;;  %v4827_v7 = vpop.f32.mrf.mxu0  ;;  %v12863_v19 = vld [vmem:[#allocation39_spill] sm:$0xff] }
 0x765   :  { %v4870_v9 = vadd.f32 %v4827_v7, %v12862_v5 }
 0x767   :  { %5305 = vmatpush.bf16.msrb.mxu1 %v11215_v24  ;;  %5331 = vmatpush.bf16.msrb.mxu3 %v11218_v17  ;;  %v8323_v33 = vmul.f32 -1.442695, %v4870_v9 }
 0x769   :  { %v11383_v52 = vpop.f32.mrf.mxu3  ;;  %8960 = vpow2.f32 %v8323_v33 }
 0x76a   :  { %v4853_v0 = vpop.f32.mrf.mxu2 }
 0x76b   :  { %5306 = vmatpush.bf16.msrb.mxu1 %v11229_v56  ;;  %5332 = vmatpush.bf16.msrb.mxu3 %v11237_v2  ;;  %v4447_v44 = vpop.f32.mrf.mxu1  ;;  %v4872_v62 = vadd.f32 %v4853_v0, %v12863_v19  ;;  %v4320_v56 = vadd.f32 %v11235_v39, %v11010_v22 }
 0x76c   :  { %v11387_v36 = vadd.f32 %v4447_v44, %v11259_v54  ;;  %v4829_v24 = vpop.f32.mrf.mxu0 }
 0x76d   :  { %v4349_v54 = vadd.f32 %v4348_v12, %v4320_v56 }
 0x76e   :  { %12864 = vst [vmem:[#allocation65_spill] sm:$0xff] %v11387_v36 }
 0x76f   :  { %v8961_v8 = vpop.eup %8960 }
 0x770   :  { %v5097_v17 = vadd.f32 1.0, %v8961_v8 }
 0x771   :  { %v4505_v47 = vpop.f32.mrf.mxu3 }
 0x772   :  { %8962 = vrcp.f32 %v5097_v17  ;;  %v11390_v7 = vadd.f32 %v4505_v47, %v11269_v28  ;;  %v4855_v5 = vpop.f32.mrf.mxu2  ;;  %v5109_v8 = vand.u32 2147483648, %v5097_v17  ;;  %vm5103_vm1 = vweird.f32 %v5097_v17 }
 0x773   :  { %v11392_v9 = vpop.f32.mrf.mxu1  ;;  %8964 = vtanh.f32 %v4872_v62  ;;  %v5107_v5 = vand.u32 2147483647, %v5097_v17 }
 0x774   :  { %12865 = vst [vmem:[#allocation39_spill] sm:$0xff] %v11390_v7  ;;  %v5047_v2 = vpop.f32.mrf.mxu0  ;;  %v5110_v39 = vor.u32 1.1754944e-38, %v5109_v8 }
 0x775   :  { %12866 = vst [vmem:[#allocation131_spill] sm:$0xff] %v11392_v9  ;;  %v5090_v7 = vadd.f32 %v5047_v2, %v4349_v54  ;;  %vm5108_vm3 = vcmp.eq.f32.partialorder %v5107_v5, 8.507059e+37 }
 0x778   :  { %v8963_v33 = vpop.eup %8962 }
 0x779   :  { %v5099_v19 = vmul.f32 %v8963_v33, %v5097_v17  ;;  %v11396_v0 = vpop.f32.mrf.mxu3  ;;  %vm5104_vm0 = vweird.f32 %v8963_v33  ;;  %v8965_v12 = vpop.eup %8964 }
 0x77a   :  { %12867 = vst [vmem:[#allocation132_spill] sm:$0xff] %v11396_v0  ;;  %vm5105_vm2 = vmor %vm5103_vm1, %vm5104_vm0  ;;  %v8326_v0 = vmul.f32 -1.442695, %v5090_v7 }
 0x77b   :  { %v5100_v24 = vsub.f32 1.0, %v5099_v19  ;;  %v4452_v44 = vpop.f32.mrf.mxu1 }
 0x77c   :  { %v11399_v36 = vadd.f32 %v4452_v44, %v11292_v18  ;;  %v5049_v47 = vpop.f32.mrf.mxu0  ;;  %8966 = vpow2.f32 %v8326_v0 }
 0x77d   :  { %v5101_v28 = vmul.f32 %v8963_v33, %v5100_v24 }
 0x77e   :  { %12868 = vst [vmem:[#allocation133_spill] sm:$0xff] %v11399_v36 }
 0x77f   :  { %v5102_v9 = vadd.f32 %v8963_v33, %v5101_v28 }
 0x781   :  { %v5106_v22 = vsel %vm5105_vm2, %v8963_v33, %v5102_v9  ;;  %v4510_v56 = vpop.f32.mrf.mxu3 }
 0x782   :  { %v5111_v19 = vsel %vm5108_vm3, %v5110_v39, %v5106_v22  ;;  %v11402_v62 = vadd.f32 %v4510_v56, %v11301_v50  ;;  %v8967_v17 = vpop.eup %8966 }
 0x783   :  { %v11404_v18 = vmul.f32 %v8965_v12, %v5111_v19  ;;  %v11406_v44 = vpop.f32.mrf.mxu1  ;;  %v5160_v7 = vadd.f32 1.0, %v8967_v17  ;;  %v4436_v12 = vadd.f32 %v11367_v11, %v11247_v41  ;;  %v12903_v41 = vld [vmem:[#allocation24_spill] sm:$0xff] }
 0x784   :  { %12869 = vst [vmem:[#allocation134_spill] sm:$0xff] %v11402_v62 }
 0x785   :  { %12870 = vst [vmem:[#allocation135_spill] sm:$0xff] %v11406_v44  ;;  %8968 = vrcp.f32 %v5160_v7  ;;  %v5172_v36 = vand.u32 2147483648, %v5160_v7  ;;  %vm5166_vm5 = vweird.f32 %v5160_v7  ;;  %v5170_v62 = vand.u32 2147483647, %v5160_v7 }
 0x786   :  { %v5073_v2 = vpop.f32.mrf.mxu2 }
 0x787   :  { %v5173_v44 = vor.u32 1.1754944e-38, %v5172_v36  ;;  %vm5171_vm7 = vcmp.eq.f32.partialorder %v5170_v62, 8.507059e+37  ;;  %v4378_v36 = vadd.f32 %v11253_v32, %v11036_v14  ;;  %v12906_v14 = vld [vmem:[#allocation88_spill] sm:$0xff] }
 0x789   :  { %v11408_v24 = vpop.f32.mrf.mxu3  ;;  %v4407_v62 = vadd.f32 %v11383_v52, %v4378_v36 }
 0x78a   :  { %12871 = vst [vmem:[#allocation136_spill] sm:$0xff] %v11408_v24  ;;  %v12876_v24 = vld [vmem:[#allocation103_spill] sm:$0xff] }
 0x78b   :  { %v4457_v54 = vpop.f32.mrf.mxu1  ;;  %v8969_v47 = vpop.eup %8968 }
 0x78c   :  { %v11411_v9 = vadd.f32 %v4457_v54, %v11325_v23  ;;  %v5162_v0 = vmul.f32 %v8969_v47, %v5160_v7  ;;  %vm5167_vm4 = vweird.f32 %v8969_v47 }
 0x78d   :  { %vm5168_vm6 = vmor %vm5166_vm5, %vm5167_vm4 }
 0x78e   :  { %12872 = vst [vmem:[#allocation137_spill] sm:$0xff] %v11411_v9  ;;  %v5075_v8 = vpop.f32.mrf.mxu2  ;;  %v5163_v56 = vsub.f32 1.0, %v5162_v0 }
 0x790   :  { %v5164_v17 = vmul.f32 %v8969_v47, %v5163_v56 }
 0x791   :  { %v4515_v33 = vpop.f32.mrf.mxu3 }
 0x792   :  { %v11414_v22 = vadd.f32 %v4515_v33, %v11332_v15  ;;  %v5165_v8 = vadd.f32 %v8969_v47, %v5164_v17 }
 0x793   :  { %v11416_v50 = vpop.f32.mrf.mxu1 }
 0x794   :  { %12873 = vst [vmem:[#allocation138_spill] sm:$0xff] %v11414_v22  ;;  %v5169_v0 = vsel %vm5168_vm6, %v8969_v47, %v5165_v8  ;;  %v12901_v22 = vld [vmem:[#allocation49_spill] sm:$0xff] }
 0x795   :  { %12874 = vst [vmem:[#allocation139_spill] sm:$0xff] %v11416_v50  ;;  %v12902_v50 = vld [vmem:[#allocation85_spill] sm:$0xff] }
 0x799   :  { %v11418_v28 = vpop.f32.mrf.mxu3 }
 0x79a   :  { %12875 = vst [vmem:[#allocation140_spill] sm:$0xff] %v11418_v28  ;;  %v12904_v28 = vld [vmem:[#allocation90_spill] sm:$0xff] }
 0x79b   :  { %v4462_v5 = vpop.f32.mrf.mxu1 }
 0x79c   :  { %v11421_v39 = vadd.f32 %v4462_v5, %v11355_v10 }
 0x7a1   :  { %v4520_v23 = vpop.f32.mrf.mxu3 }
 0x7a2   :  { %v11426_v19 = vadd.f32 %v4520_v23, %v11362_v25  ;;  %v5174_v23 = vsel %vm5171_vm7, %v5173_v44, %v5169_v0 }
 0x7a3   :  { %v4464_v15 = vpop.f32.mrf.mxu1 }
 0x7a4   :  { %v4465_v54 = vadd.f32 %v4464_v15, %v4436_v12  ;;  %v12877_v12 = vld [vmem:[#allocation44_spill] sm:$0xff] }
 0x7a6   :  { %v5092_v33 = vadd.f32 %v5073_v2, %v4465_v54 }
 0x7a8   :  { %8970 = vtanh.f32 %v5092_v33 }
 0x7a9   :  { %v4522_v10 = vpop.f32.mrf.mxu3 }
 0x7ab   :  { %v4840_v5 = vpop.f32.mrf.mxu1 }
 0x7ac   :  { %v4871_v11 = vadd.f32 %v4840_v5, %v12876_v24 }
 0x7ae   :  { %v8971_v25 = vpop.eup %8970  ;;  %v8324_v9 = vmul.f32 -1.442695, %v4871_v11 }
 0x7af   :  { %v11429_v56 = vmul.f32 %v8971_v25, %v5174_v23 }
 0x7b0   :  { %8972 = vpow2.f32 %v8324_v9  ;;  %v4494_v9 = vadd.f32 %v11376_v63, %v11263_v42  ;;  %v12905_v42 = vld [vmem:[#allocation75_spill] sm:$0xff] }
 0x7b1   :  { %v4866_v2 = vpop.f32.mrf.mxu3 }
 0x7b2   :  { %v4873_v15 = vadd.f32 %v4866_v2, %v12877_v12  ;;  %v4523_v25 = vadd.f32 %v4522_v10, %v4494_v9 }
 0x7b3   :  { %v4842_v17 = vpop.f32.mrf.mxu1 }
 0x7b4   :  { %v8325_v54 = vmul.f32 -1.442695, %v4873_v15 }
 0x7b6   :  { %v8973_v7 = vpop.eup %8972  ;;  %8974 = vpow2.f32 %v8325_v54 }
 0x7b7   :  { %v5116_v33 = vadd.f32 1.0, %v8973_v7 }
 0x7b9   :  { %8976 = vrcp.f32 %v5116_v33  ;;  %v4868_v24 = vpop.f32.mrf.mxu3  ;;  %v5128_v15 = vand.u32 2147483648, %v5116_v33  ;;  %v5126_v52 = vand.u32 2147483647, %v5116_v33  ;;  %vm5122_vm9 = vweird.f32 %v5116_v33 }
 0x7bb   :  { %v5060_v44 = vpop.f32.mrf.mxu1  ;;  %vm5127_vm11 = vcmp.eq.f32.partialorder %v5126_v52, 8.507059e+37 }
 0x7bc   :  { %v8975_v47 = vpop.eup %8974  ;;  %v5091_v8 = vadd.f32 %v5060_v44, %v4407_v62  ;;  %v5129_v44 = vor.u32 1.1754944e-38, %v5128_v15 }
 0x7bd   :  { %v5136_v0 = vadd.f32 1.0, %v8975_v47 }
 0x7be   :  { %v8327_v5 = vmul.f32 -1.442695, %v5091_v8 }
 0x7bf   :  { %v8977_v11 = vpop.eup %8976  ;;  %8978 = vrcp.f32 %v5136_v0  ;;  %vm5142_vm13 = vweird.f32 %v5136_v0 }
 0x7c0   :  { %v5118_v23 = vmul.f32 %v8977_v11, %v5116_v33  ;;  %8980 = vpow2.f32 %v8327_v5  ;;  %vm5123_vm8 = vweird.f32 %v8977_v11 }
 0x7c1   :  { %v5086_v2 = vpop.f32.mrf.mxu3  ;;  %vm5124_vm10 = vmor %vm5122_vm9, %vm5123_vm8 }
 0x7c2   :  { %v5119_v12 = vsub.f32 1.0, %v5118_v23  ;;  %v5093_v32 = vadd.f32 %v5086_v2, %v4523_v25 }
 0x7c3   :  { %v5062_v17 = vpop.f32.mrf.mxu1 }
 0x7c4   :  { %v5120_v54 = vmul.f32 %v8977_v11, %v5119_v12  ;;  %v8328_v7 = vmul.f32 -1.442695, %v5093_v32  ;;  %v5148_v17 = vand.u32 2147483648, %v5136_v0 }
 0x7c5   :  { %v8979_v36 = vpop.eup %8978 }
 0x7c6   :  { %v8981_v24 = vpop.eup %8980  ;;  %v5121_v62 = vadd.f32 %v8977_v11, %v5120_v54  ;;  %v5138_v63 = vmul.f32 %v8979_v36, %v5136_v0  ;;  %8982 = vpow2.f32 %v8328_v7  ;;  %vm5143_vm12 = vweird.f32 %v8979_v36 }
 0x7c7   :  { %v5179_v10 = vadd.f32 1.0, %v8981_v24  ;;  %vm5144_vm14 = vmor %vm5142_vm13, %vm5143_vm12  ;;  %v5149_v7 = vor.u32 1.1754944e-38, %v5148_v17 }
 0x7c8   :  { %v5125_v47 = vsel %vm5124_vm10, %v8977_v11, %v5121_v62  ;;  %v5139_v8 = vsub.f32 1.0, %v5138_v63  ;;  %v5146_v11 = vand.u32 2147483647, %v5136_v0 }
 0x7c9   :  { %v5130_v9 = vsel %vm5127_vm11, %v5129_v44, %v5125_v47  ;;  %8984 = vrcp.f32 %v5179_v10  ;;  %v5088_v5 = vpop.f32.mrf.mxu3  ;;  %v5191_v62 = vand.u32 2147483648, %v5179_v10  ;;  %v5189_v44 = vand.u32 2147483647, %v5179_v10 }
 0x7ca   :  { %v5152_v25 = vmul.f32 0.0, %v5130_v9  ;;  %v5140_v23 = vmul.f32 %v8979_v36, %v5139_v8  ;;  %vm5147_vm15 = vcmp.eq.f32.partialorder %v5146_v11, 8.507059e+37  ;;  %vm5185_vm1 = vweird.f32 %v5179_v10 }
 0x7cb   :  { %v5192_v0 = vor.u32 1.1754944e-38, %v5191_v62  ;;  %vm5190_vm3 = vcmp.eq.f32.partialorder %v5189_v44, 8.507059e+37 }
 0x7cc   :  { %v8983_v2 = vpop.eup %8982  ;;  %v11438_v12 = vadd.f32 %v11404_v18, %v5152_v25  ;;  %v5141_v33 = vadd.f32 %v8979_v36, %v5140_v23 }
 0x7cd   :  { %v5199_v32 = vadd.f32 1.0, %v8983_v2 }
 0x7ce   :  { %8986 = vtanh.f32 %v11438_v12  ;;  %v5145_v52 = vsel %vm5144_vm14, %v8979_v36, %v5141_v33 }
 0x7cf   :  { %v8985_v15 = vpop.eup %8984  ;;  %8988 = vrcp.f32 %v5199_v32  ;;  %v5150_v47 = vsel %vm5147_vm15, %v5149_v7, %v5145_v52  ;;  %v5211_v52 = vand.u32 2147483648, %v5199_v32  ;;  %vm5205_vm5 = vweird.f32 %v5199_v32 }
 0x7d0   :  { %v5181_v54 = vmul.f32 %v8985_v15, %v5179_v10  ;;  %vm5186_vm0 = vweird.f32 %v8985_v15  ;;  %v5209_v7 = vand.u32 2147483647, %v5199_v32 }
 0x7d1   :  { %vm5187_vm2 = vmor %vm5185_vm1, %vm5186_vm0  ;;  %v5212_v62 = vor.u32 1.1754944e-38, %v5211_v52  ;;  %v12893_v52 = vld [vmem:[#allocation42_spill] sm:$0xff] }
 0x7d2   :  { %v5182_v24 = vsub.f32 1.0, %v5181_v54  ;;  %v12878_v54 = vld [vmem:[#allocation107_spill] sm:$0xff]  ;;  %vm5210_vm7 = vcmp.eq.f32.partialorder %v5209_v7, 8.507059e+37  ;;  %v12894_v7 = vld [vmem:[#allocation54_spill] sm:$0xff] }
 0x7d4   :  { %v8987_v63 = vpop.eup %8986  ;;  %v5183_v18 = vmul.f32 %v8985_v15, %v5182_v24  ;;  %v12879_v24 = vld [vmem:[#allocation109_spill] sm:$0xff] }
 0x7d5   :  { %v8989_v8 = vpop.eup %8988  ;;  %v5156_v9 = vmul.f32 %v8987_v63, %v5150_v47  ;;  %v12880_v63 = vld [vmem:[#allocation108_spill] sm:$0xff] }
 0x7d6   :  { %v5184_v5 = vadd.f32 %v8985_v15, %v5183_v18  ;;  %v5201_v25 = vmul.f32 %v8989_v8, %v5199_v32  ;;  %vm5206_vm4 = vweird.f32 %v8989_v8 }
 0x7d7   :  { %v5224_v23 = vpack.c.bf16 %v5156_v9, %v5156_v9  ;;  %vm5207_vm6 = vmor %vm5205_vm5, %vm5206_vm4  ;;  %v12881_v9 = vld [vmem:[#allocation64_spill] sm:$0xff] }
 0x7d8   :  { %v5188_v2 = vsel %vm5187_vm2, %v8985_v15, %v5184_v5  ;;  %v5202_v36 = vsub.f32 1.0, %v5201_v25  ;;  %v12883_v5 = vld [vmem:[#allocation66_spill] sm:$0xff] }
 0x7d9   :  { %v5193_v33 = vsel %vm5190_vm3, %v5192_v0, %v5188_v2  ;;  %5233 = vmatmul.bf16.vlgmr.msra.gmra.mxu0 %v5224_v23  ;;  %5246 = vmatmul.bf16.vlgmr.msra.gmra.mxu1 %v5224_v23  ;;  %v12884_v25 = vld [vmem:[#allocation70_spill] sm:$0xff]  ;;  %v12885_v0 = vld [vmem:[#allocation97_spill] sm:$0xff] }
 0x7da   :  { %v5215_v17 = vmul.f32 0.0, %v5193_v33  ;;  %v5203_v11 = vmul.f32 %v8989_v8, %v5202_v36  ;;  %5259 = vmatmul.bf16.vlgmr.msra.gmra.mxu2 %v5224_v23  ;;  %5272 = vmatmul.bf16.vlgmr.msra.gmra.mxu3 %v5224_v23  ;;  %v12886_v23 = vld [vmem:[#allocation99_spill] sm:$0xff]  ;;  %v12887_v2 = vld [vmem:[#allocation18_spill] sm:$0xff]  ;;  %v12889_v33 = vld [vmem:[#allocation20_spill] sm:$0xff] }
 0x7db   :  { %5473 = vmatpush.bf16.msra.mxu0 %v12878_v54  ;;  %5486 = vmatpush.bf16.msra.mxu1 %v12834_v21  ;;  %v12888_v36 = vld [vmem:[#allocation35_spill] sm:$0xff] }
 0x7dc   :  { %v11444_v10 = vadd.f32 %v11429_v56, %v5215_v17  ;;  %5499 = vmatpush.bf16.msra.mxu2 %v10851_v16  ;;  %5512 = vmatpush.bf16.msra.mxu3 %v12835_v57  ;;  %v5204_v15 = vadd.f32 %v8989_v8, %v5203_v11  ;;  %v12890_v17 = vld [vmem:[#allocation40_spill] sm:$0xff] }
 0x7dd   :  { %v12891_v11 = vld [vmem:[#allocation72_spill] sm:$0xff] }
 0x7de   :  { %8990 = vtanh.f32 %v11444_v10  ;;  %v5208_v56 = vsel %vm5207_vm6, %v8989_v8, %v5204_v15  ;;  %v12882_v8 = vld [vmem:[#allocation106_spill] sm:$0xff] }
 0x7df   :  { %5474 = vmatpush.bf16.msra.mxu0 %v12879_v24  ;;  %5487 = vmatpush.bf16.msra.mxu1 %v12839_v49  ;;  %v5213_v44 = vsel %vm5210_vm7, %v5212_v62, %v5208_v56  ;;  %v12892_v15 = vld [vmem:[#allocation110_spill] sm:$0xff]  ;;  %v12895_v56 = vld [vmem:[#allocation95_spill] sm:$0xff] }
 0x7e0   :  { %5500 = vmatpush.bf16.msra.mxu2 %v10867_v46  ;;  %5513 = vmatpush.bf16.msra.mxu3 %v12840_v35  ;;  %v12896_v62 = vld [vmem:[#allocation79_spill] sm:$0xff] }
 0x7e3   :  { %5475 = vmatpush.bf16.msra.mxu0 %v12880_v63  ;;  %5488 = vmatpush.bf16.msra.mxu1 %v12841_v53 }
 0x7e4   :  { %v8991_v18 = vpop.eup %8990  ;;  %5501 = vmatpush.bf16.msra.mxu2 %v10878_v1  ;;  %5514 = vmatpush.bf16.msra.mxu3 %v11026_v59 }
 0x7e5   :  { %v5219_v32 = vmul.f32 %v8991_v18, %v5213_v44  ;;  %v12897_v18 = vld [vmem:[#allocation45_spill] sm:$0xff]  ;;  %v12898_v44 = vld [vmem:[#allocation59_spill] sm:$0xff] }
 0x7e7   :  { %v5285_v47 = vpack.c.bf16 %v5219_v32, %v5219_v32  ;;  %5476 = vmatpush.bf16.msra.mxu0 %v12881_v9  ;;  %5489 = vmatpush.bf16.msra.mxu1 %v12843_v26  ;;  %v12899_v32 = vld [vmem:[#allocation19_spill] sm:$0xff] }
 0x7e8   :  { %5502 = vmatpush.bf16.msra.mxu2 %v10891_v30  ;;  %5515 = vmatpush.bf16.msra.mxu3 %v11057_v4 }
 0x7e9   :  { %5294 = vmatmul.bf16.vlgmr.msrb.gmra.mxu0 %v5285_v47  ;;  %5307 = vmatmul.bf16.vlgmr.msrb.gmra.mxu1 %v5285_v47 }
 0x7ea   :  { %5320 = vmatmul.bf16.vlgmr.msrb.gmra.mxu2 %v5285_v47  ;;  %5333 = vmatmul.bf16.vlgmr.msrb.gmra.mxu3 %v5285_v47  ;;  %v12900_v47 = vld [vmem:[#allocation84_spill] sm:$0xff] }
 0x7eb   :  { %5477 = vmatpush.bf16.msra.mxu0 %v12882_v8  ;;  %5490 = vmatpush.bf16.msra.mxu1 %v11064_v38 }
 0x7ec   :  { %5503 = vmatpush.bf16.msra.mxu2 %v10906_v48  ;;  %5516 = vmatpush.bf16.msra.mxu3 %v11077_v29 }
 0x7ef   :  { %5478 = vmatpush.bf16.msra.mxu0 %v12883_v5  ;;  %5491 = vmatpush.bf16.msra.mxu1 %v12849_v45 }
 0x7f0   :  { %5504 = vmatpush.bf16.msra.mxu2 %v10919_v13  ;;  %5517 = vmatpush.bf16.msra.mxu3 %v12850_v58 }
 0x7f3   :  { %5479 = vmatpush.bf16.msra.mxu0 %v12884_v25  ;;  %5492 = vmatpush.bf16.msra.mxu1 %v11104_v60 }
 0x7f4   :  { %5505 = vmatpush.bf16.msra.mxu2 %v10932_v27  ;;  %5518 = vmatpush.bf16.msra.mxu3 %v11109_v31 }
 0x7f7   :  { %5480 = vmatpush.bf16.msra.mxu0 %v12885_v0  ;;  %5493 = vmatpush.bf16.msra.mxu1 %v11123_v55 }
 0x7f8   :  { %5506 = vmatpush.bf16.msra.mxu2 %v10947_v34  ;;  %5519 = vmatpush.bf16.msra.mxu3 %v11126_v51 }
 0x7fb   :  { %5534 = vmatpush.bf16.msrb.mxu0 %v12886_v23  ;;  %5547 = vmatpush.bf16.msrb.mxu1 %v12854_v40 }
 0x7fc   :  { %5560 = vmatpush.bf16.msrb.mxu2 %v11019_v20  ;;  %5573 = vmatpush.bf16.msrb.mxu3 %v12855_v61 }
 0x7ff   :  { %5535 = vmatpush.bf16.msrb.mxu0 %v12887_v2  ;;  %5548 = vmatpush.bf16.msrb.mxu1 %v11145_v6 }
 0x800   :  { %5561 = vmatpush.bf16.msrb.mxu2 %v12888_v36  ;;  %5574 = vmatpush.bf16.msrb.mxu3 %v11150_v37 }
 0x803   :  { %5536 = vmatpush.bf16.msrb.mxu0 %v12889_v33  ;;  %5549 = vmatpush.bf16.msrb.mxu1 %v11157_v3  ;;  %v12917_v3 = vld [vmem:[#allocation74_spill] sm:$0xff] }
 0x804   :  { %5562 = vmatpush.bf16.msrb.mxu2 %v12890_v17  ;;  %5575 = vmatpush.bf16.msrb.mxu3 %v11162_v43 }
 0x807   :  { %5537 = vmatpush.bf16.msrb.mxu0 %v12891_v11  ;;  %5550 = vmatpush.bf16.msrb.mxu1 %v12892_v15  ;;  %v12916_v15 = vld [vmem:[#allocation67_spill] sm:$0xff] }
 0x808   :  { %5563 = vmatpush.bf16.msrb.mxu2 %v12893_v52  ;;  %5576 = vmatpush.bf16.msrb.mxu3 %v12894_v7  ;;  %v12914_v7 = vld [vmem:[#allocation112_spill] sm:$0xff] }
 0x809   :  { %v12915_v52 = vld [vmem:[#allocation104_spill] sm:$0xff] }
 0x80b   :  { %5538 = vmatpush.bf16.msrb.mxu0 %v12895_v56  ;;  %5551 = vmatpush.bf16.msrb.mxu1 %v12896_v62  ;;  %v12907_v62 = vld [vmem:[#allocation28_spill] sm:$0xff] }
 0x80c   :  { %5564 = vmatpush.bf16.msrb.mxu2 %v12897_v18  ;;  %5577 = vmatpush.bf16.msrb.mxu3 %v12898_v44  ;;  %v12908_v18 = vld [vmem:[#allocation53_spill] sm:$0xff] }
 0x80d   :  { %v12909_v44 = vld [vmem:[#allocation81_spill] sm:$0xff] }
 0x80f   :  { %5539 = vmatpush.bf16.msrb.mxu0 %v12899_v32  ;;  %5552 = vmatpush.bf16.msrb.mxu1 %v12900_v47  ;;  %v12910_v32 = vld [vmem:[#allocation16_spill] sm:$0xff] }
 0x810   :  { %5565 = vmatpush.bf16.msrb.mxu2 %v12901_v22  ;;  %5578 = vmatpush.bf16.msrb.mxu3 %v12902_v50  ;;  %v12911_v47 = vld [vmem:[#allocation60_spill] sm:$0xff]  ;;  %v12912_v22 = vld [vmem:[#allocation113_spill] sm:$0xff]  ;;  %v12913_v50 = vld [vmem:[#allocation63_spill] sm:$0xff] }
 0x811   :  { %v4073_v56 = vadd.f32 %v12912_v22, %v12911_v47 }
 0x813   :  { %5540 = vmatpush.bf16.msrb.mxu0 %v12903_v41  ;;  %5553 = vmatpush.bf16.msrb.mxu1 %v12904_v28  ;;  %v4131_v41 = vadd.f32 %v12914_v7, %v12913_v50  ;;  %v4102_v28 = vadd.f32 %v12915_v52, %v4073_v56 }
 0x814   :  { %5566 = vmatpush.bf16.msrb.mxu2 %v12905_v42  ;;  %5579 = vmatpush.bf16.msrb.mxu3 %v12906_v14 }
 0x815   :  { %v4160_v42 = vadd.f32 %v12916_v15, %v4131_v41  ;;  %v12919_v15 = vld [vmem:[#allocation130_spill] sm:$0xff] }
 0x817   :  { %5541 = vmatpush.bf16.msrb.mxu0 %v12907_v62  ;;  %5554 = vmatpush.bf16.msrb.mxu1 %v12908_v18 }
 0x818   :  { %5567 = vmatpush.bf16.msrb.mxu2 %v12909_v44  ;;  %5580 = vmatpush.bf16.msrb.mxu3 %v12910_v32 }
 0x856   :  { %v5234_v11 = vpop.f32.mrf.mxu0  ;;  %v5247_v14 = vpop.f32.mrf.mxu1 }
 0x857   :  { %v5277_v43 = vadd.f32 %v5234_v11, %v4102_v28  ;;  %v5278_v62 = vadd.f32 %v5247_v14, %v4160_v42 }
 0x859   :  { %v8329_v17 = vmul.f32 -1.442695, %v5277_v43  ;;  %v8330_v18 = vmul.f32 -1.442695, %v5278_v62 }
 0x85b   :  { %8992 = vpow2.f32 %v8329_v17  ;;  %v12918_v17 = vld [vmem:[#allocation129_spill] sm:$0xff] }
 0x85c   :  { %8994 = vpow2.f32 %v8330_v18 }
 0x85d   :  { %v5260_v44 = vpop.f32.mrf.mxu2  ;;  %v5273_v32 = vpop.f32.mrf.mxu3 }
 0x85e   :  { %v5280_v33 = vadd.f32 %v5273_v32, %v12917_v3  ;;  %v5236_v22 = vpop.f32.mrf.mxu0  ;;  %v5249_v47 = vpop.f32.mrf.mxu1  ;;  %v12920_v3 = vld [vmem:[#allocation46_spill] sm:$0xff] }
 0x85f   :  { %v5279_v18 = vadd.f32 %v5260_v44, %v12920_v3 }
 0x860   :  { %v8331_v37 = vmul.f32 -1.442695, %v5280_v33 }
 0x861   :  { %v8993_v7 = vpop.eup %8992 }
 0x862   :  { %v8995_v50 = vpop.eup %8994  ;;  %v5345_v52 = vadd.f32 1.0, %v8993_v7  ;;  %8996 = vpow2.f32 %v8331_v37 }
 0x863   :  { %v5364_v41 = vadd.f32 1.0, %v8995_v50 }
 0x864   :  { %8998 = vrcp.f32 %v5345_v52  ;;  %v5357_v36 = vand.u32 2147483648, %v5345_v52  ;;  %vm5351_vm11 = vweird.f32 %v5345_v52 }
 0x865   :  { %9000 = vrcp.f32 %v5364_v41  ;;  %v5262_v28 = vpop.f32.mrf.mxu2  ;;  %v5275_v14 = vpop.f32.mrf.mxu3  ;;  %vm5370_vm10 = vweird.f32 %v5364_v41 }
 0x866   :  { %v5295_v43 = vpop.f32.mrf.mxu0  ;;  %v5308_v42 = vpop.f32.mrf.mxu1  ;;  %v5355_v14 = vand.u32 2147483647, %v5345_v52 }
 0x867   :  { %v5338_v11 = vadd.f32 %v5295_v43, %v12918_v17  ;;  %v5339_v56 = vadd.f32 %v5308_v42, %v12919_v15  ;;  %v5376_v15 = vand.u32 2147483648, %v5364_v41 }
 0x868   :  { %v8997_v62 = vpop.eup %8996  ;;  %vm5356_vm13 = vcmp.eq.f32.partialorder %v5355_v14, 8.507059e+37 }
 0x869   :  { %v11519_v32 = vadd.f32 1.0, %v8997_v62  ;;  %v8332_v33 = vmul.f32 -1.442695, %v5338_v11  ;;  %v8333_v22 = vmul.f32 -1.442695, %v5339_v56 }
 0x86a   :  { %v8999_v47 = vpop.eup %8998  ;;  %v5374_v56 = vand.u32 2147483647, %v5364_v41 }
 0x86b   :  { %v9001_v37 = vpop.eup %9000  ;;  %v5347_v50 = vmul.f32 %v8999_v47, %v5345_v52  ;;  %9002 = vrcp.f32 %v11519_v32  ;;  %vm5352_vm8 = vweird.f32 %v8999_v47  ;;  %vm5390_vm1 = vweird.f32 %v11519_v32 }
 0x86c   :  { %v5366_v7 = vmul.f32 %v9001_v37, %v5364_v41  ;;  %9004 = vtanh.f32 %v5279_v18  ;;  %vm5371_vm9 = vweird.f32 %v9001_v37  ;;  %vm5353_vm12 = vmor %vm5351_vm11, %vm5352_vm8  ;;  %vm5375_vm15 = vcmp.eq.f32.partialorder %v5374_v56, 8.507059e+37 }
 0x86d   :  { %v5348_v28 = vsub.f32 1.0, %v5347_v50  ;;  %9006 = vpow2.f32 %v8332_v33  ;;  %v5321_v43 = vpop.f32.mrf.mxu2  ;;  %v5334_v17 = vpop.f32.mrf.mxu3  ;;  %vm5372_vm14 = vmor %vm5370_vm10, %vm5371_vm9 }
 0x86e   :  { %v5367_v42 = vsub.f32 1.0, %v5366_v7  ;;  %9008 = vpow2.f32 %v8333_v22  ;;  %v5297_v44 = vpop.f32.mrf.mxu0  ;;  %v5310_v62 = vpop.f32.mrf.mxu1  ;;  %v5341_v3 = vadd.f32 %v5334_v17, %v11426_v19  ;;  %v5358_v7 = vor.u32 1.1754944e-38, %v5357_v36 }
 0x86f   :  { %v5349_v11 = vmul.f32 %v8999_v47, %v5348_v28  ;;  %v5377_v28 = vor.u32 1.1754944e-38, %v5376_v15 }
 0x870   :  { %v5368_v6 = vmul.f32 %v9001_v37, %v5367_v42  ;;  %v8334_v33 = vmul.f32 -1.442695, %v5341_v3 }
 0x871   :  { %v9003_v2 = vpop.eup %9002  ;;  %v5350_v18 = vadd.f32 %v8999_v47, %v5349_v11 }
 0x872   :  { %v9005_v50 = vpop.eup %9004  ;;  %v5369_v61 = vadd.f32 %v9001_v37, %v5368_v6  ;;  %v5386_v22 = vmul.f32 %v9003_v2, %v11519_v32  ;;  %9010 = vpow2.f32 %v8334_v33  ;;  %vm5391_vm0 = vweird.f32 %v9003_v2 }
 0x873   :  { %v9007_v44 = vpop.eup %9006  ;;  %v5354_v62 = vsel %vm5353_vm12, %v8999_v47, %v5350_v18  ;;  %vm5392_vm2 = vmor %vm5390_vm1, %vm5391_vm0 }
 0x874   :  { %v9009_v19 = vpop.eup %9008  ;;  %v5359_v17 = vsel %vm5356_vm13, %v5358_v7, %v5354_v62  ;;  %v5373_v42 = vsel %vm5372_vm14, %v9001_v37, %v5369_v61  ;;  %v5387_v41 = vsub.f32 1.0, %v5386_v22  ;;  %v5408_v11 = vadd.f32 1.0, %v9007_v44 }
 0x875   :  { %v5378_v52 = vsel %vm5375_vm15, %v5377_v28, %v5373_v42  ;;  %v5401_v3 = vmul.f32 %v9005_v50, %v5359_v17  ;;  %v5427_v20 = vadd.f32 1.0, %v9009_v19  ;;  %v5323_v40 = vpop.f32.mrf.mxu2  ;;  %v5336_v14 = vpop.f32.mrf.mxu3  ;;  %v5396_v61 = vand.u32 2147483648, %v11519_v32 }
 0x876   :  { %v5400_v6 = vmul.f32 %v5378_v52, %v11438_v12  ;;  %v5388_v36 = vmul.f32 %v9003_v2, %v5387_v41  ;;  %9012 = vrcp.f32 %v5408_v11  ;;  %v5394_v40 = vand.u32 2147483647, %v11519_v32 }
 0x877   :  { %9014 = vrcp.f32 %v5427_v20  ;;  %v5340_v12 = vadd.f32 %v5321_v43, %v11421_v39  ;;  %v5397_v7 = vor.u32 1.1754944e-38, %v5396_v61  ;;  %v5439_v19 = vand.u32 2147483648, %v5427_v20 }
 0x878   :  { %v11525_v23 = vadd.f32 %v5401_v3, %v5400_v6  ;;  %v9011_v47 = vpop.eup %9010  ;;  %v5389_v15 = vadd.f32 %v9003_v2, %v5388_v36  ;;  %vm5395_vm3 = vcmp.eq.f32.partialorder %v5394_v40, 8.507059e+37  ;;  %v5420_v17 = vand.u32 2147483648, %v5408_v11 }
 0x879   :  { %v11529_v37 = vadd.f32 1.0, %v9011_v47  ;;  %v5418_v39 = vand.u32 2147483647, %v5408_v11  ;;  %v5437_v3 = vand.u32 2147483647, %v5427_v20  ;;  %vm5414_vm6 = vweird.f32 %v5408_v11 }
 0x87a   :  { %9016 = vtanh.f32 %v11525_v23  ;;  %v5393_v50 = vsel %vm5392_vm2, %v9003_v2, %v5389_v15  ;;  %vm5433_vm7 = vweird.f32 %v5427_v20  ;;  %v5421_v36 = vor.u32 1.1754944e-38, %v5420_v17 }
 0x87b   :  { %9018 = vrcp.f32 %v11529_v37  ;;  %v5398_v42 = vsel %vm5395_vm3, %v5397_v7, %v5393_v50  ;;  %v5440_v61 = vor.u32 1.1754944e-38, %v5439_v19  ;;  %vm5419_vm10 = vcmp.eq.f32.partialorder %v5418_v39, 8.507059e+37  ;;  %v12922_v39 = vld [vmem:[#allocation89_spill] sm:$0xff] }
 0x87c   :  { %v9013_v56 = vpop.eup %9012  ;;  %9020 = vtanh.f32 %v5340_v12  ;;  %vm5438_vm11 = vcmp.eq.f32.partialorder %v5437_v3, 8.507059e+37  ;;  %vm5453_vm13 = vweird.f32 %v11529_v37  ;;  %v12926_v3 = vld [vmem:[#allocation86_spill] sm:$0xff] }
 0x87d   :  { %v9015_v18 = vpop.eup %9014  ;;  %v5410_v33 = vmul.f32 %v9013_v56, %v5408_v11  ;;  %vm5415_vm4 = vweird.f32 %v9013_v56 }
 0x87e   :  { %v5429_v22 = vmul.f32 %v9015_v18, %v5427_v20  ;;  %vm5434_vm5 = vweird.f32 %v9015_v18  ;;  %vm5416_vm8 = vmor %vm5414_vm6, %vm5415_vm4 }
 0x87f   :  { %v5411_v44 = vsub.f32 1.0, %v5410_v33  ;;  %vm5435_vm9 = vmor %vm5433_vm7, %vm5434_vm5 }
 0x880   :  { %v9017_v28 = vpop.eup %9016  ;;  %v5430_v62 = vsub.f32 1.0, %v5429_v22 }
 0x881   :  { %v5412_v32 = vmul.f32 %v9013_v56, %v5411_v44  ;;  %v5404_v43 = vmul.f32 %v9017_v28, %v5398_v42  ;;  %v9019_v41 = vpop.eup %9018  ;;  %v5459_v44 = vand.u32 2147483648, %v11529_v37 }
 0x882   :  { %v5431_v52 = vmul.f32 %v9015_v18, %v5430_v62  ;;  %v5449_v2 = vmul.f32 %v9019_v41, %v11529_v37  ;;  %v9021_v15 = vpop.eup %9020  ;;  %vm5454_vm12 = vweird.f32 %v9019_v41 }
 0x883   :  { %v5413_v14 = vadd.f32 %v9013_v56, %v5412_v32  ;;  %v5472_v6 = vpack.c.bf16 %v5404_v43, %v5404_v43  ;;  %vm5455_vm14 = vmor %vm5453_vm13, %vm5454_vm12  ;;  %v5460_v62 = vor.u32 1.1754944e-38, %v5459_v44  ;;  %v12921_v32 = vld [vmem:[#allocation99_spill] sm:$0xff]  ;;  %v12923_v43 = vld [vmem:[#allocation33_spill] sm:$0xff] }
 0x884   :  { %v5432_v47 = vadd.f32 %v9015_v18, %v5431_v52  ;;  %v5450_v12 = vsub.f32 1.0, %v5449_v2  ;;  %v12925_v52 = vld [vmem:[#allocation18_spill] sm:$0xff]  ;;  %v12943_v44 = vld [vmem:[#allocation49_spill] sm:$0xff] }
 0x885   :  { %v5417_v40 = vsel %vm5416_vm8, %v9013_v56, %v5413_v14  ;;  %5481 = vmatmul.bf16.vlgmr.msra.gmra.mxu0 %v5472_v6  ;;  %5494 = vmatmul.bf16.vlgmr.msra.gmra.mxu1 %v5472_v6  ;;  %v12927_v14 = vld [vmem:[#allocation35_spill] sm:$0xff]  ;;  %v12928_v2 = vld [vmem:[#allocation114_spill] sm:$0xff] }
 0x886   :  { %v5422_v33 = vsel %vm5419_vm10, %v5421_v36, %v5417_v40  ;;  %v5436_v50 = vsel %vm5435_vm9, %v9015_v18, %v5432_v47  ;;  %5507 = vmatmul.bf16.vlgmr.msra.gmra.mxu2 %v5472_v6  ;;  %5520 = vmatmul.bf16.vlgmr.msra.gmra.mxu3 %v5472_v6  ;;  %v5451_v22 = vmul.f32 %v9019_v41, %v5450_v12  ;;  %v12929_v6 = vld [vmem:[#allocation20_spill] sm:$0xff]  ;;  %v12930_v36 = vld [vmem:[#allocation15_spill] sm:$0xff]  ;;  %v12934_v40 = vld [vmem:[#allocation110_spill] sm:$0xff] }
 0x887   :  { %v5441_v11 = vsel %vm5438_vm11, %v5440_v61, %v5436_v50  ;;  %v5464_v7 = vmul.f32 %v9021_v15, %v5422_v33  ;;  %5721 = vmatpush.bf16.msra.mxu0 %v12878_v54  ;;  %5734 = vmatpush.bf16.msra.mxu1 %v12834_v21  ;;  %v12931_v47 = vld [vmem:[#allocation40_spill] sm:$0xff]  ;;  %v12932_v15 = vld [vmem:[#allocation50_spill] sm:$0xff]  ;;  %v12937_v50 = vld [vmem:[#allocation95_spill] sm:$0xff] }
 0x888   :  { %v5463_v20 = vmul.f32 %v5441_v11, %v11444_v10  ;;  %5747 = vmatpush.bf16.msra.mxu2 %v10851_v16  ;;  %5760 = vmatpush.bf16.msra.mxu3 %v12835_v57  ;;  %v5452_v18 = vadd.f32 %v9019_v41, %v5451_v22  ;;  %v5457_v10 = vand.u32 2147483647, %v11529_v37  ;;  %v12933_v61 = vld [vmem:[#allocation72_spill] sm:$0xff]  ;;  %v12935_v12 = vld [vmem:[#allocation42_spill] sm:$0xff]  ;;  %v12938_v11 = vld [vmem:[#allocation79_spill] sm:$0xff] }
 0x889   :  { %v12936_v33 = vld [vmem:[#allocation54_spill] sm:$0xff]  ;;  %v12940_v22 = vld [vmem:[#allocation59_spill] sm:$0xff] }
 0x88a   :  { %v11541_v56 = vadd.f32 %v5464_v7, %v5463_v20  ;;  %v5456_v28 = vsel %vm5455_vm14, %v9019_v41, %v5452_v18  ;;  %vm5458_vm15 = vcmp.eq.f32.partialorder %v5457_v10, 8.507059e+37  ;;  %v12924_v41 = vld [vmem:[#allocation91_spill] sm:$0xff]  ;;  %v12939_v7 = vld [vmem:[#allocation45_spill] sm:$0xff]  ;;  %v12942_v18 = vld [vmem:[#allocation84_spill] sm:$0xff] }
 0x88b   :  { %5722 = vmatpush.bf16.msra.mxu0 %v12879_v24  ;;  %5735 = vmatpush.bf16.msra.mxu1 %v12839_v49  ;;  %v5461_v17 = vsel %vm5458_vm15, %v5460_v62, %v5456_v28  ;;  %v12941_v20 = vld [vmem:[#allocation19_spill] sm:$0xff]  ;;  %v12944_v10 = vld [vmem:[#allocation85_spill] sm:$0xff]  ;;  %v12945_v28 = vld [vmem:[#allocation24_spill] sm:$0xff] }
 0x88c   :  { %9022 = vtanh.f32 %v11541_v56  ;;  %5748 = vmatpush.bf16.msra.mxu2 %v10867_v46  ;;  %5761 = vmatpush.bf16.msra.mxu3 %v12840_v35  ;;  %v12946_v62 = vld [vmem:[#allocation90_spill] sm:$0xff] }
 0x88f   :  { %5723 = vmatpush.bf16.msra.mxu0 %v12880_v63  ;;  %5736 = vmatpush.bf16.msra.mxu1 %v12841_v53 }
 0x890   :  { %5749 = vmatpush.bf16.msra.mxu2 %v10878_v1  ;;  %5762 = vmatpush.bf16.msra.mxu3 %v11026_v59 }
 0x892   :  { %v9023_v19 = vpop.eup %9022 }
 0x893   :  { %v5467_v42 = vmul.f32 %v9023_v19, %v5461_v17  ;;  %5724 = vmatpush.bf16.msra.mxu0 %v12881_v9  ;;  %5737 = vmatpush.bf16.msra.mxu1 %v12843_v26  ;;  %v12947_v19 = vld [vmem:[#allocation75_spill] sm:$0xff]  ;;  %v12948_v17 = vld [vmem:[#allocation88_spill] sm:$0xff] }
 0x894   :  { %5750 = vmatpush.bf16.msra.mxu2 %v10891_v30  ;;  %5763 = vmatpush.bf16.msra.mxu3 %v11057_v4 }
 0x895   :  { %v5533_v37 = vpack.c.bf16 %v5467_v42, %v5467_v42  ;;  %v12949_v42 = vld [vmem:[#allocation28_spill] sm:$0xff] }
 0x897   :  { %5542 = vmatmul.bf16.vlgmr.msrb.gmra.mxu0 %v5533_v37  ;;  %5555 = vmatmul.bf16.vlgmr.msrb.gmra.mxu1 %v5533_v37 }
 0x898   :  { %5568 = vmatmul.bf16.vlgmr.msrb.gmra.mxu2 %v5533_v37  ;;  %5581 = vmatmul.bf16.vlgmr.msrb.gmra.mxu3 %v5533_v37  ;;  %v12950_v37 = vld [vmem:[#allocation53_spill] sm:$0xff] }
 0x899   :  { %5725 = vmatpush.bf16.msra.mxu0 %v12882_v8  ;;  %5738 = vmatpush.bf16.msra.mxu1 %v11064_v38 }
 0x89a   :  { %5751 = vmatpush.bf16.msra.mxu2 %v10906_v48  ;;  %5764 = vmatpush.bf16.msra.mxu3 %v11077_v29 }
 0x89d   :  { %5726 = vmatpush.bf16.msra.mxu0 %v12883_v5  ;;  %5739 = vmatpush.bf16.msra.mxu1 %v12849_v45 }
 0x89e   :  { %5752 = vmatpush.bf16.msra.mxu2 %v10919_v13  ;;  %5765 = vmatpush.bf16.msra.mxu3 %v12850_v58 }
 0x8a1   :  { %5727 = vmatpush.bf16.msra.mxu0 %v12884_v25  ;;  %5740 = vmatpush.bf16.msra.mxu1 %v11104_v60 }
 0x8a2   :  { %5753 = vmatpush.bf16.msra.mxu2 %v10932_v27  ;;  %5766 = vmatpush.bf16.msra.mxu3 %v11109_v31 }
 0x8a5   :  { %5728 = vmatpush.bf16.msra.mxu0 %v12885_v0  ;;  %5741 = vmatpush.bf16.msra.mxu1 %v11123_v55 }
 0x8a6   :  { %5754 = vmatpush.bf16.msra.mxu2 %v10947_v34  ;;  %5767 = vmatpush.bf16.msra.mxu3 %v11126_v51 }
 0x8a9   :  { %5782 = vmatpush.bf16.msrb.mxu0 %v12921_v32  ;;  %5795 = vmatpush.bf16.msrb.mxu1 %v12922_v39 }
 0x8aa   :  { %5808 = vmatpush.bf16.msrb.mxu2 %v12923_v43  ;;  %5821 = vmatpush.bf16.msrb.mxu3 %v12924_v41 }
 0x8ad   :  { %5783 = vmatpush.bf16.msrb.mxu0 %v12925_v52  ;;  %5796 = vmatpush.bf16.msrb.mxu1 %v12926_v3 }
 0x8ae   :  { %5809 = vmatpush.bf16.msrb.mxu2 %v12927_v14  ;;  %5822 = vmatpush.bf16.msrb.mxu3 %v12928_v2  ;;  %v12964_v14 = vld [vmem:[#allocation126_spill] sm:$0xff] }
 0x8b1   :  { %5784 = vmatpush.bf16.msrb.mxu0 %v12929_v6  ;;  %5797 = vmatpush.bf16.msrb.mxu1 %v12930_v36 }
 0x8b2   :  { %5810 = vmatpush.bf16.msrb.mxu2 %v12931_v47  ;;  %5823 = vmatpush.bf16.msrb.mxu3 %v12932_v15  ;;  %v12960_v47 = vld [vmem:[#allocation127_spill] sm:$0xff] }
 0x8b5   :  { %5785 = vmatpush.bf16.msrb.mxu0 %v12933_v61  ;;  %5798 = vmatpush.bf16.msrb.mxu1 %v12934_v40 }
 0x8b6   :  { %5811 = vmatpush.bf16.msrb.mxu2 %v12935_v12  ;;  %5824 = vmatpush.bf16.msrb.mxu3 %v12936_v33  ;;  %v12955_v33 = vld [vmem:[#allocation87_spill] sm:$0xff] }
 0x8b9   :  { %5786 = vmatpush.bf16.msrb.mxu0 %v12937_v50  ;;  %5799 = vmatpush.bf16.msrb.mxu1 %v12938_v11  ;;  %v12954_v11 = vld [vmem:[#allocation101_spill] sm:$0xff] }
 0x8ba   :  { %5812 = vmatpush.bf16.msrb.mxu2 %v12939_v7  ;;  %5825 = vmatpush.bf16.msrb.mxu3 %v12940_v22  ;;  %v12951_v22 = vld [vmem:[#allocation81_spill] sm:$0xff]  ;;  %v12953_v7 = vld [vmem:[#allocation68_spill] sm:$0xff] }
 0x8bd   :  { %5787 = vmatpush.bf16.msrb.mxu0 %v12941_v20  ;;  %5800 = vmatpush.bf16.msrb.mxu1 %v12942_v18  ;;  %v12952_v20 = vld [vmem:[#allocation16_spill] sm:$0xff] }
 0x8be   :  { %5813 = vmatpush.bf16.msrb.mxu2 %v12943_v44  ;;  %5826 = vmatpush.bf16.msrb.mxu3 %v12944_v10 }
 0x8c1   :  { %5788 = vmatpush.bf16.msrb.mxu0 %v12945_v28  ;;  %5801 = vmatpush.bf16.msrb.mxu1 %v12946_v62 }
 0x8c2   :  { %5814 = vmatpush.bf16.msrb.mxu2 %v12947_v19  ;;  %5827 = vmatpush.bf16.msrb.mxu3 %v12948_v17 }
 0x8c5   :  { %5789 = vmatpush.bf16.msrb.mxu0 %v12949_v42  ;;  %5802 = vmatpush.bf16.msrb.mxu1 %v12950_v37 }
 0x8c6   :  { %5815 = vmatpush.bf16.msrb.mxu2 %v12951_v22  ;;  %5828 = vmatpush.bf16.msrb.mxu3 %v12952_v20 }
 0x902   :  { %v5482_v18 = vpop.f32.mrf.mxu0  ;;  %v5495_v44 = vpop.f32.mrf.mxu1 }
 0x903   :  { %v5525_v10 = vadd.f32 %v5482_v18, %v12953_v7  ;;  %v5526_v28 = vadd.f32 %v5495_v44, %v12954_v11  ;;  %v12956_v7 = vld [vmem:[#allocation30_spill] sm:$0xff]  ;;  %v12957_v18 = vld [vmem:[#allocation77_spill] sm:$0xff] }
 0x904   :  { %v4315_v11 = vadd.f32 %v12957_v18, %v12956_v7  ;;  %v12958_v44 = vld [vmem:[#allocation37_spill] sm:$0xff] }
 0x905   :  { %v8335_v50 = vmul.f32 -1.442695, %v5525_v10  ;;  %v8336_v62 = vmul.f32 -1.442695, %v5526_v28  ;;  %v12959_v10 = vld [vmem:[#allocation58_spill] sm:$0xff]  ;;  %v12963_v7 = vld [vmem:[#allocation117_spill] sm:$0xff] }
 0x907   :  { %9024 = vpow2.f32 %v8335_v50  ;;  %v4373_v50 = vadd.f32 %v12959_v10, %v12958_v44  ;;  %v4489_v10 = vadd.f32 %v12964_v14, %v12963_v7 }
 0x908   :  { %9026 = vpow2.f32 %v8336_v62 }
 0x909   :  { %v5508_v19 = vpop.f32.mrf.mxu2  ;;  %v5521_v17 = vpop.f32.mrf.mxu3 }
 0x90a   :  { %v5528_v42 = vadd.f32 %v5521_v17, %v12955_v33  ;;  %v5484_v12 = vpop.f32.mrf.mxu0  ;;  %v5497_v37 = vpop.f32.mrf.mxu1  ;;  %v4344_v33 = vadd.f32 %v12960_v47, %v4315_v11  ;;  %v12965_v47 = vld [vmem:[#allocation140_spill] sm:$0xff] }
 0x90b   :  { %v12961_v12 = vld [vmem:[#allocation128_spill] sm:$0xff]  ;;  %v4518_v11 = vadd.f32 %v12965_v47, %v4489_v10 }
 0x90c   :  { %v8337_v40 = vmul.f32 -1.442695, %v5528_v42  ;;  %v4402_v17 = vadd.f32 %v12961_v12, %v4373_v50 }
 0x90d   :  { %v9025_v22 = vpop.eup %9024 }
 0x90e   :  { %v9027_v61 = vpop.eup %9026  ;;  %v5593_v20 = vadd.f32 1.0, %v9025_v22  ;;  %9028 = vpow2.f32 %v8337_v40  ;;  %v12962_v22 = vld [vmem:[#allocation78_spill] sm:$0xff] }
 0x90f   :  { %v5612_v15 = vadd.f32 1.0, %v9027_v61  ;;  %v5527_v40 = vadd.f32 %v5508_v19, %v12962_v22 }
 0x910   :  { %9030 = vrcp.f32 %v5593_v20  ;;  %v5603_v22 = vand.u32 2147483647, %v5593_v20  ;;  %vm5599_vm2 = vweird.f32 %v5593_v20 }
 0x911   :  { %9032 = vrcp.f32 %v5612_v15  ;;  %v5510_v28 = vpop.f32.mrf.mxu2  ;;  %v5523_v62 = vpop.f32.mrf.mxu3  ;;  %vm5618_vm3 = vweird.f32 %v5612_v15 }
 0x912   :  { %vm5604_vm6 = vcmp.eq.f32.partialorder %v5603_v22, 8.507059e+37 }
 0x914   :  { %v9029_v42 = vpop.eup %9028  ;;  %v5543_v37 = vpop.f32.mrf.mxu0 }
 0x915   :  { %v5556_v36 = vpop.f32.mrf.mxu1  ;;  %v11617_v61 = vadd.f32 1.0, %v9029_v42  ;;  %v5586_v6 = vadd.f32 %v5543_v37, %v4344_v33  ;;  %v5624_v42 = vand.u32 2147483648, %v5612_v15  ;;  %v5605_v33 = vand.u32 2147483648, %v5593_v20 }
 0x916   :  { %v5587_v2 = vadd.f32 %v5556_v36, %v4402_v17  ;;  %v9031_v18 = vpop.eup %9030  ;;  %v5622_v17 = vand.u32 2147483647, %v5612_v15 }
 0x917   :  { %v9033_v44 = vpop.eup %9032  ;;  %v5595_v28 = vmul.f32 %v9031_v18, %v5593_v20  ;;  %9034 = vrcp.f32 %v11617_v61  ;;  %v8338_v12 = vmul.f32 -1.442695, %v5586_v6  ;;  %vm5600_vm0 = vweird.f32 %v9031_v18 }
 0x918   :  { %v5614_v50 = vmul.f32 %v9033_v44, %v5612_v15  ;;  %9036 = vtanh.f32 %v5527_v40  ;;  %v8339_v3 = vmul.f32 -1.442695, %v5587_v2  ;;  %vm5619_vm1 = vweird.f32 %v9033_v44  ;;  %vm5601_vm4 = vmor %vm5599_vm2, %vm5600_vm0 }
 0x919   :  { %v5596_v62 = vsub.f32 1.0, %v5595_v28  ;;  %9038 = vpow2.f32 %v8338_v12  ;;  %v5606_v2 = vor.u32 1.1754944e-38, %v5605_v33  ;;  %vm5620_vm5 = vmor %vm5618_vm3, %vm5619_vm1  ;;  %v5625_v12 = vor.u32 1.1754944e-38, %v5624_v42 }
 0x91a   :  { %v5615_v19 = vsub.f32 1.0, %v5614_v50  ;;  %9040 = vpow2.f32 %v8339_v3  ;;  %vm5623_vm7 = vcmp.eq.f32.partialorder %v5622_v17, 8.507059e+37  ;;  %v5644_v22 = vand.u32 2147483648, %v11617_v61 }
 0x91b   :  { %v5597_v36 = vmul.f32 %v9031_v18, %v5596_v62  ;;  %v5569_v14 = vpop.f32.mrf.mxu2  ;;  %v5582_v37 = vpop.f32.mrf.mxu3  ;;  %vm5638_vm9 = vweird.f32 %v11617_v61 }
 0x91c   :  { %v5616_v7 = vmul.f32 %v9033_v44, %v5615_v19  ;;  %v5589_v52 = vadd.f32 %v5582_v37, %v4518_v11  ;;  %v5545_v10 = vpop.f32.mrf.mxu0 }
 0x91d   :  { %v5558_v47 = vpop.f32.mrf.mxu1  ;;  %v9035_v28 = vpop.eup %9034  ;;  %v5598_v40 = vadd.f32 %v9031_v18, %v5597_v36 }
 0x91e   :  { %v5617_v6 = vadd.f32 %v9033_v44, %v5616_v7  ;;  %v5634_v50 = vmul.f32 %v9035_v28, %v11617_v61  ;;  %v9037_v62 = vpop.eup %9036  ;;  %v8340_v19 = vmul.f32 -1.442695, %v5589_v52  ;;  %vm5639_vm8 = vweird.f32 %v9035_v28  ;;  %v12967_v52 = vld [vmem:[#allocation124_spill] sm:$0xff] }
 0x91f   :  { %v5602_v41 = vsel %vm5601_vm4, %v9031_v18, %v5598_v40  ;;  %v9039_v10 = vpop.eup %9038  ;;  %v12968_v40 = vld [vmem:[#allocation139_spill] sm:$0xff]  ;;  %vm5640_vm10 = vmor %vm5638_vm9, %vm5639_vm8 }
 0x920   :  { %v5607_v3 = vsel %vm5604_vm6, %v5606_v2, %v5602_v41  ;;  %v5621_v11 = vsel %vm5620_vm5, %v9033_v44, %v5617_v6  ;;  %v5635_v37 = vsub.f32 1.0, %v5634_v50  ;;  %9042 = vpow2.f32 %v8340_v19  ;;  %v9041_v15 = vpop.eup %9040  ;;  %v12966_v41 = vld [vmem:[#allocation14_spill] sm:$0xff] }
 0x921   :  { %v5626_v36 = vsel %vm5623_vm7, %v5625_v12, %v5621_v11  ;;  %v5649_v20 = vmul.f32 %v9037_v62, %v5607_v3  ;;  %v5656_v47 = vadd.f32 1.0, %v9039_v10  ;;  %v11626_v43 = vadd.f32 1.0, %v9041_v15 }
 0x922   :  { %v5648_v33 = vmul.f32 %v5626_v36, %v11525_v23  ;;  %v5636_v7 = vmul.f32 %v9035_v28, %v5635_v37  ;;  %v4431_v44 = vadd.f32 %v12967_v52, %v12966_v41  ;;  %v5645_v12 = vor.u32 1.1754944e-38, %v5644_v22  ;;  %v12997_v41 = vld [vmem:[#allocation53_spill] sm:$0xff] }
 0x923   :  { %v5571_v39 = vpop.f32.mrf.mxu2  ;;  %v5584_v42 = vpop.f32.mrf.mxu3  ;;  %9044 = vrcp.f32 %v5656_v47  ;;  %v5685_v22 = vand.u32 2147483647, %v11626_v43  ;;  %vm5662_vm14 = vweird.f32 %v5656_v47  ;;  %vm5681_vm15 = vweird.f32 %v11626_v43 }
 0x924   :  { %v11628_v18 = vadd.f32 %v5649_v20, %v5648_v33  ;;  %9046 = vrcp.f32 %v11626_v43  ;;  %v5637_v23 = vadd.f32 %v9035_v28, %v5636_v7  ;;  %v5642_v39 = vand.u32 2147483647, %v11617_v61 }
 0x925   :  { %v4460_v2 = vadd.f32 %v12968_v40, %v4431_v44  ;;  %v5666_v33 = vand.u32 2147483647, %v5656_v47  ;;  %v5668_v7 = vand.u32 2147483648, %v5656_v47  ;;  %vm5686_vm3 = vcmp.eq.f32.partialorder %v5685_v22, 8.507059e+37  ;;  %v12973_v22 = vld [vmem:[#allocation86_spill] sm:$0xff] }
 0x926   :  { %9048 = vtanh.f32 %v11628_v18  ;;  %v9043_v17 = vpop.eup %9042  ;;  %v5641_v50 = vsel %vm5640_vm10, %v9035_v28, %v5637_v23  ;;  %vm5643_vm11 = vcmp.eq.f32.partialorder %v5642_v39, 8.507059e+37  ;;  %v5687_v28 = vand.u32 2147483648, %v11626_v43 }
 0x927   :  { %v11638_v6 = vadd.f32 1.0, %v9043_v17  ;;  %v5588_v19 = vadd.f32 %v5569_v14, %v4460_v2  ;;  %v5646_v36 = vsel %vm5643_vm11, %v5645_v12, %v5641_v50  ;;  %v5669_v39 = vor.u32 1.1754944e-38, %v5668_v7 }
 0x928   :  { %v5688_v2 = vor.u32 1.1754944e-38, %v5687_v28  ;;  %vm5667_vm2 = vcmp.eq.f32.partialorder %v5666_v33, 8.507059e+37 }
 0x929   :  { %v9045_v62 = vpop.eup %9044  ;;  %9050 = vrcp.f32 %v11638_v6  ;;  %vm5701_vm5 = vweird.f32 %v11638_v6 }
 0x92a   :  { %v9047_v3 = vpop.eup %9046  ;;  %v5658_v11 = vmul.f32 %v9045_v62, %v5656_v47  ;;  %9052 = vtanh.f32 %v5588_v19  ;;  %vm5663_vm12 = vweird.f32 %v9045_v62 }
 0x92b   :  { %v5677_v10 = vmul.f32 %v9047_v3, %v11626_v43  ;;  %vm5682_vm13 = vweird.f32 %v9047_v3  ;;  %vm5664_vm0 = vmor %vm5662_vm14, %vm5663_vm12 }
 0x92c   :  { %v9049_v37 = vpop.eup %9048  ;;  %v5659_v20 = vsub.f32 1.0, %v5658_v11  ;;  %vm5683_vm1 = vmor %vm5681_vm15, %vm5682_vm13 }
 0x92d   :  { %v5652_v61 = vmul.f32 %v9049_v37, %v5646_v36  ;;  %v5678_v15 = vsub.f32 1.0, %v5677_v10 }
 0x92e   :  { %v5660_v42 = vmul.f32 %v9045_v62, %v5659_v20  ;;  %v5707_v20 = vand.u32 2147483648, %v11638_v6 }
 0x92f   :  { %v5720_v14 = vpack.c.bf16 %v5652_v61, %v5652_v61  ;;  %v9051_v52 = vpop.eup %9050  ;;  %v5679_v44 = vmul.f32 %v9047_v3, %v5678_v15 }
 0x930   :  { %v5661_v23 = vadd.f32 %v9045_v62, %v5660_v42  ;;  %v5697_v17 = vmul.f32 %v9051_v52, %v11638_v6  ;;  %v9053_v47 = vpop.eup %9052  ;;  %vm5702_vm4 = vweird.f32 %v9051_v52  ;;  %v5708_v15 = vor.u32 1.1754944e-38, %v5707_v20  ;;  %v12969_v42 = vld [vmem:[#allocation89_spill] sm:$0xff]  ;;  %v12989_v20 = vld [vmem:[#allocation84_spill] sm:$0xff] }
 0x931   :  { %5729 = vmatmul.bf16.vlgmr.msra.gmra.mxu0 %v5720_v14  ;;  %5742 = vmatmul.bf16.vlgmr.msra.gmra.mxu1 %v5720_v14  ;;  %v5680_v40 = vadd.f32 %v9047_v3, %v5679_v44  ;;  %vm5703_vm6 = vmor %vm5701_vm5, %vm5702_vm4  ;;  %v12972_v44 = vld [vmem:[#allocation18_spill] sm:$0xff] }
 0x932   :  { %5755 = vmatmul.bf16.vlgmr.msra.gmra.mxu2 %v5720_v14  ;;  %5768 = vmatmul.bf16.vlgmr.msra.gmra.mxu3 %v5720_v14  ;;  %v5665_v50 = vsel %vm5664_vm0, %v9045_v62, %v5661_v23  ;;  %v5698_v12 = vsub.f32 1.0, %v5697_v17  ;;  %v12970_v14 = vld [vmem:[#allocation33_spill] sm:$0xff]  ;;  %v12974_v23 = vld [vmem:[#allocation35_spill] sm:$0xff]  ;;  %v12975_v17 = vld [vmem:[#allocation114_spill] sm:$0xff] }
 0x933   :  { %5969 = vmatpush.bf16.msra.mxu0 %v12878_v54  ;;  %5982 = vmatpush.bf16.msra.mxu1 %v12834_v21  ;;  %v5670_v19 = vsel %vm5667_vm2, %v5669_v39, %v5665_v50  ;;  %v5684_v11 = vsel %vm5683_vm1, %v9047_v3, %v5680_v40  ;;  %v12976_v39 = vld [vmem:[#allocation20_spill] sm:$0xff]  ;;  %v12977_v40 = vld [vmem:[#allocation15_spill] sm:$0xff]  ;;  %v12979_v50 = vld [vmem:[#allocation50_spill] sm:$0xff] }
 0x934   :  { %5995 = vmatpush.bf16.msra.mxu2 %v10851_v16  ;;  %6008 = vmatpush.bf16.msra.mxu3 %v12835_v57  ;;  %v5689_v43 = vsel %vm5686_vm3, %v5688_v2, %v5684_v11  ;;  %v5712_v37 = vmul.f32 %v9053_v47, %v5670_v19  ;;  %v5699_v10 = vmul.f32 %v9051_v52, %v5698_v12  ;;  %v12978_v2 = vld [vmem:[#allocation40_spill] sm:$0xff]  ;;  %v12981_v47 = vld [vmem:[#allocation110_spill] sm:$0xff] }
 0x935   :  { %v5711_v36 = vmul.f32 %v5689_v43, %v11541_v56  ;;  %v5705_v56 = vand.u32 2147483647, %v11638_v6  ;;  %v12980_v12 = vld [vmem:[#allocation72_spill] sm:$0xff]  ;;  %v12982_v19 = vld [vmem:[#allocation42_spill] sm:$0xff]  ;;  %v12984_v43 = vld [vmem:[#allocation95_spill] sm:$0xff] }
 0x936   :  { %v5700_v3 = vadd.f32 %v9051_v52, %v5699_v10  ;;  %v12983_v11 = vld [vmem:[#allocation54_spill] sm:$0xff]  ;;  %v12986_v10 = vld [vmem:[#allocation45_spill] sm:$0xff] }
 0x937   :  { %5970 = vmatpush.bf16.msra.mxu0 %v12879_v24  ;;  %5983 = vmatpush.bf16.msra.mxu1 %v12839_v49  ;;  %v11653_v62 = vadd.f32 %v5712_v37, %v5711_v36  ;;  %vm5706_vm7 = vcmp.eq.f32.partialorder %v5705_v56, 8.507059e+37  ;;  %v12985_v37 = vld [vmem:[#allocation79_spill] sm:$0xff]  ;;  %v12990_v56 = vld [vmem:[#allocation49_spill] sm:$0xff] }
 0x938   :  { %5996 = vmatpush.bf16.msra.mxu2 %v10867_v46  ;;  %6009 = vmatpush.bf16.msra.mxu3 %v12840_v35  ;;  %v5704_v61 = vsel %vm5703_vm6, %v9051_v52, %v5700_v3  ;;  %v12971_v52 = vld [vmem:[#allocation91_spill] sm:$0xff] }
 0x939   :  { %9054 = vtanh.f32 %v11653_v62  ;;  %v5709_v7 = vsel %vm5706_vm7, %v5708_v15, %v5704_v61  ;;  %v12987_v36 = vld [vmem:[#allocation59_spill] sm:$0xff]  ;;  %v12991_v61 = vld [vmem:[#allocation85_spill] sm:$0xff]  ;;  %v12992_v15 = vld [vmem:[#allocation24_spill] sm:$0xff] }
 0x93a   :  { %v12988_v3 = vld [vmem:[#allocation19_spill] sm:$0xff] }
 0x93b   :  { %5971 = vmatpush.bf16.msra.mxu0 %v12880_v63  ;;  %5984 = vmatpush.bf16.msra.mxu1 %v12841_v53 }
 0x93c   :  { %5997 = vmatpush.bf16.msra.mxu2 %v10878_v1  ;;  %6010 = vmatpush.bf16.msra.mxu3 %v11026_v59 }
 0x93f   :  { %5972 = vmatpush.bf16.msra.mxu0 %v12881_v9  ;;  %5985 = vmatpush.bf16.msra.mxu1 %v12843_v26  ;;  %v9055_v33 = vpop.eup %9054 }
 0x940   :  { %5998 = vmatpush.bf16.msra.mxu2 %v10891_v30  ;;  %6011 = vmatpush.bf16.msra.mxu3 %v11057_v4  ;;  %v5715_v6 = vmul.f32 %v9055_v33, %v5709_v7  ;;  %v12993_v33 = vld [vmem:[#allocation90_spill] sm:$0xff]  ;;  %v12994_v7 = vld [vmem:[#allocation75_spill] sm:$0xff] }
 0x942   :  { %v5781_v28 = vpack.c.bf16 %v5715_v6, %v5715_v6  ;;  %v12995_v6 = vld [vmem:[#allocation88_spill] sm:$0xff] }
 0x943   :  { %5973 = vmatpush.bf16.msra.mxu0 %v12882_v8  ;;  %5986 = vmatpush.bf16.msra.mxu1 %v11064_v38 }
 0x944   :  { %5999 = vmatpush.bf16.msra.mxu2 %v10906_v48  ;;  %6012 = vmatpush.bf16.msra.mxu3 %v11077_v29 }
 0x945   :  { %5790 = vmatmul.bf16.vlgmr.msrb.gmra.mxu0 %v5781_v28  ;;  %5803 = vmatmul.bf16.vlgmr.msrb.gmra.mxu1 %v5781_v28 }
 0x946   :  { %5816 = vmatmul.bf16.vlgmr.msrb.gmra.mxu2 %v5781_v28  ;;  %5829 = vmatmul.bf16.vlgmr.msrb.gmra.mxu3 %v5781_v28  ;;  %v12996_v28 = vld [vmem:[#allocation28_spill] sm:$0xff] }
 0x947   :  { %5974 = vmatpush.bf16.msra.mxu0 %v12883_v5  ;;  %5987 = vmatpush.bf16.msra.mxu1 %v12849_v45 }
 0x948   :  { %6000 = vmatpush.bf16.msra.mxu2 %v10919_v13  ;;  %6013 = vmatpush.bf16.msra.mxu3 %v12850_v58 }
 0x94b   :  { %5975 = vmatpush.bf16.msra.mxu0 %v12884_v25  ;;  %5988 = vmatpush.bf16.msra.mxu1 %v11104_v60 }
 0x94c   :  { %6001 = vmatpush.bf16.msra.mxu2 %v10932_v27  ;;  %6014 = vmatpush.bf16.msra.mxu3 %v11109_v31 }
 0x94f   :  { %5976 = vmatpush.bf16.msra.mxu0 %v12885_v0  ;;  %5989 = vmatpush.bf16.msra.mxu1 %v11123_v55 }
 0x950   :  { %6002 = vmatpush.bf16.msra.mxu2 %v10947_v34  ;;  %6015 = vmatpush.bf16.msra.mxu3 %v11126_v51 }
 0x953   :  { %6030 = vmatpush.bf16.msrb.mxu0 %v12921_v32  ;;  %6043 = vmatpush.bf16.msrb.mxu1 %v12969_v42 }
 0x954   :  { %6056 = vmatpush.bf16.msrb.mxu2 %v12970_v14  ;;  %6069 = vmatpush.bf16.msrb.mxu3 %v12971_v52 }
 0x957   :  { %6031 = vmatpush.bf16.msrb.mxu0 %v12972_v44  ;;  %6044 = vmatpush.bf16.msrb.mxu1 %v12973_v22 }
 0x958   :  { %6057 = vmatpush.bf16.msrb.mxu2 %v12974_v23  ;;  %6070 = vmatpush.bf16.msrb.mxu3 %v12975_v17 }
 0x95b   :  { %6032 = vmatpush.bf16.msrb.mxu0 %v12976_v39  ;;  %6045 = vmatpush.bf16.msrb.mxu1 %v12977_v40 }
 0x95c   :  { %6058 = vmatpush.bf16.msrb.mxu2 %v12978_v2  ;;  %6071 = vmatpush.bf16.msrb.mxu3 %v12979_v50  ;;  %v13006_v50 = vld [vmem:[#allocation55_spill] sm:$0xff] }
 0x95f   :  { %6033 = vmatpush.bf16.msrb.mxu0 %v12980_v12  ;;  %6046 = vmatpush.bf16.msrb.mxu1 %v12981_v47 }
 0x960   :  { %6059 = vmatpush.bf16.msrb.mxu2 %v12982_v19  ;;  %6072 = vmatpush.bf16.msrb.mxu3 %v12983_v11  ;;  %v13005_v11 = vld [vmem:[#allocation69_spill] sm:$0xff] }
 0x963   :  { %6034 = vmatpush.bf16.msrb.mxu0 %v12984_v43  ;;  %6047 = vmatpush.bf16.msrb.mxu1 %v12985_v37  ;;  %v13003_v37 = vld [vmem:[#allocation57_spill] sm:$0xff]  ;;  %v13004_v43 = vld [vmem:[#allocation100_spill] sm:$0xff] }
 0x964   :  { %6060 = vmatpush.bf16.msrb.mxu2 %v12986_v10  ;;  %6073 = vmatpush.bf16.msrb.mxu3 %v12987_v36  ;;  %v12998_v36 = vld [vmem:[#allocation81_spill] sm:$0xff] }
 0x967   :  { %6035 = vmatpush.bf16.msrb.mxu0 %v12988_v3  ;;  %6048 = vmatpush.bf16.msrb.mxu1 %v12989_v20  ;;  %v12999_v3 = vld [vmem:[#allocation16_spill] sm:$0xff] }
 0x968   :  { %6061 = vmatpush.bf16.msrb.mxu2 %v12990_v56  ;;  %6074 = vmatpush.bf16.msrb.mxu3 %v12991_v61  ;;  %v13000_v20 = vld [vmem:[#allocation60_spill] sm:$0xff]  ;;  %v13002_v61 = vld [vmem:[#allocation63_spill] sm:$0xff] }
 0x969   :  { %v13001_v56 = vld [vmem:[#allocation56_spill] sm:$0xff] }
 0x96a   :  { %v4078_v10 = vadd.f32 %v13001_v56, %v13000_v20 }
 0x96b   :  { %6036 = vmatpush.bf16.msrb.mxu0 %v12992_v15  ;;  %6049 = vmatpush.bf16.msrb.mxu1 %v12993_v33  ;;  %v4136_v15 = vadd.f32 %v13003_v37, %v13002_v61 }
 0x96c   :  { %6062 = vmatpush.bf16.msrb.mxu2 %v12994_v7  ;;  %6075 = vmatpush.bf16.msrb.mxu3 %v12995_v6  ;;  %v4107_v33 = vadd.f32 %v13004_v43, %v4078_v10 }
 0x96d   :  { %v4165_v7 = vadd.f32 %v13005_v11, %v4136_v15  ;;  %v13007_v15 = vld [vmem:[#allocation92_spill] sm:$0xff] }
 0x96f   :  { %6037 = vmatpush.bf16.msrb.mxu0 %v12996_v28  ;;  %6050 = vmatpush.bf16.msrb.mxu1 %v12997_v41 }
 0x970   :  { %6063 = vmatpush.bf16.msrb.mxu2 %v12998_v36  ;;  %6076 = vmatpush.bf16.msrb.mxu3 %v12999_v3 }
 0x9ae   :  { %v5730_v19 = vpop.f32.mrf.mxu0  ;;  %v5743_v6 = vpop.f32.mrf.mxu1 }
 0x9af   :  { %v5773_v47 = vadd.f32 %v5730_v19, %v4107_v33  ;;  %v5774_v28 = vadd.f32 %v5743_v6, %v4165_v7 }
 0x9b1   :  { %v8341_v12 = vmul.f32 -1.442695, %v5773_v47  ;;  %v8342_v41 = vmul.f32 -1.442695, %v5774_v28  ;;  %v13009_v28 = vld [vmem:[#allocation125_spill] sm:$0xff] }
 0x9b3   :  { %9056 = vpow2.f32 %v8341_v12 }
 0x9b4   :  { %9058 = vpow2.f32 %v8342_v41 }
 0x9b5   :  { %v5756_v36 = vpop.f32.mrf.mxu2  ;;  %v5769_v3 = vpop.f32.mrf.mxu3 }
 0x9b6   :  { %v5776_v2 = vadd.f32 %v5769_v3, %v13006_v50  ;;  %v5732_v56 = vpop.f32.mrf.mxu0  ;;  %v5745_v20 = vpop.f32.mrf.mxu1  ;;  %v5775_v12 = vadd.f32 %v5756_v36, %v13007_v15 }
 0x9b8   :  { %v8343_v40 = vmul.f32 -1.442695, %v5776_v2 }
 0x9b9   :  { %v9057_v37 = vpop.eup %9056 }
 0x9ba   :  { %v9059_v61 = vpop.eup %9058  ;;  %v5841_v43 = vadd.f32 1.0, %v9057_v37  ;;  %9060 = vpow2.f32 %v8343_v40  ;;  %v13008_v40 = vld [vmem:[#allocation47_spill] sm:$0xff] }
 0x9bb   :  { %v5860_v11 = vadd.f32 1.0, %v9059_v61 }
 0x9bc   :  { %9062 = vrcp.f32 %v5841_v43  ;;  %v5853_v36 = vand.u32 2147483648, %v5841_v43  ;;  %vm5847_vm11 = vweird.f32 %v5841_v43 }
 0x9bd   :  { %9064 = vrcp.f32 %v5860_v11  ;;  %v5758_v19 = vpop.f32.mrf.mxu2  ;;  %v5771_v10 = vpop.f32.mrf.mxu3  ;;  %v5870_v23 = vand.u32 2147483647, %v5860_v11  ;;  %vm5866_vm10 = vweird.f32 %v5860_v11 }
 0x9be   :  { %v5872_v19 = vand.u32 2147483648, %v5860_v11  ;;  %v5851_v10 = vand.u32 2147483647, %v5841_v43 }
 0x9bf   :  { %vm5871_vm15 = vcmp.eq.f32.partialorder %v5870_v23, 8.507059e+37 }
 0x9c0   :  { %v9061_v47 = vpop.eup %9060  ;;  %vm5852_vm14 = vcmp.eq.f32.partialorder %v5851_v10, 8.507059e+37 }
 0x9c1   :  { %v11725_v41 = vadd.f32 1.0, %v9061_v47 }
 0x9c2   :  { %v9063_v33 = vpop.eup %9062  ;;  %v5791_v7 = vpop.f32.mrf.mxu0 }
 0x9c3   :  { %v5804_v50 = vpop.f32.mrf.mxu1  ;;  %v9065_v3 = vpop.eup %9064  ;;  %v5843_v20 = vmul.f32 %v9063_v33, %v5841_v43  ;;  %9066 = vrcp.f32 %v11725_v41  ;;  %v5834_v61 = vadd.f32 %v5791_v7, %v13008_v40  ;;  %vm5848_vm8 = vweird.f32 %v9063_v33 }
 0x9c4   :  { %v5862_v2 = vmul.f32 %v9065_v3, %v5860_v11  ;;  %9068 = vtanh.f32 %v5775_v12  ;;  %v5835_v56 = vadd.f32 %v5804_v50, %v13009_v28  ;;  %vm5867_vm9 = vweird.f32 %v9065_v3  ;;  %vm5849_vm12 = vmor %vm5847_vm11, %vm5848_vm8  ;;  %v13010_v11 = vld [vmem:[#allocation138_spill] sm:$0xff] }
 0x9c5   :  { %v5844_v6 = vsub.f32 1.0, %v5843_v20  ;;  %v8344_v15 = vmul.f32 -1.442695, %v5834_v61  ;;  %v5854_v50 = vor.u32 1.1754944e-38, %v5853_v36  ;;  %vm5868_vm13 = vmor %vm5866_vm10, %vm5867_vm9  ;;  %v5873_v28 = vor.u32 1.1754944e-38, %v5872_v19 }
 0x9c6   :  { %v5863_v37 = vsub.f32 1.0, %v5862_v2  ;;  %v8345_v39 = vmul.f32 -1.442695, %v5835_v56  ;;  %v5892_v23 = vand.u32 2147483648, %v11725_v41  ;;  %vm5886_vm1 = vweird.f32 %v11725_v41 }
 0x9c7   :  { %v5845_v47 = vmul.f32 %v9063_v33, %v5844_v6  ;;  %9070 = vpow2.f32 %v8344_v15 }
 0x9c8   :  { %v5864_v17 = vmul.f32 %v9065_v3, %v5863_v37  ;;  %9072 = vpow2.f32 %v8345_v39 }
 0x9c9   :  { %v9067_v22 = vpop.eup %9066  ;;  %v5846_v44 = vadd.f32 %v9063_v33, %v5845_v47  ;;  %v5817_v12 = vpop.f32.mrf.mxu2 }
 0x9ca   :  { %v5830_v7 = vpop.f32.mrf.mxu3  ;;  %v5865_v20 = vadd.f32 %v9065_v3, %v5864_v17  ;;  %v5882_v2 = vmul.f32 %v9067_v22, %v11725_v41  ;;  %v5793_v6 = vpop.f32.mrf.mxu0  ;;  %vm5887_vm0 = vweird.f32 %v9067_v22 }
 0x9cb   :  { %v5806_v40 = vpop.f32.mrf.mxu1  ;;  %v9069_v61 = vpop.eup %9068  ;;  %v5850_v56 = vsel %vm5849_vm12, %v9063_v33, %v5846_v44  ;;  %v5837_v37 = vadd.f32 %v5830_v7, %v13010_v11  ;;  %vm5888_vm2 = vmor %vm5886_vm1, %vm5887_vm0 }
 0x9cc   :  { %v5855_v43 = vsel %vm5852_vm14, %v5854_v50, %v5850_v56  ;;  %v5869_v47 = vsel %vm5868_vm13, %v9065_v3, %v5865_v20  ;;  %v5883_v15 = vsub.f32 1.0, %v5882_v2  ;;  %v5893_v3 = vor.u32 1.1754944e-38, %v5892_v23 }
 0x9cd   :  { %v5874_v52 = vsel %vm5871_vm15, %v5873_v28, %v5869_v47  ;;  %v5897_v36 = vmul.f32 %v9069_v61, %v5855_v43  ;;  %v8346_v17 = vmul.f32 -1.442695, %v5837_v37  ;;  %v9071_v6 = vpop.eup %9070  ;;  %v13011_v28 = vld [vmem:[#allocation137_spill] sm:$0xff] }
 0x9ce   :  { %v5896_v14 = vmul.f32 %v5874_v52, %v11628_v18  ;;  %v5884_v39 = vmul.f32 %v9067_v22, %v5883_v15  ;;  %v9073_v40 = vpop.eup %9072  ;;  %v5904_v19 = vadd.f32 1.0, %v9071_v6  ;;  %v5890_v18 = vand.u32 2147483647, %v11725_v41 }
 0x9cf   :  { %9074 = vpow2.f32 %v8346_v17  ;;  %v5923_v44 = vadd.f32 1.0, %v9073_v40  ;;  %v5836_v56 = vadd.f32 %v5817_v12, %v13011_v28 }
 0x9d0   :  { %v11734_v51 = vadd.f32 %v5897_v36, %v5896_v14  ;;  %v5885_v7 = vadd.f32 %v9067_v22, %v5884_v39  ;;  %vm5891_vm3 = vcmp.eq.f32.partialorder %v5890_v18, 8.507059e+37  ;;  %v5916_v17 = vand.u32 2147483648, %v5904_v19 }
 0x9d1   :  { %v5819_v33 = vpop.f32.mrf.mxu2  ;;  %v5935_v39 = vand.u32 2147483648, %v5923_v44  ;;  %v5914_v40 = vand.u32 2147483647, %v5904_v19  ;;  %v5933_v12 = vand.u32 2147483647, %v5923_v44  ;;  %vm5910_vm6 = vweird.f32 %v5904_v19 }
 0x9d2   :  { %v5832_v10 = vpop.f32.mrf.mxu3  ;;  %9076 = vtanh.f32 %v11734_v51  ;;  %v5889_v14 = vsel %vm5888_vm2, %v9067_v22, %v5885_v7  ;;  %vm5929_vm7 = vweird.f32 %v5923_v44  ;;  %v5917_v23 = vor.u32 1.1754944e-38, %v5916_v17 }
 0x9d3   :  { %9078 = vrcp.f32 %v5904_v19  ;;  %v5894_v2 = vsel %vm5891_vm3, %v5893_v3, %v5889_v14  ;;  %v5936_v14 = vor.u32 1.1754944e-38, %v5935_v39  ;;  %vm5915_vm10 = vcmp.eq.f32.partialorder %v5914_v40, 8.507059e+37  ;;  %v13013_v39 = vld [vmem:[#allocation33_spill] sm:$0xff]  ;;  %v13015_v40 = vld [vmem:[#allocation18_spill] sm:$0xff] }
 0x9d4   :  { %9080 = vrcp.f32 %v5923_v44  ;;  %vm5934_vm11 = vcmp.eq.f32.partialorder %v5933_v12, 8.507059e+37  ;;  %v13017_v12 = vld [vmem:[#allocation35_spill] sm:$0xff] }
 0x9d5   :  { %v9075_v52 = vpop.eup %9074 }
 0x9d6   :  { %v11740_v50 = vadd.f32 1.0, %v9075_v52 }
 0x9d8   :  { %v9077_v20 = vpop.eup %9076  ;;  %9082 = vrcp.f32 %v11740_v50  ;;  %vm5949_vm13 = vweird.f32 %v11740_v50 }
 0x9d9   :  { %v9079_v61 = vpop.eup %9078  ;;  %v5900_v11 = vmul.f32 %v9077_v20, %v5894_v2  ;;  %9084 = vtanh.f32 %v5836_v56 }
 0x9da   :  { %v9081_v37 = vpop.eup %9080  ;;  %v5906_v43 = vmul.f32 %v9079_v61, %v5904_v19  ;;  %vm5911_vm4 = vweird.f32 %v9079_v61 }
 0x9db   :  { %v5925_v41 = vmul.f32 %v9081_v37, %v5923_v44  ;;  %v5968_v47 = vpack.c.bf16 %v5900_v11, %v5900_v11  ;;  %vm5930_vm5 = vweird.f32 %v9081_v37  ;;  %vm5912_vm8 = vmor %vm5910_vm6, %vm5911_vm4 }
 0x9dc   :  { %v5907_v15 = vsub.f32 1.0, %v5906_v43  ;;  %vm5931_vm9 = vmor %vm5929_vm7, %vm5930_vm5 }
 0x9dd   :  { %v5926_v36 = vsub.f32 1.0, %v5925_v41  ;;  %5977 = vmatmul.bf16.vlgmr.msra.gmra.mxu0 %v5968_v47  ;;  %5990 = vmatmul.bf16.vlgmr.msra.gmra.mxu1 %v5968_v47 }
 0x9de   :  { %v9083_v22 = vpop.eup %9082  ;;  %v5908_v6 = vmul.f32 %v9079_v61, %v5907_v15  ;;  %6003 = vmatmul.bf16.vlgmr.msra.gmra.mxu2 %v5968_v47  ;;  %6016 = vmatmul.bf16.vlgmr.msra.gmra.mxu3 %v5968_v47 }
 0x9df   :  { %v5927_v33 = vmul.f32 %v9081_v37, %v5926_v36  ;;  %v5945_v10 = vmul.f32 %v9083_v22, %v11740_v50  ;;  %6217 = vmatpush.bf16.msra.mxu0 %v12878_v54  ;;  %6230 = vmatpush.bf16.msra.mxu1 %v12834_v21  ;;  %v9085_v20 = vpop.eup %9084  ;;  %vm5950_vm12 = vweird.f32 %v9083_v22 }
 0x9e0   :  { %v5909_v7 = vadd.f32 %v9079_v61, %v5908_v6  ;;  %6243 = vmatpush.bf16.msra.mxu2 %v10851_v16  ;;  %6256 = vmatpush.bf16.msra.mxu3 %v12835_v57  ;;  %vm5951_vm14 = vmor %vm5949_vm13, %vm5950_vm12  ;;  %v13014_v6 = vld [vmem:[#allocation91_spill] sm:$0xff] }
 0x9e1   :  { %v5928_v18 = vadd.f32 %v9081_v37, %v5927_v33  ;;  %v5946_v52 = vsub.f32 1.0, %v5945_v10  ;;  %v13016_v33 = vld [vmem:[#allocation86_spill] sm:$0xff] }
 0x9e2   :  { %v5913_v3 = vsel %vm5912_vm8, %v9079_v61, %v5909_v7  ;;  %v13018_v10 = vld [vmem:[#allocation114_spill] sm:$0xff]  ;;  %v13019_v7 = vld [vmem:[#allocation20_spill] sm:$0xff] }
 0x9e3   :  { %v5918_v2 = vsel %vm5915_vm10, %v5917_v23, %v5913_v3  ;;  %v5932_v28 = vsel %vm5931_vm9, %v9081_v37, %v5928_v18  ;;  %6218 = vmatpush.bf16.msra.mxu0 %v12879_v24  ;;  %6231 = vmatpush.bf16.msra.mxu1 %v12839_v49  ;;  %v5947_v44 = vmul.f32 %v9083_v22, %v5946_v52  ;;  %v5955_v37 = vand.u32 2147483648, %v11740_v50  ;;  %v13020_v23 = vld [vmem:[#allocation15_spill] sm:$0xff]  ;;  %v13021_v18 = vld [vmem:[#allocation40_spill] sm:$0xff]  ;;  %v13022_v52 = vld [vmem:[#allocation50_spill] sm:$0xff] }
 0x9e4   :  { %v5937_v19 = vsel %vm5934_vm11, %v5936_v14, %v5932_v28  ;;  %v5960_v56 = vmul.f32 %v9085_v20, %v5918_v2  ;;  %6244 = vmatpush.bf16.msra.mxu2 %v10867_v46  ;;  %6257 = vmatpush.bf16.msra.mxu3 %v12840_v35  ;;  %v13023_v14 = vld [vmem:[#allocation72_spill] sm:$0xff]  ;;  %v13024_v3 = vld [vmem:[#allocation110_spill] sm:$0xff]  ;;  %v13027_v28 = vld [vmem:[#allocation95_spill] sm:$0xff] }
 0x9e5   :  { %v5959_v11 = vmul.f32 %v5937_v19, %v11653_v62  ;;  %v5948_v61 = vadd.f32 %v9083_v22, %v5947_v44  ;;  %v5953_v62 = vand.u32 2147483647, %v11740_v50  ;;  %v5956_v47 = vor.u32 1.1754944e-38, %v5955_v37  ;;  %v13025_v20 = vld [vmem:[#allocation42_spill] sm:$0xff]  ;;  %v13028_v19 = vld [vmem:[#allocation79_spill] sm:$0xff]  ;;  %v13033_v37 = vld [vmem:[#allocation49_spill] sm:$0xff] }
 0x9e6   :  { %v13026_v2 = vld [vmem:[#allocation54_spill] sm:$0xff]  ;;  %v13030_v44 = vld [vmem:[#allocation59_spill] sm:$0xff] }
 0x9e7   :  { %v11755_v43 = vadd.f32 %v5960_v56, %v5959_v11  ;;  %6219 = vmatpush.bf16.msra.mxu0 %v12880_v63  ;;  %6232 = vmatpush.bf16.msra.mxu1 %v12841_v53  ;;  %v5952_v41 = vsel %vm5951_vm14, %v9083_v22, %v5948_v61  ;;  %vm5954_vm15 = vcmp.eq.f32.partialorder %v5953_v62, 8.507059e+37  ;;  %v13012_v22 = vld [vmem:[#allocation80_spill] sm:$0xff]  ;;  %v13029_v56 = vld [vmem:[#allocation45_spill] sm:$0xff]  ;;  %v13031_v11 = vld [vmem:[#allocation19_spill] sm:$0xff] }
 0x9e8   :  { %6245 = vmatpush.bf16.msra.mxu2 %v10878_v1  ;;  %6258 = vmatpush.bf16.msra.mxu3 %v11026_v59  ;;  %v5957_v36 = vsel %vm5954_vm15, %v5956_v47, %v5952_v41  ;;  %v13032_v61 = vld [vmem:[#allocation84_spill] sm:$0xff]  ;;  %v13034_v62 = vld [vmem:[#allocation85_spill] sm:$0xff]  ;;  %v13036_v47 = vld [vmem:[#allocation90_spill] sm:$0xff] }
 0x9e9   :  { %9086 = vtanh.f32 %v11755_v43  ;;  %v13035_v41 = vld [vmem:[#allocation24_spill] sm:$0xff] }
 0x9eb   :  { %6220 = vmatpush.bf16.msra.mxu0 %v12881_v9  ;;  %6233 = vmatpush.bf16.msra.mxu1 %v12843_v26 }
 0x9ec   :  { %6246 = vmatpush.bf16.msra.mxu2 %v10891_v30  ;;  %6259 = vmatpush.bf16.msra.mxu3 %v11057_v4 }
 0x9ef   :  { %v9087_v15 = vpop.eup %9086  ;;  %6221 = vmatpush.bf16.msra.mxu0 %v12882_v8  ;;  %6234 = vmatpush.bf16.msra.mxu1 %v11064_v38 }
 0x9f0   :  { %v5963_v17 = vmul.f32 %v9087_v15, %v5957_v36  ;;  %6247 = vmatpush.bf16.msra.mxu2 %v10906_v48  ;;  %6260 = vmatpush.bf16.msra.mxu3 %v11077_v29  ;;  %v13037_v15 = vld [vmem:[#allocation75_spill] sm:$0xff]  ;;  %v13038_v36 = vld [vmem:[#allocation88_spill] sm:$0xff] }
 0x9f2   :  { %v6029_v50 = vpack.c.bf16 %v5963_v17, %v5963_v17  ;;  %v13039_v17 = vld [vmem:[#allocation28_spill] sm:$0xff] }
 0x9f3   :  { %6222 = vmatpush.bf16.msra.mxu0 %v12883_v5  ;;  %6235 = vmatpush.bf16.msra.mxu1 %v12849_v45 }
 0x9f4   :  { %6038 = vmatmul.bf16.vlgmr.msrb.gmra.mxu0 %v6029_v50  ;;  %6051 = vmatmul.bf16.vlgmr.msrb.gmra.mxu1 %v6029_v50 }
 0x9f5   :  { %6064 = vmatmul.bf16.vlgmr.msrb.gmra.mxu2 %v6029_v50  ;;  %6077 = vmatmul.bf16.vlgmr.msrb.gmra.mxu3 %v6029_v50  ;;  %v13040_v50 = vld [vmem:[#allocation53_spill] sm:$0xff] }
 0x9f6   :  { %6248 = vmatpush.bf16.msra.mxu2 %v10919_v13  ;;  %6261 = vmatpush.bf16.msra.mxu3 %v12850_v58 }
 0x9f7   :  { %6223 = vmatpush.bf16.msra.mxu0 %v12884_v25  ;;  %6236 = vmatpush.bf16.msra.mxu1 %v11104_v60 }
 0x9fa   :  { %6249 = vmatpush.bf16.msra.mxu2 %v10932_v27  ;;  %6262 = vmatpush.bf16.msra.mxu3 %v11109_v31 }
 0x9fb   :  { %6224 = vmatpush.bf16.msra.mxu0 %v12885_v0  ;;  %6237 = vmatpush.bf16.msra.mxu1 %v11123_v55 }
 0x9fe   :  { %6250 = vmatpush.bf16.msra.mxu2 %v10947_v34  ;;  %6263 = vmatpush.bf16.msra.mxu3 %v13012_v22 }
 0x9ff   :  { %6278 = vmatpush.bf16.msrb.mxu0 %v12921_v32  ;;  %6291 = vmatpush.bf16.msrb.mxu1 %v12969_v42  ;;  %v13055_v42 = vld [vmem:[#allocation136_spill] sm:$0xff] }
 0xa02   :  { %6304 = vmatpush.bf16.msrb.mxu2 %v13013_v39  ;;  %6317 = vmatpush.bf16.msrb.mxu3 %v13014_v6 }
 0xa03   :  { %6279 = vmatpush.bf16.msrb.mxu0 %v13015_v40  ;;  %6292 = vmatpush.bf16.msrb.mxu1 %v13016_v33 }
 0xa06   :  { %6305 = vmatpush.bf16.msrb.mxu2 %v13017_v12  ;;  %6318 = vmatpush.bf16.msrb.mxu3 %v13018_v10 }
 0xa07   :  { %6280 = vmatpush.bf16.msrb.mxu0 %v13019_v7  ;;  %6293 = vmatpush.bf16.msrb.mxu1 %v13020_v23  ;;  %v13053_v7 = vld [vmem:[#allocation117_spill] sm:$0xff] }
 0xa0a   :  { %6306 = vmatpush.bf16.msrb.mxu2 %v13021_v18  ;;  %6319 = vmatpush.bf16.msrb.mxu3 %v13022_v52 }
 0xa0b   :  { %6281 = vmatpush.bf16.msrb.mxu0 %v13023_v14  ;;  %6294 = vmatpush.bf16.msrb.mxu1 %v13024_v3 }
 0xa0e   :  { %6307 = vmatpush.bf16.msrb.mxu2 %v13025_v20  ;;  %6320 = vmatpush.bf16.msrb.mxu3 %v13026_v2  ;;  %v13045_v2 = vld [vmem:[#allocation83_spill] sm:$0xff] }
 0xa0f   :  { %6282 = vmatpush.bf16.msrb.mxu0 %v13027_v28  ;;  %6295 = vmatpush.bf16.msrb.mxu1 %v13028_v19  ;;  %v13044_v19 = vld [vmem:[#allocation98_spill] sm:$0xff] }
 0xa12   :  { %6308 = vmatpush.bf16.msrb.mxu2 %v13029_v56  ;;  %6321 = vmatpush.bf16.msrb.mxu3 %v13030_v44  ;;  %v13041_v44 = vld [vmem:[#allocation81_spill] sm:$0xff]  ;;  %v13043_v56 = vld [vmem:[#allocation71_spill] sm:$0xff] }
 0xa13   :  { %6283 = vmatpush.bf16.msrb.mxu0 %v13031_v11  ;;  %6296 = vmatpush.bf16.msrb.mxu1 %v13032_v61  ;;  %v13042_v11 = vld [vmem:[#allocation16_spill] sm:$0xff] }
 0xa16   :  { %6309 = vmatpush.bf16.msrb.mxu2 %v13033_v37  ;;  %6322 = vmatpush.bf16.msrb.mxu3 %v13034_v62 }
 0xa17   :  { %6284 = vmatpush.bf16.msrb.mxu0 %v13035_v41  ;;  %6297 = vmatpush.bf16.msrb.mxu1 %v13036_v47 }
 0xa1a   :  { %6310 = vmatpush.bf16.msrb.mxu2 %v13037_v15  ;;  %6323 = vmatpush.bf16.msrb.mxu3 %v13038_v36 }
 0xa1b   :  { %6285 = vmatpush.bf16.msrb.mxu0 %v13039_v17  ;;  %6298 = vmatpush.bf16.msrb.mxu1 %v13040_v50 }
 0xa1e   :  { %6311 = vmatpush.bf16.msrb.mxu2 %v13041_v44  ;;  %6324 = vmatpush.bf16.msrb.mxu3 %v13042_v11 }
 0xa5a   :  { %v5978_v61 = vpop.f32.mrf.mxu0  ;;  %v5991_v37 = vpop.f32.mrf.mxu1 }
 0xa5b   :  { %v6021_v62 = vadd.f32 %v5978_v61, %v13043_v56  ;;  %v6022_v41 = vadd.f32 %v5991_v37, %v13044_v19  ;;  %v13046_v37 = vld [vmem:[#allocation52_spill] sm:$0xff] }
 0xa5d   :  { %v8347_v28 = vmul.f32 -1.442695, %v6021_v62  ;;  %v8348_v47 = vmul.f32 -1.442695, %v6022_v41 }
 0xa5f   :  { %9088 = vpow2.f32 %v8347_v28 }
 0xa60   :  { %9090 = vpow2.f32 %v8348_v47  ;;  %v13047_v47 = vld [vmem:[#allocation30_spill] sm:$0xff] }
 0xa61   :  { %v6004_v15 = vpop.f32.mrf.mxu2  ;;  %v6017_v36 = vpop.f32.mrf.mxu3 }
 0xa62   :  { %v6024_v17 = vadd.f32 %v6017_v36, %v13045_v2  ;;  %v5980_v20 = vpop.f32.mrf.mxu0  ;;  %v5993_v50 = vpop.f32.mrf.mxu1  ;;  %v6023_v28 = vadd.f32 %v6004_v15, %v13046_v37  ;;  %v13048_v2 = vld [vmem:[#allocation76_spill] sm:$0xff]  ;;  %v13049_v36 = vld [vmem:[#allocation37_spill] sm:$0xff]  ;;  %v13054_v15 = vld [vmem:[#allocation122_spill] sm:$0xff] }
 0xa63   :  { %v4310_v20 = vadd.f32 %v13048_v2, %v13047_v47 }
 0xa64   :  { %v8349_v3 = vmul.f32 -1.442695, %v6024_v17  ;;  %v13050_v17 = vld [vmem:[#allocation93_spill] sm:$0xff] }
 0xa65   :  { %v9089_v44 = vpop.eup %9088  ;;  %v4368_v50 = vadd.f32 %v13050_v17, %v13049_v36 }
 0xa66   :  { %v9091_v14 = vpop.eup %9090  ;;  %v6089_v11 = vadd.f32 1.0, %v9089_v44  ;;  %9092 = vpow2.f32 %v8349_v3 }
 0xa67   :  { %v6108_v52 = vadd.f32 1.0, %v9091_v14  ;;  %v13051_v14 = vld [vmem:[#allocation123_spill] sm:$0xff] }
 0xa68   :  { %9094 = vrcp.f32 %v6089_v11  ;;  %v4339_v3 = vadd.f32 %v13051_v14, %v4310_v20  ;;  %v6099_v10 = vand.u32 2147483647, %v6089_v11  ;;  %v6101_v33 = vand.u32 2147483648, %v6089_v11 }
 0xa69   :  { %9096 = vrcp.f32 %v6108_v52  ;;  %v6006_v56 = vpop.f32.mrf.mxu2  ;;  %v6019_v19 = vpop.f32.mrf.mxu3  ;;  %v6120_v40 = vand.u32 2147483648, %v6108_v52  ;;  %v6118_v39 = vand.u32 2147483647, %v6108_v52  ;;  %vm6114_vm2 = vweird.f32 %v6108_v52 }
 0xa6a   :  { %v13052_v56 = vld [vmem:[#allocation48_spill] sm:$0xff]  ;;  %vm6095_vm3 = vweird.f32 %v6089_v11  ;;  %vm6100_vm6 = vcmp.eq.f32.partialorder %v6099_v10, 8.507059e+37 }
 0xa6b   :  { %v4397_v19 = vadd.f32 %v13052_v56, %v4368_v50  ;;  %vm6119_vm7 = vcmp.eq.f32.partialorder %v6118_v39, 8.507059e+37 }
 0xa6c   :  { %v9093_v61 = vpop.eup %9092 }
 0xa6d   :  { %v11821_v62 = vadd.f32 1.0, %v9093_v61  ;;  %v4484_v61 = vadd.f32 %v13054_v15, %v13053_v7 }
 0xa6e   :  { %v9095_v41 = vpop.eup %9094 }
 0xa6f   :  { %v9097_v18 = vpop.eup %9096  ;;  %v6091_v44 = vmul.f32 %v9095_v41, %v6089_v11  ;;  %9098 = vrcp.f32 %v11821_v62  ;;  %vm6096_vm0 = vweird.f32 %v9095_v41  ;;  %v4513_v15 = vadd.f32 %v13055_v42, %v4484_v61 }
 0xa70   :  { %v6110_v23 = vmul.f32 %v9097_v18, %v6108_v52  ;;  %9100 = vtanh.f32 %v6023_v28  ;;  %vm6115_vm1 = vweird.f32 %v9097_v18  ;;  %vm6097_vm4 = vmor %vm6095_vm3, %vm6096_vm0  ;;  %v6102_v28 = vor.u32 1.1754944e-38, %v6101_v33 }
 0xa71   :  { %v6092_v37 = vsub.f32 1.0, %v6091_v44  ;;  %v6039_v12 = vpop.f32.mrf.mxu0  ;;  %v6052_v2 = vpop.f32.mrf.mxu1  ;;  %vm6116_vm5 = vmor %vm6114_vm2, %vm6115_vm1  ;;  %vm6134_vm9 = vweird.f32 %v11821_v62 }
 0xa72   :  { %v6111_v47 = vsub.f32 1.0, %v6110_v23  ;;  %v6082_v17 = vadd.f32 %v6039_v12, %v4339_v3  ;;  %v6083_v36 = vadd.f32 %v6052_v2, %v4397_v19  ;;  %v6121_v19 = vor.u32 1.1754944e-38, %v6120_v40 }
 0xa73   :  { %v6093_v6 = vmul.f32 %v9095_v41, %v6092_v37 }
 0xa74   :  { %v6112_v20 = vmul.f32 %v9097_v18, %v6111_v47  ;;  %v8350_v50 = vmul.f32 -1.442695, %v6082_v17  ;;  %v8351_v14 = vmul.f32 -1.442695, %v6083_v36 }
 0xa75   :  { %v9099_v56 = vpop.eup %9098  ;;  %v6094_v44 = vadd.f32 %v9095_v41, %v6093_v6 }
 0xa76   :  { %v6113_v23 = vadd.f32 %v9097_v18, %v6112_v20  ;;  %v6130_v12 = vmul.f32 %v9099_v56, %v11821_v62  ;;  %9102 = vpow2.f32 %v8350_v50  ;;  %v9101_v3 = vpop.eup %9100  ;;  %vm6135_vm8 = vweird.f32 %v9099_v56 }
 0xa77   :  { %v6098_v37 = vsel %vm6097_vm4, %v9095_v41, %v6094_v44  ;;  %9104 = vpow2.f32 %v8351_v14  ;;  %vm6136_vm10 = vmor %vm6134_vm9, %vm6135_vm8 }
 0xa78   :  { %v6103_v47 = vsel %vm6100_vm6, %v6102_v28, %v6098_v37  ;;  %v6117_v36 = vsel %vm6116_vm5, %v9097_v18, %v6113_v23  ;;  %v6131_v2 = vsub.f32 1.0, %v6130_v12  ;;  %v6065_v42 = vpop.f32.mrf.mxu2  ;;  %v6078_v52 = vpop.f32.mrf.mxu3  ;;  %v6140_v18 = vand.u32 2147483648, %v11821_v62  ;;  %v13056_v28 = vld [vmem:[#allocation14_spill] sm:$0xff]  ;;  %v13057_v23 = vld [vmem:[#allocation29_spill] sm:$0xff] }
 0xa79   :  { %v6122_v6 = vsel %vm6119_vm7, %v6121_v19, %v6117_v36  ;;  %v6145_v11 = vmul.f32 %v9101_v3, %v6103_v47  ;;  %v6085_v61 = vadd.f32 %v6078_v52, %v4513_v15  ;;  %v6041_v33 = vpop.f32.mrf.mxu0  ;;  %v6054_v17 = vpop.f32.mrf.mxu1  ;;  %v6138_v15 = vand.u32 2147483647, %v11821_v62  ;;  %v13058_v19 = vld [vmem:[#allocation135_spill] sm:$0xff] }
 0xa7a   :  { %v6144_v20 = vmul.f32 %v6122_v6, %v11734_v51  ;;  %v6132_v50 = vmul.f32 %v9099_v56, %v6131_v2  ;;  %v4426_v12 = vadd.f32 %v13057_v23, %v13056_v28  ;;  %v13088_v28 = vld [vmem:[#allocation53_spill] sm:$0xff] }
 0xa7b   :  { %v8352_v7 = vmul.f32 -1.442695, %v6085_v61  ;;  %vm6139_vm11 = vcmp.eq.f32.partialorder %v6138_v15, 8.507059e+37 }
 0xa7c   :  { %v9103_v32 = vpop.eup %9102  ;;  %v11835_v40 = vadd.f32 %v6145_v11, %v6144_v20  ;;  %v6133_v39 = vadd.f32 %v9099_v56, %v6132_v50  ;;  %v4455_v37 = vadd.f32 %v13058_v19, %v4426_v12 }
 0xa7d   :  { %v9105_v10 = vpop.eup %9104  ;;  %v6152_v41 = vadd.f32 1.0, %v9103_v32  ;;  %9106 = vpow2.f32 %v8352_v7  ;;  %v6141_v7 = vor.u32 1.1754944e-38, %v6140_v18 }
 0xa7e   :  { %9108 = vtanh.f32 %v11835_v40  ;;  %v6171_v14 = vadd.f32 1.0, %v9105_v10  ;;  %v6137_v32 = vsel %vm6136_vm10, %v9099_v56, %v6133_v39  ;;  %v6084_v62 = vadd.f32 %v6065_v42, %v4455_v37 }
 0xa7f   :  { %9110 = vrcp.f32 %v6152_v41  ;;  %v6142_v2 = vsel %vm6139_vm11, %v6141_v7, %v6137_v32  ;;  %v6164_v50 = vand.u32 2147483648, %v6152_v41  ;;  %v6162_v18 = vand.u32 2147483647, %v6152_v41 }
 0xa80   :  { %9112 = vrcp.f32 %v6171_v14  ;;  %v6067_v51 = vpop.f32.mrf.mxu2  ;;  %v6080_v44 = vpop.f32.mrf.mxu3  ;;  %v6183_v10 = vand.u32 2147483648, %v6171_v14  ;;  %v6181_v42 = vand.u32 2147483647, %v6171_v14  ;;  %vm6158_vm14 = vweird.f32 %v6152_v41 }
 0xa81   :  { %vm6177_vm15 = vweird.f32 %v6171_v14  ;;  %v6165_v23 = vor.u32 1.1754944e-38, %v6164_v50  ;;  %vm6163_vm2 = vcmp.eq.f32.partialorder %v6162_v18, 8.507059e+37  ;;  %v13061_v18 = vld [vmem:[#allocation33_spill] sm:$0xff] }
 0xa82   :  { %v6184_v7 = vor.u32 1.1754944e-38, %v6183_v10  ;;  %vm6182_vm3 = vcmp.eq.f32.partialorder %v6181_v42, 8.507059e+37  ;;  %v13059_v10 = vld [vmem:[#allocation99_spill] sm:$0xff]  ;;  %v13063_v42 = vld [vmem:[#allocation18_spill] sm:$0xff] }
 0xa83   :  { %v9107_v3 = vpop.eup %9106 }
 0xa84   :  { %v9109_v47 = vpop.eup %9108  ;;  %v11844_v36 = vadd.f32 1.0, %v9107_v3 }
 0xa85   :  { %v9111_v52 = vpop.eup %9110  ;;  %v6148_v6 = vmul.f32 %v9109_v47, %v6142_v2 }
 0xa86   :  { %v9113_v11 = vpop.eup %9112  ;;  %v6154_v61 = vmul.f32 %v9111_v52, %v6152_v41  ;;  %9114 = vrcp.f32 %v11844_v36  ;;  %vm6159_vm12 = vweird.f32 %v9111_v52  ;;  %vm6197_vm5 = vweird.f32 %v11844_v36 }
 0xa87   :  { %v6173_v33 = vmul.f32 %v9113_v11, %v6171_v14  ;;  %v6216_v20 = vpack.c.bf16 %v6148_v6, %v6148_v6  ;;  %9116 = vtanh.f32 %v6084_v62  ;;  %vm6178_vm13 = vweird.f32 %v9113_v11  ;;  %vm6160_vm0 = vmor %vm6158_vm14, %vm6159_vm12 }
 0xa88   :  { %v6155_v17 = vsub.f32 1.0, %v6154_v61  ;;  %vm6179_vm1 = vmor %vm6177_vm15, %vm6178_vm13 }
 0xa89   :  { %v6174_v56 = vsub.f32 1.0, %v6173_v33  ;;  %6225 = vmatmul.bf16.vlgmr.msra.gmra.mxu0 %v6216_v20  ;;  %6238 = vmatmul.bf16.vlgmr.msra.gmra.mxu1 %v6216_v20 }
 0xa8a   :  { %v6156_v39 = vmul.f32 %v9111_v52, %v6155_v17  ;;  %6251 = vmatmul.bf16.vlgmr.msra.gmra.mxu2 %v6216_v20  ;;  %6264 = vmatmul.bf16.vlgmr.msra.gmra.mxu3 %v6216_v20 }
 0xa8b   :  { %v6175_v15 = vmul.f32 %v9113_v11, %v6174_v56  ;;  %6465 = vmatpush.bf16.msra.mxu0 %v12878_v54  ;;  %6478 = vmatpush.bf16.msra.mxu1 %v12834_v21 }
 0xa8c   :  { %v9115_v51 = vpop.eup %9114  ;;  %v6157_v44 = vadd.f32 %v9111_v52, %v6156_v39  ;;  %6491 = vmatpush.bf16.msra.mxu2 %v10851_v16  ;;  %6504 = vmatpush.bf16.msra.mxu3 %v12835_v57  ;;  %v13060_v39 = vld [vmem:[#allocation89_spill] sm:$0xff] }
 0xa8d   :  { %v6176_v12 = vadd.f32 %v9113_v11, %v6175_v15  ;;  %v6193_v32 = vmul.f32 %v9115_v51, %v11844_v36  ;;  %v9117_v41 = vpop.eup %9116  ;;  %vm6198_vm4 = vweird.f32 %v9115_v51  ;;  %v13062_v15 = vld [vmem:[#allocation91_spill] sm:$0xff] }
 0xa8e   :  { %v6161_v3 = vsel %vm6160_vm0, %v9111_v52, %v6157_v44  ;;  %vm6199_vm6 = vmor %vm6197_vm5, %vm6198_vm4  ;;  %v13065_v44 = vld [vmem:[#allocation35_spill] sm:$0xff] }
 0xa8f   :  { %v6166_v19 = vsel %vm6163_vm2, %v6165_v23, %v6161_v3  ;;  %v6180_v37 = vsel %vm6179_vm1, %v9113_v11, %v6176_v12  ;;  %v6194_v14 = vsub.f32 1.0, %v6193_v32  ;;  %6466 = vmatpush.bf16.msra.mxu0 %v12879_v24  ;;  %6479 = vmatpush.bf16.msra.mxu1 %v12839_v49  ;;  %v6203_v11 = vand.u32 2147483648, %v11844_v36  ;;  %v13066_v23 = vld [vmem:[#allocation114_spill] sm:$0xff]  ;;  %v13067_v12 = vld [vmem:[#allocation20_spill] sm:$0xff]  ;;  %v13068_v32 = vld [vmem:[#allocation15_spill] sm:$0xff] }
 0xa90   :  { %v6185_v47 = vsel %vm6182_vm3, %v6184_v7, %v6180_v37  ;;  %v6208_v2 = vmul.f32 %v9117_v41, %v6166_v19  ;;  %6492 = vmatpush.bf16.msra.mxu2 %v10867_v46  ;;  %6505 = vmatpush.bf16.msra.mxu3 %v12840_v35  ;;  %v13069_v7 = vld [vmem:[#allocation40_spill] sm:$0xff]  ;;  %v13070_v3 = vld [vmem:[#allocation50_spill] sm:$0xff] }
 0xa91   :  { %v6207_v62 = vmul.f32 %v6185_v47, %v11755_v43  ;;  %v6195_v6 = vmul.f32 %v9115_v51, %v6194_v14  ;;  %v6201_v43 = vand.u32 2147483647, %v11844_v36  ;;  %v6204_v17 = vor.u32 1.1754944e-38, %v6203_v11  ;;  %v13071_v41 = vld [vmem:[#allocation72_spill] sm:$0xff]  ;;  %v13072_v19 = vld [vmem:[#allocation110_spill] sm:$0xff]  ;;  %v13075_v47 = vld [vmem:[#allocation95_spill] sm:$0xff] }
 0xa92   :  { %v13073_v37 = vld [vmem:[#allocation42_spill] sm:$0xff]  ;;  %v13080_v11 = vld [vmem:[#allocation84_spill] sm:$0xff] }
 0xa93   :  { %v11859_v52 = vadd.f32 %v6208_v2, %v6207_v62  ;;  %v6196_v61 = vadd.f32 %v9115_v51, %v6195_v6  ;;  %6467 = vmatpush.bf16.msra.mxu0 %v12880_v63  ;;  %6480 = vmatpush.bf16.msra.mxu1 %v12841_v53  ;;  %vm6202_vm7 = vcmp.eq.f32.partialorder %v6201_v43, 8.507059e+37  ;;  %v13074_v14 = vld [vmem:[#allocation54_spill] sm:$0xff]  ;;  %v13076_v2 = vld [vmem:[#allocation79_spill] sm:$0xff]  ;;  %v13077_v62 = vld [vmem:[#allocation45_spill] sm:$0xff] }
 0xa94   :  { %6493 = vmatpush.bf16.msra.mxu2 %v10878_v1  ;;  %6506 = vmatpush.bf16.msra.mxu3 %v11026_v59  ;;  %v13078_v6 = vld [vmem:[#allocation59_spill] sm:$0xff]  ;;  %v13081_v43 = vld [vmem:[#allocation49_spill] sm:$0xff] }
 0xa95   :  { %9118 = vtanh.f32 %v11859_v52  ;;  %v6200_v33 = vsel %vm6199_vm6, %v9115_v51, %v6196_v61  ;;  %v13064_v51 = vld [vmem:[#allocation86_spill] sm:$0xff]  ;;  %v13079_v61 = vld [vmem:[#allocation19_spill] sm:$0xff] }
 0xa96   :  { %v6205_v56 = vsel %vm6202_vm7, %v6204_v17, %v6200_v33  ;;  %v13082_v33 = vld [vmem:[#allocation85_spill] sm:$0xff]  ;;  %v13083_v17 = vld [vmem:[#allocation24_spill] sm:$0xff] }
 0xa97   :  { %6468 = vmatpush.bf16.msra.mxu0 %v12881_v9  ;;  %6481 = vmatpush.bf16.msra.mxu1 %v12843_v26 }
 0xa98   :  { %6494 = vmatpush.bf16.msra.mxu2 %v10891_v30  ;;  %6507 = vmatpush.bf16.msra.mxu3 %v11057_v4 }
 0xa9b   :  { %v9119_v20 = vpop.eup %9118  ;;  %6469 = vmatpush.bf16.msra.mxu0 %v12882_v8  ;;  %6482 = vmatpush.bf16.msra.mxu1 %v11064_v38 }
 0xa9c   :  { %v6211_v50 = vmul.f32 %v9119_v20, %v6205_v56  ;;  %6495 = vmatpush.bf16.msra.mxu2 %v10906_v48  ;;  %6508 = vmatpush.bf16.msra.mxu3 %v11077_v29  ;;  %v13084_v20 = vld [vmem:[#allocation90_spill] sm:$0xff]  ;;  %v13085_v56 = vld [vmem:[#allocation75_spill] sm:$0xff] }
 0xa9e   :  { %v6277_v36 = vpack.c.bf16 %v6211_v50, %v6211_v50  ;;  %v13086_v50 = vld [vmem:[#allocation88_spill] sm:$0xff] }
 0xa9f   :  { %6470 = vmatpush.bf16.msra.mxu0 %v12883_v5  ;;  %6483 = vmatpush.bf16.msra.mxu1 %v12849_v45 }
 0xaa0   :  { %6286 = vmatmul.bf16.vlgmr.msrb.gmra.mxu0 %v6277_v36  ;;  %6299 = vmatmul.bf16.vlgmr.msrb.gmra.mxu1 %v6277_v36 }
 0xaa1   :  { %6312 = vmatmul.bf16.vlgmr.msrb.gmra.mxu2 %v6277_v36  ;;  %6325 = vmatmul.bf16.vlgmr.msrb.gmra.mxu3 %v6277_v36  ;;  %v13087_v36 = vld [vmem:[#allocation28_spill] sm:$0xff] }
 0xaa2   :  { %6496 = vmatpush.bf16.msra.mxu2 %v10919_v13  ;;  %6509 = vmatpush.bf16.msra.mxu3 %v12850_v58 }
 0xaa3   :  { %6471 = vmatpush.bf16.msra.mxu0 %v12884_v25  ;;  %6484 = vmatpush.bf16.msra.mxu1 %v11104_v60 }
 0xaa6   :  { %6497 = vmatpush.bf16.msra.mxu2 %v10932_v27  ;;  %6510 = vmatpush.bf16.msra.mxu3 %v11109_v31 }
 0xaa7   :  { %6472 = vmatpush.bf16.msra.mxu0 %v12885_v0  ;;  %6485 = vmatpush.bf16.msra.mxu1 %v11123_v55 }
 0xaaa   :  { %6498 = vmatpush.bf16.msra.mxu2 %v10947_v34  ;;  %6511 = vmatpush.bf16.msra.mxu3 %v13012_v22 }
 0xaab   :  { %6526 = vmatpush.bf16.msrb.mxu0 %v13059_v10  ;;  %6539 = vmatpush.bf16.msrb.mxu1 %v13060_v39 }
 0xaae   :  { %6552 = vmatpush.bf16.msrb.mxu2 %v13061_v18  ;;  %6565 = vmatpush.bf16.msrb.mxu3 %v13062_v15 }
 0xaaf   :  { %6527 = vmatpush.bf16.msrb.mxu0 %v13063_v42  ;;  %6540 = vmatpush.bf16.msrb.mxu1 %v13064_v51 }
 0xab2   :  { %6553 = vmatpush.bf16.msrb.mxu2 %v13065_v44  ;;  %6566 = vmatpush.bf16.msrb.mxu3 %v13066_v23 }
 0xab3   :  { %6528 = vmatpush.bf16.msrb.mxu0 %v13067_v12  ;;  %6541 = vmatpush.bf16.msrb.mxu1 %v13068_v32 }
 0xab6   :  { %6554 = vmatpush.bf16.msrb.mxu2 %v13069_v7  ;;  %6567 = vmatpush.bf16.msrb.mxu3 %v13070_v3  ;;  %v13097_v3 = vld [vmem:[#allocation102_spill] sm:$0xff] }
 0xab7   :  { %6529 = vmatpush.bf16.msrb.mxu0 %v13071_v41  ;;  %6542 = vmatpush.bf16.msrb.mxu1 %v13072_v19 }
 0xaba   :  { %6555 = vmatpush.bf16.msrb.mxu2 %v13073_v37  ;;  %6568 = vmatpush.bf16.msrb.mxu3 %v13074_v14  ;;  %v13096_v14 = vld [vmem:[#allocation23_spill] sm:$0xff] }
 0xabb   :  { %6530 = vmatpush.bf16.msrb.mxu0 %v13075_v47  ;;  %6543 = vmatpush.bf16.msrb.mxu1 %v13076_v2  ;;  %v13094_v2 = vld [vmem:[#allocation105_spill] sm:$0xff] }
 0xabc   :  { %v13095_v47 = vld [vmem:[#allocation17_spill] sm:$0xff] }
 0xabe   :  { %6556 = vmatpush.bf16.msrb.mxu2 %v13077_v62  ;;  %6569 = vmatpush.bf16.msrb.mxu3 %v13078_v6  ;;  %v13089_v6 = vld [vmem:[#allocation81_spill] sm:$0xff] }
 0xabf   :  { %6531 = vmatpush.bf16.msrb.mxu0 %v13079_v61  ;;  %6544 = vmatpush.bf16.msrb.mxu1 %v13080_v11  ;;  %v13090_v61 = vld [vmem:[#allocation16_spill] sm:$0xff] }
 0xac0   :  { %v13091_v11 = vld [vmem:[#allocation60_spill] sm:$0xff] }
 0xac2   :  { %6557 = vmatpush.bf16.msrb.mxu2 %v13081_v43  ;;  %6570 = vmatpush.bf16.msrb.mxu3 %v13082_v33  ;;  %v13092_v43 = vld [vmem:[#allocation62_spill] sm:$0xff]  ;;  %v13093_v33 = vld [vmem:[#allocation63_spill] sm:$0xff] }
 0xac3   :  { %6532 = vmatpush.bf16.msrb.mxu0 %v13083_v17  ;;  %6545 = vmatpush.bf16.msrb.mxu1 %v13084_v20  ;;  %v4083_v62 = vadd.f32 %v13092_v43, %v13091_v11  ;;  %v4141_v17 = vadd.f32 %v13094_v2, %v13093_v33 }
 0xac5   :  { %v4112_v20 = vadd.f32 %v13095_v47, %v4083_v62 }
 0xac6   :  { %6558 = vmatpush.bf16.msrb.mxu2 %v13085_v56  ;;  %6571 = vmatpush.bf16.msrb.mxu3 %v13086_v50  ;;  %v4170_v56 = vadd.f32 %v13096_v14, %v4141_v17 }
 0xac7   :  { %6533 = vmatpush.bf16.msrb.mxu0 %v13087_v36  ;;  %6546 = vmatpush.bf16.msrb.mxu1 %v13088_v28 }
 0xaca   :  { %6559 = vmatpush.bf16.msrb.mxu2 %v13089_v6  ;;  %6572 = vmatpush.bf16.msrb.mxu3 %v13090_v61  ;;  %v13098_v6 = vld [vmem:[#allocation96_spill] sm:$0xff]  ;;  %v13099_v61 = vld [vmem:[#allocation111_spill] sm:$0xff] }
 0xacb   :  { %v4257_v7 = vadd.f32 %v13098_v6, %v13097_v3 }
 0xacd   :  { %v4286_v32 = vadd.f32 %v13099_v61, %v4257_v7  ;;  %v13102_v7 = vld [vmem:[#allocation82_spill] sm:$0xff] }
 0xb06   :  { %v6226_v37 = vpop.f32.mrf.mxu0  ;;  %v6239_v50 = vpop.f32.mrf.mxu1 }
 0xb07   :  { %v6269_v19 = vadd.f32 %v6226_v37, %v4112_v20  ;;  %v6270_v36 = vadd.f32 %v6239_v50, %v4170_v56  ;;  %v13101_v20 = vld [vmem:[#allocation73_spill] sm:$0xff] }
 0xb09   :  { %v8353_v41 = vmul.f32 -1.442695, %v6269_v19  ;;  %v8354_v28 = vmul.f32 -1.442695, %v6270_v36  ;;  %v13100_v19 = vld [vmem:[#allocation61_spill] sm:$0xff] }
 0xb0a   :  { %v4199_v56 = vadd.f32 %v13101_v20, %v13100_v19 }
 0xb0b   :  { %9120 = vpow2.f32 %v8353_v41 }
 0xb0c   :  { %9122 = vpow2.f32 %v8354_v28  ;;  %v4228_v28 = vadd.f32 %v13102_v7, %v4199_v56 }
 0xb0d   :  { %v6252_v11 = vpop.f32.mrf.mxu2  ;;  %v6265_v43 = vpop.f32.mrf.mxu3 }
 0xb0e   :  { %v6272_v2 = vadd.f32 %v6265_v43, %v4286_v32  ;;  %v6228_v33 = vpop.f32.mrf.mxu0  ;;  %v6241_v47 = vpop.f32.mrf.mxu1  ;;  %v6271_v50 = vadd.f32 %v6252_v11, %v4228_v28 }
 0xb10   :  { %v8355_v62 = vmul.f32 -1.442695, %v6272_v2 }
 0xb11   :  { %v9121_v14 = vpop.eup %9120 }
 0xb12   :  { %v9123_v17 = vpop.eup %9122  ;;  %v6337_v12 = vadd.f32 1.0, %v9121_v14  ;;  %9124 = vpow2.f32 %v8355_v62 }
 0xb13   :  { %v6356_v37 = vadd.f32 1.0, %v9123_v17  ;;  %v13103_v17 = vld [vmem:[#allocation27_spill] sm:$0xff] }
 0xb14   :  { %9126 = vrcp.f32 %v6337_v12  ;;  %v6347_v7 = vand.u32 2147483647, %v6337_v12  ;;  %v6349_v11 = vand.u32 2147483648, %v6337_v12  ;;  %vm6343_vm11 = vweird.f32 %v6337_v12 }
 0xb15   :  { %9128 = vrcp.f32 %v6356_v37  ;;  %v6254_v41 = vpop.f32.mrf.mxu2  ;;  %v6267_v6 = vpop.f32.mrf.mxu3  ;;  %v6368_v56 = vand.u32 2147483648, %v6356_v37  ;;  %v6366_v44 = vand.u32 2147483647, %v6356_v37  ;;  %vm6362_vm10 = vweird.f32 %v6356_v37 }
 0xb16   :  { %v13104_v41 = vld [vmem:[#allocation36_spill] sm:$0xff]  ;;  %vm6348_vm14 = vcmp.eq.f32.partialorder %v6347_v7, 8.507059e+37 }
 0xb17   :  { %vm6367_vm15 = vcmp.eq.f32.partialorder %v6366_v44, 8.507059e+37 }
 0xb18   :  { %v9125_v61 = vpop.eup %9124 }
 0xb19   :  { %v11933_v32 = vadd.f32 1.0, %v9125_v61 }
 0xb1a   :  { %v9127_v36 = vpop.eup %9126 }
 0xb1b   :  { %v9129_v43 = vpop.eup %9128  ;;  %v6339_v2 = vmul.f32 %v9127_v36, %v6337_v12  ;;  %9130 = vrcp.f32 %v11933_v32  ;;  %vm6344_vm8 = vweird.f32 %v9127_v36  ;;  %vm6382_vm1 = vweird.f32 %v11933_v32 }
 0xb1c   :  { %v6358_v33 = vmul.f32 %v9129_v43, %v6356_v37  ;;  %9132 = vtanh.f32 %v6271_v50  ;;  %vm6363_vm9 = vweird.f32 %v9129_v43  ;;  %vm6345_vm12 = vmor %vm6343_vm11, %vm6344_vm8  ;;  %v6350_v50 = vor.u32 1.1754944e-38, %v6349_v11  ;;  %v13105_v11 = vld [vmem:[#allocation134_spill] sm:$0xff] }
 0xb1d   :  { %v6287_v47 = vpop.f32.mrf.mxu0  ;;  %v6300_v62 = vpop.f32.mrf.mxu1  ;;  %v6340_v14 = vsub.f32 1.0, %v6339_v2  ;;  %vm6364_vm13 = vmor %vm6362_vm10, %vm6363_vm9 }
 0xb1e   :  { %v6330_v20 = vadd.f32 %v6287_v47, %v13103_v17  ;;  %v6331_v6 = vadd.f32 %v6300_v62, %v13104_v41  ;;  %v6359_v19 = vsub.f32 1.0, %v6358_v33  ;;  %v6369_v62 = vor.u32 1.1754944e-38, %v6368_v56 }
 0xb1f   :  { %v6341_v28 = vmul.f32 %v9127_v36, %v6340_v14 }
 0xb20   :  { %v8356_v61 = vmul.f32 -1.442695, %v6330_v20  ;;  %v8357_v3 = vmul.f32 -1.442695, %v6331_v6  ;;  %v6360_v23 = vmul.f32 %v9129_v43, %v6359_v19 }
 0xb21   :  { %v9131_v51 = vpop.eup %9130  ;;  %v6342_v42 = vadd.f32 %v9127_v36, %v6341_v28 }
 0xb22   :  { %9134 = vpow2.f32 %v8356_v61  ;;  %v6361_v2 = vadd.f32 %v9129_v43, %v6360_v23  ;;  %v6378_v33 = vmul.f32 %v9131_v51, %v11933_v32  ;;  %v9133_v47 = vpop.eup %9132  ;;  %vm6383_vm0 = vweird.f32 %v9131_v51 }
 0xb23   :  { %9136 = vpow2.f32 %v8357_v3  ;;  %v6346_v14 = vsel %vm6345_vm12, %v9127_v36, %v6342_v42  ;;  %vm6384_vm2 = vmor %vm6382_vm1, %vm6383_vm0 }
 0xb24   :  { %v6313_v17 = vpop.f32.mrf.mxu2  ;;  %v6326_v19 = vpop.f32.mrf.mxu3  ;;  %v6351_v20 = vsel %vm6348_vm14, %v6350_v50, %v6346_v14  ;;  %v6365_v41 = vsel %vm6364_vm13, %v9129_v43, %v6361_v2  ;;  %v6379_v37 = vsub.f32 1.0, %v6378_v33  ;;  %v6388_v43 = vand.u32 2147483648, %v11933_v32 }
 0xb25   :  { %v6289_v6 = vpop.f32.mrf.mxu0  ;;  %v6302_v12 = vpop.f32.mrf.mxu1  ;;  %v6370_v28 = vsel %vm6367_vm15, %v6369_v62, %v6365_v41  ;;  %v6393_v61 = vmul.f32 %v9133_v47, %v6351_v20  ;;  %v6333_v23 = vadd.f32 %v6326_v19, %v13105_v11  ;;  %v6386_v50 = vand.u32 2147483647, %v11933_v32  ;;  %v13106_v19 = vld [vmem:[#allocation133_spill] sm:$0xff] }
 0xb26   :  { %v6392_v15 = vmul.f32 %v6370_v28, %v11835_v40  ;;  %v6380_v3 = vmul.f32 %v9131_v51, %v6379_v37  ;;  %v6389_v33 = vor.u32 1.1754944e-38, %v6388_v43  ;;  %v6332_v20 = vadd.f32 %v6313_v17, %v13106_v19  ;;  %v13130_v19 = vld [vmem:[#allocation24_spill] sm:$0xff] }
 0xb27   :  { %v8358_v39 = vmul.f32 -1.442695, %v6333_v23  ;;  %vm6387_vm3 = vcmp.eq.f32.partialorder %v6386_v50, 8.507059e+37 }
 0xb28   :  { %v9135_v18 = vpop.eup %9134  ;;  %v11941_v42 = vadd.f32 %v6393_v61, %v6392_v15  ;;  %v6381_v44 = vadd.f32 %v9131_v51, %v6380_v3 }
 0xb29   :  { %v9137_v56 = vpop.eup %9136  ;;  %v6400_v36 = vadd.f32 1.0, %v9135_v18  ;;  %9138 = vpow2.f32 %v8358_v39 }
 0xb2a   :  { %v6419_v7 = vadd.f32 1.0, %v9137_v56  ;;  %9140 = vtanh.f32 %v11941_v42  ;;  %v6385_v15 = vsel %vm6384_vm2, %v9131_v51, %v6381_v44 }
 0xb2b   :  { %9142 = vrcp.f32 %v6400_v36  ;;  %v6390_v62 = vsel %vm6387_vm3, %v6389_v33, %v6385_v15  ;;  %v6412_v51 = vand.u32 2147483648, %v6400_v36  ;;  %v6410_v3 = vand.u32 2147483647, %v6400_v36 }
 0xb2c   :  { %v6315_v40 = vpop.f32.mrf.mxu2  ;;  %v6328_v2 = vpop.f32.mrf.mxu3  ;;  %9144 = vrcp.f32 %v6419_v7  ;;  %v6431_v11 = vand.u32 2147483648, %v6419_v7  ;;  %v6429_v17 = vand.u32 2147483647, %v6419_v7  ;;  %vm6406_vm6 = vweird.f32 %v6400_v36 }
 0xb2d   :  { %vm6425_vm7 = vweird.f32 %v6419_v7  ;;  %v6413_v50 = vor.u32 1.1754944e-38, %v6412_v51  ;;  %vm6411_vm10 = vcmp.eq.f32.partialorder %v6410_v3, 8.507059e+37  ;;  %v13139_v3 = vld [vmem:[#allocation32_spill] sm:$0xff] }
 0xb2e   :  { %v6432_v15 = vor.u32 1.1754944e-38, %v6431_v11  ;;  %vm6430_vm11 = vcmp.eq.f32.partialorder %v6429_v17, 8.507059e+37  ;;  %v13138_v11 = vld [vmem:[#allocation25_spill] sm:$0xff] }
 0xb2f   :  { %v9139_v18 = vpop.eup %9138 }
 0xb30   :  { %v9141_v47 = vpop.eup %9140  ;;  %v11947_v39 = vadd.f32 1.0, %v9139_v18 }
 0xb31   :  { %v9143_v14 = vpop.eup %9142  ;;  %v6396_v41 = vmul.f32 %v9141_v47, %v6390_v62 }
 0xb32   :  { %v9145_v37 = vpop.eup %9144  ;;  %v6402_v6 = vmul.f32 %v9143_v14, %v6400_v36  ;;  %9146 = vrcp.f32 %v11947_v39  ;;  %vm6407_vm4 = vweird.f32 %v9143_v14  ;;  %vm6445_vm13 = vweird.f32 %v11947_v39 }
 0xb33   :  { %v6421_v32 = vmul.f32 %v9145_v37, %v6419_v7  ;;  %v6464_v28 = vpack.c.bf16 %v6396_v41, %v6396_v41  ;;  %9148 = vtanh.f32 %v6332_v20  ;;  %vm6426_vm5 = vweird.f32 %v9145_v37  ;;  %vm6408_vm8 = vmor %vm6406_vm6, %vm6407_vm4  ;;  %v13131_v20 = vld [vmem:[#allocation90_spill] sm:$0xff]  ;;  %v13132_v41 = vld [vmem:[#allocation75_spill] sm:$0xff] }
 0xb34   :  { %v6403_v12 = vsub.f32 1.0, %v6402_v6  ;;  %vm6427_vm9 = vmor %vm6425_vm7, %vm6426_vm5  ;;  %v13134_v6 = vld [vmem:[#allocation28_spill] sm:$0xff] }
 0xb35   :  { %v6422_v61 = vsub.f32 1.0, %v6421_v32  ;;  %6473 = vmatmul.bf16.vlgmr.msra.gmra.mxu0 %v6464_v28  ;;  %6486 = vmatmul.bf16.vlgmr.msra.gmra.mxu1 %v6464_v28  ;;  %v13135_v32 = vld [vmem:[#allocation53_spill] sm:$0xff] }
 0xb36   :  { %v6404_v23 = vmul.f32 %v9143_v14, %v6403_v12  ;;  %6499 = vmatmul.bf16.vlgmr.msra.gmra.mxu2 %v6464_v28  ;;  %6512 = vmatmul.bf16.vlgmr.msra.gmra.mxu3 %v6464_v28  ;;  %v13136_v12 = vld [vmem:[#allocation81_spill] sm:$0xff]  ;;  %v13137_v28 = vld [vmem:[#allocation16_spill] sm:$0xff] }
 0xb37   :  { %v6423_v56 = vmul.f32 %v9145_v37, %v6422_v61  ;;  %6713 = vmatpush.bf16.msra.mxu0 %v12878_v54  ;;  %6726 = vmatpush.bf16.msra.mxu1 %v12834_v21 }
 0xb38   :  { %v9147_v44 = vpop.eup %9146  ;;  %v6405_v43 = vadd.f32 %v9143_v14, %v6404_v23  ;;  %6739 = vmatpush.bf16.msra.mxu2 %v10851_v16  ;;  %6752 = vmatpush.bf16.msra.mxu3 %v12835_v57 }
 0xb39   :  { %v6424_v40 = vadd.f32 %v9145_v37, %v6423_v56  ;;  %v6441_v2 = vmul.f32 %v9147_v44, %v11947_v39  ;;  %v9149_v36 = vpop.eup %9148  ;;  %vm6446_vm12 = vweird.f32 %v9147_v44 }
 0xb3a   :  { %v6409_v33 = vsel %vm6408_vm8, %v9143_v14, %v6405_v43  ;;  %vm6447_vm14 = vmor %vm6445_vm13, %vm6446_vm12 }
 0xb3b   :  { %v6414_v54 = vsel %vm6411_vm10, %v6413_v50, %v6409_v33  ;;  %v6428_v18 = vsel %vm6427_vm9, %v9145_v37, %v6424_v40  ;;  %v6442_v21 = vsub.f32 1.0, %v6441_v2  ;;  %6714 = vmatpush.bf16.msra.mxu0 %v12879_v24  ;;  %6727 = vmatpush.bf16.msra.mxu1 %v12839_v49  ;;  %v6451_v24 = vand.u32 2147483648, %v11947_v39  ;;  %v13133_v37 = vld [vmem:[#allocation88_spill] sm:$0xff]  ;;  %v13140_v40 = vld [vmem:[#allocation115_spill] sm:$0xff] }
 0xb3c   :  { %v6433_v7 = vsel %vm6430_vm11, %v6432_v15, %v6428_v18  ;;  %v6456_v47 = vmul.f32 %v9149_v36, %v6414_v54  ;;  %6740 = vmatpush.bf16.msra.mxu2 %v10867_v46  ;;  %6753 = vmatpush.bf16.msra.mxu3 %v12840_v35  ;;  %v6449_v46 = vand.u32 2147483647, %v11947_v39  ;;  %v13129_v39 = vld [vmem:[#allocation85_spill] sm:$0xff] }
 0xb3d   :  { %v6455_v16 = vmul.f32 %v6433_v7, %v11859_v52  ;;  %v6443_v62 = vmul.f32 %v9147_v44, %v6442_v21  ;;  %v6452_v49 = vor.u32 1.1754944e-38, %v6451_v24  ;;  %v13127_v52 = vld [vmem:[#allocation84_spill] sm:$0xff]  ;;  %v13142_v24 = vld [vmem:[#allocation41_spill] sm:$0xff] }
 0xb3e   :  { %vm6450_vm15 = vcmp.eq.f32.partialorder %v6449_v46, 8.507059e+37 }
 0xb3f   :  { %v11963_v57 = vadd.f32 %v6456_v47, %v6455_v16  ;;  %v6444_v14 = vadd.f32 %v9147_v44, %v6443_v62  ;;  %6715 = vmatpush.bf16.msra.mxu0 %v12880_v63  ;;  %6728 = vmatpush.bf16.msra.mxu1 %v12841_v53 }
 0xb40   :  { %6741 = vmatpush.bf16.msra.mxu2 %v10878_v1  ;;  %6754 = vmatpush.bf16.msra.mxu3 %v11026_v59 }
 0xb41   :  { %9150 = vtanh.f32 %v11963_v57  ;;  %v6448_v35 = vsel %vm6447_vm14, %v9147_v44, %v6444_v14  ;;  %v13141_v14 = vld [vmem:[#allocation30_spill] sm:$0xff] }
 0xb42   :  { %v6453_v1 = vsel %vm6450_vm15, %v6452_v49, %v6448_v35  ;;  %v4305_v46 = vadd.f32 %v13142_v24, %v13141_v14  ;;  %v13143_v35 = vld [vmem:[#allocation37_spill] sm:$0xff]  ;;  %v13144_v49 = vld [vmem:[#allocation43_spill] sm:$0xff] }
 0xb43   :  { %6716 = vmatpush.bf16.msra.mxu0 %v12881_v9  ;;  %6729 = vmatpush.bf16.msra.mxu1 %v12843_v26  ;;  %v13118_v26 = vld [vmem:[#allocation72_spill] sm:$0xff]  ;;  %v13121_v9 = vld [vmem:[#allocation54_spill] sm:$0xff] }
 0xb44   :  { %6742 = vmatpush.bf16.msra.mxu2 %v10891_v30  ;;  %6755 = vmatpush.bf16.msra.mxu3 %v11057_v4  ;;  %v13107_v30 = vld [vmem:[#allocation89_spill] sm:$0xff]  ;;  %v13110_v4 = vld [vmem:[#allocation18_spill] sm:$0xff] }
 0xb47   :  { %v9151_v53 = vpop.eup %9150  ;;  %6717 = vmatpush.bf16.msra.mxu0 %v12882_v8  ;;  %6730 = vmatpush.bf16.msra.mxu1 %v11064_v38  ;;  %v13112_v38 = vld [vmem:[#allocation35_spill] sm:$0xff] }
 0xb48   :  { %v6459_v63 = vmul.f32 %v9151_v53, %v6453_v1  ;;  %6743 = vmatpush.bf16.msra.mxu2 %v10906_v48  ;;  %6756 = vmatpush.bf16.msra.mxu3 %v11077_v29  ;;  %v13108_v48 = vld [vmem:[#allocation33_spill] sm:$0xff]  ;;  %v13113_v29 = vld [vmem:[#allocation114_spill] sm:$0xff]  ;;  %v13122_v8 = vld [vmem:[#allocation95_spill] sm:$0xff]  ;;  %v4363_v53 = vadd.f32 %v13144_v49, %v13143_v35 }
 0xb49   :  { %v13145_v1 = vld [vmem:[#allocation51_spill] sm:$0xff]  ;;  %v13151_v49 = vld [vmem:[#allocation14_spill] sm:$0xff] }
 0xb4a   :  { %v6525_v59 = vpack.c.bf16 %v6459_v63, %v6459_v63 }
 0xb4b   :  { %6718 = vmatpush.bf16.msra.mxu0 %v12883_v5  ;;  %6731 = vmatpush.bf16.msra.mxu1 %v12849_v45  ;;  %v13120_v45 = vld [vmem:[#allocation42_spill] sm:$0xff]  ;;  %v13123_v5 = vld [vmem:[#allocation79_spill] sm:$0xff] }
 0xb4c   :  { %6534 = vmatmul.bf16.vlgmr.msrb.gmra.mxu0 %v6525_v59  ;;  %6547 = vmatmul.bf16.vlgmr.msrb.gmra.mxu1 %v6525_v59 }
 0xb4d   :  { %6560 = vmatmul.bf16.vlgmr.msrb.gmra.mxu2 %v6525_v59  ;;  %6573 = vmatmul.bf16.vlgmr.msrb.gmra.mxu3 %v6525_v59 }
 0xb4e   :  { %6744 = vmatpush.bf16.msra.mxu2 %v10919_v13  ;;  %6757 = vmatpush.bf16.msra.mxu3 %v12850_v58  ;;  %v13109_v13 = vld [vmem:[#allocation91_spill] sm:$0xff]  ;;  %v13119_v58 = vld [vmem:[#allocation110_spill] sm:$0xff] }
 0xb4f   :  { %6719 = vmatpush.bf16.msra.mxu0 %v12884_v25  ;;  %6732 = vmatpush.bf16.msra.mxu1 %v11104_v60  ;;  %v13116_v60 = vld [vmem:[#allocation40_spill] sm:$0xff]  ;;  %v13124_v25 = vld [vmem:[#allocation45_spill] sm:$0xff] }
 0xb52   :  { %6745 = vmatpush.bf16.msra.mxu2 %v10932_v27  ;;  %6758 = vmatpush.bf16.msra.mxu3 %v11109_v31  ;;  %v13111_v27 = vld [vmem:[#allocation86_spill] sm:$0xff]  ;;  %v13114_v31 = vld [vmem:[#allocation20_spill] sm:$0xff] }
 0xb53   :  { %6720 = vmatpush.bf16.msra.mxu0 %v12885_v0  ;;  %6733 = vmatpush.bf16.msra.mxu1 %v11123_v55  ;;  %v13117_v55 = vld [vmem:[#allocation50_spill] sm:$0xff]  ;;  %v13125_v0 = vld [vmem:[#allocation59_spill] sm:$0xff] }
 0xb56   :  { %6746 = vmatpush.bf16.msra.mxu2 %v10947_v34  ;;  %6759 = vmatpush.bf16.msra.mxu3 %v13012_v22  ;;  %v13115_v34 = vld [vmem:[#allocation15_spill] sm:$0xff] }
 0xb57   :  { %6774 = vmatpush.bf16.msrb.mxu0 %v13059_v10  ;;  %6787 = vmatpush.bf16.msrb.mxu1 %v13107_v30  ;;  %v13126_v22 = vld [vmem:[#allocation19_spill] sm:$0xff]  ;;  %v13128_v10 = vld [vmem:[#allocation49_spill] sm:$0xff] }
 0xb5a   :  { %6800 = vmatpush.bf16.msrb.mxu2 %v13108_v48  ;;  %6813 = vmatpush.bf16.msrb.mxu3 %v13109_v13  ;;  %v13146_v13 = vld [vmem:[#allocation121_spill] sm:$0xff] }
 0xb5b   :  { %6775 = vmatpush.bf16.msrb.mxu0 %v13110_v4  ;;  %6788 = vmatpush.bf16.msrb.mxu1 %v13111_v27  ;;  %v4334_v4 = vadd.f32 %v13146_v13, %v4305_v46  ;;  %v13147_v27 = vld [vmem:[#allocation22_spill] sm:$0xff]  ;;  %v13153_v13 = vld [vmem:[#allocation131_spill] sm:$0xff] }
 0xb5e   :  { %6801 = vmatpush.bf16.msrb.mxu2 %v13112_v38  ;;  %6814 = vmatpush.bf16.msrb.mxu3 %v13113_v29  ;;  %v4392_v38 = vadd.f32 %v13147_v27, %v4363_v53  ;;  %v13152_v53 = vld [vmem:[#allocation120_spill] sm:$0xff] }
 0xb5f   :  { %6776 = vmatpush.bf16.msrb.mxu0 %v13114_v31  ;;  %6789 = vmatpush.bf16.msrb.mxu1 %v13115_v34 }
 0xb62   :  { %6802 = vmatpush.bf16.msrb.mxu2 %v13116_v60  ;;  %6815 = vmatpush.bf16.msrb.mxu3 %v13117_v55 }
 0xb63   :  { %6777 = vmatpush.bf16.msrb.mxu0 %v13118_v26  ;;  %6790 = vmatpush.bf16.msrb.mxu1 %v13119_v58 }
 0xb66   :  { %6803 = vmatpush.bf16.msrb.mxu2 %v13120_v45  ;;  %6816 = vmatpush.bf16.msrb.mxu3 %v13121_v9 }
 0xb67   :  { %6778 = vmatpush.bf16.msrb.mxu0 %v13122_v8  ;;  %6791 = vmatpush.bf16.msrb.mxu1 %v13123_v5 }
 0xb6a   :  { %6804 = vmatpush.bf16.msrb.mxu2 %v13124_v25  ;;  %6817 = vmatpush.bf16.msrb.mxu3 %v13125_v0 }
 0xb6b   :  { %6779 = vmatpush.bf16.msrb.mxu0 %v13126_v22  ;;  %6792 = vmatpush.bf16.msrb.mxu1 %v13127_v52  ;;  %v13148_v52 = vld [vmem:[#allocation117_spill] sm:$0xff] }
 0xb6e   :  { %6805 = vmatpush.bf16.msrb.mxu2 %v13128_v10  ;;  %6818 = vmatpush.bf16.msrb.mxu3 %v13129_v39  ;;  %v13149_v10 = vld [vmem:[#allocation21_spill] sm:$0xff] }
 0xb6f   :  { %6780 = vmatpush.bf16.msrb.mxu0 %v13130_v19  ;;  %6793 = vmatpush.bf16.msrb.mxu1 %v13131_v20  ;;  %v4479_v39 = vadd.f32 %v13149_v10, %v13148_v52 }
 0xb72   :  { %6806 = vmatpush.bf16.msrb.mxu2 %v13132_v41  ;;  %6819 = vmatpush.bf16.msrb.mxu3 %v13133_v37 }
 0xb73   :  { %6781 = vmatpush.bf16.msrb.mxu0 %v13134_v6  ;;  %6794 = vmatpush.bf16.msrb.mxu1 %v13135_v32 }
 0xb76   :  { %6807 = vmatpush.bf16.msrb.mxu2 %v13136_v12  ;;  %6820 = vmatpush.bf16.msrb.mxu3 %v13137_v28 }
 0xbb2   :  { %v6474_v61 = vpop.f32.mrf.mxu0  ;;  %v6487_v51 = vpop.f32.mrf.mxu1 }
 0xbb3   :  { %v6517_v23 = vadd.f32 %v6474_v61, %v13138_v11  ;;  %v6518_v56 = vadd.f32 %v6487_v51, %v13139_v3  ;;  %v13150_v61 = vld [vmem:[#allocation132_spill] sm:$0xff] }
 0xbb4   :  { %v4508_v51 = vadd.f32 %v13150_v61, %v4479_v39 }
 0xbb5   :  { %v8359_v17 = vmul.f32 -1.442695, %v6517_v23  ;;  %v8360_v44 = vmul.f32 -1.442695, %v6518_v56 }
 0xbb7   :  { %9152 = vpow2.f32 %v8359_v17 }
 0xbb8   :  { %9154 = vpow2.f32 %v8360_v44 }
 0xbb9   :  { %v6500_v43 = vpop.f32.mrf.mxu2  ;;  %v6513_v50 = vpop.f32.mrf.mxu3 }
 0xbba   :  { %v6520_v2 = vadd.f32 %v6513_v50, %v13140_v40  ;;  %v6476_v15 = vpop.f32.mrf.mxu0  ;;  %v6489_v33 = vpop.f32.mrf.mxu1  ;;  %v6519_v63 = vadd.f32 %v6500_v43, %v13145_v1  ;;  %v4421_v1 = vadd.f32 %v13152_v53, %v13151_v49 }
 0xbbc   :  { %v8361_v36 = vmul.f32 -1.442695, %v6520_v2 }
 0xbbd   :  { %v9153_v54 = vpop.eup %9152 }
 0xbbe   :  { %v9155_v18 = vpop.eup %9154  ;;  %v6585_v21 = vadd.f32 1.0, %v9153_v54  ;;  %9156 = vpow2.f32 %v8361_v36 }
 0xbbf   :  { %v6604_v7 = vadd.f32 1.0, %v9155_v18 }
 0xbc0   :  { %9158 = vrcp.f32 %v6585_v21  ;;  %v6595_v8 = vand.u32 2147483647, %v6585_v21  ;;  %v6597_v5 = vand.u32 2147483648, %v6585_v21  ;;  %vm6591_vm3 = vweird.f32 %v6585_v21 }
 0xbc1   :  { %9160 = vrcp.f32 %v6604_v7  ;;  %v6502_v47 = vpop.f32.mrf.mxu2  ;;  %v6515_v16 = vpop.f32.mrf.mxu3  ;;  %v6616_v9 = vand.u32 2147483648, %v6604_v7  ;;  %v6614_v20 = vand.u32 2147483647, %v6604_v7  ;;  %vm6610_vm2 = vweird.f32 %v6604_v7 }
 0xbc2   :  { %v6598_v6 = vor.u32 1.1754944e-38, %v6597_v5  ;;  %vm6596_vm6 = vcmp.eq.f32.partialorder %v6595_v8, 8.507059e+37 }
 0xbc3   :  { %v6617_v11 = vor.u32 1.1754944e-38, %v6616_v9  ;;  %vm6615_vm7 = vcmp.eq.f32.partialorder %v6614_v20, 8.507059e+37 }
 0xbc4   :  { %v9157_v62 = vpop.eup %9156 }
 0xbc5   :  { %v12033_v59 = vadd.f32 1.0, %v9157_v62 }
 0xbc6   :  { %v9159_v30 = vpop.eup %9158 }
 0xbc7   :  { %v9161_v48 = vpop.eup %9160  ;;  %v6587_v29 = vmul.f32 %v9159_v30, %v6585_v21  ;;  %9162 = vrcp.f32 %v12033_v59  ;;  %vm6592_vm0 = vweird.f32 %v9159_v30  ;;  %v6636_v24 = vand.u32 2147483648, %v12033_v59 }
 0xbc8   :  { %v6606_v31 = vmul.f32 %v9161_v48, %v6604_v7  ;;  %9164 = vtanh.f32 %v6519_v63  ;;  %vm6611_vm1 = vweird.f32 %v9161_v48  ;;  %vm6593_vm4 = vmor %vm6591_vm3, %vm6592_vm0  ;;  %vm6630_vm9 = vweird.f32 %v12033_v59 }
 0xbc9   :  { %v6535_v34 = vpop.f32.mrf.mxu0  ;;  %v6548_v60 = vpop.f32.mrf.mxu1  ;;  %v6588_v55 = vsub.f32 1.0, %v6587_v29  ;;  %vm6612_vm5 = vmor %vm6610_vm2, %vm6611_vm1  ;;  %v6634_v46 = vand.u32 2147483647, %v12033_v59 }
 0xbca   :  { %v6578_v26 = vadd.f32 %v6535_v34, %v4334_v4  ;;  %v6579_v58 = vadd.f32 %v6548_v60, %v4392_v38  ;;  %v6607_v45 = vsub.f32 1.0, %v6606_v31  ;;  %v4450_v4 = vadd.f32 %v13153_v13, %v4421_v1 }
 0xbcb   :  { %v6589_v25 = vmul.f32 %v9159_v30, %v6588_v55  ;;  %vm6635_vm11 = vcmp.eq.f32.partialorder %v6634_v46, 8.507059e+37  ;;  %v13157_v46 = vld [vmem:[#allocation31_spill] sm:$0xff] }
 0xbcc   :  { %v8362_v0 = vmul.f32 -1.442695, %v6578_v26  ;;  %v8363_v22 = vmul.f32 -1.442695, %v6579_v58  ;;  %v6608_v19 = vmul.f32 %v9161_v48, %v6607_v45 }
 0xbcd   :  { %v9163_v41 = vpop.eup %9162  ;;  %v6590_v37 = vadd.f32 %v9159_v30, %v6589_v25 }
 0xbce   :  { %9166 = vpow2.f32 %v8362_v0  ;;  %v6609_v32 = vadd.f32 %v9161_v48, %v6608_v19  ;;  %v6626_v12 = vmul.f32 %v9163_v41, %v12033_v59  ;;  %v9165_v28 = vpop.eup %9164  ;;  %vm6631_vm8 = vweird.f32 %v9163_v41 }
 0xbcf   :  { %9168 = vpow2.f32 %v8363_v22  ;;  %v6594_v23 = vsel %vm6593_vm4, %v9159_v30, %v6590_v37  ;;  %vm6632_vm10 = vmor %vm6630_vm9, %vm6631_vm8  ;;  %v6637_v30 = vor.u32 1.1754944e-38, %v6636_v24  ;;  %v13156_v24 = vld [vmem:[#allocation102_spill] sm:$0xff] }
 0xbd0   :  { %v6561_v3 = vpop.f32.mrf.mxu2  ;;  %v6574_v56 = vpop.f32.mrf.mxu3  ;;  %v6599_v17 = vsel %vm6596_vm6, %v6598_v6, %v6594_v23  ;;  %v6613_v44 = vsel %vm6612_vm5, %v9161_v48, %v6609_v32  ;;  %v6627_v43 = vsub.f32 1.0, %v6626_v12 }
 0xbd1   :  { %v6537_v50 = vpop.f32.mrf.mxu0  ;;  %v6550_v40 = vpop.f32.mrf.mxu1  ;;  %v6618_v2 = vsel %vm6615_vm7, %v6617_v11, %v6613_v44  ;;  %v6641_v15 = vmul.f32 %v9165_v28, %v6599_v17  ;;  %v6581_v33 = vadd.f32 %v6574_v56, %v4508_v51  ;;  %v6580_v34 = vadd.f32 %v6561_v3, %v4450_v4 }
 0xbd2   :  { %v6640_v36 = vmul.f32 %v6618_v2, %v11941_v42  ;;  %v6628_v54 = vmul.f32 %v9163_v41, %v6627_v43 }
 0xbd3   :  { %v8364_v21 = vmul.f32 -1.442695, %v6581_v33 }
 0xbd4   :  { %v9167_v18 = vpop.eup %9166  ;;  %v12043_v47 = vadd.f32 %v6641_v15, %v6640_v36  ;;  %v6629_v14 = vadd.f32 %v9163_v41, %v6628_v54 }
 0xbd5   :  { %v9169_v7 = vpop.eup %9168  ;;  %v6648_v16 = vadd.f32 1.0, %v9167_v18  ;;  %9170 = vpow2.f32 %v8364_v21  ;;  %v13154_v18 = vld [vmem:[#allocation34_spill] sm:$0xff] }
 0xbd6   :  { %v6667_v62 = vadd.f32 1.0, %v9169_v7  ;;  %9172 = vtanh.f32 %v12043_v47  ;;  %v6633_v63 = vsel %vm6632_vm10, %v9163_v41, %v6629_v14  ;;  %v13155_v7 = vld [vmem:[#allocation38_spill] sm:$0xff] }
 0xbd7   :  { %9174 = vrcp.f32 %v6648_v16  ;;  %v6638_v29 = vsel %vm6635_vm11, %v6637_v30, %v6633_v63  ;;  %v6660_v8 = vand.u32 2147483648, %v6648_v16  ;;  %v6658_v0 = vand.u32 2147483647, %v6648_v16 }
 0xbd8   :  { %v6563_v42 = vpop.f32.mrf.mxu2  ;;  %v6576_v35 = vpop.f32.mrf.mxu3  ;;  %9176 = vrcp.f32 %v6667_v62  ;;  %v6679_v5 = vand.u32 2147483648, %v6667_v62  ;;  %v6677_v52 = vand.u32 2147483647, %v6667_v62  ;;  %vm6654_vm14 = vweird.f32 %v6648_v16 }
 0xbd9   :  { %vm6673_vm15 = vweird.f32 %v6667_v62  ;;  %v6661_v19 = vor.u32 1.1754944e-38, %v6660_v8  ;;  %vm6659_vm2 = vcmp.eq.f32.partialorder %v6658_v0, 8.507059e+37  ;;  %v4262_v42 = vadd.f32 %v13157_v46, %v13156_v24  ;;  %v13158_v35 = vld [vmem:[#allocation118_spill] sm:$0xff]  ;;  %v13164_v24 = vld [vmem:[#allocation39_spill] sm:$0xff] }
 0xbda   :  { %v6680_v37 = vor.u32 1.1754944e-38, %v6679_v5  ;;  %vm6678_vm3 = vcmp.eq.f32.partialorder %v6677_v52, 8.507059e+37 }
 0xbdb   :  { %v9171_v48 = vpop.eup %9170  ;;  %v4291_v49 = vadd.f32 %v13158_v35, %v4262_v42 }
 0xbdc   :  { %v9173_v27 = vpop.eup %9172  ;;  %v6687_v38 = vadd.f32 1.0, %v9171_v48 }
 0xbdd   :  { %v9175_v31 = vpop.eup %9174  ;;  %v6644_v59 = vmul.f32 %v9173_v27, %v6638_v29 }
 0xbde   :  { %v9177_v60 = vpop.eup %9176  ;;  %v6650_v55 = vmul.f32 %v9175_v31, %v6648_v16  ;;  %9178 = vrcp.f32 %v6687_v38  ;;  %vm6655_vm12 = vweird.f32 %v9175_v31  ;;  %v6699_v44 = vand.u32 2147483648, %v6687_v38 }
 0xbdf   :  { %v6669_v26 = vmul.f32 %v9177_v60, %v6667_v62  ;;  %v6712_v45 = vpack.c.bf16 %v6644_v59, %v6644_v59  ;;  %9180 = vtanh.f32 %v6580_v34  ;;  %vm6674_vm13 = vweird.f32 %v9177_v60  ;;  %vm6656_vm0 = vmor %vm6654_vm14, %vm6655_vm12  ;;  %v13160_v34 = vld [vmem:[#allocation26_spill] sm:$0xff] }
 0xbe0   :  { %v6651_v58 = vsub.f32 1.0, %v6650_v55  ;;  %vm6675_vm1 = vmor %vm6673_vm15, %vm6674_vm13  ;;  %vm6693_vm5 = vweird.f32 %v6687_v38  ;;  %v6697_v43 = vand.u32 2147483647, %v6687_v38  ;;  %v6700_v40 = vor.u32 1.1754944e-38, %v6699_v44 }
 0xbe1   :  { %v6670_v9 = vsub.f32 1.0, %v6669_v26  ;;  %6721 = vmatmul.bf16.vlgmr.msra.gmra.mxu0 %v6712_v45  ;;  %6734 = vmatmul.bf16.vlgmr.msra.gmra.mxu1 %v6712_v45  ;;  %v13161_v26 = vld [vmem:[#allocation116_spill] sm:$0xff] }
 0xbe2   :  { %v6652_v25 = vmul.f32 %v9175_v31, %v6651_v58  ;;  %6747 = vmatmul.bf16.vlgmr.msra.gmra.mxu2 %v6712_v45  ;;  %6760 = vmatmul.bf16.vlgmr.msra.gmra.mxu3 %v6712_v45  ;;  %vm6698_vm7 = vcmp.eq.f32.partialorder %v6697_v43, 8.507059e+37 }
 0xbe3   :  { %v6671_v22 = vmul.f32 %v9177_v60, %v6670_v9 }
 0xbe4   :  { %v9179_v10 = vpop.eup %9178  ;;  %v6653_v39 = vadd.f32 %v9175_v31, %v6652_v25 }
 0xbe5   :  { %v6672_v20 = vadd.f32 %v9177_v60, %v6671_v22  ;;  %v6689_v41 = vmul.f32 %v9179_v10, %v6687_v38  ;;  %v9181_v32 = vpop.eup %9180  ;;  %vm6694_vm4 = vweird.f32 %v9179_v10 }
 0xbe6   :  { %v6657_v6 = vsel %vm6656_vm0, %v9175_v31, %v6653_v39  ;;  %vm6695_vm6 = vmor %vm6693_vm5, %vm6694_vm4  ;;  %v13159_v31 = vld [vmem:[#allocation61_spill] sm:$0xff] }
 0xbe7   :  { %v6662_v12 = vsel %vm6659_vm2, %v6661_v19, %v6657_v6  ;;  %v6676_v28 = vsel %vm6675_vm1, %v9177_v60, %v6672_v20  ;;  %v6690_v61 = vsub.f32 1.0, %v6689_v41  ;;  %v4204_v59 = vadd.f32 %v13160_v34, %v13159_v31  ;;  %v13162_v19 = vld [vmem:[#allocation119_spill] sm:$0xff]  ;;  %v13163_v41 = vld [vmem:[#allocation94_spill] sm:$0xff] }
 0xbe8   :  { %v6681_v51 = vsel %vm6678_vm3, %v6680_v37, %v6676_v28  ;;  %v6704_v11 = vmul.f32 %v9181_v32, %v6662_v12 }
 0xbe9   :  { %v6703_v23 = vmul.f32 %v6681_v51, %v11963_v57  ;;  %v6691_v3 = vmul.f32 %v9179_v10, %v6690_v61  ;;  %v4233_v58 = vadd.f32 %v13161_v26, %v4204_v59 }
 0xbeb   :  { %v12053_v56 = vadd.f32 %v6704_v11, %v6703_v23  ;;  %v6692_v17 = vadd.f32 %v9179_v10, %v6691_v3 }
 0xbed   :  { %9182 = vtanh.f32 %v12053_v56  ;;  %v6696_v50 = vsel %vm6695_vm6, %v9179_v10, %v6692_v17 }
 0xbee   :  { %v6701_v15 = vsel %vm6698_vm7, %v6700_v40, %v6696_v50 }
 0xbf3   :  { %v9183_v2 = vpop.eup %9182 }
 0xbf4   :  { %v6707_v33 = vmul.f32 %v9183_v2, %v6701_v15 }
 0xbf6   :  { %v6773_v36 = vpack.c.bf16 %v6707_v33, %v6707_v33 }
 0xbf8   :  { %6782 = vmatmul.bf16.vlgmr.msrb.gmra.mxu0 %v6773_v36  ;;  %6795 = vmatmul.bf16.vlgmr.msrb.gmra.mxu1 %v6773_v36 }
 0xbf9   :  { %6808 = vmatmul.bf16.vlgmr.msrb.gmra.mxu2 %v6773_v36  ;;  %6821 = vmatmul.bf16.vlgmr.msrb.gmra.mxu3 %v6773_v36 }
 0xc5e   :  { %v6722_v57 = vpop.f32.mrf.mxu0  ;;  %v6735_v54 = vpop.f32.mrf.mxu1 }
 0xc5f   :  { %v6765_v21 = vadd.f32 %v6722_v57, %v13154_v18  ;;  %v6766_v16 = vadd.f32 %v6735_v54, %v13155_v7 }
 0xc61   :  { %v8365_v62 = vmul.f32 -1.442695, %v6765_v21  ;;  %v8366_v14 = vmul.f32 -1.442695, %v6766_v16 }
 0xc63   :  { %9184 = vpow2.f32 %v8365_v62 }
 0xc64   :  { %9186 = vpow2.f32 %v8366_v14 }
 0xc65   :  { %v6748_v53 = vpop.f32.mrf.mxu2  ;;  %v6761_v1 = vpop.f32.mrf.mxu3 }
 0xc66   :  { %v6768_v63 = vadd.f32 %v6761_v1, %v4291_v49  ;;  %v6724_v30 = vpop.f32.mrf.mxu0  ;;  %v6737_v48 = vpop.f32.mrf.mxu1  ;;  %v6767_v9 = vadd.f32 %v6748_v53, %v4233_v58 }
 0xc68   :  { %v8367_v13 = vmul.f32 -1.442695, %v6768_v63 }
 0xc69   :  { %v9185_v4 = vpop.eup %9184 }
 0xc6a   :  { %v9187_v27 = vpop.eup %9186  ;;  %v6833_v38 = vadd.f32 1.0, %v9185_v4  ;;  %9188 = vpow2.f32 %v8367_v13 }
 0xc6b   :  { %v6852_v29 = vadd.f32 1.0, %v9187_v27 }
 0xc6c   :  { %9190 = vrcp.f32 %v6833_v38  ;;  %v6843_v12 = vand.u32 2147483647, %v6833_v38  ;;  %v6845_v28 = vand.u32 2147483648, %v6833_v38  ;;  %vm6839_vm11 = vweird.f32 %v6833_v38 }
 0xc6d   :  { %9192 = vrcp.f32 %v6852_v29  ;;  %v6750_v60 = vpop.f32.mrf.mxu2  ;;  %v6763_v55 = vpop.f32.mrf.mxu3  ;;  %v6864_v32 = vand.u32 2147483648, %v6852_v29  ;;  %v6862_v3 = vand.u32 2147483647, %v6852_v29  ;;  %vm6858_vm10 = vweird.f32 %v6852_v29 }
 0xc6e   :  { %v6846_v43 = vor.u32 1.1754944e-38, %v6845_v28  ;;  %vm6844_vm14 = vcmp.eq.f32.partialorder %v6843_v12, 8.507059e+37 }
 0xc6f   :  { %v6865_v15 = vor.u32 1.1754944e-38, %v6864_v32  ;;  %vm6863_vm15 = vcmp.eq.f32.partialorder %v6862_v3, 8.507059e+37 }
 0xc70   :  { %v9189_v45 = vpop.eup %9188 }
 0xc71   :  { %v12064_v8 = vadd.f32 1.0, %v9189_v45  ;;  %v13165_v45 = vld [vmem:[#allocation65_spill] sm:$0xff] }
 0xc72   :  { %v9191_v5 = vpop.eup %9190 }
 0xc73   :  { %v9193_v25 = vpop.eup %9192  ;;  %v6835_v0 = vmul.f32 %v9191_v5, %v6833_v38  ;;  %9194 = vrcp.f32 %v12064_v8  ;;  %vm6840_vm8 = vweird.f32 %v9191_v5  ;;  %v6884_v4 = vand.u32 2147483648, %v12064_v8 }
 0xc74   :  { %v6854_v22 = vmul.f32 %v9193_v25, %v6852_v29  ;;  %9196 = vtanh.f32 %v6767_v9  ;;  %vm6859_vm9 = vweird.f32 %v9193_v25  ;;  %vm6841_vm12 = vmor %vm6839_vm11, %vm6840_vm8  ;;  %vm6878_vm1 = vweird.f32 %v12064_v8 }
 0xc75   :  { %v6783_v52 = vpop.f32.mrf.mxu0  ;;  %v6796_v10 = vpop.f32.mrf.mxu1  ;;  %v6836_v39 = vsub.f32 1.0, %v6835_v0  ;;  %vm6860_vm13 = vmor %vm6858_vm10, %vm6859_vm9  ;;  %v6882_v27 = vand.u32 2147483647, %v12064_v8  ;;  %v6885_v31 = vor.u32 1.1754944e-38, %v6884_v4 }
 0xc76   :  { %v6826_v20 = vadd.f32 %v6783_v52, %v13162_v19  ;;  %v6827_v37 = vadd.f32 %v6796_v10, %v13163_v41  ;;  %v6855_v6 = vsub.f32 1.0, %v6854_v22 }
 0xc77   :  { %v6837_v61 = vmul.f32 %v9191_v5, %v6836_v39  ;;  %vm6883_vm3 = vcmp.eq.f32.partialorder %v6882_v27, 8.507059e+37 }
 0xc78   :  { %v8368_v51 = vmul.f32 -1.442695, %v6826_v20  ;;  %v8369_v11 = vmul.f32 -1.442695, %v6827_v37  ;;  %v6856_v23 = vmul.f32 %v9193_v25, %v6855_v6 }
 0xc79   :  { %v9195_v17 = vpop.eup %9194  ;;  %v6838_v44 = vadd.f32 %v9191_v5, %v6837_v61 }
 0xc7a   :  { %9198 = vpow2.f32 %v8368_v51  ;;  %v6857_v50 = vadd.f32 %v9193_v25, %v6856_v23  ;;  %v6874_v40 = vmul.f32 %v9195_v17, %v12064_v8  ;;  %v9197_v2 = vpop.eup %9196  ;;  %vm6879_vm0 = vweird.f32 %v9195_v17 }
 0xc7b   :  { %9200 = vpow2.f32 %v8369_v11  ;;  %v6842_v33 = vsel %vm6841_vm12, %v9191_v5, %v6838_v44  ;;  %vm6880_vm2 = vmor %vm6878_vm1, %vm6879_vm0 }
 0xc7c   :  { %v6809_v36 = vpop.f32.mrf.mxu2  ;;  %v6822_v57 = vpop.f32.mrf.mxu3  ;;  %v6847_v54 = vsel %vm6844_vm14, %v6846_v43, %v6842_v33  ;;  %v6861_v18 = vsel %vm6860_vm13, %v9193_v25, %v6857_v50  ;;  %v6875_v21 = vsub.f32 1.0, %v6874_v40 }
 0xc7d   :  { %v6785_v7 = vpop.f32.mrf.mxu0  ;;  %v6798_v16 = vpop.f32.mrf.mxu1  ;;  %v6866_v62 = vsel %vm6863_vm15, %v6865_v15, %v6861_v18  ;;  %v6889_v14 = vmul.f32 %v9197_v2, %v6847_v54  ;;  %v6829_v46 = vadd.f32 %v6822_v57, %v13164_v24  ;;  %v6828_v9 = vadd.f32 %v6809_v36, %v13165_v45 }
 0xc7e   :  { %v6888_v42 = vmul.f32 %v6866_v62, %v12043_v47  ;;  %v6876_v35 = vmul.f32 %v9195_v17, %v6875_v21 }
 0xc7f   :  { %v8370_v53 = vmul.f32 -1.442695, %v6829_v46 }
 0xc80   :  { %v9199_v49 = vpop.eup %9198  ;;  %v6890_v63 = vadd.f32 %v6889_v14, %v6888_v42  ;;  %v6877_v48 = vadd.f32 %v9195_v17, %v6876_v35 }
 0xc81   :  { %v9201_v1 = vpop.eup %9200  ;;  %v6896_v30 = vadd.f32 1.0, %v9199_v49  ;;  %9202 = vpow2.f32 %v8370_v53 }
 0xc82   :  { %v6915_v13 = vadd.f32 1.0, %v9201_v1  ;;  %9204 = vtanh.f32 %v6890_v63  ;;  %v6881_v29 = vsel %vm6880_vm2, %v9195_v17, %v6877_v48 }
 0xc83   :  { %9206 = vrcp.f32 %v6896_v30  ;;  %v6886_v60 = vsel %vm6883_vm3, %v6885_v31, %v6881_v29  ;;  %v6908_v52 = vand.u32 2147483648, %v6896_v30  ;;  %v6906_v19 = vand.u32 2147483647, %v6896_v30 }
 0xc84   :  { %v6811_v38 = vpop.f32.mrf.mxu2  ;;  %v6824_v47 = vpop.f32.mrf.mxu3  ;;  %9208 = vrcp.f32 %v6915_v13  ;;  %v6927_v10 = vand.u32 2147483648, %v6915_v13  ;;  %v6925_v41 = vand.u32 2147483647, %v6915_v13  ;;  %vm6902_vm6 = vweird.f32 %v6896_v30 }
 0xc85   :  { %vm6921_vm7 = vweird.f32 %v6915_v13  ;;  %v6909_v32 = vor.u32 1.1754944e-38, %v6908_v52  ;;  %vm6907_vm10 = vcmp.eq.f32.partialorder %v6906_v19, 8.507059e+37 }
 0xc86   :  { %v6928_v61 = vor.u32 1.1754944e-38, %v6927_v10  ;;  %vm6926_vm11 = vcmp.eq.f32.partialorder %v6925_v41, 8.507059e+37 }
 0xc87   :  { %v9203_v34 = vpop.eup %9202 }
 0xc88   :  { %v9205_v59 = vpop.eup %9204  ;;  %v6935_v55 = vadd.f32 1.0, %v9203_v34 }
 0xc89   :  { %v9207_v26 = vpop.eup %9206  ;;  %v6892_v58 = vmul.f32 %v9205_v59, %v6886_v60 }
 0xc8a   :  { %v9209_v5 = vpop.eup %9208  ;;  %v6898_v25 = vmul.f32 %v9207_v26, %v6896_v30  ;;  %9210 = vrcp.f32 %v6935_v55  ;;  %vm6903_vm4 = vweird.f32 %v9207_v26  ;;  %v6947_v33 = vand.u32 2147483648, %v6935_v55 }
 0xc8b   :  { %6957 = vst [vmem:[%s12090_s7 + $0x8] sm:$0xff] %v6892_v58  ;;  %v6917_v8 = vmul.f32 %v9209_v5, %v6915_v13  ;;  %9212 = vtanh.f32 %v6828_v9  ;;  %vm6922_vm5 = vweird.f32 %v9209_v5  ;;  %vm6904_vm8 = vmor %vm6902_vm6, %vm6903_vm4  ;;  %vm6941_vm13 = vweird.f32 %v6935_v55 }
 0xc8c   :  { %v6899_v0 = vsub.f32 1.0, %v6898_v25  ;;  %vm6923_vm9 = vmor %vm6921_vm7, %vm6922_vm5  ;;  %v6945_v36 = vand.u32 2147483647, %v6935_v55  ;;  %v6948_v54 = vor.u32 1.1754944e-38, %v6947_v33 }
 0xc8d   :  { %v6918_v22 = vsub.f32 1.0, %v6917_v8 }
 0xc8e   :  { %v6900_v39 = vmul.f32 %v9207_v26, %v6899_v0  ;;  %vm6946_vm15 = vcmp.eq.f32.partialorder %v6945_v36, 8.507059e+37 }
 0xc8f   :  { %v6919_v20 = vmul.f32 %v9209_v5, %v6918_v22 }
 0xc90   :  { %v9211_v37 = vpop.eup %9210  ;;  %v6901_v6 = vadd.f32 %v9207_v26, %v6900_v39 }
 0xc91   :  { %v6920_v12 = vadd.f32 %v9209_v5, %v6919_v20  ;;  %v6937_v28 = vmul.f32 %v9211_v37, %v6935_v55  ;;  %v9213_v11 = vpop.eup %9212  ;;  %vm6942_vm12 = vweird.f32 %v9211_v37 }
 0xc92   :  { %v6905_v51 = vsel %vm6904_vm8, %v9207_v26, %v6901_v6  ;;  %vm6943_vm14 = vmor %vm6941_vm13, %vm6942_vm12 }
 0xc93   :  { %v6910_v23 = vsel %vm6907_vm10, %v6909_v32, %v6905_v51  ;;  %v6924_v3 = vsel %vm6923_vm9, %v9209_v5, %v6920_v12  ;;  %v6938_v17 = vsub.f32 1.0, %v6937_v28 }
 0xc94   :  { %v6929_v44 = vsel %vm6926_vm11, %v6928_v61, %v6924_v3  ;;  %v6952_v43 = vmul.f32 %v9213_v11, %v6910_v23 }
 0xc95   :  { %v6951_v50 = vmul.f32 %v6929_v44, %v12053_v56  ;;  %v6939_v40 = vmul.f32 %v9211_v37, %v6938_v17 }
 0xc97   :  { %v6953_v2 = vadd.f32 %v6952_v43, %v6951_v50  ;;  %v6940_v15 = vadd.f32 %v9211_v37, %v6939_v40 }
 0xc99   :  { %9214 = vtanh.f32 %v6953_v2  ;;  %v6944_v57 = vsel %vm6943_vm14, %v9211_v37, %v6940_v15 }
 0xc9a   :  { %v6949_v21 = vsel %vm6946_vm15, %v6948_v54, %v6944_v57 }
 0xc9f   :  { %v9215_v18 = vpop.eup %9214 }
 0xca0   :  { %v6955_v7 = vmul.f32 %v9215_v18, %v6949_v21 }
 0xca2   :  { %6956 = vst [vmem:[%s12090_s7] sm:$0xff] %v6955_v7 }
 0xca3   :  { %6962 = vsyncpa [#allocation5], 1 }
 0xca4   :  { %6963 = vsyncpa [#allocation7], 1 }
 0xca5   :  { %6964 = vsyncpa [#allocation10], 1 }

</bundles_post_ra>
